<compile_context>
chip_gen: v5e
topology: v5e:2x2
jax: 0.10.0
libtpu: 0.0.40
codegen_flags: <defaults>
</compile_context>

<pallas_src>
import functools

import numpy as np
import jax
import jax.numpy as jnp
from jax import lax
from jax.experimental import pallas as pl
from jax.experimental.pallas import tpu as pltpu


# ------------------------------ Pallas kernel ------------------------------ #

def dgcn_recent_kernel(x_ref, lap_ref, wx1_ref, wh1_ref, b1_ref,
                       wx2_ref, wh2_ref, b2_ref, whead_ref, bc_ref,
                       out_ref, fx_ref, h1_ref, h2_ref, hg_ref):
    # One batch element per grid step.
    #   x_ref    : (T*Cin, N)        row index t*Cin + c
    #   lap_ref  : (K, N, N)         transposed Chebyshev stack
    #   wx*_ref  : (K, 4*Cout, cin)  input-side weights (gate rows [j,i,f,o])
    #   wh*_ref  : (4*Cout, K*Cout)  hidden-side weights, cols ordered k*Cout + c
    #   b*_ref   : (4*Cout, 1)
    #   whead_ref: (T//2, T*Cout)    head conv packed as one matmul
    #   bc_ref   : (1, 1)
    #   out_ref  : (T//2, N)
    #   scratch  : fx (T*4Cout, N), h1/h2 (T*Cout, N), hg (K*Cout, N)
    f32 = jnp.float32
    N = x_ref.shape[1]
    K = lap_ref.shape[0]
    Cout4 = wh1_ref.shape[0]
    Cout = Cout4 // 4
    T = h1_ref.shape[0] // Cout
    Cin = x_ref.shape[0] // T

    lap = [lap_ref[k] for k in range(K)]          # K x (N, N), loaded once

    def hoist_xside(inp_flat, cin, wx_ref_k, bias_col):
        # inp_flat: (T*cin, N) with row index t*cin + c.
        # Graph conv for ALL (t, c) rows at once -> K MXU dots, completely off the
        # serial recurrence path.  Bias broadcast hoisted & folded in here.
        bias_full = jnp.broadcast_to(bias_col, (Cout4, N))
        xg = [jnp.dot(inp_flat, lap[k], preferred_element_type=f32) for k in range(K)]
        wxk = [wx_ref_k[k] for k in range(K)]                     # (Cout4, cin)
        for t in range(T):                                        # independent, hoisted
            acc = bias_full
            for k in range(K):
                acc = acc + jnp.dot(wxk[k], xg[k][t * cin:(t + 1) * cin, :],
                                    preferred_element_type=f32)
            fx_ref[t * Cout4:(t + 1) * Cout4, :] = acc

    def run_recurrence(wh, h_out_ref):
        # Only the h-dependent half stays inside the serial loop:
        # K graph dots + one packed weight dot per step.
        h = jnp.zeros((Cout, N), f32)
        c = jnp.zeros((Cout, N), f32)
        for t in range(T):                                        # static unroll
            for k in range(K):
                hg_ref[k * Cout:(k + 1) * Cout, :] = jnp.dot(
                    h, lap[k], preferred_element_type=f32)
            fea = (fx_ref[t * Cout4:(t + 1) * Cout4, :]
                   + jnp.dot(wh, hg_ref[...], preferred_element_type=f32))
            # gate rows pre-permuted to [j, i, f, o] -> one sigmoid slab for i/f/o
            jg = fea[:Cout, :]
            sg = jax.nn.sigmoid(fea[Cout:, :])
            ig = sg[:Cout, :]
            fg = sg[Cout:2 * Cout, :]
            og = sg[2 * Cout:, :]
            c = c * fg + ig * jnp.tanh(jg)
            h = jnp.tanh(c) * og
            h_out_ref[t * Cout:(t + 1) * Cout, :] = h

    # ---- ST block 1 : c_in -> c_out ----
    hoist_xside(x_ref[...], Cin, wx1_ref, b1_ref[...])
    run_recurrence(wh1_ref[...], h1_ref)
    # ---- ST block 2 : c_out -> c_out ----
    hoist_xside(h1_ref[...], Cout, wx2_ref, b2_ref[...])
    run_recurrence(wh2_ref[...], h2_ref)
    # ---- head: Conv2d(c_out, 1, (1,2), stride (1,2)) as ONE matmul, one store ----
    out_ref[...] = (jnp.dot(whead_ref[...], h2_ref[...],
                            preferred_element_type=f32) + bc_ref[...])


# --------------------------- wrapper / glue code ---------------------------- #

def cheb_stack_t(A, K):
    # Chebyshev stack T_0 .. T_{K-1}(A), then transpose(-1, -2) as in the baseline.
    N = A.shape[0]
    Ls = [jnp.eye(N, dtype=A.dtype)]
    if K >= 2:
        Ls.append(A)
    for _ in range(2, K):
        Ls.append(2.0 * (A @ Ls[-1]) - Ls[-2])
    return jnp.transpose(jnp.stack(Ls, axis=0), (0, 2, 1))        # (K, N, N)


def _replicated_spec(shape):
    zeros = (0,) * len(shape)
    return pl.BlockSpec(shape, lambda b, zeros=zeros: zeros)


@functools.partial(jax.jit, static_argnames=("K",))
def dgcn_recent_forward(x_w, x_d, x_r, supports, params, K=3):
    # Interface fidelity: x_w / x_d are accepted but the reference forward only
    # consumes x_r.
    del x_w, x_d
    f32 = jnp.float32
    B, Cin, N, T = x_r.shape
    Cout4 = params["W1"].shape[0]
    Cout = Cout4 // 4

    x = x_r.astype(f32)
    # BatchNorm2d(c_in, affine=False): training-mode batch statistics, biased var.
    mean = jnp.mean(x, axis=(0, 2, 3), keepdims=True)
    var = jnp.mean((x - mean) ** 2, axis=(0, 2, 3), keepdims=True)
    x = (x - mean) * lax.rsqrt(var + 1e-5)

    # A = h + supports, row-normalized:  diag(1/(rowsum + 1e-4)) @ A
    A = params["h"].astype(f32) + supports.astype(f32)
    d = 1.0 / (jnp.sum(A, axis=-1) + 1e-4)
    A = d[:, None] * A
    # TODO(synk): F.dropout(A, 0.5, training) is stochastic; deterministic eval no-op.
    A1 = A
    lap_t = cheb_stack_t(A1, K)

    # Kernel layout: per batch, a 2-D (T*Cin, N) slab with row index t*Cin + c.
    xk = jnp.transpose(x, (0, 3, 1, 2)).reshape(B, T * Cin, N)

    # Gate-row permutation [i,j,f,o] -> [j,i,f,o]: sigmoid then covers one slab.
    perm = jnp.concatenate([jnp.arange(Cout, 2 * Cout),
                            jnp.arange(0, Cout),
                            jnp.arange(2 * Cout, 4 * Cout)])

    def prep_block_weights(W_full, b_vec, cin):
        # Conv1d(K*(cin+Cout) -> 4*Cout, k=1) weight; column index = c*K + k.
        ctot = W_full.shape[1] // K
        Wr = W_full.astype(f32).reshape(Cout4, ctot, K)            # [o, c, k]
        wx = jnp.transpose(Wr[:, :cin, :], (2, 0, 1))              # (K, Cout4, cin)
        wh = jnp.transpose(Wr[:, cin:, :], (0, 2, 1)).reshape(Cout4, K * Cout)
        b = b_vec.astype(f32)[perm].reshape(Cout4, 1)
        return wx[:, perm, :], wh[perm, :], b

    wx1, wh1, b1 = prep_block_weights(params["W1"], params["b1"], Cin)
    wx2, wh2, b2 = prep_block_weights(params["W2"], params["b2"], Cout)

    # Head Conv2d(Cout, 1, (1,2), stride (1,2)) packed as a single (T/2, T*Cout) matmul.
    wv = params["Wc"].astype(f32)[0, :, 0, :].T.reshape(1, 2 * Cout)  # idx parity*Cout+c
    whead = jnp.kron(jnp.eye(T // 2, dtype=f32), wv)                  # (T/2, T*Cout)
    bc = params["bc"].astype(f32).reshape(1, 1)

    out = pl.pallas_call(
        dgcn_recent_kernel,
        out_shape=jax.ShapeDtypeStruct((B, T // 2, N), f32),
        grid_spec=pltpu.PrefetchScalarGridSpec(
            num_scalar_prefetch=0,
            grid=(B,),
            in_specs=[
                pl.BlockSpec((None, T * Cin, N), lambda b: (b, 0, 0)),
                _replicated_spec(lap_t.shape),
                _replicated_spec(wx1.shape),
                _replicated_spec(wh1.shape),
                _replicated_spec(b1.shape),
                _replicated_spec(wx2.shape),
                _replicated_spec(wh2.shape),
                _replicated_spec(b2.shape),
                _replicated_spec(whead.shape),
                _replicated_spec(bc.shape),
            ],
            out_specs=pl.BlockSpec((None, T // 2, N), lambda b: (b, 0, 0)),
            scratch_shapes=[
                pltpu.VMEM((T * Cout4, N), f32),   # hoisted x-side term, all timesteps
                pltpu.VMEM((T * Cout, N), f32),    # block-1 hidden states
                pltpu.VMEM((T * Cout, N), f32),    # block-2 hidden states
                pltpu.VMEM((K * Cout, N), f32),    # per-step packed graph-conv slab
            ],
        ),
        compiler_params=pltpu.CompilerParams(
            dimension_semantics=("parallel",),      # v7x: batch-parallel across 2 TCs
            vmem_limit_bytes=64 * 1024 * 1024,
        ),
    )(xk, lap_t, wx1, wh1, b1, wx2, wh2, b2, whead, bc)

    out = jnp.transpose(out, (0, 2, 1))             # == conv1(x).squeeze(): (B, N, T//2)
    return out, A1, A


# ------------------------- pure-JAX reference check ------------------------- #

def ref_forward(x_w, x_d, x_r, supports, params, K=3):
    del x_w, x_d
    f32 = jnp.float32
    B, Cin, N, T = x_r.shape
    Cout4 = params["W1"].shape[0]
    Cout = Cout4 // 4

    x = x_r.astype(f32)
    mean = jnp.mean(x, axis=(0, 2, 3), keepdims=True)
    var = jnp.mean((x - mean) ** 2, axis=(0, 2, 3), keepdims=True)
    x = (x - mean) / jnp.sqrt(var + 1e-5)

    A = params["h"].astype(f32) + supports.astype(f32)
    d = 1.0 / (jnp.sum(A, axis=-1) + 1e-4)
    A = d[:, None] * A
    A1 = A
    lap_t = cheb_stack_t(A1, K)

    def st_block(x, W, b):                           # x: (B, C, N, T)
        h = jnp.zeros((B, Cout, N), f32)
        c = jnp.zeros((B, Cout, N), f32)
        outs = []
        for t in range(T):
            tem = jnp.concatenate([x[:, :, :, t], h], axis=1)
            res = jnp.einsum("bcn,knq->bckq", tem, lap_t).reshape(B, -1, N)
            fea = jnp.einsum("om,bmn->bon", W, res) + b[None, :, None]
            ig, jg, fg, og = jnp.split(fea, 4, axis=1)
            c = c * jax.nn.sigmoid(fg) + jax.nn.sigmoid(ig) * jnp.tanh(jg)
            h = jnp.tanh(c) * jax.nn.sigmoid(og)
            outs.append(h)
        return jnp.stack(outs, axis=-1)              # (B, Cout, N, T)

    x = st_block(x, params["W1"], params["b1"])
    x = st_block(x, params["W2"], params["b2"])
    Wc = params["Wc"].astype(f32)
    out = (jnp.einsum("c,bcnt->bnt", Wc[0, :, 0, 0], x[..., 0::2])
           + jnp.einsum("c,bcnt->bnt", Wc[0, :, 0, 1], x[..., 1::2])
           + params["bc"][0])
    return out, A1, A


# ----------------------------------- main ------------------------------------ #

def init_params(key, c_in, c_out, num_nodes, K):
    ks = jax.random.split(key, 7)
    ctot1 = c_in + c_out
    ctot2 = c_out + c_out
    return {
        "W1": 0.1 * jax.random.normal(ks[0], (4 * c_out, K * ctot1), jnp.float32),
        "b1": 0.1 * jax.random.normal(ks[1], (4 * c_out,), jnp.float32),
        "W2": 0.1 * jax.random.normal(ks[2], (4 * c_out, K * ctot2), jnp.float32),
        "b2": 0.1 * jax.random.normal(ks[3], (4 * c_out,), jnp.float32),
        "Wc": 0.1 * jax.random.normal(ks[4], (1, c_out, 1, 2), jnp.float32),  # Conv2d(c_out,1,(1,2))
        "bc": 0.1 * jax.random.normal(ks[5], (1,), jnp.float32),
        "h": jax.random.uniform(ks[6], (num_nodes, num_nodes), jnp.float32, 0.0, 1e-4),
    }


if __name__ == "__main__":
    B, c_in, c_out = 2, 4, 8
    num_nodes, week, day, recent = 16, 4, 4, 8
    K, Kt = 3, 3

    key = jax.random.PRNGKey(0)
    ks = jax.random.split(key, 5)
    x_w = jax.random.normal(ks[0], (B, c_in, num_nodes, week), jnp.float32)
    x_d = jax.random.normal(ks[1], (B, c_in, num_nodes, day), jnp.float32)
    x_r = jax.random.normal(ks[2], (B, c_in, num_nodes, recent), jnp.float32)

    A0 = jax.random.uniform(ks[3], (num_nodes, num_nodes), jnp.float32)
    supports = 0.5 * (A0 + A0.T)                    # symmetric non-negative adjacency

    params = init_params(ks[4], c_in, c_out, num_nodes, K)

    out, d_adj, A = dgcn_recent_forward(x_w, x_d, x_r, supports, params, K=K)
    out = jax.block_until_ready(out)
    assert out.shape == (B, num_nodes, recent // 2), out.shape

    ref_out, ref_d_adj, ref_A = ref_forward(x_w, x_d, x_r, supports, params, K=K)
    np.testing.assert_allclose(np.asarray(out), np.asarray(ref_out),
                               rtol=2e-2, atol=2e-2)
    np.testing.assert_allclose(np.asarray(A), np.asarray(ref_A), rtol=1e-5, atol=1e-5)

    print("KERNEL_OK")
</pallas_src>

<mosaic_0001>
module attributes {stable_mosaic.version = 11 : i64} {
  func.func @dgcn_recent_kernel(%arg0: i32, %arg1: memref<1x32x16xf32, #tpu.memory_space<vmem>>, %arg2: memref<3x16x16xf32, #tpu.memory_space<vmem>>, %arg3: memref<3x32x4xf32, #tpu.memory_space<vmem>>, %arg4: memref<32x24xf32, #tpu.memory_space<vmem>>, %arg5: memref<32x1xf32, #tpu.memory_space<vmem>>, %arg6: memref<3x32x8xf32, #tpu.memory_space<vmem>>, %arg7: memref<32x24xf32, #tpu.memory_space<vmem>>, %arg8: memref<32x1xf32, #tpu.memory_space<vmem>>, %arg9: memref<4x64xf32, #tpu.memory_space<vmem>>, %arg10: memref<1x1xf32, #tpu.memory_space<vmem>>, %arg11: memref<1x4x16xf32, #tpu.memory_space<vmem>>, %arg12: memref<256x16xf32, #tpu.memory_space<vmem>>, %arg13: memref<64x16xf32, #tpu.memory_space<vmem>>, %arg14: memref<64x16xf32, #tpu.memory_space<vmem>>, %arg15: memref<24x16xf32, #tpu.memory_space<vmem>>) attributes {dimension_semantics = [#tpu.dimension_semantics<parallel>], iteration_bounds = array<i64: 2>, scalar_prefetch = 0 : i64, scratch_operands = 4 : i64, tpu.core_type = #tpu.core_type<tc>, window_params = [{transform_indices = @transform_0, window_bounds = array<i64: 1, 32, 16>}, {pipeline_mode = #tpu.pipeline_mode<synchronous>, transform_indices = @transform_1, window_bounds = array<i64: 3, 16, 16>}, {pipeline_mode = #tpu.pipeline_mode<synchronous>, transform_indices = @transform_2, window_bounds = array<i64: 3, 32, 4>}, {pipeline_mode = #tpu.pipeline_mode<synchronous>, transform_indices = @transform_3, window_bounds = array<i64: 32, 24>}, {pipeline_mode = #tpu.pipeline_mode<synchronous>, transform_indices = @transform_4, window_bounds = array<i64: 32, 1>}, {pipeline_mode = #tpu.pipeline_mode<synchronous>, transform_indices = @transform_5, window_bounds = array<i64: 3, 32, 8>}, {pipeline_mode = #tpu.pipeline_mode<synchronous>, transform_indices = @transform_6, window_bounds = array<i64: 32, 24>}, {pipeline_mode = #tpu.pipeline_mode<synchronous>, transform_indices = @transform_7, window_bounds = array<i64: 32, 1>}, {pipeline_mode = #tpu.pipeline_mode<synchronous>, transform_indices = @transform_8, window_bounds = array<i64: 4, 64>}, {pipeline_mode = #tpu.pipeline_mode<synchronous>, transform_indices = @transform_9, window_bounds = array<i64: 1, 1>}, {transform_indices = @transform_10, window_bounds = array<i64: 1, 4, 16>}]} {
    %c0 = arith.constant 0 : index
    %c0_0 = arith.constant 0 : index
    %c0_1 = arith.constant 0 : index
    %0 = vector.load %arg2[%c0, %c0_0, %c0_1] : memref<3x16x16xf32, #tpu.memory_space<vmem>>, vector<1x16x16xf32>
    %1 = vector.shape_cast %0 : vector<1x16x16xf32> to vector<16x16xf32>
    %c1 = arith.constant 1 : index
    %c0_2 = arith.constant 0 : index
    %c0_3 = arith.constant 0 : index
    %2 = vector.load %arg2[%c1, %c0_2, %c0_3] : memref<3x16x16xf32, #tpu.memory_space<vmem>>, vector<1x16x16xf32>
    %3 = vector.shape_cast %2 : vector<1x16x16xf32> to vector<16x16xf32>
    %c2 = arith.constant 2 : index
    %c0_4 = arith.constant 0 : index
    %c0_5 = arith.constant 0 : index
    %4 = vector.load %arg2[%c2, %c0_4, %c0_5] : memref<3x16x16xf32, #tpu.memory_space<vmem>>, vector<1x16x16xf32>
    %5 = vector.shape_cast %4 : vector<1x16x16xf32> to vector<16x16xf32>
    %c0_6 = arith.constant 0 : index
    %c0_7 = arith.constant 0 : index
    %c0_8 = arith.constant 0 : index
    %6 = vector.load %arg1[%c0_6, %c0_7, %c0_8] : memref<1x32x16xf32, #tpu.memory_space<vmem>>, vector<1x32x16xf32>
    %7 = vector.shape_cast %6 : vector<1x32x16xf32> to vector<32x16xf32>
    %c0_9 = arith.constant 0 : index
    %c0_10 = arith.constant 0 : index
    %8 = vector.load %arg5[%c0_9, %c0_10] : memref<32x1xf32, #tpu.memory_space<vmem>>, vector<32x1xf32>
    %9 = vector.shape_cast %8 : vector<32x1xf32> to vector<32x1xf32>
    %10 = vector.broadcast %9 : vector<32x1xf32> to vector<32x16xf32>
    %cst = arith.constant dense<0.000000e+00> : vector<32x16xf32>
    %11 = tpu.matmul %7, %1, %cst {dimension_numbers = #tpu.dot_dimension_numbers<[1], [0], [0], [1], [0, 0, 1, 1], [], []>} : vector<32x16xf32>, vector<16x16xf32>, vector<32x16xf32> -> vector<32x16xf32>
    %cst_11 = arith.constant dense<0.000000e+00> : vector<32x16xf32>
    %12 = tpu.matmul %7, %3, %cst_11 {dimension_numbers = #tpu.dot_dimension_numbers<[1], [0], [0], [1], [0, 0, 1, 1], [], []>} : vector<32x16xf32>, vector<16x16xf32>, vector<32x16xf32> -> vector<32x16xf32>
    %cst_12 = arith.constant dense<0.000000e+00> : vector<32x16xf32>
    %13 = tpu.matmul %7, %5, %cst_12 {dimension_numbers = #tpu.dot_dimension_numbers<[1], [0], [0], [1], [0, 0, 1, 1], [], []>} : vector<32x16xf32>, vector<16x16xf32>, vector<32x16xf32> -> vector<32x16xf32>
    %c0_13 = arith.constant 0 : index
    %c0_14 = arith.constant 0 : index
    %c0_15 = arith.constant 0 : index
    %14 = vector.load %arg3[%c0_13, %c0_14, %c0_15] : memref<3x32x4xf32, #tpu.memory_space<vmem>>, vector<1x32x4xf32>
    %15 = vector.shape_cast %14 : vector<1x32x4xf32> to vector<32x4xf32>
    %c1_16 = arith.constant 1 : index
    %c0_17 = arith.constant 0 : index
    %c0_18 = arith.constant 0 : index
    %16 = vector.load %arg3[%c1_16, %c0_17, %c0_18] : memref<3x32x4xf32, #tpu.memory_space<vmem>>, vector<1x32x4xf32>
    %17 = vector.shape_cast %16 : vector<1x32x4xf32> to vector<32x4xf32>
    %c2_19 = arith.constant 2 : index
    %c0_20 = arith.constant 0 : index
    %c0_21 = arith.constant 0 : index
    %18 = vector.load %arg3[%c2_19, %c0_20, %c0_21] : memref<3x32x4xf32, #tpu.memory_space<vmem>>, vector<1x32x4xf32>
    %19 = vector.shape_cast %18 : vector<1x32x4xf32> to vector<32x4xf32>
    %20 = vector.extract_strided_slice %11 {offsets = [0, 0], sizes = [4, 16], strides = [1, 1]} : vector<32x16xf32> to vector<4x16xf32>
    %cst_22 = arith.constant dense<0.000000e+00> : vector<32x16xf32>
    %21 = tpu.matmul %15, %20, %cst_22 {dimension_numbers = #tpu.dot_dimension_numbers<[1], [0], [0], [1], [0, 0, 1, 1], [], []>} : vector<32x4xf32>, vector<4x16xf32>, vector<32x16xf32> -> vector<32x16xf32>
    %22 = arith.addf %10, %21 : vector<32x16xf32>
    %23 = vector.extract_strided_slice %12 {offsets = [0, 0], sizes = [4, 16], strides = [1, 1]} : vector<32x16xf32> to vector<4x16xf32>
    %cst_23 = arith.constant dense<0.000000e+00> : vector<32x16xf32>
    %24 = tpu.matmul %17, %23, %cst_23 {dimension_numbers = #tpu.dot_dimension_numbers<[1], [0], [0], [1], [0, 0, 1, 1], [], []>} : vector<32x4xf32>, vector<4x16xf32>, vector<32x16xf32> -> vector<32x16xf32>
    %25 = arith.addf %22, %24 : vector<32x16xf32>
    %26 = vector.extract_strided_slice %13 {offsets = [0, 0], sizes = [4, 16], strides = [1, 1]} : vector<32x16xf32> to vector<4x16xf32>
    %cst_24 = arith.constant dense<0.000000e+00> : vector<32x16xf32>
    %27 = tpu.matmul %19, %26, %cst_24 {dimension_numbers = #tpu.dot_dimension_numbers<[1], [0], [0], [1], [0, 0, 1, 1], [], []>} : vector<32x4xf32>, vector<4x16xf32>, vector<32x16xf32> -> vector<32x16xf32>
    %28 = arith.addf %25, %27 : vector<32x16xf32>
    %c0_25 = arith.constant 0 : index
    %c0_26 = arith.constant 0 : index
    %29 = vector.load %arg12[%c0_25, %c0_26] : memref<256x16xf32, #tpu.memory_space<vmem>>, vector<32x16xf32>
    tpu.vector_store %arg12[%c0_25, %c0_26], %28 {strides = array<i32>} : memref<256x16xf32, #tpu.memory_space<vmem>>, vector<32x16xf32>,
    %30 = vector.extract_strided_slice %11 {offsets = [4, 0], sizes = [4, 16], strides = [1, 1]} : vector<32x16xf32> to vector<4x16xf32>
    %cst_27 = arith.constant dense<0.000000e+00> : vector<32x16xf32>
    %31 = tpu.matmul %15, %30, %cst_27 {dimension_numbers = #tpu.dot_dimension_numbers<[1], [0], [0], [1], [0, 0, 1, 1], [], []>} : vector<32x4xf32>, vector<4x16xf32>, vector<32x16xf32> -> vector<32x16xf32>
    %32 = arith.addf %10, %31 : vector<32x16xf32>
    %33 = vector.extract_strided_slice %12 {offsets = [4, 0], sizes = [4, 16], strides = [1, 1]} : vector<32x16xf32> to vector<4x16xf32>
    %cst_28 = arith.constant dense<0.000000e+00> : vector<32x16xf32>
    %34 = tpu.matmul %17, %33, %cst_28 {dimension_numbers = #tpu.dot_dimension_numbers<[1], [0], [0], [1], [0, 0, 1, 1], [], []>} : vector<32x4xf32>, vector<4x16xf32>, vector<32x16xf32> -> vector<32x16xf32>
    %35 = arith.addf %32, %34 : vector<32x16xf32>
    %36 = vector.extract_strided_slice %13 {offsets = [4, 0], sizes = [4, 16], strides = [1, 1]} : vector<32x16xf32> to vector<4x16xf32>
    %cst_29 = arith.constant dense<0.000000e+00> : vector<32x16xf32>
    %37 = tpu.matmul %19, %36, %cst_29 {dimension_numbers = #tpu.dot_dimension_numbers<[1], [0], [0], [1], [0, 0, 1, 1], [], []>} : vector<32x4xf32>, vector<4x16xf32>, vector<32x16xf32> -> vector<32x16xf32>
    %38 = arith.addf %35, %37 : vector<32x16xf32>
    %c32 = arith.constant 32 : index
    %c0_30 = arith.constant 0 : index
    %39 = vector.load %arg12[%c32, %c0_30] : memref<256x16xf32, #tpu.memory_space<vmem>>, vector<32x16xf32>
    tpu.vector_store %arg12[%c32, %c0_30], %38 {strides = array<i32>} : memref<256x16xf32, #tpu.memory_space<vmem>>, vector<32x16xf32>,
    %40 = vector.extract_strided_slice %11 {offsets = [8, 0], sizes = [4, 16], strides = [1, 1]} : vector<32x16xf32> to vector<4x16xf32>
    %cst_31 = arith.constant dense<0.000000e+00> : vector<32x16xf32>
    %41 = tpu.matmul %15, %40, %cst_31 {dimension_numbers = #tpu.dot_dimension_numbers<[1], [0], [0], [1], [0, 0, 1, 1], [], []>} : vector<32x4xf32>, vector<4x16xf32>, vector<32x16xf32> -> vector<32x16xf32>
    %42 = arith.addf %10, %41 : vector<32x16xf32>
    %43 = vector.extract_strided_slice %12 {offsets = [8, 0], sizes = [4, 16], strides = [1, 1]} : vector<32x16xf32> to vector<4x16xf32>
    %cst_32 = arith.constant dense<0.000000e+00> : vector<32x16xf32>
    %44 = tpu.matmul %17, %43, %cst_32 {dimension_numbers = #tpu.dot_dimension_numbers<[1], [0], [0], [1], [0, 0, 1, 1], [], []>} : vector<32x4xf32>, vector<4x16xf32>, vector<32x16xf32> -> vector<32x16xf32>
    %45 = arith.addf %42, %44 : vector<32x16xf32>
    %46 = vector.extract_strided_slice %13 {offsets = [8, 0], sizes = [4, 16], strides = [1, 1]} : vector<32x16xf32> to vector<4x16xf32>
    %cst_33 = arith.constant dense<0.000000e+00> : vector<32x16xf32>
    %47 = tpu.matmul %19, %46, %cst_33 {dimension_numbers = #tpu.dot_dimension_numbers<[1], [0], [0], [1], [0, 0, 1, 1], [], []>} : vector<32x4xf32>, vector<4x16xf32>, vector<32x16xf32> -> vector<32x16xf32>
    %48 = arith.addf %45, %47 : vector<32x16xf32>
    %c64 = arith.constant 64 : index
    %c0_34 = arith.constant 0 : index
    %49 = vector.load %arg12[%c64, %c0_34] : memref<256x16xf32, #tpu.memory_space<vmem>>, vector<32x16xf32>
    tpu.vector_store %arg12[%c64, %c0_34], %48 {strides = array<i32>} : memref<256x16xf32, #tpu.memory_space<vmem>>, vector<32x16xf32>,
    %50 = vector.extract_strided_slice %11 {offsets = [12, 0], sizes = [4, 16], strides = [1, 1]} : vector<32x16xf32> to vector<4x16xf32>
    %cst_35 = arith.constant dense<0.000000e+00> : vector<32x16xf32>
    %51 = tpu.matmul %15, %50, %cst_35 {dimension_numbers = #tpu.dot_dimension_numbers<[1], [0], [0], [1], [0, 0, 1, 1], [], []>} : vector<32x4xf32>, vector<4x16xf32>, vector<32x16xf32> -> vector<32x16xf32>
    %52 = arith.addf %10, %51 : vector<32x16xf32>
    %53 = vector.extract_strided_slice %12 {offsets = [12, 0], sizes = [4, 16], strides = [1, 1]} : vector<32x16xf32> to vector<4x16xf32>
    %cst_36 = arith.constant dense<0.000000e+00> : vector<32x16xf32>
    %54 = tpu.matmul %17, %53, %cst_36 {dimension_numbers = #tpu.dot_dimension_numbers<[1], [0], [0], [1], [0, 0, 1, 1], [], []>} : vector<32x4xf32>, vector<4x16xf32>, vector<32x16xf32> -> vector<32x16xf32>
    %55 = arith.addf %52, %54 : vector<32x16xf32>
    %56 = vector.extract_strided_slice %13 {offsets = [12, 0], sizes = [4, 16], strides = [1, 1]} : vector<32x16xf32> to vector<4x16xf32>
    %cst_37 = arith.constant dense<0.000000e+00> : vector<32x16xf32>
    %57 = tpu.matmul %19, %56, %cst_37 {dimension_numbers = #tpu.dot_dimension_numbers<[1], [0], [0], [1], [0, 0, 1, 1], [], []>} : vector<32x4xf32>, vector<4x16xf32>, vector<32x16xf32> -> vector<32x16xf32>
    %58 = arith.addf %55, %57 : vector<32x16xf32>
    %c96 = arith.constant 96 : index
    %c0_38 = arith.constant 0 : index
    %59 = vector.load %arg12[%c96, %c0_38] : memref<256x16xf32, #tpu.memory_space<vmem>>, vector<32x16xf32>
    tpu.vector_store %arg12[%c96, %c0_38], %58 {strides = array<i32>} : memref<256x16xf32, #tpu.memory_space<vmem>>, vector<32x16xf32>,
    %60 = vector.extract_strided_slice %11 {offsets = [16, 0], sizes = [4, 16], strides = [1, 1]} : vector<32x16xf32> to vector<4x16xf32>
    %cst_39 = arith.constant dense<0.000000e+00> : vector<32x16xf32>
    %61 = tpu.matmul %15, %60, %cst_39 {dimension_numbers = #tpu.dot_dimension_numbers<[1], [0], [0], [1], [0, 0, 1, 1], [], []>} : vector<32x4xf32>, vector<4x16xf32>, vector<32x16xf32> -> vector<32x16xf32>
    %62 = arith.addf %10, %61 : vector<32x16xf32>
    %63 = vector.extract_strided_slice %12 {offsets = [16, 0], sizes = [4, 16], strides = [1, 1]} : vector<32x16xf32> to vector<4x16xf32>
    %cst_40 = arith.constant dense<0.000000e+00> : vector<32x16xf32>
    %64 = tpu.matmul %17, %63, %cst_40 {dimension_numbers = #tpu.dot_dimension_numbers<[1], [0], [0], [1], [0, 0, 1, 1], [], []>} : vector<32x4xf32>, vector<4x16xf32>, vector<32x16xf32> -> vector<32x16xf32>
    %65 = arith.addf %62, %64 : vector<32x16xf32>
    %66 = vector.extract_strided_slice %13 {offsets = [16, 0], sizes = [4, 16], strides = [1, 1]} : vector<32x16xf32> to vector<4x16xf32>
    %cst_41 = arith.constant dense<0.000000e+00> : vector<32x16xf32>
    %67 = tpu.matmul %19, %66, %cst_41 {dimension_numbers = #tpu.dot_dimension_numbers<[1], [0], [0], [1], [0, 0, 1, 1], [], []>} : vector<32x4xf32>, vector<4x16xf32>, vector<32x16xf32> -> vector<32x16xf32>
    %68 = arith.addf %65, %67 : vector<32x16xf32>
    %c128 = arith.constant 128 : index
    %c0_42 = arith.constant 0 : index
    %69 = vector.load %arg12[%c128, %c0_42] : memref<256x16xf32, #tpu.memory_space<vmem>>, vector<32x16xf32>
    tpu.vector_store %arg12[%c128, %c0_42], %68 {strides = array<i32>} : memref<256x16xf32, #tpu.memory_space<vmem>>, vector<32x16xf32>,
    %70 = vector.extract_strided_slice %11 {offsets = [20, 0], sizes = [4, 16], strides = [1, 1]} : vector<32x16xf32> to vector<4x16xf32>
    %cst_43 = arith.constant dense<0.000000e+00> : vector<32x16xf32>
    %71 = tpu.matmul %15, %70, %cst_43 {dimension_numbers = #tpu.dot_dimension_numbers<[1], [0], [0], [1], [0, 0, 1, 1], [], []>} : vector<32x4xf32>, vector<4x16xf32>, vector<32x16xf32> -> vector<32x16xf32>
    %72 = arith.addf %10, %71 : vector<32x16xf32>
    %73 = vector.extract_strided_slice %12 {offsets = [20, 0], sizes = [4, 16], strides = [1, 1]} : vector<32x16xf32> to vector<4x16xf32>
    %cst_44 = arith.constant dense<0.000000e+00> : vector<32x16xf32>
    %74 = tpu.matmul %17, %73, %cst_44 {dimension_numbers = #tpu.dot_dimension_numbers<[1], [0], [0], [1], [0, 0, 1, 1], [], []>} : vector<32x4xf32>, vector<4x16xf32>, vector<32x16xf32> -> vector<32x16xf32>
    %75 = arith.addf %72, %74 : vector<32x16xf32>
    %76 = vector.extract_strided_slice %13 {offsets = [20, 0], sizes = [4, 16], strides = [1, 1]} : vector<32x16xf32> to vector<4x16xf32>
    %cst_45 = arith.constant dense<0.000000e+00> : vector<32x16xf32>
    %77 = tpu.matmul %19, %76, %cst_45 {dimension_numbers = #tpu.dot_dimension_numbers<[1], [0], [0], [1], [0, 0, 1, 1], [], []>} : vector<32x4xf32>, vector<4x16xf32>, vector<32x16xf32> -> vector<32x16xf32>
    %78 = arith.addf %75, %77 : vector<32x16xf32>
    %c160 = arith.constant 160 : index
    %c0_46 = arith.constant 0 : index
    %79 = vector.load %arg12[%c160, %c0_46] : memref<256x16xf32, #tpu.memory_space<vmem>>, vector<32x16xf32>
    tpu.vector_store %arg12[%c160, %c0_46], %78 {strides = array<i32>} : memref<256x16xf32, #tpu.memory_space<vmem>>, vector<32x16xf32>,
    %80 = vector.extract_strided_slice %11 {offsets = [24, 0], sizes = [4, 16], strides = [1, 1]} : vector<32x16xf32> to vector<4x16xf32>
    %cst_47 = arith.constant dense<0.000000e+00> : vector<32x16xf32>
    %81 = tpu.matmul %15, %80, %cst_47 {dimension_numbers = #tpu.dot_dimension_numbers<[1], [0], [0], [1], [0, 0, 1, 1], [], []>} : vector<32x4xf32>, vector<4x16xf32>, vector<32x16xf32> -> vector<32x16xf32>
    %82 = arith.addf %10, %81 : vector<32x16xf32>
    %83 = vector.extract_strided_slice %12 {offsets = [24, 0], sizes = [4, 16], strides = [1, 1]} : vector<32x16xf32> to vector<4x16xf32>
    %cst_48 = arith.constant dense<0.000000e+00> : vector<32x16xf32>
    %84 = tpu.matmul %17, %83, %cst_48 {dimension_numbers = #tpu.dot_dimension_numbers<[1], [0], [0], [1], [0, 0, 1, 1], [], []>} : vector<32x4xf32>, vector<4x16xf32>, vector<32x16xf32> -> vector<32x16xf32>
    %85 = arith.addf %82, %84 : vector<32x16xf32>
    %86 = vector.extract_strided_slice %13 {offsets = [24, 0], sizes = [4, 16], strides = [1, 1]} : vector<32x16xf32> to vector<4x16xf32>
    %cst_49 = arith.constant dense<0.000000e+00> : vector<32x16xf32>
    %87 = tpu.matmul %19, %86, %cst_49 {dimension_numbers = #tpu.dot_dimension_numbers<[1], [0], [0], [1], [0, 0, 1, 1], [], []>} : vector<32x4xf32>, vector<4x16xf32>, vector<32x16xf32> -> vector<32x16xf32>
    %88 = arith.addf %85, %87 : vector<32x16xf32>
    %c192 = arith.constant 192 : index
    %c0_50 = arith.constant 0 : index
    %89 = vector.load %arg12[%c192, %c0_50] : memref<256x16xf32, #tpu.memory_space<vmem>>, vector<32x16xf32>
    tpu.vector_store %arg12[%c192, %c0_50], %88 {strides = array<i32>} : memref<256x16xf32, #tpu.memory_space<vmem>>, vector<32x16xf32>,
    %90 = vector.extract_strided_slice %11 {offsets = [28, 0], sizes = [4, 16], strides = [1, 1]} : vector<32x16xf32> to vector<4x16xf32>
    %cst_51 = arith.constant dense<0.000000e+00> : vector<32x16xf32>
    %91 = tpu.matmul %15, %90, %cst_51 {dimension_numbers = #tpu.dot_dimension_numbers<[1], [0], [0], [1], [0, 0, 1, 1], [], []>} : vector<32x4xf32>, vector<4x16xf32>, vector<32x16xf32> -> vector<32x16xf32>
    %92 = arith.addf %10, %91 : vector<32x16xf32>
    %93 = vector.extract_strided_slice %12 {offsets = [28, 0], sizes = [4, 16], strides = [1, 1]} : vector<32x16xf32> to vector<4x16xf32>
    %cst_52 = arith.constant dense<0.000000e+00> : vector<32x16xf32>
    %94 = tpu.matmul %17, %93, %cst_52 {dimension_numbers = #tpu.dot_dimension_numbers<[1], [0], [0], [1], [0, 0, 1, 1], [], []>} : vector<32x4xf32>, vector<4x16xf32>, vector<32x16xf32> -> vector<32x16xf32>
    %95 = arith.addf %92, %94 : vector<32x16xf32>
    %96 = vector.extract_strided_slice %13 {offsets = [28, 0], sizes = [4, 16], strides = [1, 1]} : vector<32x16xf32> to vector<4x16xf32>
    %cst_53 = arith.constant dense<0.000000e+00> : vector<32x16xf32>
    %97 = tpu.matmul %19, %96, %cst_53 {dimension_numbers = #tpu.dot_dimension_numbers<[1], [0], [0], [1], [0, 0, 1, 1], [], []>} : vector<32x4xf32>, vector<4x16xf32>, vector<32x16xf32> -> vector<32x16xf32>
    %98 = arith.addf %95, %97 : vector<32x16xf32>
    %c224 = arith.constant 224 : index
    %c0_54 = arith.constant 0 : index
    %99 = vector.load %arg12[%c224, %c0_54] : memref<256x16xf32, #tpu.memory_space<vmem>>, vector<32x16xf32>
    tpu.vector_store %arg12[%c224, %c0_54], %98 {strides = array<i32>} : memref<256x16xf32, #tpu.memory_space<vmem>>, vector<32x16xf32>,
    %c0_55 = arith.constant 0 : index
    %c0_56 = arith.constant 0 : index
    %100 = vector.load %arg4[%c0_55, %c0_56] : memref<32x24xf32, #tpu.memory_space<vmem>>, vector<32x24xf32>
    %cst_57 = arith.constant 0.000000e+00 : f32
    %101 = vector.broadcast %cst_57 : f32 to vector<8x16xf32>
    %cst_58 = arith.constant 0.000000e+00 : f32
    %102 = vector.broadcast %cst_58 : f32 to vector<8x16xf32>
    %cst_59 = arith.constant dense<0.000000e+00> : vector<8x16xf32>
    %103 = tpu.matmul %101, %1, %cst_59 {dimension_numbers = #tpu.dot_dimension_numbers<[1], [0], [0], [1], [0, 0, 1, 1], [], []>} : vector<8x16xf32>, vector<16x16xf32>, vector<8x16xf32> -> vector<8x16xf32>
    %c0_60 = arith.constant 0 : index
    %c0_61 = arith.constant 0 : index
    %104 = vector.load %arg15[%c0_60, %c0_61] : memref<24x16xf32, #tpu.memory_space<vmem>>, vector<8x16xf32>
    tpu.vector_store %arg15[%c0_60, %c0_61], %103 {strides = array<i32>} : memref<24x16xf32, #tpu.memory_space<vmem>>, vector<8x16xf32>,
    %cst_62 = arith.constant dense<0.000000e+00> : vector<8x16xf32>
    %105 = tpu.matmul %101, %3, %cst_62 {dimension_numbers = #tpu.dot_dimension_numbers<[1], [0], [0], [1], [0, 0, 1, 1], [], []>} : vector<8x16xf32>, vector<16x16xf32>, vector<8x16xf32> -> vector<8x16xf32>
    %c8 = arith.constant 8 : index
    %c0_63 = arith.constant 0 : index
    %106 = vector.load %arg15[%c8, %c0_63] : memref<24x16xf32, #tpu.memory_space<vmem>>, vector<8x16xf32>
    tpu.vector_store %arg15[%c8, %c0_63], %105 {strides = array<i32>} : memref<24x16xf32, #tpu.memory_space<vmem>>, vector<8x16xf32>,
    %cst_64 = arith.constant dense<0.000000e+00> : vector<8x16xf32>
    %107 = tpu.matmul %101, %5, %cst_64 {dimension_numbers = #tpu.dot_dimension_numbers<[1], [0], [0], [1], [0, 0, 1, 1], [], []>} : vector<8x16xf32>, vector<16x16xf32>, vector<8x16xf32> -> vector<8x16xf32>
    %c16 = arith.constant 16 : index
    %c0_65 = arith.constant 0 : index
    %108 = vector.load %arg15[%c16, %c0_65] : memref<24x16xf32, #tpu.memory_space<vmem>>, vector<8x16xf32>
    tpu.vector_store %arg15[%c16, %c0_65], %107 {strides = array<i32>} : memref<24x16xf32, #tpu.memory_space<vmem>>, vector<8x16xf32>,
    %c0_66 = arith.constant 0 : index
    %c0_67 = arith.constant 0 : index
    %109 = vector.load %arg12[%c0_66, %c0_67] : memref<256x16xf32, #tpu.memory_space<vmem>>, vector<32x16xf32>
    %c0_68 = arith.constant 0 : index
    %c0_69 = arith.constant 0 : index
    %110 = vector.load %arg15[%c0_68, %c0_69] : memref<24x16xf32, #tpu.memory_space<vmem>>, vector<24x16xf32>
    %cst_70 = arith.constant dense<0.000000e+00> : vector<32x16xf32>
    %111 = tpu.matmul %100, %110, %cst_70 {dimension_numbers = #tpu.dot_dimension_numbers<[1], [0], [0], [1], [0, 0, 1, 1], [], []>} : vector<32x24xf32>, vector<24x16xf32>, vector<32x16xf32> -> vector<32x16xf32>
    %112 = arith.addf %109, %111 : vector<32x16xf32>
    %113 = vector.extract_strided_slice %112 {offsets = [0, 0], sizes = [8, 16], strides = [1, 1]} : vector<32x16xf32> to vector<8x16xf32>
    %114 = vector.extract_strided_slice %112 {offsets = [8, 0], sizes = [24, 16], strides = [1, 1]} : vector<32x16xf32> to vector<24x16xf32>
    %115 = arith.negf %114 : vector<24x16xf32>
    %116 = math.exp %115 : vector<24x16xf32>
    %cst_71 = arith.constant 1.000000e+00 : f32
    %117 = vector.broadcast %cst_71 : f32 to vector<24x16xf32>
    %118 = arith.addf %117, %116 : vector<24x16xf32>
    %119 = arith.divf %117, %118 : vector<24x16xf32>
    %120 = vector.extract_strided_slice %119 {offsets = [0, 0], sizes = [8, 16], strides = [1, 1]} : vector<24x16xf32> to vector<8x16xf32>
    %121 = vector.extract_strided_slice %119 {offsets = [8, 0], sizes = [8, 16], strides = [1, 1]} : vector<24x16xf32> to vector<8x16xf32>
    %122 = vector.extract_strided_slice %119 {offsets = [16, 0], sizes = [8, 16], strides = [1, 1]} : vector<24x16xf32> to vector<8x16xf32>
    %123 = arith.mulf %102, %121 : vector<8x16xf32>
    %124 = math.tanh %113 : vector<8x16xf32>
    %125 = arith.mulf %120, %124 : vector<8x16xf32>
    %126 = arith.addf %123, %125 : vector<8x16xf32>
    %127 = math.tanh %126 : vector<8x16xf32>
    %128 = arith.mulf %127, %122 : vector<8x16xf32>
    %c0_72 = arith.constant 0 : index
    %c0_73 = arith.constant 0 : index
    %129 = vector.load %arg13[%c0_72, %c0_73] : memref<64x16xf32, #tpu.memory_space<vmem>>, vector<8x16xf32>
    tpu.vector_store %arg13[%c0_72, %c0_73], %128 {strides = array<i32>} : memref<64x16xf32, #tpu.memory_space<vmem>>, vector<8x16xf32>,
    %cst_74 = arith.constant dense<0.000000e+00> : vector<8x16xf32>
    %130 = tpu.matmul %128, %1, %cst_74 {dimension_numbers = #tpu.dot_dimension_numbers<[1], [0], [0], [1], [0, 0, 1, 1], [], []>} : vector<8x16xf32>, vector<16x16xf32>, vector<8x16xf32> -> vector<8x16xf32>
    %c0_75 = arith.constant 0 : index
    %c0_76 = arith.constant 0 : index
    %131 = vector.load %arg15[%c0_75, %c0_76] : memref<24x16xf32, #tpu.memory_space<vmem>>, vector<8x16xf32>
    tpu.vector_store %arg15[%c0_75, %c0_76], %130 {strides = array<i32>} : memref<24x16xf32, #tpu.memory_space<vmem>>, vector<8x16xf32>,
    %cst_77 = arith.constant dense<0.000000e+00> : vector<8x16xf32>
    %132 = tpu.matmul %128, %3, %cst_77 {dimension_numbers = #tpu.dot_dimension_numbers<[1], [0], [0], [1], [0, 0, 1, 1], [], []>} : vector<8x16xf32>, vector<16x16xf32>, vector<8x16xf32> -> vector<8x16xf32>
    %c8_78 = arith.constant 8 : index
    %c0_79 = arith.constant 0 : index
    %133 = vector.load %arg15[%c8_78, %c0_79] : memref<24x16xf32, #tpu.memory_space<vmem>>, vector<8x16xf32>
    tpu.vector_store %arg15[%c8_78, %c0_79], %132 {strides = array<i32>} : memref<24x16xf32, #tpu.memory_space<vmem>>, vector<8x16xf32>,
    %cst_80 = arith.constant dense<0.000000e+00> : vector<8x16xf32>
    %134 = tpu.matmul %128, %5, %cst_80 {dimension_numbers = #tpu.dot_dimension_numbers<[1], [0], [0], [1], [0, 0, 1, 1], [], []>} : vector<8x16xf32>, vector<16x16xf32>, vector<8x16xf32> -> vector<8x16xf32>
    %c16_81 = arith.constant 16 : index
    %c0_82 = arith.constant 0 : index
    %135 = vector.load %arg15[%c16_81, %c0_82] : memref<24x16xf32, #tpu.memory_space<vmem>>, vector<8x16xf32>
    tpu.vector_store %arg15[%c16_81, %c0_82], %134 {strides = array<i32>} : memref<24x16xf32, #tpu.memory_space<vmem>>, vector<8x16xf32>,
    %c32_83 = arith.constant 32 : index
    %c0_84 = arith.constant 0 : index
    %136 = vector.load %arg12[%c32_83, %c0_84] : memref<256x16xf32, #tpu.memory_space<vmem>>, vector<32x16xf32>
    %c0_85 = arith.constant 0 : index
    %c0_86 = arith.constant 0 : index
    %137 = vector.load %arg15[%c0_85, %c0_86] : memref<24x16xf32, #tpu.memory_space<vmem>>, vector<24x16xf32>
    %cst_87 = arith.constant dense<0.000000e+00> : vector<32x16xf32>
    %138 = tpu.matmul %100, %137, %cst_87 {dimension_numbers = #tpu.dot_dimension_numbers<[1], [0], [0], [1], [0, 0, 1, 1], [], []>} : vector<32x24xf32>, vector<24x16xf32>, vector<32x16xf32> -> vector<32x16xf32>
    %139 = arith.addf %136, %138 : vector<32x16xf32>
    %140 = vector.extract_strided_slice %139 {offsets = [0, 0], sizes = [8, 16], strides = [1, 1]} : vector<32x16xf32> to vector<8x16xf32>
    %141 = vector.extract_strided_slice %139 {offsets = [8, 0], sizes = [24, 16], strides = [1, 1]} : vector<32x16xf32> to vector<24x16xf32>
    %142 = arith.negf %141 : vector<24x16xf32>
    %143 = math.exp %142 : vector<24x16xf32>
    %cst_88 = arith.constant 1.000000e+00 : f32
    %144 = vector.broadcast %cst_88 : f32 to vector<24x16xf32>
    %145 = arith.addf %144, %143 : vector<24x16xf32>
    %146 = arith.divf %144, %145 : vector<24x16xf32>
    %147 = vector.extract_strided_slice %146 {offsets = [0, 0], sizes = [8, 16], strides = [1, 1]} : vector<24x16xf32> to vector<8x16xf32>
    %148 = vector.extract_strided_slice %146 {offsets = [8, 0], sizes = [8, 16], strides = [1, 1]} : vector<24x16xf32> to vector<8x16xf32>
    %149 = vector.extract_strided_slice %146 {offsets = [16, 0], sizes = [8, 16], strides = [1, 1]} : vector<24x16xf32> to vector<8x16xf32>
    %150 = arith.mulf %126, %148 : vector<8x16xf32>
    %151 = math.tanh %140 : vector<8x16xf32>
    %152 = arith.mulf %147, %151 : vector<8x16xf32>
    %153 = arith.addf %150, %152 : vector<8x16xf32>
    %154 = math.tanh %153 : vector<8x16xf32>
    %155 = arith.mulf %154, %149 : vector<8x16xf32>
    %c8_89 = arith.constant 8 : index
    %c0_90 = arith.constant 0 : index
    %156 = vector.load %arg13[%c8_89, %c0_90] : memref<64x16xf32, #tpu.memory_space<vmem>>, vector<8x16xf32>
    tpu.vector_store %arg13[%c8_89, %c0_90], %155 {strides = array<i32>} : memref<64x16xf32, #tpu.memory_space<vmem>>, vector<8x16xf32>,
    %cst_91 = arith.constant dense<0.000000e+00> : vector<8x16xf32>
    %157 = tpu.matmul %155, %1, %cst_91 {dimension_numbers = #tpu.dot_dimension_numbers<[1], [0], [0], [1], [0, 0, 1, 1], [], []>} : vector<8x16xf32>, vector<16x16xf32>, vector<8x16xf32> -> vector<8x16xf32>
    %c0_92 = arith.constant 0 : index
    %c0_93 = arith.constant 0 : index
    %158 = vector.load %arg15[%c0_92, %c0_93] : memref<24x16xf32, #tpu.memory_space<vmem>>, vector<8x16xf32>
    tpu.vector_store %arg15[%c0_92, %c0_93], %157 {strides = array<i32>} : memref<24x16xf32, #tpu.memory_space<vmem>>, vector<8x16xf32>,
    %cst_94 = arith.constant dense<0.000000e+00> : vector<8x16xf32>
    %159 = tpu.matmul %155, %3, %cst_94 {dimension_numbers = #tpu.dot_dimension_numbers<[1], [0], [0], [1], [0, 0, 1, 1], [], []>} : vector<8x16xf32>, vector<16x16xf32>, vector<8x16xf32> -> vector<8x16xf32>
    %c8_95 = arith.constant 8 : index
    %c0_96 = arith.constant 0 : index
    %160 = vector.load %arg15[%c8_95, %c0_96] : memref<24x16xf32, #tpu.memory_space<vmem>>, vector<8x16xf32>
    tpu.vector_store %arg15[%c8_95, %c0_96], %159 {strides = array<i32>} : memref<24x16xf32, #tpu.memory_space<vmem>>, vector<8x16xf32>,
    %cst_97 = arith.constant dense<0.000000e+00> : vector<8x16xf32>
    %161 = tpu.matmul %155, %5, %cst_97 {dimension_numbers = #tpu.dot_dimension_numbers<[1], [0], [0], [1], [0, 0, 1, 1], [], []>} : vector<8x16xf32>, vector<16x16xf32>, vector<8x16xf32> -> vector<8x16xf32>
    %c16_98 = arith.constant 16 : index
    %c0_99 = arith.constant 0 : index
    %162 = vector.load %arg15[%c16_98, %c0_99] : memref<24x16xf32, #tpu.memory_space<vmem>>, vector<8x16xf32>
    tpu.vector_store %arg15[%c16_98, %c0_99], %161 {strides = array<i32>} : memref<24x16xf32, #tpu.memory_space<vmem>>, vector<8x16xf32>,
    %c64_100 = arith.constant 64 : index
    %c0_101 = arith.constant 0 : index
    %163 = vector.load %arg12[%c64_100, %c0_101] : memref<256x16xf32, #tpu.memory_space<vmem>>, vector<32x16xf32>
    %c0_102 = arith.constant 0 : index
    %c0_103 = arith.constant 0 : index
    %164 = vector.load %arg15[%c0_102, %c0_103] : memref<24x16xf32, #tpu.memory_space<vmem>>, vector<24x16xf32>
    %cst_104 = arith.constant dense<0.000000e+00> : vector<32x16xf32>
    %165 = tpu.matmul %100, %164, %cst_104 {dimension_numbers = #tpu.dot_dimension_numbers<[1], [0], [0], [1], [0, 0, 1, 1], [], []>} : vector<32x24xf32>, vector<24x16xf32>, vector<32x16xf32> -> vector<32x16xf32>
    %166 = arith.addf %163, %165 : vector<32x16xf32>
    %167 = vector.extract_strided_slice %166 {offsets = [0, 0], sizes = [8, 16], strides = [1, 1]} : vector<32x16xf32> to vector<8x16xf32>
    %168 = vector.extract_strided_slice %166 {offsets = [8, 0], sizes = [24, 16], strides = [1, 1]} : vector<32x16xf32> to vector<24x16xf32>
    %169 = arith.negf %168 : vector<24x16xf32>
    %170 = math.exp %169 : vector<24x16xf32>
    %cst_105 = arith.constant 1.000000e+00 : f32
    %171 = vector.broadcast %cst_105 : f32 to vector<24x16xf32>
    %172 = arith.addf %171, %170 : vector<24x16xf32>
    %173 = arith.divf %171, %172 : vector<24x16xf32>
    %174 = vector.extract_strided_slice %173 {offsets = [0, 0], sizes = [8, 16], strides = [1, 1]} : vector<24x16xf32> to vector<8x16xf32>
    %175 = vector.extract_strided_slice %173 {offsets = [8, 0], sizes = [8, 16], strides = [1, 1]} : vector<24x16xf32> to vector<8x16xf32>
    %176 = vector.extract_strided_slice %173 {offsets = [16, 0], sizes = [8, 16], strides = [1, 1]} : vector<24x16xf32> to vector<8x16xf32>
    %177 = arith.mulf %153, %175 : vector<8x16xf32>
    %178 = math.tanh %167 : vector<8x16xf32>
    %179 = arith.mulf %174, %178 : vector<8x16xf32>
    %180 = arith.addf %177, %179 : vector<8x16xf32>
    %181 = math.tanh %180 : vector<8x16xf32>
    %182 = arith.mulf %181, %176 : vector<8x16xf32>
    %c16_106 = arith.constant 16 : index
    %c0_107 = arith.constant 0 : index
    %183 = vector.load %arg13[%c16_106, %c0_107] : memref<64x16xf32, #tpu.memory_space<vmem>>, vector<8x16xf32>
    tpu.vector_store %arg13[%c16_106, %c0_107], %182 {strides = array<i32>} : memref<64x16xf32, #tpu.memory_space<vmem>>, vector<8x16xf32>,
    %cst_108 = arith.constant dense<0.000000e+00> : vector<8x16xf32>
    %184 = tpu.matmul %182, %1, %cst_108 {dimension_numbers = #tpu.dot_dimension_numbers<[1], [0], [0], [1], [0, 0, 1, 1], [], []>} : vector<8x16xf32>, vector<16x16xf32>, vector<8x16xf32> -> vector<8x16xf32>
    %c0_109 = arith.constant 0 : index
    %c0_110 = arith.constant 0 : index
    %185 = vector.load %arg15[%c0_109, %c0_110] : memref<24x16xf32, #tpu.memory_space<vmem>>, vector<8x16xf32>
    tpu.vector_store %arg15[%c0_109, %c0_110], %184 {strides = array<i32>} : memref<24x16xf32, #tpu.memory_space<vmem>>, vector<8x16xf32>,
    %cst_111 = arith.constant dense<0.000000e+00> : vector<8x16xf32>
    %186 = tpu.matmul %182, %3, %cst_111 {dimension_numbers = #tpu.dot_dimension_numbers<[1], [0], [0], [1], [0, 0, 1, 1], [], []>} : vector<8x16xf32>, vector<16x16xf32>, vector<8x16xf32> -> vector<8x16xf32>
    %c8_112 = arith.constant 8 : index
    %c0_113 = arith.constant 0 : index
    %187 = vector.load %arg15[%c8_112, %c0_113] : memref<24x16xf32, #tpu.memory_space<vmem>>, vector<8x16xf32>
    tpu.vector_store %arg15[%c8_112, %c0_113], %186 {strides = array<i32>} : memref<24x16xf32, #tpu.memory_space<vmem>>, vector<8x16xf32>,
    %cst_114 = arith.constant dense<0.000000e+00> : vector<8x16xf32>
    %188 = tpu.matmul %182, %5, %cst_114 {dimension_numbers = #tpu.dot_dimension_numbers<[1], [0], [0], [1], [0, 0, 1, 1], [], []>} : vector<8x16xf32>, vector<16x16xf32>, vector<8x16xf32> -> vector<8x16xf32>
    %c16_115 = arith.constant 16 : index
    %c0_116 = arith.constant 0 : index
    %189 = vector.load %arg15[%c16_115, %c0_116] : memref<24x16xf32, #tpu.memory_space<vmem>>, vector<8x16xf32>
    tpu.vector_store %arg15[%c16_115, %c0_116], %188 {strides = array<i32>} : memref<24x16xf32, #tpu.memory_space<vmem>>, vector<8x16xf32>,
    %c96_117 = arith.constant 96 : index
    %c0_118 = arith.constant 0 : index
    %190 = vector.load %arg12[%c96_117, %c0_118] : memref<256x16xf32, #tpu.memory_space<vmem>>, vector<32x16xf32>
    %c0_119 = arith.constant 0 : index
    %c0_120 = arith.constant 0 : index
    %191 = vector.load %arg15[%c0_119, %c0_120] : memref<24x16xf32, #tpu.memory_space<vmem>>, vector<24x16xf32>
    %cst_121 = arith.constant dense<0.000000e+00> : vector<32x16xf32>
    %192 = tpu.matmul %100, %191, %cst_121 {dimension_numbers = #tpu.dot_dimension_numbers<[1], [0], [0], [1], [0, 0, 1, 1], [], []>} : vector<32x24xf32>, vector<24x16xf32>, vector<32x16xf32> -> vector<32x16xf32>
    %193 = arith.addf %190, %192 : vector<32x16xf32>
    %194 = vector.extract_strided_slice %193 {offsets = [0, 0], sizes = [8, 16], strides = [1, 1]} : vector<32x16xf32> to vector<8x16xf32>
    %195 = vector.extract_strided_slice %193 {offsets = [8, 0], sizes = [24, 16], strides = [1, 1]} : vector<32x16xf32> to vector<24x16xf32>
    %196 = arith.negf %195 : vector<24x16xf32>
    %197 = math.exp %196 : vector<24x16xf32>
    %cst_122 = arith.constant 1.000000e+00 : f32
    %198 = vector.broadcast %cst_122 : f32 to vector<24x16xf32>
    %199 = arith.addf %198, %197 : vector<24x16xf32>
    %200 = arith.divf %198, %199 : vector<24x16xf32>
    %201 = vector.extract_strided_slice %200 {offsets = [0, 0], sizes = [8, 16], strides = [1, 1]} : vector<24x16xf32> to vector<8x16xf32>
    %202 = vector.extract_strided_slice %200 {offsets = [8, 0], sizes = [8, 16], strides = [1, 1]} : vector<24x16xf32> to vector<8x16xf32>
    %203 = vector.extract_strided_slice %200 {offsets = [16, 0], sizes = [8, 16], strides = [1, 1]} : vector<24x16xf32> to vector<8x16xf32>
    %204 = arith.mulf %180, %202 : vector<8x16xf32>
    %205 = math.tanh %194 : vector<8x16xf32>
    %206 = arith.mulf %201, %205 : vector<8x16xf32>
    %207 = arith.addf %204, %206 : vector<8x16xf32>
    %208 = math.tanh %207 : vector<8x16xf32>
    %209 = arith.mulf %208, %203 : vector<8x16xf32>
    %c24 = arith.constant 24 : index
    %c0_123 = arith.constant 0 : index
    %210 = vector.load %arg13[%c24, %c0_123] : memref<64x16xf32, #tpu.memory_space<vmem>>, vector<8x16xf32>
    tpu.vector_store %arg13[%c24, %c0_123], %209 {strides = array<i32>} : memref<64x16xf32, #tpu.memory_space<vmem>>, vector<8x16xf32>,
    %cst_124 = arith.constant dense<0.000000e+00> : vector<8x16xf32>
    %211 = tpu.matmul %209, %1, %cst_124 {dimension_numbers = #tpu.dot_dimension_numbers<[1], [0], [0], [1], [0, 0, 1, 1], [], []>} : vector<8x16xf32>, vector<16x16xf32>, vector<8x16xf32> -> vector<8x16xf32>
    %c0_125 = arith.constant 0 : index
    %c0_126 = arith.constant 0 : index
    %212 = vector.load %arg15[%c0_125, %c0_126] : memref<24x16xf32, #tpu.memory_space<vmem>>, vector<8x16xf32>
    tpu.vector_store %arg15[%c0_125, %c0_126], %211 {strides = array<i32>} : memref<24x16xf32, #tpu.memory_space<vmem>>, vector<8x16xf32>,
    %cst_127 = arith.constant dense<0.000000e+00> : vector<8x16xf32>
    %213 = tpu.matmul %209, %3, %cst_127 {dimension_numbers = #tpu.dot_dimension_numbers<[1], [0], [0], [1], [0, 0, 1, 1], [], []>} : vector<8x16xf32>, vector<16x16xf32>, vector<8x16xf32> -> vector<8x16xf32>
    %c8_128 = arith.constant 8 : index
    %c0_129 = arith.constant 0 : index
    %214 = vector.load %arg15[%c8_128, %c0_129] : memref<24x16xf32, #tpu.memory_space<vmem>>, vector<8x16xf32>
    tpu.vector_store %arg15[%c8_128, %c0_129], %213 {strides = array<i32>} : memref<24x16xf32, #tpu.memory_space<vmem>>, vector<8x16xf32>,
    %cst_130 = arith.constant dense<0.000000e+00> : vector<8x16xf32>
    %215 = tpu.matmul %209, %5, %cst_130 {dimension_numbers = #tpu.dot_dimension_numbers<[1], [0], [0], [1], [0, 0, 1, 1], [], []>} : vector<8x16xf32>, vector<16x16xf32>, vector<8x16xf32> -> vector<8x16xf32>
    %c16_131 = arith.constant 16 : index
    %c0_132 = arith.constant 0 : index
    %216 = vector.load %arg15[%c16_131, %c0_132] : memref<24x16xf32, #tpu.memory_space<vmem>>, vector<8x16xf32>
    tpu.vector_store %arg15[%c16_131, %c0_132], %215 {strides = array<i32>} : memref<24x16xf32, #tpu.memory_space<vmem>>, vector<8x16xf32>,
    %c128_133 = arith.constant 128 : index
    %c0_134 = arith.constant 0 : index
    %217 = vector.load %arg12[%c128_133, %c0_134] : memref<256x16xf32, #tpu.memory_space<vmem>>, vector<32x16xf32>
    %c0_135 = arith.constant 0 : index
    %c0_136 = arith.constant 0 : index
    %218 = vector.load %arg15[%c0_135, %c0_136] : memref<24x16xf32, #tpu.memory_space<vmem>>, vector<24x16xf32>
    %cst_137 = arith.constant dense<0.000000e+00> : vector<32x16xf32>
    %219 = tpu.matmul %100, %218, %cst_137 {dimension_numbers = #tpu.dot_dimension_numbers<[1], [0], [0], [1], [0, 0, 1, 1], [], []>} : vector<32x24xf32>, vector<24x16xf32>, vector<32x16xf32> -> vector<32x16xf32>
    %220 = arith.addf %217, %219 : vector<32x16xf32>
    %221 = vector.extract_strided_slice %220 {offsets = [0, 0], sizes = [8, 16], strides = [1, 1]} : vector<32x16xf32> to vector<8x16xf32>
    %222 = vector.extract_strided_slice %220 {offsets = [8, 0], sizes = [24, 16], strides = [1, 1]} : vector<32x16xf32> to vector<24x16xf32>
    %223 = arith.negf %222 : vector<24x16xf32>
    %224 = math.exp %223 : vector<24x16xf32>
    %cst_138 = arith.constant 1.000000e+00 : f32
    %225 = vector.broadcast %cst_138 : f32 to vector<24x16xf32>
    %226 = arith.addf %225, %224 : vector<24x16xf32>
    %227 = arith.divf %225, %226 : vector<24x16xf32>
    %228 = vector.extract_strided_slice %227 {offsets = [0, 0], sizes = [8, 16], strides = [1, 1]} : vector<24x16xf32> to vector<8x16xf32>
    %229 = vector.extract_strided_slice %227 {offsets = [8, 0], sizes = [8, 16], strides = [1, 1]} : vector<24x16xf32> to vector<8x16xf32>
    %230 = vector.extract_strided_slice %227 {offsets = [16, 0], sizes = [8, 16], strides = [1, 1]} : vector<24x16xf32> to vector<8x16xf32>
    %231 = arith.mulf %207, %229 : vector<8x16xf32>
    %232 = math.tanh %221 : vector<8x16xf32>
    %233 = arith.mulf %228, %232 : vector<8x16xf32>
    %234 = arith.addf %231, %233 : vector<8x16xf32>
    %235 = math.tanh %234 : vector<8x16xf32>
    %236 = arith.mulf %235, %230 : vector<8x16xf32>
    %c32_139 = arith.constant 32 : index
    %c0_140 = arith.constant 0 : index
    %237 = vector.load %arg13[%c32_139, %c0_140] : memref<64x16xf32, #tpu.memory_space<vmem>>, vector<8x16xf32>
    tpu.vector_store %arg13[%c32_139, %c0_140], %236 {strides = array<i32>} : memref<64x16xf32, #tpu.memory_space<vmem>>, vector<8x16xf32>,
    %cst_141 = arith.constant dense<0.000000e+00> : vector<8x16xf32>
    %238 = tpu.matmul %236, %1, %cst_141 {dimension_numbers = #tpu.dot_dimension_numbers<[1], [0], [0], [1], [0, 0, 1, 1], [], []>} : vector<8x16xf32>, vector<16x16xf32>, vector<8x16xf32> -> vector<8x16xf32>
    %c0_142 = arith.constant 0 : index
    %c0_143 = arith.constant 0 : index
    %239 = vector.load %arg15[%c0_142, %c0_143] : memref<24x16xf32, #tpu.memory_space<vmem>>, vector<8x16xf32>
    tpu.vector_store %arg15[%c0_142, %c0_143], %238 {strides = array<i32>} : memref<24x16xf32, #tpu.memory_space<vmem>>, vector<8x16xf32>,
    %cst_144 = arith.constant dense<0.000000e+00> : vector<8x16xf32>
    %240 = tpu.matmul %236, %3, %cst_144 {dimension_numbers = #tpu.dot_dimension_numbers<[1], [0], [0], [1], [0, 0, 1, 1], [], []>} : vector<8x16xf32>, vector<16x16xf32>, vector<8x16xf32> -> vector<8x16xf32>
    %c8_145 = arith.constant 8 : index
    %c0_146 = arith.constant 0 : index
    %241 = vector.load %arg15[%c8_145, %c0_146] : memref<24x16xf32, #tpu.memory_space<vmem>>, vector<8x16xf32>
    tpu.vector_store %arg15[%c8_145, %c0_146], %240 {strides = array<i32>} : memref<24x16xf32, #tpu.memory_space<vmem>>, vector<8x16xf32>,
    %cst_147 = arith.constant dense<0.000000e+00> : vector<8x16xf32>
    %242 = tpu.matmul %236, %5, %cst_147 {dimension_numbers = #tpu.dot_dimension_numbers<[1], [0], [0], [1], [0, 0, 1, 1], [], []>} : vector<8x16xf32>, vector<16x16xf32>, vector<8x16xf32> -> vector<8x16xf32>
    %c16_148 = arith.constant 16 : index
    %c0_149 = arith.constant 0 : index
    %243 = vector.load %arg15[%c16_148, %c0_149] : memref<24x16xf32, #tpu.memory_space<vmem>>, vector<8x16xf32>
    tpu.vector_store %arg15[%c16_148, %c0_149], %242 {strides = array<i32>} : memref<24x16xf32, #tpu.memory_space<vmem>>, vector<8x16xf32>,
    %c160_150 = arith.constant 160 : index
    %c0_151 = arith.constant 0 : index
    %244 = vector.load %arg12[%c160_150, %c0_151] : memref<256x16xf32, #tpu.memory_space<vmem>>, vector<32x16xf32>
    %c0_152 = arith.constant 0 : index
    %c0_153 = arith.constant 0 : index
    %245 = vector.load %arg15[%c0_152, %c0_153] : memref<24x16xf32, #tpu.memory_space<vmem>>, vector<24x16xf32>
    %cst_154 = arith.constant dense<0.000000e+00> : vector<32x16xf32>
    %246 = tpu.matmul %100, %245, %cst_154 {dimension_numbers = #tpu.dot_dimension_numbers<[1], [0], [0], [1], [0, 0, 1, 1], [], []>} : vector<32x24xf32>, vector<24x16xf32>, vector<32x16xf32> -> vector<32x16xf32>
    %247 = arith.addf %244, %246 : vector<32x16xf32>
    %248 = vector.extract_strided_slice %247 {offsets = [0, 0], sizes = [8, 16], strides = [1, 1]} : vector<32x16xf32> to vector<8x16xf32>
    %249 = vector.extract_strided_slice %247 {offsets = [8, 0], sizes = [24, 16], strides = [1, 1]} : vector<32x16xf32> to vector<24x16xf32>
    %250 = arith.negf %249 : vector<24x16xf32>
    %251 = math.exp %250 : vector<24x16xf32>
    %cst_155 = arith.constant 1.000000e+00 : f32
    %252 = vector.broadcast %cst_155 : f32 to vector<24x16xf32>
    %253 = arith.addf %252, %251 : vector<24x16xf32>
    %254 = arith.divf %252, %253 : vector<24x16xf32>
    %255 = vector.extract_strided_slice %254 {offsets = [0, 0], sizes = [8, 16], strides = [1, 1]} : vector<24x16xf32> to vector<8x16xf32>
    %256 = vector.extract_strided_slice %254 {offsets = [8, 0], sizes = [8, 16], strides = [1, 1]} : vector<24x16xf32> to vector<8x16xf32>
    %257 = vector.extract_strided_slice %254 {offsets = [16, 0], sizes = [8, 16], strides = [1, 1]} : vector<24x16xf32> to vector<8x16xf32>
    %258 = arith.mulf %234, %256 : vector<8x16xf32>
    %259 = math.tanh %248 : vector<8x16xf32>
    %260 = arith.mulf %255, %259 : vector<8x16xf32>
    %261 = arith.addf %258, %260 : vector<8x16xf32>
    %262 = math.tanh %261 : vector<8x16xf32>
    %263 = arith.mulf %262, %257 : vector<8x16xf32>
    %c40 = arith.constant 40 : index
    %c0_156 = arith.constant 0 : index
    %264 = vector.load %arg13[%c40, %c0_156] : memref<64x16xf32, #tpu.memory_space<vmem>>, vector<8x16xf32>
    tpu.vector_store %arg13[%c40, %c0_156], %263 {strides = array<i32>} : memref<64x16xf32, #tpu.memory_space<vmem>>, vector<8x16xf32>,
    %cst_157 = arith.constant dense<0.000000e+00> : vector<8x16xf32>
    %265 = tpu.matmul %263, %1, %cst_157 {dimension_numbers = #tpu.dot_dimension_numbers<[1], [0], [0], [1], [0, 0, 1, 1], [], []>} : vector<8x16xf32>, vector<16x16xf32>, vector<8x16xf32> -> vector<8x16xf32>
    %c0_158 = arith.constant 0 : index
    %c0_159 = arith.constant 0 : index
    %266 = vector.load %arg15[%c0_158, %c0_159] : memref<24x16xf32, #tpu.memory_space<vmem>>, vector<8x16xf32>
    tpu.vector_store %arg15[%c0_158, %c0_159], %265 {strides = array<i32>} : memref<24x16xf32, #tpu.memory_space<vmem>>, vector<8x16xf32>,
    %cst_160 = arith.constant dense<0.000000e+00> : vector<8x16xf32>
    %267 = tpu.matmul %263, %3, %cst_160 {dimension_numbers = #tpu.dot_dimension_numbers<[1], [0], [0], [1], [0, 0, 1, 1], [], []>} : vector<8x16xf32>, vector<16x16xf32>, vector<8x16xf32> -> vector<8x16xf32>
    %c8_161 = arith.constant 8 : index
    %c0_162 = arith.constant 0 : index
    %268 = vector.load %arg15[%c8_161, %c0_162] : memref<24x16xf32, #tpu.memory_space<vmem>>, vector<8x16xf32>
    tpu.vector_store %arg15[%c8_161, %c0_162], %267 {strides = array<i32>} : memref<24x16xf32, #tpu.memory_space<vmem>>, vector<8x16xf32>,
    %cst_163 = arith.constant dense<0.000000e+00> : vector<8x16xf32>
    %269 = tpu.matmul %263, %5, %cst_163 {dimension_numbers = #tpu.dot_dimension_numbers<[1], [0], [0], [1], [0, 0, 1, 1], [], []>} : vector<8x16xf32>, vector<16x16xf32>, vector<8x16xf32> -> vector<8x16xf32>
    %c16_164 = arith.constant 16 : index
    %c0_165 = arith.constant 0 : index
    %270 = vector.load %arg15[%c16_164, %c0_165] : memref<24x16xf32, #tpu.memory_space<vmem>>, vector<8x16xf32>
    tpu.vector_store %arg15[%c16_164, %c0_165], %269 {strides = array<i32>} : memref<24x16xf32, #tpu.memory_space<vmem>>, vector<8x16xf32>,
    %c192_166 = arith.constant 192 : index
    %c0_167 = arith.constant 0 : index
    %271 = vector.load %arg12[%c192_166, %c0_167] : memref<256x16xf32, #tpu.memory_space<vmem>>, vector<32x16xf32>
    %c0_168 = arith.constant 0 : index
    %c0_169 = arith.constant 0 : index
    %272 = vector.load %arg15[%c0_168, %c0_169] : memref<24x16xf32, #tpu.memory_space<vmem>>, vector<24x16xf32>
    %cst_170 = arith.constant dense<0.000000e+00> : vector<32x16xf32>
    %273 = tpu.matmul %100, %272, %cst_170 {dimension_numbers = #tpu.dot_dimension_numbers<[1], [0], [0], [1], [0, 0, 1, 1], [], []>} : vector<32x24xf32>, vector<24x16xf32>, vector<32x16xf32> -> vector<32x16xf32>
    %274 = arith.addf %271, %273 : vector<32x16xf32>
    %275 = vector.extract_strided_slice %274 {offsets = [0, 0], sizes = [8, 16], strides = [1, 1]} : vector<32x16xf32> to vector<8x16xf32>
    %276 = vector.extract_strided_slice %274 {offsets = [8, 0], sizes = [24, 16], strides = [1, 1]} : vector<32x16xf32> to vector<24x16xf32>
    %277 = arith.negf %276 : vector<24x16xf32>
    %278 = math.exp %277 : vector<24x16xf32>
    %cst_171 = arith.constant 1.000000e+00 : f32
    %279 = vector.broadcast %cst_171 : f32 to vector<24x16xf32>
    %280 = arith.addf %279, %278 : vector<24x16xf32>
    %281 = arith.divf %279, %280 : vector<24x16xf32>
    %282 = vector.extract_strided_slice %281 {offsets = [0, 0], sizes = [8, 16], strides = [1, 1]} : vector<24x16xf32> to vector<8x16xf32>
    %283 = vector.extract_strided_slice %281 {offsets = [8, 0], sizes = [8, 16], strides = [1, 1]} : vector<24x16xf32> to vector<8x16xf32>
    %284 = vector.extract_strided_slice %281 {offsets = [16, 0], sizes = [8, 16], strides = [1, 1]} : vector<24x16xf32> to vector<8x16xf32>
    %285 = arith.mulf %261, %283 : vector<8x16xf32>
    %286 = math.tanh %275 : vector<8x16xf32>
    %287 = arith.mulf %282, %286 : vector<8x16xf32>
    %288 = arith.addf %285, %287 : vector<8x16xf32>
    %289 = math.tanh %288 : vector<8x16xf32>
    %290 = arith.mulf %289, %284 : vector<8x16xf32>
    %c48 = arith.constant 48 : index
    %c0_172 = arith.constant 0 : index
    %291 = vector.load %arg13[%c48, %c0_172] : memref<64x16xf32, #tpu.memory_space<vmem>>, vector<8x16xf32>
    tpu.vector_store %arg13[%c48, %c0_172], %290 {strides = array<i32>} : memref<64x16xf32, #tpu.memory_space<vmem>>, vector<8x16xf32>,
    %cst_173 = arith.constant dense<0.000000e+00> : vector<8x16xf32>
    %292 = tpu.matmul %290, %1, %cst_173 {dimension_numbers = #tpu.dot_dimension_numbers<[1], [0], [0], [1], [0, 0, 1, 1], [], []>} : vector<8x16xf32>, vector<16x16xf32>, vector<8x16xf32> -> vector<8x16xf32>
    %c0_174 = arith.constant 0 : index
    %c0_175 = arith.constant 0 : index
    %293 = vector.load %arg15[%c0_174, %c0_175] : memref<24x16xf32, #tpu.memory_space<vmem>>, vector<8x16xf32>
    tpu.vector_store %arg15[%c0_174, %c0_175], %292 {strides = array<i32>} : memref<24x16xf32, #tpu.memory_space<vmem>>, vector<8x16xf32>,
    %cst_176 = arith.constant dense<0.000000e+00> : vector<8x16xf32>
    %294 = tpu.matmul %290, %3, %cst_176 {dimension_numbers = #tpu.dot_dimension_numbers<[1], [0], [0], [1], [0, 0, 1, 1], [], []>} : vector<8x16xf32>, vector<16x16xf32>, vector<8x16xf32> -> vector<8x16xf32>
    %c8_177 = arith.constant 8 : index
    %c0_178 = arith.constant 0 : index
    %295 = vector.load %arg15[%c8_177, %c0_178] : memref<24x16xf32, #tpu.memory_space<vmem>>, vector<8x16xf32>
    tpu.vector_store %arg15[%c8_177, %c0_178], %294 {strides = array<i32>} : memref<24x16xf32, #tpu.memory_space<vmem>>, vector<8x16xf32>,
    %cst_179 = arith.constant dense<0.000000e+00> : vector<8x16xf32>
    %296 = tpu.matmul %290, %5, %cst_179 {dimension_numbers = #tpu.dot_dimension_numbers<[1], [0], [0], [1], [0, 0, 1, 1], [], []>} : vector<8x16xf32>, vector<16x16xf32>, vector<8x16xf32> -> vector<8x16xf32>
    %c16_180 = arith.constant 16 : index
    %c0_181 = arith.constant 0 : index
    %297 = vector.load %arg15[%c16_180, %c0_181] : memref<24x16xf32, #tpu.memory_space<vmem>>, vector<8x16xf32>
    tpu.vector_store %arg15[%c16_180, %c0_181], %296 {strides = array<i32>} : memref<24x16xf32, #tpu.memory_space<vmem>>, vector<8x16xf32>,
    %c224_182 = arith.constant 224 : index
    %c0_183 = arith.constant 0 : index
    %298 = vector.load %arg12[%c224_182, %c0_183] : memref<256x16xf32, #tpu.memory_space<vmem>>, vector<32x16xf32>
    %c0_184 = arith.constant 0 : index
    %c0_185 = arith.constant 0 : index
    %299 = vector.load %arg15[%c0_184, %c0_185] : memref<24x16xf32, #tpu.memory_space<vmem>>, vector<24x16xf32>
    %cst_186 = arith.constant dense<0.000000e+00> : vector<32x16xf32>
    %300 = tpu.matmul %100, %299, %cst_186 {dimension_numbers = #tpu.dot_dimension_numbers<[1], [0], [0], [1], [0, 0, 1, 1], [], []>} : vector<32x24xf32>, vector<24x16xf32>, vector<32x16xf32> -> vector<32x16xf32>
    %301 = arith.addf %298, %300 : vector<32x16xf32>
    %302 = vector.extract_strided_slice %301 {offsets = [0, 0], sizes = [8, 16], strides = [1, 1]} : vector<32x16xf32> to vector<8x16xf32>
    %303 = vector.extract_strided_slice %301 {offsets = [8, 0], sizes = [24, 16], strides = [1, 1]} : vector<32x16xf32> to vector<24x16xf32>
    %304 = arith.negf %303 : vector<24x16xf32>
    %305 = math.exp %304 : vector<24x16xf32>
    %cst_187 = arith.constant 1.000000e+00 : f32
    %306 = vector.broadcast %cst_187 : f32 to vector<24x16xf32>
    %307 = arith.addf %306, %305 : vector<24x16xf32>
    %308 = arith.divf %306, %307 : vector<24x16xf32>
    %309 = vector.extract_strided_slice %308 {offsets = [0, 0], sizes = [8, 16], strides = [1, 1]} : vector<24x16xf32> to vector<8x16xf32>
    %310 = vector.extract_strided_slice %308 {offsets = [8, 0], sizes = [8, 16], strides = [1, 1]} : vector<24x16xf32> to vector<8x16xf32>
    %311 = vector.extract_strided_slice %308 {offsets = [16, 0], sizes = [8, 16], strides = [1, 1]} : vector<24x16xf32> to vector<8x16xf32>
    %312 = arith.mulf %288, %310 : vector<8x16xf32>
    %313 = math.tanh %302 : vector<8x16xf32>
    %314 = arith.mulf %309, %313 : vector<8x16xf32>
    %315 = arith.addf %312, %314 : vector<8x16xf32>
    %316 = math.tanh %315 : vector<8x16xf32>
    %317 = arith.mulf %316, %311 : vector<8x16xf32>
    %c56 = arith.constant 56 : index
    %c0_188 = arith.constant 0 : index
    %318 = vector.load %arg13[%c56, %c0_188] : memref<64x16xf32, #tpu.memory_space<vmem>>, vector<8x16xf32>
    tpu.vector_store %arg13[%c56, %c0_188], %317 {strides = array<i32>} : memref<64x16xf32, #tpu.memory_space<vmem>>, vector<8x16xf32>,
    %c0_189 = arith.constant 0 : index
    %c0_190 = arith.constant 0 : index
    %319 = vector.load %arg13[%c0_189, %c0_190] : memref<64x16xf32, #tpu.memory_space<vmem>>, vector<64x16xf32>
    %c0_191 = arith.constant 0 : index
    %c0_192 = arith.constant 0 : index
    %320 = vector.load %arg8[%c0_191, %c0_192] : memref<32x1xf32, #tpu.memory_space<vmem>>, vector<32x1xf32>
    %321 = vector.shape_cast %320 : vector<32x1xf32> to vector<32x1xf32>
    %322 = vector.broadcast %321 : vector<32x1xf32> to vector<32x16xf32>
    %cst_193 = arith.constant dense<0.000000e+00> : vector<64x16xf32>
    %323 = tpu.matmul %319, %1, %cst_193 {dimension_numbers = #tpu.dot_dimension_numbers<[1], [0], [0], [1], [0, 0, 1, 1], [], []>} : vector<64x16xf32>, vector<16x16xf32>, vector<64x16xf32> -> vector<64x16xf32>
    %cst_194 = arith.constant dense<0.000000e+00> : vector<64x16xf32>
    %324 = tpu.matmul %319, %3, %cst_194 {dimension_numbers = #tpu.dot_dimension_numbers<[1], [0], [0], [1], [0, 0, 1, 1], [], []>} : vector<64x16xf32>, vector<16x16xf32>, vector<64x16xf32> -> vector<64x16xf32>
    %cst_195 = arith.constant dense<0.000000e+00> : vector<64x16xf32>
    %325 = tpu.matmul %319, %5, %cst_195 {dimension_numbers = #tpu.dot_dimension_numbers<[1], [0], [0], [1], [0, 0, 1, 1], [], []>} : vector<64x16xf32>, vector<16x16xf32>, vector<64x16xf32> -> vector<64x16xf32>
    %c0_196 = arith.constant 0 : index
    %c0_197 = arith.constant 0 : index
    %c0_198 = arith.constant 0 : index
    %326 = vector.load %arg6[%c0_196, %c0_197, %c0_198] : memref<3x32x8xf32, #tpu.memory_space<vmem>>, vector<1x32x8xf32>
    %327 = vector.shape_cast %326 : vector<1x32x8xf32> to vector<32x8xf32>
    %c1_199 = arith.constant 1 : index
    %c0_200 = arith.constant 0 : index
    %c0_201 = arith.constant 0 : index
    %328 = vector.load %arg6[%c1_199, %c0_200, %c0_201] : memref<3x32x8xf32, #tpu.memory_space<vmem>>, vector<1x32x8xf32>
    %329 = vector.shape_cast %328 : vector<1x32x8xf32> to vector<32x8xf32>
    %c2_202 = arith.constant 2 : index
    %c0_203 = arith.constant 0 : index
    %c0_204 = arith.constant 0 : index
    %330 = vector.load %arg6[%c2_202, %c0_203, %c0_204] : memref<3x32x8xf32, #tpu.memory_space<vmem>>, vector<1x32x8xf32>
    %331 = vector.shape_cast %330 : vector<1x32x8xf32> to vector<32x8xf32>
    %332 = vector.extract_strided_slice %323 {offsets = [0, 0], sizes = [8, 16], strides = [1, 1]} : vector<64x16xf32> to vector<8x16xf32>
    %cst_205 = arith.constant dense<0.000000e+00> : vector<32x16xf32>
    %333 = tpu.matmul %327, %332, %cst_205 {dimension_numbers = #tpu.dot_dimension_numbers<[1], [0], [0], [1], [0, 0, 1, 1], [], []>} : vector<32x8xf32>, vector<8x16xf32>, vector<32x16xf32> -> vector<32x16xf32>
    %334 = arith.addf %322, %333 : vector<32x16xf32>
    %335 = vector.extract_strided_slice %324 {offsets = [0, 0], sizes = [8, 16], strides = [1, 1]} : vector<64x16xf32> to vector<8x16xf32>
    %cst_206 = arith.constant dense<0.000000e+00> : vector<32x16xf32>
    %336 = tpu.matmul %329, %335, %cst_206 {dimension_numbers = #tpu.dot_dimension_numbers<[1], [0], [0], [1], [0, 0, 1, 1], [], []>} : vector<32x8xf32>, vector<8x16xf32>, vector<32x16xf32> -> vector<32x16xf32>
    %337 = arith.addf %334, %336 : vector<32x16xf32>
    %338 = vector.extract_strided_slice %325 {offsets = [0, 0], sizes = [8, 16], strides = [1, 1]} : vector<64x16xf32> to vector<8x16xf32>
    %cst_207 = arith.constant dense<0.000000e+00> : vector<32x16xf32>
    %339 = tpu.matmul %331, %338, %cst_207 {dimension_numbers = #tpu.dot_dimension_numbers<[1], [0], [0], [1], [0, 0, 1, 1], [], []>} : vector<32x8xf32>, vector<8x16xf32>, vector<32x16xf32> -> vector<32x16xf32>
    %340 = arith.addf %337, %339 : vector<32x16xf32>
    %c0_208 = arith.constant 0 : index
    %c0_209 = arith.constant 0 : index
    %341 = vector.load %arg12[%c0_208, %c0_209] : memref<256x16xf32, #tpu.memory_space<vmem>>, vector<32x16xf32>
    tpu.vector_store %arg12[%c0_208, %c0_209], %340 {strides = array<i32>} : memref<256x16xf32, #tpu.memory_space<vmem>>, vector<32x16xf32>,
    %342 = vector.extract_strided_slice %323 {offsets = [8, 0], sizes = [8, 16], strides = [1, 1]} : vector<64x16xf32> to vector<8x16xf32>
    %cst_210 = arith.constant dense<0.000000e+00> : vector<32x16xf32>
    %343 = tpu.matmul %327, %342, %cst_210 {dimension_numbers = #tpu.dot_dimension_numbers<[1], [0], [0], [1], [0, 0, 1, 1], [], []>} : vector<32x8xf32>, vector<8x16xf32>, vector<32x16xf32> -> vector<32x16xf32>
    %344 = arith.addf %322, %343 : vector<32x16xf32>
    %345 = vector.extract_strided_slice %324 {offsets = [8, 0], sizes = [8, 16], strides = [1, 1]} : vector<64x16xf32> to vector<8x16xf32>
    %cst_211 = arith.constant dense<0.000000e+00> : vector<32x16xf32>
    %346 = tpu.matmul %329, %345, %cst_211 {dimension_numbers = #tpu.dot_dimension_numbers<[1], [0], [0], [1], [0, 0, 1, 1], [], []>} : vector<32x8xf32>, vector<8x16xf32>, vector<32x16xf32> -> vector<32x16xf32>
    %347 = arith.addf %344, %346 : vector<32x16xf32>
    %348 = vector.extract_strided_slice %325 {offsets = [8, 0], sizes = [8, 16], strides = [1, 1]} : vector<64x16xf32> to vector<8x16xf32>
    %cst_212 = arith.constant dense<0.000000e+00> : vector<32x16xf32>
    %349 = tpu.matmul %331, %348, %cst_212 {dimension_numbers = #tpu.dot_dimension_numbers<[1], [0], [0], [1], [0, 0, 1, 1], [], []>} : vector<32x8xf32>, vector<8x16xf32>, vector<32x16xf32> -> vector<32x16xf32>
    %350 = arith.addf %347, %349 : vector<32x16xf32>
    %c32_213 = arith.constant 32 : index
    %c0_214 = arith.constant 0 : index
    %351 = vector.load %arg12[%c32_213, %c0_214] : memref<256x16xf32, #tpu.memory_space<vmem>>, vector<32x16xf32>
    tpu.vector_store %arg12[%c32_213, %c0_214], %350 {strides = array<i32>} : memref<256x16xf32, #tpu.memory_space<vmem>>, vector<32x16xf32>,
    %352 = vector.extract_strided_slice %323 {offsets = [16, 0], sizes = [8, 16], strides = [1, 1]} : vector<64x16xf32> to vector<8x16xf32>
    %cst_215 = arith.constant dense<0.000000e+00> : vector<32x16xf32>
    %353 = tpu.matmul %327, %352, %cst_215 {dimension_numbers = #tpu.dot_dimension_numbers<[1], [0], [0], [1], [0, 0, 1, 1], [], []>} : vector<32x8xf32>, vector<8x16xf32>, vector<32x16xf32> -> vector<32x16xf32>
    %354 = arith.addf %322, %353 : vector<32x16xf32>
    %355 = vector.extract_strided_slice %324 {offsets = [16, 0], sizes = [8, 16], strides = [1, 1]} : vector<64x16xf32> to vector<8x16xf32>
    %cst_216 = arith.constant dense<0.000000e+00> : vector<32x16xf32>
    %356 = tpu.matmul %329, %355, %cst_216 {dimension_numbers = #tpu.dot_dimension_numbers<[1], [0], [0], [1], [0, 0, 1, 1], [], []>} : vector<32x8xf32>, vector<8x16xf32>, vector<32x16xf32> -> vector<32x16xf32>
    %357 = arith.addf %354, %356 : vector<32x16xf32>
    %358 = vector.extract_strided_slice %325 {offsets = [16, 0], sizes = [8, 16], strides = [1, 1]} : vector<64x16xf32> to vector<8x16xf32>
    %cst_217 = arith.constant dense<0.000000e+00> : vector<32x16xf32>
    %359 = tpu.matmul %331, %358, %cst_217 {dimension_numbers = #tpu.dot_dimension_numbers<[1], [0], [0], [1], [0, 0, 1, 1], [], []>} : vector<32x8xf32>, vector<8x16xf32>, vector<32x16xf32> -> vector<32x16xf32>
    %360 = arith.addf %357, %359 : vector<32x16xf32>
    %c64_218 = arith.constant 64 : index
    %c0_219 = arith.constant 0 : index
    %361 = vector.load %arg12[%c64_218, %c0_219] : memref<256x16xf32, #tpu.memory_space<vmem>>, vector<32x16xf32>
    tpu.vector_store %arg12[%c64_218, %c0_219], %360 {strides = array<i32>} : memref<256x16xf32, #tpu.memory_space<vmem>>, vector<32x16xf32>,
    %362 = vector.extract_strided_slice %323 {offsets = [24, 0], sizes = [8, 16], strides = [1, 1]} : vector<64x16xf32> to vector<8x16xf32>
    %cst_220 = arith.constant dense<0.000000e+00> : vector<32x16xf32>
    %363 = tpu.matmul %327, %362, %cst_220 {dimension_numbers = #tpu.dot_dimension_numbers<[1], [0], [0], [1], [0, 0, 1, 1], [], []>} : vector<32x8xf32>, vector<8x16xf32>, vector<32x16xf32> -> vector<32x16xf32>
    %364 = arith.addf %322, %363 : vector<32x16xf32>
    %365 = vector.extract_strided_slice %324 {offsets = [24, 0], sizes = [8, 16], strides = [1, 1]} : vector<64x16xf32> to vector<8x16xf32>
    %cst_221 = arith.constant dense<0.000000e+00> : vector<32x16xf32>
    %366 = tpu.matmul %329, %365, %cst_221 {dimension_numbers = #tpu.dot_dimension_numbers<[1], [0], [0], [1], [0, 0, 1, 1], [], []>} : vector<32x8xf32>, vector<8x16xf32>, vector<32x16xf32> -> vector<32x16xf32>
    %367 = arith.addf %364, %366 : vector<32x16xf32>
    %368 = vector.extract_strided_slice %325 {offsets = [24, 0], sizes = [8, 16], strides = [1, 1]} : vector<64x16xf32> to vector<8x16xf32>
    %cst_222 = arith.constant dense<0.000000e+00> : vector<32x16xf32>
    %369 = tpu.matmul %331, %368, %cst_222 {dimension_numbers = #tpu.dot_dimension_numbers<[1], [0], [0], [1], [0, 0, 1, 1], [], []>} : vector<32x8xf32>, vector<8x16xf32>, vector<32x16xf32> -> vector<32x16xf32>
    %370 = arith.addf %367, %369 : vector<32x16xf32>
    %c96_223 = arith.constant 96 : index
    %c0_224 = arith.constant 0 : index
    %371 = vector.load %arg12[%c96_223, %c0_224] : memref<256x16xf32, #tpu.memory_space<vmem>>, vector<32x16xf32>
    tpu.vector_store %arg12[%c96_223, %c0_224], %370 {strides = array<i32>} : memref<256x16xf32, #tpu.memory_space<vmem>>, vector<32x16xf32>,
    %372 = vector.extract_strided_slice %323 {offsets = [32, 0], sizes = [8, 16], strides = [1, 1]} : vector<64x16xf32> to vector<8x16xf32>
    %cst_225 = arith.constant dense<0.000000e+00> : vector<32x16xf32>
    %373 = tpu.matmul %327, %372, %cst_225 {dimension_numbers = #tpu.dot_dimension_numbers<[1], [0], [0], [1], [0, 0, 1, 1], [], []>} : vector<32x8xf32>, vector<8x16xf32>, vector<32x16xf32> -> vector<32x16xf32>
    %374 = arith.addf %322, %373 : vector<32x16xf32>
    %375 = vector.extract_strided_slice %324 {offsets = [32, 0], sizes = [8, 16], strides = [1, 1]} : vector<64x16xf32> to vector<8x16xf32>
    %cst_226 = arith.constant dense<0.000000e+00> : vector<32x16xf32>
    %376 = tpu.matmul %329, %375, %cst_226 {dimension_numbers = #tpu.dot_dimension_numbers<[1], [0], [0], [1], [0, 0, 1, 1], [], []>} : vector<32x8xf32>, vector<8x16xf32>, vector<32x16xf32> -> vector<32x16xf32>
    %377 = arith.addf %374, %376 : vector<32x16xf32>
    %378 = vector.extract_strided_slice %325 {offsets = [32, 0], sizes = [8, 16], strides = [1, 1]} : vector<64x16xf32> to vector<8x16xf32>
    %cst_227 = arith.constant dense<0.000000e+00> : vector<32x16xf32>
    %379 = tpu.matmul %331, %378, %cst_227 {dimension_numbers = #tpu.dot_dimension_numbers<[1], [0], [0], [1], [0, 0, 1, 1], [], []>} : vector<32x8xf32>, vector<8x16xf32>, vector<32x16xf32> -> vector<32x16xf32>
    %380 = arith.addf %377, %379 : vector<32x16xf32>
    %c128_228 = arith.constant 128 : index
    %c0_229 = arith.constant 0 : index
    %381 = vector.load %arg12[%c128_228, %c0_229] : memref<256x16xf32, #tpu.memory_space<vmem>>, vector<32x16xf32>
    tpu.vector_store %arg12[%c128_228, %c0_229], %380 {strides = array<i32>} : memref<256x16xf32, #tpu.memory_space<vmem>>, vector<32x16xf32>,
    %382 = vector.extract_strided_slice %323 {offsets = [40, 0], sizes = [8, 16], strides = [1, 1]} : vector<64x16xf32> to vector<8x16xf32>
    %cst_230 = arith.constant dense<0.000000e+00> : vector<32x16xf32>
    %383 = tpu.matmul %327, %382, %cst_230 {dimension_numbers = #tpu.dot_dimension_numbers<[1], [0], [0], [1], [0, 0, 1, 1], [], []>} : vector<32x8xf32>, vector<8x16xf32>, vector<32x16xf32> -> vector<32x16xf32>
    %384 = arith.addf %322, %383 : vector<32x16xf32>
    %385 = vector.extract_strided_slice %324 {offsets = [40, 0], sizes = [8, 16], strides = [1, 1]} : vector<64x16xf32> to vector<8x16xf32>
    %cst_231 = arith.constant dense<0.000000e+00> : vector<32x16xf32>
    %386 = tpu.matmul %329, %385, %cst_231 {dimension_numbers = #tpu.dot_dimension_numbers<[1], [0], [0], [1], [0, 0, 1, 1], [], []>} : vector<32x8xf32>, vector<8x16xf32>, vector<32x16xf32> -> vector<32x16xf32>
    %387 = arith.addf %384, %386 : vector<32x16xf32>
    %388 = vector.extract_strided_slice %325 {offsets = [40, 0], sizes = [8, 16], strides = [1, 1]} : vector<64x16xf32> to vector<8x16xf32>
    %cst_232 = arith.constant dense<0.000000e+00> : vector<32x16xf32>
    %389 = tpu.matmul %331, %388, %cst_232 {dimension_numbers = #tpu.dot_dimension_numbers<[1], [0], [0], [1], [0, 0, 1, 1], [], []>} : vector<32x8xf32>, vector<8x16xf32>, vector<32x16xf32> -> vector<32x16xf32>
    %390 = arith.addf %387, %389 : vector<32x16xf32>
    %c160_233 = arith.constant 160 : index
    %c0_234 = arith.constant 0 : index
    %391 = vector.load %arg12[%c160_233, %c0_234] : memref<256x16xf32, #tpu.memory_space<vmem>>, vector<32x16xf32>
    tpu.vector_store %arg12[%c160_233, %c0_234], %390 {strides = array<i32>} : memref<256x16xf32, #tpu.memory_space<vmem>>, vector<32x16xf32>,
    %392 = vector.extract_strided_slice %323 {offsets = [48, 0], sizes = [8, 16], strides = [1, 1]} : vector<64x16xf32> to vector<8x16xf32>
    %cst_235 = arith.constant dense<0.000000e+00> : vector<32x16xf32>
    %393 = tpu.matmul %327, %392, %cst_235 {dimension_numbers = #tpu.dot_dimension_numbers<[1], [0], [0], [1], [0, 0, 1, 1], [], []>} : vector<32x8xf32>, vector<8x16xf32>, vector<32x16xf32> -> vector<32x16xf32>
    %394 = arith.addf %322, %393 : vector<32x16xf32>
    %395 = vector.extract_strided_slice %324 {offsets = [48, 0], sizes = [8, 16], strides = [1, 1]} : vector<64x16xf32> to vector<8x16xf32>
    %cst_236 = arith.constant dense<0.000000e+00> : vector<32x16xf32>
    %396 = tpu.matmul %329, %395, %cst_236 {dimension_numbers = #tpu.dot_dimension_numbers<[1], [0], [0], [1], [0, 0, 1, 1], [], []>} : vector<32x8xf32>, vector<8x16xf32>, vector<32x16xf32> -> vector<32x16xf32>
    %397 = arith.addf %394, %396 : vector<32x16xf32>
    %398 = vector.extract_strided_slice %325 {offsets = [48, 0], sizes = [8, 16], strides = [1, 1]} : vector<64x16xf32> to vector<8x16xf32>
    %cst_237 = arith.constant dense<0.000000e+00> : vector<32x16xf32>
    %399 = tpu.matmul %331, %398, %cst_237 {dimension_numbers = #tpu.dot_dimension_numbers<[1], [0], [0], [1], [0, 0, 1, 1], [], []>} : vector<32x8xf32>, vector<8x16xf32>, vector<32x16xf32> -> vector<32x16xf32>
    %400 = arith.addf %397, %399 : vector<32x16xf32>
    %c192_238 = arith.constant 192 : index
    %c0_239 = arith.constant 0 : index
    %401 = vector.load %arg12[%c192_238, %c0_239] : memref<256x16xf32, #tpu.memory_space<vmem>>, vector<32x16xf32>
    tpu.vector_store %arg12[%c192_238, %c0_239], %400 {strides = array<i32>} : memref<256x16xf32, #tpu.memory_space<vmem>>, vector<32x16xf32>,
    %402 = vector.extract_strided_slice %323 {offsets = [56, 0], sizes = [8, 16], strides = [1, 1]} : vector<64x16xf32> to vector<8x16xf32>
    %cst_240 = arith.constant dense<0.000000e+00> : vector<32x16xf32>
    %403 = tpu.matmul %327, %402, %cst_240 {dimension_numbers = #tpu.dot_dimension_numbers<[1], [0], [0], [1], [0, 0, 1, 1], [], []>} : vector<32x8xf32>, vector<8x16xf32>, vector<32x16xf32> -> vector<32x16xf32>
    %404 = arith.addf %322, %403 : vector<32x16xf32>
    %405 = vector.extract_strided_slice %324 {offsets = [56, 0], sizes = [8, 16], strides = [1, 1]} : vector<64x16xf32> to vector<8x16xf32>
    %cst_241 = arith.constant dense<0.000000e+00> : vector<32x16xf32>
    %406 = tpu.matmul %329, %405, %cst_241 {dimension_numbers = #tpu.dot_dimension_numbers<[1], [0], [0], [1], [0, 0, 1, 1], [], []>} : vector<32x8xf32>, vector<8x16xf32>, vector<32x16xf32> -> vector<32x16xf32>
    %407 = arith.addf %404, %406 : vector<32x16xf32>
    %408 = vector.extract_strided_slice %325 {offsets = [56, 0], sizes = [8, 16], strides = [1, 1]} : vector<64x16xf32> to vector<8x16xf32>
    %cst_242 = arith.constant dense<0.000000e+00> : vector<32x16xf32>
    %409 = tpu.matmul %331, %408, %cst_242 {dimension_numbers = #tpu.dot_dimension_numbers<[1], [0], [0], [1], [0, 0, 1, 1], [], []>} : vector<32x8xf32>, vector<8x16xf32>, vector<32x16xf32> -> vector<32x16xf32>
    %410 = arith.addf %407, %409 : vector<32x16xf32>
    %c224_243 = arith.constant 224 : index
    %c0_244 = arith.constant 0 : index
    %411 = vector.load %arg12[%c224_243, %c0_244] : memref<256x16xf32, #tpu.memory_space<vmem>>, vector<32x16xf32>
    tpu.vector_store %arg12[%c224_243, %c0_244], %410 {strides = array<i32>} : memref<256x16xf32, #tpu.memory_space<vmem>>, vector<32x16xf32>,
    %c0_245 = arith.constant 0 : index
    %c0_246 = arith.constant 0 : index
    %412 = vector.load %arg7[%c0_245, %c0_246] : memref<32x24xf32, #tpu.memory_space<vmem>>, vector<32x24xf32>
    %cst_247 = arith.constant 0.000000e+00 : f32
    %413 = vector.broadcast %cst_247 : f32 to vector<8x16xf32>
    %cst_248 = arith.constant 0.000000e+00 : f32
    %414 = vector.broadcast %cst_248 : f32 to vector<8x16xf32>
    %cst_249 = arith.constant dense<0.000000e+00> : vector<8x16xf32>
    %415 = tpu.matmul %413, %1, %cst_249 {dimension_numbers = #tpu.dot_dimension_numbers<[1], [0], [0], [1], [0, 0, 1, 1], [], []>} : vector<8x16xf32>, vector<16x16xf32>, vector<8x16xf32> -> vector<8x16xf32>
    %c0_250 = arith.constant 0 : index
    %c0_251 = arith.constant 0 : index
    %416 = vector.load %arg15[%c0_250, %c0_251] : memref<24x16xf32, #tpu.memory_space<vmem>>, vector<8x16xf32>
    tpu.vector_store %arg15[%c0_250, %c0_251], %415 {strides = array<i32>} : memref<24x16xf32, #tpu.memory_space<vmem>>, vector<8x16xf32>,
    %cst_252 = arith.constant dense<0.000000e+00> : vector<8x16xf32>
    %417 = tpu.matmul %413, %3, %cst_252 {dimension_numbers = #tpu.dot_dimension_numbers<[1], [0], [0], [1], [0, 0, 1, 1], [], []>} : vector<8x16xf32>, vector<16x16xf32>, vector<8x16xf32> -> vector<8x16xf32>
    %c8_253 = arith.constant 8 : index
    %c0_254 = arith.constant 0 : index
    %418 = vector.load %arg15[%c8_253, %c0_254] : memref<24x16xf32, #tpu.memory_space<vmem>>, vector<8x16xf32>
    tpu.vector_store %arg15[%c8_253, %c0_254], %417 {strides = array<i32>} : memref<24x16xf32, #tpu.memory_space<vmem>>, vector<8x16xf32>,
    %cst_255 = arith.constant dense<0.000000e+00> : vector<8x16xf32>
    %419 = tpu.matmul %413, %5, %cst_255 {dimension_numbers = #tpu.dot_dimension_numbers<[1], [0], [0], [1], [0, 0, 1, 1], [], []>} : vector<8x16xf32>, vector<16x16xf32>, vector<8x16xf32> -> vector<8x16xf32>
    %c16_256 = arith.constant 16 : index
    %c0_257 = arith.constant 0 : index
    %420 = vector.load %arg15[%c16_256, %c0_257] : memref<24x16xf32, #tpu.memory_space<vmem>>, vector<8x16xf32>
    tpu.vector_store %arg15[%c16_256, %c0_257], %419 {strides = array<i32>} : memref<24x16xf32, #tpu.memory_space<vmem>>, vector<8x16xf32>,
    %c0_258 = arith.constant 0 : index
    %c0_259 = arith.constant 0 : index
    %421 = vector.load %arg12[%c0_258, %c0_259] : memref<256x16xf32, #tpu.memory_space<vmem>>, vector<32x16xf32>
    %c0_260 = arith.constant 0 : index
    %c0_261 = arith.constant 0 : index
    %422 = vector.load %arg15[%c0_260, %c0_261] : memref<24x16xf32, #tpu.memory_space<vmem>>, vector<24x16xf32>
    %cst_262 = arith.constant dense<0.000000e+00> : vector<32x16xf32>
    %423 = tpu.matmul %412, %422, %cst_262 {dimension_numbers = #tpu.dot_dimension_numbers<[1], [0], [0], [1], [0, 0, 1, 1], [], []>} : vector<32x24xf32>, vector<24x16xf32>, vector<32x16xf32> -> vector<32x16xf32>
    %424 = arith.addf %421, %423 : vector<32x16xf32>
    %425 = vector.extract_strided_slice %424 {offsets = [0, 0], sizes = [8, 16], strides = [1, 1]} : vector<32x16xf32> to vector<8x16xf32>
    %426 = vector.extract_strided_slice %424 {offsets = [8, 0], sizes = [24, 16], strides = [1, 1]} : vector<32x16xf32> to vector<24x16xf32>
    %427 = arith.negf %426 : vector<24x16xf32>
    %428 = math.exp %427 : vector<24x16xf32>
    %cst_263 = arith.constant 1.000000e+00 : f32
    %429 = vector.broadcast %cst_263 : f32 to vector<24x16xf32>
    %430 = arith.addf %429, %428 : vector<24x16xf32>
    %431 = arith.divf %429, %430 : vector<24x16xf32>
    %432 = vector.extract_strided_slice %431 {offsets = [0, 0], sizes = [8, 16], strides = [1, 1]} : vector<24x16xf32> to vector<8x16xf32>
    %433 = vector.extract_strided_slice %431 {offsets = [8, 0], sizes = [8, 16], strides = [1, 1]} : vector<24x16xf32> to vector<8x16xf32>
    %434 = vector.extract_strided_slice %431 {offsets = [16, 0], sizes = [8, 16], strides = [1, 1]} : vector<24x16xf32> to vector<8x16xf32>
    %435 = arith.mulf %414, %433 : vector<8x16xf32>
    %436 = math.tanh %425 : vector<8x16xf32>
    %437 = arith.mulf %432, %436 : vector<8x16xf32>
    %438 = arith.addf %435, %437 : vector<8x16xf32>
    %439 = math.tanh %438 : vector<8x16xf32>
    %440 = arith.mulf %439, %434 : vector<8x16xf32>
    %c0_264 = arith.constant 0 : index
    %c0_265 = arith.constant 0 : index
    %441 = vector.load %arg14[%c0_264, %c0_265] : memref<64x16xf32, #tpu.memory_space<vmem>>, vector<8x16xf32>
    tpu.vector_store %arg14[%c0_264, %c0_265], %440 {strides = array<i32>} : memref<64x16xf32, #tpu.memory_space<vmem>>, vector<8x16xf32>,
    %cst_266 = arith.constant dense<0.000000e+00> : vector<8x16xf32>
    %442 = tpu.matmul %440, %1, %cst_266 {dimension_numbers = #tpu.dot_dimension_numbers<[1], [0], [0], [1], [0, 0, 1, 1], [], []>} : vector<8x16xf32>, vector<16x16xf32>, vector<8x16xf32> -> vector<8x16xf32>
    %c0_267 = arith.constant 0 : index
    %c0_268 = arith.constant 0 : index
    %443 = vector.load %arg15[%c0_267, %c0_268] : memref<24x16xf32, #tpu.memory_space<vmem>>, vector<8x16xf32>
    tpu.vector_store %arg15[%c0_267, %c0_268], %442 {strides = array<i32>} : memref<24x16xf32, #tpu.memory_space<vmem>>, vector<8x16xf32>,
    %cst_269 = arith.constant dense<0.000000e+00> : vector<8x16xf32>
    %444 = tpu.matmul %440, %3, %cst_269 {dimension_numbers = #tpu.dot_dimension_numbers<[1], [0], [0], [1], [0, 0, 1, 1], [], []>} : vector<8x16xf32>, vector<16x16xf32>, vector<8x16xf32> -> vector<8x16xf32>
    %c8_270 = arith.constant 8 : index
    %c0_271 = arith.constant 0 : index
    %445 = vector.load %arg15[%c8_270, %c0_271] : memref<24x16xf32, #tpu.memory_space<vmem>>, vector<8x16xf32>
    tpu.vector_store %arg15[%c8_270, %c0_271], %444 {strides = array<i32>} : memref<24x16xf32, #tpu.memory_space<vmem>>, vector<8x16xf32>,
    %cst_272 = arith.constant dense<0.000000e+00> : vector<8x16xf32>
    %446 = tpu.matmul %440, %5, %cst_272 {dimension_numbers = #tpu.dot_dimension_numbers<[1], [0], [0], [1], [0, 0, 1, 1], [], []>} : vector<8x16xf32>, vector<16x16xf32>, vector<8x16xf32> -> vector<8x16xf32>
    %c16_273 = arith.constant 16 : index
    %c0_274 = arith.constant 0 : index
    %447 = vector.load %arg15[%c16_273, %c0_274] : memref<24x16xf32, #tpu.memory_space<vmem>>, vector<8x16xf32>
    tpu.vector_store %arg15[%c16_273, %c0_274], %446 {strides = array<i32>} : memref<24x16xf32, #tpu.memory_space<vmem>>, vector<8x16xf32>,
    %c32_275 = arith.constant 32 : index
    %c0_276 = arith.constant 0 : index
    %448 = vector.load %arg12[%c32_275, %c0_276] : memref<256x16xf32, #tpu.memory_space<vmem>>, vector<32x16xf32>
    %c0_277 = arith.constant 0 : index
    %c0_278 = arith.constant 0 : index
    %449 = vector.load %arg15[%c0_277, %c0_278] : memref<24x16xf32, #tpu.memory_space<vmem>>, vector<24x16xf32>
    %cst_279 = arith.constant dense<0.000000e+00> : vector<32x16xf32>
    %450 = tpu.matmul %412, %449, %cst_279 {dimension_numbers = #tpu.dot_dimension_numbers<[1], [0], [0], [1], [0, 0, 1, 1], [], []>} : vector<32x24xf32>, vector<24x16xf32>, vector<32x16xf32> -> vector<32x16xf32>
    %451 = arith.addf %448, %450 : vector<32x16xf32>
    %452 = vector.extract_strided_slice %451 {offsets = [0, 0], sizes = [8, 16], strides = [1, 1]} : vector<32x16xf32> to vector<8x16xf32>
    %453 = vector.extract_strided_slice %451 {offsets = [8, 0], sizes = [24, 16], strides = [1, 1]} : vector<32x16xf32> to vector<24x16xf32>
    %454 = arith.negf %453 : vector<24x16xf32>
    %455 = math.exp %454 : vector<24x16xf32>
    %cst_280 = arith.constant 1.000000e+00 : f32
    %456 = vector.broadcast %cst_280 : f32 to vector<24x16xf32>
    %457 = arith.addf %456, %455 : vector<24x16xf32>
    %458 = arith.divf %456, %457 : vector<24x16xf32>
    %459 = vector.extract_strided_slice %458 {offsets = [0, 0], sizes = [8, 16], strides = [1, 1]} : vector<24x16xf32> to vector<8x16xf32>
    %460 = vector.extract_strided_slice %458 {offsets = [8, 0], sizes = [8, 16], strides = [1, 1]} : vector<24x16xf32> to vector<8x16xf32>
    %461 = vector.extract_strided_slice %458 {offsets = [16, 0], sizes = [8, 16], strides = [1, 1]} : vector<24x16xf32> to vector<8x16xf32>
    %462 = arith.mulf %438, %460 : vector<8x16xf32>
    %463 = math.tanh %452 : vector<8x16xf32>
    %464 = arith.mulf %459, %463 : vector<8x16xf32>
    %465 = arith.addf %462, %464 : vector<8x16xf32>
    %466 = math.tanh %465 : vector<8x16xf32>
    %467 = arith.mulf %466, %461 : vector<8x16xf32>
    %c8_281 = arith.constant 8 : index
    %c0_282 = arith.constant 0 : index
    %468 = vector.load %arg14[%c8_281, %c0_282] : memref<64x16xf32, #tpu.memory_space<vmem>>, vector<8x16xf32>
    tpu.vector_store %arg14[%c8_281, %c0_282], %467 {strides = array<i32>} : memref<64x16xf32, #tpu.memory_space<vmem>>, vector<8x16xf32>,
    %cst_283 = arith.constant dense<0.000000e+00> : vector<8x16xf32>
    %469 = tpu.matmul %467, %1, %cst_283 {dimension_numbers = #tpu.dot_dimension_numbers<[1], [0], [0], [1], [0, 0, 1, 1], [], []>} : vector<8x16xf32>, vector<16x16xf32>, vector<8x16xf32> -> vector<8x16xf32>
    %c0_284 = arith.constant 0 : index
    %c0_285 = arith.constant 0 : index
    %470 = vector.load %arg15[%c0_284, %c0_285] : memref<24x16xf32, #tpu.memory_space<vmem>>, vector<8x16xf32>
    tpu.vector_store %arg15[%c0_284, %c0_285], %469 {strides = array<i32>} : memref<24x16xf32, #tpu.memory_space<vmem>>, vector<8x16xf32>,
    %cst_286 = arith.constant dense<0.000000e+00> : vector<8x16xf32>
    %471 = tpu.matmul %467, %3, %cst_286 {dimension_numbers = #tpu.dot_dimension_numbers<[1], [0], [0], [1], [0, 0, 1, 1], [], []>} : vector<8x16xf32>, vector<16x16xf32>, vector<8x16xf32> -> vector<8x16xf32>
    %c8_287 = arith.constant 8 : index
    %c0_288 = arith.constant 0 : index
    %472 = vector.load %arg15[%c8_287, %c0_288] : memref<24x16xf32, #tpu.memory_space<vmem>>, vector<8x16xf32>
    tpu.vector_store %arg15[%c8_287, %c0_288], %471 {strides = array<i32>} : memref<24x16xf32, #tpu.memory_space<vmem>>, vector<8x16xf32>,
    %cst_289 = arith.constant dense<0.000000e+00> : vector<8x16xf32>
    %473 = tpu.matmul %467, %5, %cst_289 {dimension_numbers = #tpu.dot_dimension_numbers<[1], [0], [0], [1], [0, 0, 1, 1], [], []>} : vector<8x16xf32>, vector<16x16xf32>, vector<8x16xf32> -> vector<8x16xf32>
    %c16_290 = arith.constant 16 : index
    %c0_291 = arith.constant 0 : index
    %474 = vector.load %arg15[%c16_290, %c0_291] : memref<24x16xf32, #tpu.memory_space<vmem>>, vector<8x16xf32>
    tpu.vector_store %arg15[%c16_290, %c0_291], %473 {strides = array<i32>} : memref<24x16xf32, #tpu.memory_space<vmem>>, vector<8x16xf32>,
    %c64_292 = arith.constant 64 : index
    %c0_293 = arith.constant 0 : index
    %475 = vector.load %arg12[%c64_292, %c0_293] : memref<256x16xf32, #tpu.memory_space<vmem>>, vector<32x16xf32>
    %c0_294 = arith.constant 0 : index
    %c0_295 = arith.constant 0 : index
    %476 = vector.load %arg15[%c0_294, %c0_295] : memref<24x16xf32, #tpu.memory_space<vmem>>, vector<24x16xf32>
    %cst_296 = arith.constant dense<0.000000e+00> : vector<32x16xf32>
    %477 = tpu.matmul %412, %476, %cst_296 {dimension_numbers = #tpu.dot_dimension_numbers<[1], [0], [0], [1], [0, 0, 1, 1], [], []>} : vector<32x24xf32>, vector<24x16xf32>, vector<32x16xf32> -> vector<32x16xf32>
    %478 = arith.addf %475, %477 : vector<32x16xf32>
    %479 = vector.extract_strided_slice %478 {offsets = [0, 0], sizes = [8, 16], strides = [1, 1]} : vector<32x16xf32> to vector<8x16xf32>
    %480 = vector.extract_strided_slice %478 {offsets = [8, 0], sizes = [24, 16], strides = [1, 1]} : vector<32x16xf32> to vector<24x16xf32>
    %481 = arith.negf %480 : vector<24x16xf32>
    %482 = math.exp %481 : vector<24x16xf32>
    %cst_297 = arith.constant 1.000000e+00 : f32
    %483 = vector.broadcast %cst_297 : f32 to vector<24x16xf32>
    %484 = arith.addf %483, %482 : vector<24x16xf32>
    %485 = arith.divf %483, %484 : vector<24x16xf32>
    %486 = vector.extract_strided_slice %485 {offsets = [0, 0], sizes = [8, 16], strides = [1, 1]} : vector<24x16xf32> to vector<8x16xf32>
    %487 = vector.extract_strided_slice %485 {offsets = [8, 0], sizes = [8, 16], strides = [1, 1]} : vector<24x16xf32> to vector<8x16xf32>
    %488 = vector.extract_strided_slice %485 {offsets = [16, 0], sizes = [8, 16], strides = [1, 1]} : vector<24x16xf32> to vector<8x16xf32>
    %489 = arith.mulf %465, %487 : vector<8x16xf32>
    %490 = math.tanh %479 : vector<8x16xf32>
    %491 = arith.mulf %486, %490 : vector<8x16xf32>
    %492 = arith.addf %489, %491 : vector<8x16xf32>
    %493 = math.tanh %492 : vector<8x16xf32>
    %494 = arith.mulf %493, %488 : vector<8x16xf32>
    %c16_298 = arith.constant 16 : index
    %c0_299 = arith.constant 0 : index
    %495 = vector.load %arg14[%c16_298, %c0_299] : memref<64x16xf32, #tpu.memory_space<vmem>>, vector<8x16xf32>
    tpu.vector_store %arg14[%c16_298, %c0_299], %494 {strides = array<i32>} : memref<64x16xf32, #tpu.memory_space<vmem>>, vector<8x16xf32>,
    %cst_300 = arith.constant dense<0.000000e+00> : vector<8x16xf32>
    %496 = tpu.matmul %494, %1, %cst_300 {dimension_numbers = #tpu.dot_dimension_numbers<[1], [0], [0], [1], [0, 0, 1, 1], [], []>} : vector<8x16xf32>, vector<16x16xf32>, vector<8x16xf32> -> vector<8x16xf32>
    %c0_301 = arith.constant 0 : index
    %c0_302 = arith.constant 0 : index
    %497 = vector.load %arg15[%c0_301, %c0_302] : memref<24x16xf32, #tpu.memory_space<vmem>>, vector<8x16xf32>
    tpu.vector_store %arg15[%c0_301, %c0_302], %496 {strides = array<i32>} : memref<24x16xf32, #tpu.memory_space<vmem>>, vector<8x16xf32>,
    %cst_303 = arith.constant dense<0.000000e+00> : vector<8x16xf32>
    %498 = tpu.matmul %494, %3, %cst_303 {dimension_numbers = #tpu.dot_dimension_numbers<[1], [0], [0], [1], [0, 0, 1, 1], [], []>} : vector<8x16xf32>, vector<16x16xf32>, vector<8x16xf32> -> vector<8x16xf32>
    %c8_304 = arith.constant 8 : index
    %c0_305 = arith.constant 0 : index
    %499 = vector.load %arg15[%c8_304, %c0_305] : memref<24x16xf32, #tpu.memory_space<vmem>>, vector<8x16xf32>
    tpu.vector_store %arg15[%c8_304, %c0_305], %498 {strides = array<i32>} : memref<24x16xf32, #tpu.memory_space<vmem>>, vector<8x16xf32>,
    %cst_306 = arith.constant dense<0.000000e+00> : vector<8x16xf32>
    %500 = tpu.matmul %494, %5, %cst_306 {dimension_numbers = #tpu.dot_dimension_numbers<[1], [0], [0], [1], [0, 0, 1, 1], [], []>} : vector<8x16xf32>, vector<16x16xf32>, vector<8x16xf32> -> vector<8x16xf32>
    %c16_307 = arith.constant 16 : index
    %c0_308 = arith.constant 0 : index
    %501 = vector.load %arg15[%c16_307, %c0_308] : memref<24x16xf32, #tpu.memory_space<vmem>>, vector<8x16xf32>
    tpu.vector_store %arg15[%c16_307, %c0_308], %500 {strides = array<i32>} : memref<24x16xf32, #tpu.memory_space<vmem>>, vector<8x16xf32>,
    %c96_309 = arith.constant 96 : index
    %c0_310 = arith.constant 0 : index
    %502 = vector.load %arg12[%c96_309, %c0_310] : memref<256x16xf32, #tpu.memory_space<vmem>>, vector<32x16xf32>
    %c0_311 = arith.constant 0 : index
    %c0_312 = arith.constant 0 : index
    %503 = vector.load %arg15[%c0_311, %c0_312] : memref<24x16xf32, #tpu.memory_space<vmem>>, vector<24x16xf32>
    %cst_313 = arith.constant dense<0.000000e+00> : vector<32x16xf32>
    %504 = tpu.matmul %412, %503, %cst_313 {dimension_numbers = #tpu.dot_dimension_numbers<[1], [0], [0], [1], [0, 0, 1, 1], [], []>} : vector<32x24xf32>, vector<24x16xf32>, vector<32x16xf32> -> vector<32x16xf32>
    %505 = arith.addf %502, %504 : vector<32x16xf32>
    %506 = vector.extract_strided_slice %505 {offsets = [0, 0], sizes = [8, 16], strides = [1, 1]} : vector<32x16xf32> to vector<8x16xf32>
    %507 = vector.extract_strided_slice %505 {offsets = [8, 0], sizes = [24, 16], strides = [1, 1]} : vector<32x16xf32> to vector<24x16xf32>
    %508 = arith.negf %507 : vector<24x16xf32>
    %509 = math.exp %508 : vector<24x16xf32>
    %cst_314 = arith.constant 1.000000e+00 : f32
    %510 = vector.broadcast %cst_314 : f32 to vector<24x16xf32>
    %511 = arith.addf %510, %509 : vector<24x16xf32>
    %512 = arith.divf %510, %511 : vector<24x16xf32>
    %513 = vector.extract_strided_slice %512 {offsets = [0, 0], sizes = [8, 16], strides = [1, 1]} : vector<24x16xf32> to vector<8x16xf32>
    %514 = vector.extract_strided_slice %512 {offsets = [8, 0], sizes = [8, 16], strides = [1, 1]} : vector<24x16xf32> to vector<8x16xf32>
    %515 = vector.extract_strided_slice %512 {offsets = [16, 0], sizes = [8, 16], strides = [1, 1]} : vector<24x16xf32> to vector<8x16xf32>
    %516 = arith.mulf %492, %514 : vector<8x16xf32>
    %517 = math.tanh %506 : vector<8x16xf32>
    %518 = arith.mulf %513, %517 : vector<8x16xf32>
    %519 = arith.addf %516, %518 : vector<8x16xf32>
    %520 = math.tanh %519 : vector<8x16xf32>
    %521 = arith.mulf %520, %515 : vector<8x16xf32>
    %c24_315 = arith.constant 24 : index
    %c0_316 = arith.constant 0 : index
    %522 = vector.load %arg14[%c24_315, %c0_316] : memref<64x16xf32, #tpu.memory_space<vmem>>, vector<8x16xf32>
    tpu.vector_store %arg14[%c24_315, %c0_316], %521 {strides = array<i32>} : memref<64x16xf32, #tpu.memory_space<vmem>>, vector<8x16xf32>,
    %cst_317 = arith.constant dense<0.000000e+00> : vector<8x16xf32>
    %523 = tpu.matmul %521, %1, %cst_317 {dimension_numbers = #tpu.dot_dimension_numbers<[1], [0], [0], [1], [0, 0, 1, 1], [], []>} : vector<8x16xf32>, vector<16x16xf32>, vector<8x16xf32> -> vector<8x16xf32>
    %c0_318 = arith.constant 0 : index
    %c0_319 = arith.constant 0 : index
    %524 = vector.load %arg15[%c0_318, %c0_319] : memref<24x16xf32, #tpu.memory_space<vmem>>, vector<8x16xf32>
    tpu.vector_store %arg15[%c0_318, %c0_319], %523 {strides = array<i32>} : memref<24x16xf32, #tpu.memory_space<vmem>>, vector<8x16xf32>,
    %cst_320 = arith.constant dense<0.000000e+00> : vector<8x16xf32>
    %525 = tpu.matmul %521, %3, %cst_320 {dimension_numbers = #tpu.dot_dimension_numbers<[1], [0], [0], [1], [0, 0, 1, 1], [], []>} : vector<8x16xf32>, vector<16x16xf32>, vector<8x16xf32> -> vector<8x16xf32>
    %c8_321 = arith.constant 8 : index
    %c0_322 = arith.constant 0 : index
    %526 = vector.load %arg15[%c8_321, %c0_322] : memref<24x16xf32, #tpu.memory_space<vmem>>, vector<8x16xf32>
    tpu.vector_store %arg15[%c8_321, %c0_322], %525 {strides = array<i32>} : memref<24x16xf32, #tpu.memory_space<vmem>>, vector<8x16xf32>,
    %cst_323 = arith.constant dense<0.000000e+00> : vector<8x16xf32>
    %527 = tpu.matmul %521, %5, %cst_323 {dimension_numbers = #tpu.dot_dimension_numbers<[1], [0], [0], [1], [0, 0, 1, 1], [], []>} : vector<8x16xf32>, vector<16x16xf32>, vector<8x16xf32> -> vector<8x16xf32>
    %c16_324 = arith.constant 16 : index
    %c0_325 = arith.constant 0 : index
    %528 = vector.load %arg15[%c16_324, %c0_325] : memref<24x16xf32, #tpu.memory_space<vmem>>, vector<8x16xf32>
    tpu.vector_store %arg15[%c16_324, %c0_325], %527 {strides = array<i32>} : memref<24x16xf32, #tpu.memory_space<vmem>>, vector<8x16xf32>,
    %c128_326 = arith.constant 128 : index
    %c0_327 = arith.constant 0 : index
    %529 = vector.load %arg12[%c128_326, %c0_327] : memref<256x16xf32, #tpu.memory_space<vmem>>, vector<32x16xf32>
    %c0_328 = arith.constant 0 : index
    %c0_329 = arith.constant 0 : index
    %530 = vector.load %arg15[%c0_328, %c0_329] : memref<24x16xf32, #tpu.memory_space<vmem>>, vector<24x16xf32>
    %cst_330 = arith.constant dense<0.000000e+00> : vector<32x16xf32>
    %531 = tpu.matmul %412, %530, %cst_330 {dimension_numbers = #tpu.dot_dimension_numbers<[1], [0], [0], [1], [0, 0, 1, 1], [], []>} : vector<32x24xf32>, vector<24x16xf32>, vector<32x16xf32> -> vector<32x16xf32>
    %532 = arith.addf %529, %531 : vector<32x16xf32>
    %533 = vector.extract_strided_slice %532 {offsets = [0, 0], sizes = [8, 16], strides = [1, 1]} : vector<32x16xf32> to vector<8x16xf32>
    %534 = vector.extract_strided_slice %532 {offsets = [8, 0], sizes = [24, 16], strides = [1, 1]} : vector<32x16xf32> to vector<24x16xf32>
    %535 = arith.negf %534 : vector<24x16xf32>
    %536 = math.exp %535 : vector<24x16xf32>
    %cst_331 = arith.constant 1.000000e+00 : f32
    %537 = vector.broadcast %cst_331 : f32 to vector<24x16xf32>
    %538 = arith.addf %537, %536 : vector<24x16xf32>
    %539 = arith.divf %537, %538 : vector<24x16xf32>
    %540 = vector.extract_strided_slice %539 {offsets = [0, 0], sizes = [8, 16], strides = [1, 1]} : vector<24x16xf32> to vector<8x16xf32>
    %541 = vector.extract_strided_slice %539 {offsets = [8, 0], sizes = [8, 16], strides = [1, 1]} : vector<24x16xf32> to vector<8x16xf32>
    %542 = vector.extract_strided_slice %539 {offsets = [16, 0], sizes = [8, 16], strides = [1, 1]} : vector<24x16xf32> to vector<8x16xf32>
    %543 = arith.mulf %519, %541 : vector<8x16xf32>
    %544 = math.tanh %533 : vector<8x16xf32>
    %545 = arith.mulf %540, %544 : vector<8x16xf32>
    %546 = arith.addf %543, %545 : vector<8x16xf32>
    %547 = math.tanh %546 : vector<8x16xf32>
    %548 = arith.mulf %547, %542 : vector<8x16xf32>
    %c32_332 = arith.constant 32 : index
    %c0_333 = arith.constant 0 : index
    %549 = vector.load %arg14[%c32_332, %c0_333] : memref<64x16xf32, #tpu.memory_space<vmem>>, vector<8x16xf32>
    tpu.vector_store %arg14[%c32_332, %c0_333], %548 {strides = array<i32>} : memref<64x16xf32, #tpu.memory_space<vmem>>, vector<8x16xf32>,
    %cst_334 = arith.constant dense<0.000000e+00> : vector<8x16xf32>
    %550 = tpu.matmul %548, %1, %cst_334 {dimension_numbers = #tpu.dot_dimension_numbers<[1], [0], [0], [1], [0, 0, 1, 1], [], []>} : vector<8x16xf32>, vector<16x16xf32>, vector<8x16xf32> -> vector<8x16xf32>
    %c0_335 = arith.constant 0 : index
    %c0_336 = arith.constant 0 : index
    %551 = vector.load %arg15[%c0_335, %c0_336] : memref<24x16xf32, #tpu.memory_space<vmem>>, vector<8x16xf32>
    tpu.vector_store %arg15[%c0_335, %c0_336], %550 {strides = array<i32>} : memref<24x16xf32, #tpu.memory_space<vmem>>, vector<8x16xf32>,
    %cst_337 = arith.constant dense<0.000000e+00> : vector<8x16xf32>
    %552 = tpu.matmul %548, %3, %cst_337 {dimension_numbers = #tpu.dot_dimension_numbers<[1], [0], [0], [1], [0, 0, 1, 1], [], []>} : vector<8x16xf32>, vector<16x16xf32>, vector<8x16xf32> -> vector<8x16xf32>
    %c8_338 = arith.constant 8 : index
    %c0_339 = arith.constant 0 : index
    %553 = vector.load %arg15[%c8_338, %c0_339] : memref<24x16xf32, #tpu.memory_space<vmem>>, vector<8x16xf32>
    tpu.vector_store %arg15[%c8_338, %c0_339], %552 {strides = array<i32>} : memref<24x16xf32, #tpu.memory_space<vmem>>, vector<8x16xf32>,
    %cst_340 = arith.constant dense<0.000000e+00> : vector<8x16xf32>
    %554 = tpu.matmul %548, %5, %cst_340 {dimension_numbers = #tpu.dot_dimension_numbers<[1], [0], [0], [1], [0, 0, 1, 1], [], []>} : vector<8x16xf32>, vector<16x16xf32>, vector<8x16xf32> -> vector<8x16xf32>
    %c16_341 = arith.constant 16 : index
    %c0_342 = arith.constant 0 : index
    %555 = vector.load %arg15[%c16_341, %c0_342] : memref<24x16xf32, #tpu.memory_space<vmem>>, vector<8x16xf32>
    tpu.vector_store %arg15[%c16_341, %c0_342], %554 {strides = array<i32>} : memref<24x16xf32, #tpu.memory_space<vmem>>, vector<8x16xf32>,
    %c160_343 = arith.constant 160 : index
    %c0_344 = arith.constant 0 : index
    %556 = vector.load %arg12[%c160_343, %c0_344] : memref<256x16xf32, #tpu.memory_space<vmem>>, vector<32x16xf32>
    %c0_345 = arith.constant 0 : index
    %c0_346 = arith.constant 0 : index
    %557 = vector.load %arg15[%c0_345, %c0_346] : memref<24x16xf32, #tpu.memory_space<vmem>>, vector<24x16xf32>
    %cst_347 = arith.constant dense<0.000000e+00> : vector<32x16xf32>
    %558 = tpu.matmul %412, %557, %cst_347 {dimension_numbers = #tpu.dot_dimension_numbers<[1], [0], [0], [1], [0, 0, 1, 1], [], []>} : vector<32x24xf32>, vector<24x16xf32>, vector<32x16xf32> -> vector<32x16xf32>
    %559 = arith.addf %556, %558 : vector<32x16xf32>
    %560 = vector.extract_strided_slice %559 {offsets = [0, 0], sizes = [8, 16], strides = [1, 1]} : vector<32x16xf32> to vector<8x16xf32>
    %561 = vector.extract_strided_slice %559 {offsets = [8, 0], sizes = [24, 16], strides = [1, 1]} : vector<32x16xf32> to vector<24x16xf32>
    %562 = arith.negf %561 : vector<24x16xf32>
    %563 = math.exp %562 : vector<24x16xf32>
    %cst_348 = arith.constant 1.000000e+00 : f32
    %564 = vector.broadcast %cst_348 : f32 to vector<24x16xf32>
    %565 = arith.addf %564, %563 : vector<24x16xf32>
    %566 = arith.divf %564, %565 : vector<24x16xf32>
    %567 = vector.extract_strided_slice %566 {offsets = [0, 0], sizes = [8, 16], strides = [1, 1]} : vector<24x16xf32> to vector<8x16xf32>
    %568 = vector.extract_strided_slice %566 {offsets = [8, 0], sizes = [8, 16], strides = [1, 1]} : vector<24x16xf32> to vector<8x16xf32>
    %569 = vector.extract_strided_slice %566 {offsets = [16, 0], sizes = [8, 16], strides = [1, 1]} : vector<24x16xf32> to vector<8x16xf32>
    %570 = arith.mulf %546, %568 : vector<8x16xf32>
    %571 = math.tanh %560 : vector<8x16xf32>
    %572 = arith.mulf %567, %571 : vector<8x16xf32>
    %573 = arith.addf %570, %572 : vector<8x16xf32>
    %574 = math.tanh %573 : vector<8x16xf32>
    %575 = arith.mulf %574, %569 : vector<8x16xf32>
    %c40_349 = arith.constant 40 : index
    %c0_350 = arith.constant 0 : index
    %576 = vector.load %arg14[%c40_349, %c0_350] : memref<64x16xf32, #tpu.memory_space<vmem>>, vector<8x16xf32>
    tpu.vector_store %arg14[%c40_349, %c0_350], %575 {strides = array<i32>} : memref<64x16xf32, #tpu.memory_space<vmem>>, vector<8x16xf32>,
    %cst_351 = arith.constant dense<0.000000e+00> : vector<8x16xf32>
    %577 = tpu.matmul %575, %1, %cst_351 {dimension_numbers = #tpu.dot_dimension_numbers<[1], [0], [0], [1], [0, 0, 1, 1], [], []>} : vector<8x16xf32>, vector<16x16xf32>, vector<8x16xf32> -> vector<8x16xf32>
    %c0_352 = arith.constant 0 : index
    %c0_353 = arith.constant 0 : index
    %578 = vector.load %arg15[%c0_352, %c0_353] : memref<24x16xf32, #tpu.memory_space<vmem>>, vector<8x16xf32>
    tpu.vector_store %arg15[%c0_352, %c0_353], %577 {strides = array<i32>} : memref<24x16xf32, #tpu.memory_space<vmem>>, vector<8x16xf32>,
    %cst_354 = arith.constant dense<0.000000e+00> : vector<8x16xf32>
    %579 = tpu.matmul %575, %3, %cst_354 {dimension_numbers = #tpu.dot_dimension_numbers<[1], [0], [0], [1], [0, 0, 1, 1], [], []>} : vector<8x16xf32>, vector<16x16xf32>, vector<8x16xf32> -> vector<8x16xf32>
    %c8_355 = arith.constant 8 : index
    %c0_356 = arith.constant 0 : index
    %580 = vector.load %arg15[%c8_355, %c0_356] : memref<24x16xf32, #tpu.memory_space<vmem>>, vector<8x16xf32>
    tpu.vector_store %arg15[%c8_355, %c0_356], %579 {strides = array<i32>} : memref<24x16xf32, #tpu.memory_space<vmem>>, vector<8x16xf32>,
    %cst_357 = arith.constant dense<0.000000e+00> : vector<8x16xf32>
    %581 = tpu.matmul %575, %5, %cst_357 {dimension_numbers = #tpu.dot_dimension_numbers<[1], [0], [0], [1], [0, 0, 1, 1], [], []>} : vector<8x16xf32>, vector<16x16xf32>, vector<8x16xf32> -> vector<8x16xf32>
    %c16_358 = arith.constant 16 : index
    %c0_359 = arith.constant 0 : index
    %582 = vector.load %arg15[%c16_358, %c0_359] : memref<24x16xf32, #tpu.memory_space<vmem>>, vector<8x16xf32>
    tpu.vector_store %arg15[%c16_358, %c0_359], %581 {strides = array<i32>} : memref<24x16xf32, #tpu.memory_space<vmem>>, vector<8x16xf32>,
    %c192_360 = arith.constant 192 : index
    %c0_361 = arith.constant 0 : index
    %583 = vector.load %arg12[%c192_360, %c0_361] : memref<256x16xf32, #tpu.memory_space<vmem>>, vector<32x16xf32>
    %c0_362 = arith.constant 0 : index
    %c0_363 = arith.constant 0 : index
    %584 = vector.load %arg15[%c0_362, %c0_363] : memref<24x16xf32, #tpu.memory_space<vmem>>, vector<24x16xf32>
    %cst_364 = arith.constant dense<0.000000e+00> : vector<32x16xf32>
    %585 = tpu.matmul %412, %584, %cst_364 {dimension_numbers = #tpu.dot_dimension_numbers<[1], [0], [0], [1], [0, 0, 1, 1], [], []>} : vector<32x24xf32>, vector<24x16xf32>, vector<32x16xf32> -> vector<32x16xf32>
    %586 = arith.addf %583, %585 : vector<32x16xf32>
    %587 = vector.extract_strided_slice %586 {offsets = [0, 0], sizes = [8, 16], strides = [1, 1]} : vector<32x16xf32> to vector<8x16xf32>
    %588 = vector.extract_strided_slice %586 {offsets = [8, 0], sizes = [24, 16], strides = [1, 1]} : vector<32x16xf32> to vector<24x16xf32>
    %589 = arith.negf %588 : vector<24x16xf32>
    %590 = math.exp %589 : vector<24x16xf32>
    %cst_365 = arith.constant 1.000000e+00 : f32
    %591 = vector.broadcast %cst_365 : f32 to vector<24x16xf32>
    %592 = arith.addf %591, %590 : vector<24x16xf32>
    %593 = arith.divf %591, %592 : vector<24x16xf32>
    %594 = vector.extract_strided_slice %593 {offsets = [0, 0], sizes = [8, 16], strides = [1, 1]} : vector<24x16xf32> to vector<8x16xf32>
    %595 = vector.extract_strided_slice %593 {offsets = [8, 0], sizes = [8, 16], strides = [1, 1]} : vector<24x16xf32> to vector<8x16xf32>
    %596 = vector.extract_strided_slice %593 {offsets = [16, 0], sizes = [8, 16], strides = [1, 1]} : vector<24x16xf32> to vector<8x16xf32>
    %597 = arith.mulf %573, %595 : vector<8x16xf32>
    %598 = math.tanh %587 : vector<8x16xf32>
    %599 = arith.mulf %594, %598 : vector<8x16xf32>
    %600 = arith.addf %597, %599 : vector<8x16xf32>
    %601 = math.tanh %600 : vector<8x16xf32>
    %602 = arith.mulf %601, %596 : vector<8x16xf32>
    %c48_366 = arith.constant 48 : index
    %c0_367 = arith.constant 0 : index
    %603 = vector.load %arg14[%c48_366, %c0_367] : memref<64x16xf32, #tpu.memory_space<vmem>>, vector<8x16xf32>
    tpu.vector_store %arg14[%c48_366, %c0_367], %602 {strides = array<i32>} : memref<64x16xf32, #tpu.memory_space<vmem>>, vector<8x16xf32>,
    %cst_368 = arith.constant dense<0.000000e+00> : vector<8x16xf32>
    %604 = tpu.matmul %602, %1, %cst_368 {dimension_numbers = #tpu.dot_dimension_numbers<[1], [0], [0], [1], [0, 0, 1, 1], [], []>} : vector<8x16xf32>, vector<16x16xf32>, vector<8x16xf32> -> vector<8x16xf32>
    %c0_369 = arith.constant 0 : index
    %c0_370 = arith.constant 0 : index
    %605 = vector.load %arg15[%c0_369, %c0_370] : memref<24x16xf32, #tpu.memory_space<vmem>>, vector<8x16xf32>
    tpu.vector_store %arg15[%c0_369, %c0_370], %604 {strides = array<i32>} : memref<24x16xf32, #tpu.memory_space<vmem>>, vector<8x16xf32>,
    %cst_371 = arith.constant dense<0.000000e+00> : vector<8x16xf32>
    %606 = tpu.matmul %602, %3, %cst_371 {dimension_numbers = #tpu.dot_dimension_numbers<[1], [0], [0], [1], [0, 0, 1, 1], [], []>} : vector<8x16xf32>, vector<16x16xf32>, vector<8x16xf32> -> vector<8x16xf32>
    %c8_372 = arith.constant 8 : index
    %c0_373 = arith.constant 0 : index
    %607 = vector.load %arg15[%c8_372, %c0_373] : memref<24x16xf32, #tpu.memory_space<vmem>>, vector<8x16xf32>
    tpu.vector_store %arg15[%c8_372, %c0_373], %606 {strides = array<i32>} : memref<24x16xf32, #tpu.memory_space<vmem>>, vector<8x16xf32>,
    %cst_374 = arith.constant dense<0.000000e+00> : vector<8x16xf32>
    %608 = tpu.matmul %602, %5, %cst_374 {dimension_numbers = #tpu.dot_dimension_numbers<[1], [0], [0], [1], [0, 0, 1, 1], [], []>} : vector<8x16xf32>, vector<16x16xf32>, vector<8x16xf32> -> vector<8x16xf32>
    %c16_375 = arith.constant 16 : index
    %c0_376 = arith.constant 0 : index
    %609 = vector.load %arg15[%c16_375, %c0_376] : memref<24x16xf32, #tpu.memory_space<vmem>>, vector<8x16xf32>
    tpu.vector_store %arg15[%c16_375, %c0_376], %608 {strides = array<i32>} : memref<24x16xf32, #tpu.memory_space<vmem>>, vector<8x16xf32>,
    %c224_377 = arith.constant 224 : index
    %c0_378 = arith.constant 0 : index
    %610 = vector.load %arg12[%c224_377, %c0_378] : memref<256x16xf32, #tpu.memory_space<vmem>>, vector<32x16xf32>
    %c0_379 = arith.constant 0 : index
    %c0_380 = arith.constant 0 : index
    %611 = vector.load %arg15[%c0_379, %c0_380] : memref<24x16xf32, #tpu.memory_space<vmem>>, vector<24x16xf32>
    %cst_381 = arith.constant dense<0.000000e+00> : vector<32x16xf32>
    %612 = tpu.matmul %412, %611, %cst_381 {dimension_numbers = #tpu.dot_dimension_numbers<[1], [0], [0], [1], [0, 0, 1, 1], [], []>} : vector<32x24xf32>, vector<24x16xf32>, vector<32x16xf32> -> vector<32x16xf32>
    %613 = arith.addf %610, %612 : vector<32x16xf32>
    %614 = vector.extract_strided_slice %613 {offsets = [0, 0], sizes = [8, 16], strides = [1, 1]} : vector<32x16xf32> to vector<8x16xf32>
    %615 = vector.extract_strided_slice %613 {offsets = [8, 0], sizes = [24, 16], strides = [1, 1]} : vector<32x16xf32> to vector<24x16xf32>
    %616 = arith.negf %615 : vector<24x16xf32>
    %617 = math.exp %616 : vector<24x16xf32>
    %cst_382 = arith.constant 1.000000e+00 : f32
    %618 = vector.broadcast %cst_382 : f32 to vector<24x16xf32>
    %619 = arith.addf %618, %617 : vector<24x16xf32>
    %620 = arith.divf %618, %619 : vector<24x16xf32>
    %621 = vector.extract_strided_slice %620 {offsets = [0, 0], sizes = [8, 16], strides = [1, 1]} : vector<24x16xf32> to vector<8x16xf32>
    %622 = vector.extract_strided_slice %620 {offsets = [8, 0], sizes = [8, 16], strides = [1, 1]} : vector<24x16xf32> to vector<8x16xf32>
    %623 = vector.extract_strided_slice %620 {offsets = [16, 0], sizes = [8, 16], strides = [1, 1]} : vector<24x16xf32> to vector<8x16xf32>
    %624 = arith.mulf %600, %622 : vector<8x16xf32>
    %625 = math.tanh %614 : vector<8x16xf32>
    %626 = arith.mulf %621, %625 : vector<8x16xf32>
    %627 = arith.addf %624, %626 : vector<8x16xf32>
    %628 = math.tanh %627 : vector<8x16xf32>
    %629 = arith.mulf %628, %623 : vector<8x16xf32>
    %c56_383 = arith.constant 56 : index
    %c0_384 = arith.constant 0 : index
    %630 = vector.load %arg14[%c56_383, %c0_384] : memref<64x16xf32, #tpu.memory_space<vmem>>, vector<8x16xf32>
    tpu.vector_store %arg14[%c56_383, %c0_384], %629 {strides = array<i32>} : memref<64x16xf32, #tpu.memory_space<vmem>>, vector<8x16xf32>,
    %c0_385 = arith.constant 0 : index
    %c0_386 = arith.constant 0 : index
    %631 = vector.load %arg9[%c0_385, %c0_386] : memref<4x64xf32, #tpu.memory_space<vmem>>, vector<4x64xf32>
    %c0_387 = arith.constant 0 : index
    %c0_388 = arith.constant 0 : index
    %632 = vector.load %arg14[%c0_387, %c0_388] : memref<64x16xf32, #tpu.memory_space<vmem>>, vector<64x16xf32>
    %cst_389 = arith.constant dense<0.000000e+00> : vector<4x16xf32>
    %633 = tpu.matmul %631, %632, %cst_389 {dimension_numbers = #tpu.dot_dimension_numbers<[1], [0], [0], [1], [0, 0, 1, 1], [], []>} : vector<4x64xf32>, vector<64x16xf32>, vector<4x16xf32> -> vector<4x16xf32>
    %c0_390 = arith.constant 0 : index
    %c0_391 = arith.constant 0 : index
    %634 = vector.load %arg10[%c0_390, %c0_391] : memref<1x1xf32, #tpu.memory_space<vmem>>, vector<1x1xf32>
    %635 = vector.broadcast %634 : vector<1x1xf32> to vector<4x16xf32>
    %636 = arith.addf %633, %635 : vector<4x16xf32>
    %c0_392 = arith.constant 0 : index
    %c0_393 = arith.constant 0 : index
    %c0_394 = arith.constant 0 : index
    %637 = vector.load %arg11[%c0_392, %c0_393, %c0_394] : memref<1x4x16xf32, #tpu.memory_space<vmem>>, vector<1x4x16xf32>
    %638 = vector.shape_cast %637 : vector<1x4x16xf32> to vector<4x16xf32>
    %639 = vector.shape_cast %636 : vector<4x16xf32> to vector<1x4x16xf32>
    tpu.vector_store %arg11[%c0_392, %c0_393, %c0_394], %639 {strides = array<i32>} : memref<1x4x16xf32, #tpu.memory_space<vmem>>, vector<1x4x16xf32>,
    return
  }
  func.func @transform_0(%arg0: i32) -> (i32, i32, i32) {
    %c0_i32 = arith.constant 0 : i32
    %c0_i32_0 = arith.constant 0 : i32
    %c0_i32_1 = arith.constant 0 : i32
    return %arg0, %c0_i32, %c0_i32_0 : i32, i32, i32
  }
  func.func @transform_1(%arg0: i32) -> (i32, i32, i32) {
    %c0_i32 = arith.constant 0 : i32
    %c0_i32_0 = arith.constant 0 : i32
    %c0_i32_1 = arith.constant 0 : i32
    %c0_i32_2 = arith.constant 0 : i32
    return %c0_i32, %c0_i32_0, %c0_i32_1 : i32, i32, i32
  }
  func.func @transform_2(%arg0: i32) -> (i32, i32, i32) {
    %c0_i32 = arith.constant 0 : i32
    %c0_i32_0 = arith.constant 0 : i32
    %c0_i32_1 = arith.constant 0 : i32
    %c0_i32_2 = arith.constant 0 : i32
    return %c0_i32, %c0_i32_0, %c0_i32_1 : i32, i32, i32
  }
  func.func @transform_3(%arg0: i32) -> (i32, i32) {
    %c0_i32 = arith.constant 0 : i32
    %c0_i32_0 = arith.constant 0 : i32
    %c0_i32_1 = arith.constant 0 : i32
    return %c0_i32, %c0_i32_0 : i32, i32
  }
  func.func @transform_4(%arg0: i32) -> (i32, i32) {
    %c0_i32 = arith.constant 0 : i32
    %c0_i32_0 = arith.constant 0 : i32
    %c0_i32_1 = arith.constant 0 : i32
    return %c0_i32, %c0_i32_0 : i32, i32
  }
  func.func @transform_5(%arg0: i32) -> (i32, i32, i32) {
    %c0_i32 = arith.constant 0 : i32
    %c0_i32_0 = arith.constant 0 : i32
    %c0_i32_1 = arith.constant 0 : i32
    %c0_i32_2 = arith.constant 0 : i32
    return %c0_i32, %c0_i32_0, %c0_i32_1 : i32, i32, i32
  }
  func.func @transform_6(%arg0: i32) -> (i32, i32) {
    %c0_i32 = arith.constant 0 : i32
    %c0_i32_0 = arith.constant 0 : i32
    %c0_i32_1 = arith.constant 0 : i32
    return %c0_i32, %c0_i32_0 : i32, i32
  }
  func.func @transform_7(%arg0: i32) -> (i32, i32) {
    %c0_i32 = arith.constant 0 : i32
    %c0_i32_0 = arith.constant 0 : i32
    %c0_i32_1 = arith.constant 0 : i32
    return %c0_i32, %c0_i32_0 : i32, i32
  }
  func.func @transform_8(%arg0: i32) -> (i32, i32) {
    %c0_i32 = arith.constant 0 : i32
    %c0_i32_0 = arith.constant 0 : i32
    %c0_i32_1 = arith.constant 0 : i32
    return %c0_i32, %c0_i32_0 : i32, i32
  }
  func.func @transform_9(%arg0: i32) -> (i32, i32) {
    %c0_i32 = arith.constant 0 : i32
    %c0_i32_0 = arith.constant 0 : i32
    %c0_i32_1 = arith.constant 0 : i32
    return %c0_i32, %c0_i32_0 : i32, i32
  }
  func.func @transform_10(%arg0: i32) -> (i32, i32, i32) {
    %c0_i32 = arith.constant 0 : i32
    %c0_i32_0 = arith.constant 0 : i32
    %c0_i32_1 = arith.constant 0 : i32
    return %arg0, %c0_i32, %c0_i32_0 : i32, i32, i32
  }
}

</mosaic_0001>

<bundles_post_ra>
// kernel: dgcn_recent_forward.1
= control target key start
LH: loop header
LB: loop body
LE: loop exit
PB: predicated region body
PF: predicated region fallthrough
CT: control target
= control target key end

     0   :  { %s7744_s0 = inlined_call_operand.vmem [shape: f32[2,32,16], index: 0, kind: input, shape index: {}]   ;;  %s7745_s1 = inlined_call_operand.vmem [shape: f32[3,16,16], index: 1, kind: input, shape index: {}]   ;;  %s7746_s2 = inlined_call_operand.vmem [shape: f32[3,32,4], index: 2, kind: input, shape index: {}]   ;;  %s7747_s3 = inlined_call_operand.vmem [shape: f32[32,24], index: 3, kind: input, shape index: {}]   ;;  %s7748_s4 = inlined_call_operand.vmem [shape: f32[32,1], index: 4, kind: input, shape index: {}]   ;;  %s7749_s5 = inlined_call_operand.vmem [shape: f32[3,32,8], index: 5, kind: input, shape index: {}]   ;;  %s7750_s6 = inlined_call_operand.vmem [shape: f32[32,24], index: 6, kind: input, shape index: {}]   ;;  %s7751_s7 = inlined_call_operand.vmem [shape: f32[32,1], index: 7, kind: input, shape index: {}]   ;;  %s7752_s8 = inlined_call_operand.vmem [shape: f32[4,64], index: 8, kind: input, shape index: {}]   ;;  %s7753_s9 = inlined_call_operand.<no memory space> [shape: f32[1,1], index: 9, kind: input, shape index: {}]   ;;  %s7754_s10 = inlined_call_operand.hbm [shape: f32[2,4,16], index: 10, kind: output, shape index: {}]  }
   0x1   :  { %v15_v0 = vstv %s7753_s9 }
   0x2   :  { %16 = vst [vmem:[#allocation6] sm:$0x1] %v15_v0 }
   0x3   :  { %17 = vsyncpa [#allocation8], 0 }
   0x4   :  { %19 = vsyncpa [#allocation8 + $0x1], 0  ;;  %s6197_s15 = smov 0   ;;  %s6199_s16 = smov 0  }
   0x5   :  { %s6201_s17 = smov 0   ;;  %s6203_s18 = smov 0  }
   0x6 LB: > { %s6218_s9 = sadd.s32 4294967295, %s6135_s18   ;;  %s5305_s19 = sadd.s32 4294967294, %s6135_s18   ;;  %s6135_s18 = sphi %s6203_s18, %s7760_s18   ;;  %s6131_s17 = sphi %s6201_s17, %s7759_s17   ;;  %s6127_s16 = sphi %s6199_s16, %s7758_s16   ;;  %s6123_s15 = sphi %s6197_s15, %s7757_s15  }
   0x7   : > { %s6222_s20 = sadd.s32 1, %s6135_s18   ;;  %s247_s21 = sadd.s32 1, %s6131_s17 }
   0x8   : > { %s244_s22 = ssub.s32 %s6135_s18, %s6222_s20  ;;  %p257_p0 = scmp.ne.s32.totalorder %s6131_s17, %s6127_s16 }
   0x9   : > { %p245_p1 = scmp.eq.s32.totalorder %s244_s22, 0  ;;  %p258_p2 = scmp.eq.s32.totalorder %s6218_s9, 1 }
   0xa   : > { %p263_p3 = scmp.ne.s32.totalorder %s6127_s16, %s6123_s15  ;;  %p264_p4 = scmp.eq.s32.totalorder %s5305_s19, 1 }
   0xb   : > { %s6233_s23 = scalar_select %p245_p1, %s6131_s17, %s247_s21  }
   0xc   : > { %p6235_p5 = por %p258_p2, %p257_p0  ;;  %p6239_p6 = por %p264_p4, %p263_p3 }
   0xd   : > { %p5308_p7 = scmp.ge.s32.totalorder %s6135_s18, 1  ;;  %p317_p8 = scmp.lt.s32.totalorder %s6135_s18, 3 }
   0xf   : > { %p318_p9 = pnand %p5308_p7, %p317_p8 }
  0x10   : > { %p355_p10 = scmp.lt.s32.totalorder (!%p318_p9), %s6218_s9, 1  ;;  %s352_s13 = sand.u32 (!%p318_p9), 1, %s6127_s16  }
  0x11   : > { %321 = sbr.rel (%p318_p9) target bundleno = 5894 (0x1706), region = 60  ;;  %s5309_s14 = sshll.u32 (!%p318_p9), %s352_s13, 2 }
  0x12   : > { %s5740_s19 = sshll.u32 (!%p318_p9), %s6218_s9, 2 }
  0x16   : > { %v6248_v1 = vld [vmem:[%s7745_s1 + $0x8] sm:$0xff]  ;;  %v6253_v2 = vld [vmem:[%s7745_s1 + $0x18] sm:$0xff]  ;;  %v6258_v3 = vld [vmem:[%s7745_s1] sm:$0xff]  ;;  %s356_s26 = scalar_select %p355_p10, %s6218_s9, 1  ;;  %vm396_vm0 = vcmask 130048   ;;  %v6137_v11 = vmov 0  }
  0x17   : > { %423 = vmatpush.msra.mxu0 %v6248_v1  ;;  %452 = vmatpush.msra.mxu1 %v6253_v2  ;;  %v6266_v4 = vld [vmem:[%s7745_s1 + $0x10] sm:$0xff]  ;;  %v6271_v5 = vld [vmem:[%s7745_s1 + $0x28] sm:$0xff]  ;;  %v6276_v6 = vld [vmem:[%s7745_s1 + $0x20] sm:$0xff]  ;;  %vm523_vm1 = vcmask 1043456   ;;  %vm510_vm2 = vcmask 31744   ;;  %vm1521_vm3 = vcmask 195584  }
  0x18   : > { %5744 = vmatpush.msra.mxu2 %v6271_v5  ;;  %s5743_s27 = sshll.u32 %s356_s26, 5  ;;  %5788 = vset.pattern.permute.xlu1 %v6137_v11  ;;  %v375_v12 = vld [vmem:[%s7748_s4 + $0x18] sm:$0xff]  ;;  %v372_v13 = vld [vmem:[%s7748_s4] sm:$0xff]  ;;  %v373_v14 = vld [vmem:[%s7748_s4 + $0x8] sm:$0xff]  ;;  %s5241_s26 = scalar_lea.hbm %s7754_s10, %s5740_s19 }
  0x19   : > { %424 = vmatpush.msra.mxu0 %v6258_v3  ;;  %453 = vmatpush.msra.mxu1 %v6266_v4  ;;  %s359_s30 = scalar_lea.vmem %s7744_s0, %s5743_s27  ;;  %v6312_v15 = vld [vmem:[%s7746_s2] sm:$0xff]  ;;  %v374_v21 = vld [vmem:[%s7748_s4 + $0x10] sm:$0xff]  ;;  %v6335_v22 = vld [vmem:[%s7746_s2 + $0x8] sm:$0xff]  ;;  %s354_s27 = scalar_lea.vmem [#allocation7], %s5309_s14 }
  0x1a   : > { %5745 = vmatpush.msra.mxu2 %v6276_v6  ;;  %v368_v7 = vld [vmem:[%s359_s30] sm:$0xff]  ;;  %v369_v8 = vld [vmem:[%s359_s30 + $0x8] sm:$0xff]  ;;  %v370_v9 = vld [vmem:[%s359_s30 + $0x10] sm:$0xff]  ;;  %5787 = vset.pattern.permute.xlu0 %v6137_v11  ;;  %s5243_s28 = sshll.u32 %s354_s27, 4  ;;  %s5245_s29 = sshll.u32 %s5241_s26, 4  ;;  %s5244_s28 = int_to_ptr.vmem [resolvable:$true] %s5243_s28  ;;  %s5246_s29 = int_to_ptr.hbm [resolvable:$true] %s5245_s29 }
  0x1b   : > { %481 = vmatpush.msrb.mxu1 %v6271_v5  ;;  %5316 = vmatmul.msk.f32.vlgmr.msra.gmra.mxu0 %vm396_vm0, %v368_v7  ;;  %v371_v10 = vld [vmem:[%s359_s30 + $0x18] sm:$0xff]  ;;  %v6318_v20 = vld [vmem:[%s7746_s2 + $0x20] sm:$0xff]  ;;  %v6341_v26 = vld [vmem:[%s7746_s2 + $0x28] sm:$0xff]  ;;  %s5231_s30 = scalar_lea.sflag [#allocation8], %s352_s13  ;;  %s6087_s11 = sshra.s32 %s5246_s29, 4  ;;  %s6088_s11 = int_to_ptr.hbm [resolvable:$true] %s6087_s11 }
  0x1c   : > { %5320 = vmatmul.msk.f32.vlgmr.msra.gmra.mxu1 %vm396_vm0, %v368_v7  ;;  %5325 = vmatmul.msk.f32.vlgmr.msra.gmra.mxu2 %vm396_vm0, %v369_v8  ;;  %v6354_v28 = vld [vmem:[%s7746_s2 + $0x10] sm:$0xff]  ;;  %v6371_v32 = vld [vmem:[%s7746_s2 + $0x18] sm:$0xff]  ;;  %v6389_v35 = vld [vmem:[%s7746_s2 + $0x40] sm:$0xff]  ;;  %s6089_s12 = scalar_lea.hbm %s6088_s11, 4  ;;  %s6093_s14 = scalar_lea.hbm %s7754_s10, 8 }
  0x1d   : > { %482 = vmatpush.msrb.mxu1 %v6276_v6  ;;  %393 = vperm.xlu1 %5788, %v375_v12   ;;  %v6359_v30 = vld [vmem:[%s7746_s2 + $0x30] sm:$0xff]  ;;  %v6378_v34 = vld [vmem:[%s7746_s2 + $0x38] sm:$0xff]  ;;  %v6409_v42 = vld [vmem:[%s7746_s2 + $0x48] sm:$0xff]  ;;  %p6090_p11 = scmp.ne.s32.totalorder %s6088_s11, %s6089_s12  ;;  %p6094_p0 = scmp.lt.s32.totalorder %s6088_s11, %s7754_s10 }
  0x1e   : > { %5789 = vset.pattern.permute.xlu2 %v6137_v11  ;;  %383 = vperm.xlu0 %5787, %v373_v14   ;;  %v6422_v43 = vld [vmem:[%s7746_s2 + $0x50] sm:$0xff]  ;;  %v6435_v44 = vld [vmem:[%s7746_s2 + $0x58] sm:$0xff]  ;;  %v6138_v11 = vmov 0.0   ;;  %p6095_p1 = scmp.lt.s32.totalorder %s6093_s14, %s6089_s12 }
  0x1f   : > { %p6091_p12 = pnand %p6090_p11, %p6235_p5 }
  0x20   : > { %p6096_p2 = por %p6095_p1, %p6094_p0 }
  0x21   : > { %p6092_p13 = pneg %p6091_p12 }
  0x23   : > { %5317 = vmatmul.msk.f32.gmra.mxu0 %vm396_vm0, %v369_v8  ;;  %p6097_p3 = pnand %p6096_p2, %p6092_p13 }
  0x24   : > { %5321 = vmatmul.msk.f32.gmra.mxu1 %vm396_vm0, %v369_v8  ;;  %5326 = vmatmul.msk.f32.gmra.mxu2 %vm396_vm0, %v370_v9 }
  0x25   : > { %378 = vperm.xlu1 %5788, %v372_v13  }
  0x26   : > { %388 = vperm.xlu0 %5787, %v374_v21  }
  0x2b   : > { %5318 = vmatmul.msk.f32.gmra.mxu0 %vm396_vm0, %v370_v9 }
  0x2c   : > { %5322 = vmatmul.msk.f32.gmra.mxu1 %vm396_vm0, %v370_v9  ;;  %5327 = vmatmul.msk.f32.gmra.mxu2 %vm396_vm0, %v371_v10 }
  0x33   : > { %5319 = vmatmul.msk.f32.gmra.mxu0 %vm396_vm0, %v371_v10 }
  0x34   : > { %5323 = vmatmul.msk.f32.gmra.mxu1 %vm396_vm0, %v371_v10 }
  0x3c   : > { %5324 = vmatmul.msk.f32.vlgmr.msrb.gmra.mxu1 %vm396_vm0, %v368_v7 }
  0x8f   : > { %v6560_v60 = vpop.permute.xlu1 %393 }
  0x90   : > { %v6588_v13 = vpop.permute.xlu0 %383 }
  0x97   : > { %v6576_v8 = vpop.permute.xlu1 %378 }
  0x98   : > { %v426_v16 = vpop.f32.mrf.mxu0 }
  0x99   : > { %v455_v17 = vpop.f32.mrf.mxu1  ;;  %v660_v18 = vrot.slane %v426_v16, 4  ;;  %5336 = vmatpush.msk.msra.mxu3 %vm523_vm1, %v426_v16 }
  0x9a   : > { %v696_v19 = vrot.slane %v455_v17, 4  ;;  %5337 = vmatmul.msk.f32.vlgmr.msra.gmra.mxu3 %vm510_vm2, %v6312_v15 }
  0x9b   : > { %5341 = vmatpush.msk.msrb.mxu3 %vm523_vm1, %v455_v17  ;;  %5351 = vmatpush.msk.msra.mxu1 %vm523_vm1, %v660_v18 }
  0x9c   : > { %5356 = vmatpush.msk.msrb.mxu2 %vm523_vm1, %v696_v19  ;;  %5352 = vmatmul.msk.f32.vlgmr.msra.gmra.mxu1 %vm510_vm2, %v6312_v15 }
  0x9d   : > { %5357 = vmatmul.msk.f32.vlgmr.msrb.gmra.mxu2 %vm510_vm2, %v6318_v20 }
  0x9f   : > { %v487_v23 = vpop.f32.mrf.mxu2 }
  0xa0   : > { %v956_v25 = vrot.slane %v487_v23, 4  ;;  %5376 = vmatpush.msk.msra.mxu2 %vm523_vm1, %v487_v23  ;;  %v429_v27 = vpop.f32.mrf.mxu0 }
  0xa1   : > { %v458_v24 = vpop.f32.mrf.mxu1  ;;  %v884_v37 = vrot.slane %v429_v27, 4 }
  0xa2   : > { %5371 = vmatpush.msk.msrb.mxu1 %vm523_vm1, %v458_v24  ;;  %5338 = vmatmul.msk.f32.gmra.mxu3 %vm510_vm2, %v6335_v22  ;;  %v920_v38 = vrot.slane %v458_v24, 4 }
  0xa4   : > { %5391 = vmatpush.msk.msra.mxu1 %vm523_vm1, %v956_v25 }
  0xa5   : > { %5358 = vmatmul.msk.f32.gmra.mxu2 %vm510_vm2, %v6341_v26  ;;  %5353 = vmatmul.msk.f32.gmra.mxu1 %vm510_vm2, %v6335_v22 }
  0xa7   : > { %v490_v45 = vpop.f32.mrf.mxu2 }
  0xa8   : > { %v432_v31 = vpop.f32.mrf.mxu0  ;;  %v1180_v47 = vrot.slane %v490_v45, 4 }
  0xa9   : > { %v461_v29 = vpop.f32.mrf.mxu1  ;;  %5396 = vmatpush.msk.msrb.mxu2 %vm523_vm1, %v432_v31  ;;  %v1108_v41 = vrot.slane %v432_v31, 4 }
  0xaa   : > { %5339 = vmatmul.msk.f32.gmra.mxu3 %vm510_vm2, %v6354_v28  ;;  %v1144_v40 = vrot.slane %v461_v29, 4 }
  0xad   : > { %5359 = vmatmul.msk.f32.gmra.mxu2 %vm510_vm2, %v6359_v30  ;;  %5354 = vmatmul.msk.f32.gmra.mxu1 %vm510_vm2, %v6354_v28 }
  0xaf   : > { %v493_v46 = vpop.f32.mrf.mxu2 }
  0xb0   : > { %v1404_v48 = vrot.slane %v493_v46, 4  ;;  %v435_v49 = vpop.f32.mrf.mxu0 }
  0xb1   : > { %v6373_v33 = vpop.f32.mrf.mxu1  ;;  %v1332_v51 = vrot.slane %v435_v49, 4 }
  0xb2   : > { %5340 = vmatmul.msk.f32.gmra.mxu3 %vm510_vm2, %v6371_v32  ;;  %v1368_v50 = vrot.slane %v6373_v33, 4 }
  0xb5   : > { %5360 = vmatmul.msk.f32.gmra.mxu2 %vm510_vm2, %v6378_v34  ;;  %5355 = vmatmul.msk.f32.gmra.mxu1 %vm510_vm2, %v6371_v32 }
  0xb9   : > { %v484_v36 = vpop.f32.mrf.mxu1 }
  0xba   : > { %v732_v39 = vrot.slane %v484_v36, 4  ;;  %5346 = vmatpush.msk.msrb.mxu0 %vm523_vm1, %v484_v36  ;;  %5342 = vmatmul.msk.f32.vlgmr.msrb.gmra.mxu3 %vm510_vm2, %v6318_v20 }
  0xbb   : > { %5347 = vmatmul.msk.f32.vlgmr.msrb.gmra.mxu0 %vm510_vm2, %v6389_v35 }
  0xbc   : > { %5366 = vmatpush.msk.msra.mxu0 %vm523_vm1, %v429_v27  ;;  %5361 = vmatpush.msk.msra.mxu3 %vm523_vm1, %v732_v39  ;;  %v6603_v27 = vpop.permute.xlu0 %388 }
  0xbd   : > { %5377 = vmatmul.msk.f32.vlgmr.msra.gmra.mxu2 %vm510_vm2, %v6389_v35  ;;  %5372 = vmatmul.msk.f32.vlgmr.msrb.gmra.mxu1 %vm510_vm2, %v6318_v20 }
  0xbe   : > { %5381 = vmatpush.msk.msrb.mxu3 %vm523_vm1, %v884_v37  ;;  %5386 = vmatpush.msk.msrb.mxu0 %vm523_vm1, %v920_v38 }
  0xbf   : > { %5411 = vmatpush.msk.msrb.mxu1 %vm523_vm1, %v1108_v41  ;;  %5416 = vmatpush.msk.msra.mxu2 %vm523_vm1, %v1144_v40 }
  0xc2   : > { %5343 = vmatmul.msk.f32.gmra.mxu3 %vm510_vm2, %v6341_v26 }
  0xc3   : > { %5348 = vmatmul.msk.f32.gmra.mxu0 %vm510_vm2, %v6409_v42 }
  0xc5   : > { %5378 = vmatmul.msk.f32.gmra.mxu2 %vm510_vm2, %v6409_v42  ;;  %5373 = vmatmul.msk.f32.gmra.mxu1 %vm510_vm2, %v6341_v26 }
  0xca   : > { %5344 = vmatmul.msk.f32.gmra.mxu3 %vm510_vm2, %v6359_v30 }
  0xcb   : > { %5349 = vmatmul.msk.f32.gmra.mxu0 %vm510_vm2, %v6422_v43 }
  0xcd   : > { %5379 = vmatmul.msk.f32.gmra.mxu2 %vm510_vm2, %v6422_v43  ;;  %5374 = vmatmul.msk.f32.gmra.mxu1 %vm510_vm2, %v6359_v30 }
  0xd2   : > { %5345 = vmatmul.msk.f32.gmra.mxu3 %vm510_vm2, %v6378_v34 }
  0xd3   : > { %5350 = vmatmul.msk.f32.gmra.mxu0 %vm510_vm2, %v6435_v44 }
  0xd5   : > { %5380 = vmatmul.msk.f32.gmra.mxu2 %vm510_vm2, %v6435_v44  ;;  %5375 = vmatmul.msk.f32.gmra.mxu1 %vm510_vm2, %v6378_v34 }
  0xda   : > { %5362 = vmatmul.msk.f32.vlgmr.msra.gmra.mxu3 %vm510_vm2, %v6389_v35 }
  0xdb   : > { %5367 = vmatmul.msk.f32.vlgmr.msra.gmra.mxu0 %vm510_vm2, %v6312_v15  ;;  %5401 = vmatpush.msk.msra.mxu3 %vm523_vm1, %v461_v29 }
  0xdc   : > { %5406 = vmatpush.msk.msra.mxu0 %vm523_vm1, %v490_v45 }
  0xdd   : > { %5397 = vmatmul.msk.f32.vlgmr.msrb.gmra.mxu2 %vm510_vm2, %v6312_v15  ;;  %5392 = vmatmul.msk.f32.vlgmr.msra.gmra.mxu1 %vm510_vm2, %v6389_v35 }
  0xde   : > { %5431 = vmatpush.msk.msra.mxu1 %vm523_vm1, %v6373_v33  ;;  %5436 = vmatpush.msk.msrb.mxu2 %vm523_vm1, %v493_v46 }
  0xe2   : > { %5363 = vmatmul.msk.f32.gmra.mxu3 %vm510_vm2, %v6409_v42 }
  0xe3   : > { %5368 = vmatmul.msk.f32.gmra.mxu0 %vm510_vm2, %v6335_v22 }
  0xe5   : > { %5398 = vmatmul.msk.f32.gmra.mxu2 %vm510_vm2, %v6335_v22  ;;  %5393 = vmatmul.msk.f32.gmra.mxu1 %vm510_vm2, %v6409_v42 }
  0xea   : > { %5364 = vmatmul.msk.f32.gmra.mxu3 %vm510_vm2, %v6422_v43 }
  0xeb   : > { %5369 = vmatmul.msk.f32.gmra.mxu0 %vm510_vm2, %v6354_v28 }
  0xed   : > { %5399 = vmatmul.msk.f32.gmra.mxu2 %vm510_vm2, %v6354_v28  ;;  %5394 = vmatmul.msk.f32.gmra.mxu1 %vm510_vm2, %v6422_v43 }
  0xf2   : > { %5365 = vmatmul.msk.f32.gmra.mxu3 %vm510_vm2, %v6435_v44 }
  0xf3   : > { %5370 = vmatmul.msk.f32.gmra.mxu0 %vm510_vm2, %v6371_v32 }
  0xf5   : > { %5400 = vmatmul.msk.f32.gmra.mxu2 %vm510_vm2, %v6371_v32  ;;  %5395 = vmatmul.msk.f32.gmra.mxu1 %vm510_vm2, %v6435_v44 }
  0xfa   : > { %5382 = vmatmul.msk.f32.vlgmr.msrb.gmra.mxu3 %vm510_vm2, %v6312_v15 }
  0xfb   : > { %5387 = vmatmul.msk.f32.vlgmr.msrb.gmra.mxu0 %vm510_vm2, %v6318_v20  ;;  %5421 = vmatpush.msk.msrb.mxu3 %vm523_vm1, %v1180_v47 }
  0xfc   : > { %5426 = vmatpush.msk.msrb.mxu0 %vm523_vm1, %v435_v49 }
  0xfd   : > { %5417 = vmatmul.msk.f32.vlgmr.msra.gmra.mxu2 %vm510_vm2, %v6318_v20  ;;  %5412 = vmatmul.msk.f32.vlgmr.msrb.gmra.mxu1 %vm510_vm2, %v6312_v15 }
  0xfe   : > { %1465 = vmatpush.msra.mxu2 %v6248_v1  ;;  %5451 = vmatpush.msk.msrb.mxu1 %vm523_vm1, %v1404_v48 }
 0x100   : > { %1466 = vmatpush.msra.mxu2 %v6258_v3 }
 0x102   : > { %5383 = vmatmul.msk.f32.gmra.mxu3 %vm510_vm2, %v6335_v22 }
 0x103   : > { %5388 = vmatmul.msk.f32.gmra.mxu0 %vm510_vm2, %v6341_v26 }
 0x105   : > { %5418 = vmatmul.msk.f32.gmra.mxu2 %vm510_vm2, %v6341_v26  ;;  %5413 = vmatmul.msk.f32.gmra.mxu1 %vm510_vm2, %v6335_v22 }
 0x10a   : > { %5384 = vmatmul.msk.f32.gmra.mxu3 %vm510_vm2, %v6354_v28 }
 0x10b   : > { %5389 = vmatmul.msk.f32.gmra.mxu0 %vm510_vm2, %v6359_v30 }
 0x10d   : > { %5419 = vmatmul.msk.f32.gmra.mxu2 %vm510_vm2, %v6359_v30  ;;  %5414 = vmatmul.msk.f32.gmra.mxu1 %vm510_vm2, %v6354_v28 }
 0x112   : > { %5385 = vmatmul.msk.f32.gmra.mxu3 %vm510_vm2, %v6371_v32 }
 0x113   : > { %5390 = vmatmul.msk.f32.gmra.mxu0 %vm510_vm2, %v6378_v34 }
 0x115   : > { %5420 = vmatmul.msk.f32.gmra.mxu2 %vm510_vm2, %v6378_v34  ;;  %5415 = vmatmul.msk.f32.gmra.mxu1 %vm510_vm2, %v6371_v32 }
 0x119   : > { %v6524_v52 = vpop.f32.mrf.mxu1 }
 0x11a   : > { %5402 = vmatmul.msk.f32.vlgmr.msra.gmra.mxu3 %vm510_vm2, %v6318_v20  ;;  %v692_v45 = vadd.f32 %v6524_v52, %v6576_v8 }
 0x11b   : > { %5407 = vmatmul.msk.f32.vlgmr.msra.gmra.mxu0 %vm510_vm2, %v6389_v35  ;;  %5441 = vmatpush.msk.msra.mxu3 %vm523_vm1, %v1332_v51 }
 0x11c   : > { %5446 = vmatpush.msk.msra.mxu0 %vm523_vm1, %v1368_v50 }
 0x11d   : > { %5437 = vmatmul.msk.f32.vlgmr.msrb.gmra.mxu2 %vm510_vm2, %v6389_v35  ;;  %v544_v53 = vpop.f32.mrf.mxu3  ;;  %5432 = vmatmul.msk.f32.vlgmr.msra.gmra.mxu1 %vm510_vm2, %v6318_v20 }
 0x11e   : > { %1486 = vmatpush.msrb.mxu2 %v6253_v2  ;;  %1690 = vmatpush.msra.mxu1 %v6271_v5  ;;  %v556_v9 = vadd.f32 %v544_v53, %v6576_v8 }
 0x120   : > { %v6534_v54 = vpop.f32.mrf.mxu2  ;;  %1487 = vmatpush.msrb.mxu2 %v6266_v4  ;;  %1691 = vmatpush.msra.mxu1 %v6276_v6 }
 0x121   : > { %v728_v50 = vadd.f32 %v6534_v54, %v692_v45 }
 0x122   : > { %5403 = vmatmul.msk.f32.gmra.mxu3 %vm510_vm2, %v6341_v26  ;;  %v6542_v55 = vpop.f32.mrf.mxu1 }
 0x123   : > { %5408 = vmatmul.msk.f32.gmra.mxu0 %vm510_vm2, %v6409_v42 }
 0x125   : > { %5438 = vmatmul.msk.f32.gmra.mxu2 %vm510_vm2, %v6409_v42  ;;  %v547_v56 = vpop.f32.mrf.mxu3  ;;  %5433 = vmatmul.msk.f32.gmra.mxu1 %vm510_vm2, %v6341_v26 }
 0x128   : > { %v6548_v57 = vpop.f32.mrf.mxu2 }
 0x12a   : > { %5404 = vmatmul.msk.f32.gmra.mxu3 %vm510_vm2, %v6359_v30  ;;  %v6554_v58 = vpop.f32.mrf.mxu1 }
 0x12b   : > { %5409 = vmatmul.msk.f32.gmra.mxu0 %vm510_vm2, %v6422_v43 }
 0x12d   : > { %5439 = vmatmul.msk.f32.gmra.mxu2 %vm510_vm2, %v6422_v43  ;;  %v550_v59 = vpop.f32.mrf.mxu3  ;;  %5434 = vmatmul.msk.f32.gmra.mxu1 %vm510_vm2, %v6359_v30 }
 0x12e   : > { %v558_v29 = vadd.f32 %v550_v59, %v6603_v27 }
 0x130   : > { %v6562_v61 = vpop.f32.mrf.mxu2 }
 0x132   : > { %5405 = vmatmul.msk.f32.gmra.mxu3 %vm510_vm2, %v6378_v34  ;;  %v6568_v62 = vpop.f32.mrf.mxu1 }
 0x133   : > { %5410 = vmatmul.msk.f32.gmra.mxu0 %vm510_vm2, %v6435_v44 }
 0x135   : > { %5440 = vmatmul.msk.f32.gmra.mxu2 %vm510_vm2, %v6435_v44  ;;  %v553_v63 = vpop.f32.mrf.mxu3  ;;  %5435 = vmatmul.msk.f32.gmra.mxu1 %vm510_vm2, %v6378_v34 }
 0x136   : > { %v559_v39 = vadd.f32 %v553_v63, %v6560_v60 }
 0x138   : > { %v640_v0 = vpop.f32.mrf.mxu0  ;;  %v6574_v7 = vpop.f32.mrf.mxu2 }
 0x13a   : > { %5422 = vmatmul.msk.f32.vlgmr.msrb.gmra.mxu3 %vm510_vm2, %v6389_v35  ;;  %v828_v10 = vpop.f32.mrf.mxu1 }
 0x13b   : > { %5427 = vmatmul.msk.f32.vlgmr.msrb.gmra.mxu0 %vm510_vm2, %v6312_v15  ;;  %1648 = vmatpush.msrb.mxu3 %v6248_v1 }
 0x13c   : > { %1669 = vmatpush.msrb.mxu0 %v6253_v2 }
 0x13d   : > { %1467 = vmatmul.f32.vlgmr.msra.gmra.mxu2 %v6138_v11  ;;  %v592_v12 = vpop.f32.mrf.mxu3  ;;  %5452 = vmatmul.msk.f32.vlgmr.msrb.gmra.mxu1 %vm510_vm2, %v6389_v35 }
 0x13e   : > { %1507 = vmatpush.msra.mxu2 %v6271_v5  ;;  %v604_v14 = vadd.f32 %v592_v12, %v556_v9  ;;  %1649 = vmatpush.msrb.mxu3 %v6258_v3  ;;  %v557_v5 = vadd.f32 %v547_v56, %v6588_v13 }
 0x13f   : > { %1670 = vmatpush.msrb.mxu0 %v6266_v4  ;;  %1839 = vmatpush.msrb.mxu1 %v6253_v2 }
 0x140   : > { %v643_v16 = vpop.f32.mrf.mxu0  ;;  %v864_v17 = vpop.f32.mrf.mxu2  ;;  %1508 = vmatpush.msra.mxu2 %v6276_v6  ;;  %v652_v18 = vadd.f32 %v640_v0, %v604_v14 }
 0x141   : > { %1840 = vmatpush.msrb.mxu1 %v6266_v4 }
 0x142   : > { %656 = vst.msk [vmem:[#allocation2] sm:$0xff] %vm396_vm0, %v652_v18  ;;  %5423 = vmatmul.msk.f32.gmra.mxu3 %vm510_vm2, %v6409_v42  ;;  %v831_v19 = vpop.f32.mrf.mxu1  ;;  %v695_v18 = vadd.f32 %v6568_v62, %v6560_v60 }
 0x143   : > { %5428 = vmatmul.msk.f32.gmra.mxu0 %vm510_vm2, %v6335_v22 }
 0x145   : > { %1488 = vmatmul.f32.vlgmr.msrb.gmra.mxu2 %v6138_v11  ;;  %v595_v21 = vpop.f32.mrf.mxu3  ;;  %5453 = vmatmul.msk.f32.gmra.mxu1 %vm510_vm2, %v6409_v42 }
 0x146   : > { %v605_v6 = vadd.f32 %v595_v21, %v557_v5 }
 0x148   : > { %v646_v23 = vpop.f32.mrf.mxu0  ;;  %v867_v24 = vpop.f32.mrf.mxu2  ;;  %v653_v25 = vadd.f32 %v643_v16, %v605_v6 }
 0x14a   : > { %657 = vst.msk [vmem:[#allocation2 + $0x8] sm:$0xff] %vm396_vm0, %v653_v25  ;;  %5424 = vmatmul.msk.f32.gmra.mxu3 %vm510_vm2, %v6422_v43  ;;  %v834_v35 = vpop.f32.mrf.mxu1 }
 0x14b   : > { %5429 = vmatmul.msk.f32.gmra.mxu0 %vm510_vm2, %v6354_v28 }
 0x14d   : > { %1509 = vmatmul.f32.vlgmr.msra.gmra.mxu2 %v6138_v11  ;;  %v598_v31 = vpop.f32.mrf.mxu3  ;;  %5454 = vmatmul.msk.f32.gmra.mxu1 %vm510_vm2, %v6422_v43 }
 0x14e   : > { %v606_v33 = vadd.f32 %v598_v31, %v558_v29 }
 0x150   : > { %v649_v36 = vpop.f32.mrf.mxu0  ;;  %v870_v37 = vpop.f32.mrf.mxu2  ;;  %v654_v38 = vadd.f32 %v646_v23, %v606_v33 }
 0x152   : > { %658 = vst.msk [vmem:[#allocation2 + $0x10] sm:$0xff] %vm396_vm0, %v654_v38  ;;  %5425 = vmatmul.msk.f32.gmra.mxu3 %vm510_vm2, %v6435_v44  ;;  %v837_v48 = vpop.f32.mrf.mxu1 }
 0x153   : > { %5430 = vmatmul.msk.f32.gmra.mxu0 %vm510_vm2, %v6371_v32 }
 0x155   : > { %v601_v40 = vpop.f32.mrf.mxu3  ;;  %5455 = vmatmul.msk.f32.gmra.mxu1 %vm510_vm2, %v6435_v44 }
 0x156   : > { %v607_v41 = vadd.f32 %v601_v40, %v559_v39 }
 0x158   : > { %v792_v42 = vpop.f32.mrf.mxu0  ;;  %v873_v43 = vpop.f32.mrf.mxu2  ;;  %v655_v46 = vadd.f32 %v649_v36, %v607_v41 }
 0x159   : > { %v804_v47 = vadd.f32 %v792_v42, %v6576_v8 }
 0x15a   : > { %659 = vst.msk [vmem:[#allocation2 + $0x18] sm:$0xff] %vm396_vm0, %v655_v46  ;;  %5442 = vmatmul.msk.f32.vlgmr.msra.gmra.mxu3 %vm510_vm2, %v6312_v15  ;;  %v693_v15 = vadd.f32 %v6542_v55, %v6588_v13  ;;  %v976_v59 = vpop.f32.mrf.mxu1 }
 0x15b   : > { %v840_v49 = vadd.f32 %v828_v10, %v804_v47  ;;  %5447 = vmatmul.msk.f32.vlgmr.msra.gmra.mxu0 %vm510_vm2, %v6318_v20  ;;  %v694_v10 = vadd.f32 %v6554_v58, %v6603_v27 }
 0x15c   : > { %1818 = vmatpush.msra.mxu0 %v6248_v1  ;;  %v729_v54 = vadd.f32 %v6548_v57, %v693_v15 }
 0x15d   : > { %v876_v44 = vadd.f32 %v864_v17, %v840_v49  ;;  %v752_v51 = vpop.f32.mrf.mxu3  ;;  %v730_v12 = vadd.f32 %v6562_v61, %v694_v10  ;;  %v731_v61 = vadd.f32 %v6574_v7, %v695_v18 }
 0x15e   : > { %1819 = vmatpush.msra.mxu0 %v6258_v3  ;;  %v764_v52 = vadd.f32 %v752_v51, %v728_v50 }
 0x15f   : > { %880 = vst.msk [vmem:[#allocation2 + $0x40] sm:$0xff] %vm396_vm0, %v876_v44 }
 0x160   : > { %v795_v53 = vpop.f32.mrf.mxu0  ;;  %v6633_v56 = vpop.f32.mrf.mxu2  ;;  %768 = vst.msk [vmem:[#allocation2 + $0x20] sm:$0xff] %vm396_vm0, %v764_v52 }
 0x161   : > { %v805_v20 = vadd.f32 %v795_v53, %v6588_v13  ;;  %v1028_v15 = vadd.f32 %v6633_v56, %v6576_v8 }
 0x162   : > { %5443 = vmatmul.msk.f32.gmra.mxu3 %vm510_vm2, %v6335_v22  ;;  %v979_v57 = vpop.f32.mrf.mxu1 }
 0x163   : > { %v841_v1 = vadd.f32 %v831_v19, %v805_v20  ;;  %5448 = vmatmul.msk.f32.gmra.mxu0 %vm510_vm2, %v6341_v26 }
 0x165   : > { %v877_v3 = vadd.f32 %v867_v24, %v841_v1  ;;  %v755_v63 = vpop.f32.mrf.mxu3 }
 0x166   : > { %v765_v0 = vadd.f32 %v755_v63, %v729_v54 }
 0x167   : > { %881 = vst.msk [vmem:[#allocation2 + $0x48] sm:$0xff] %vm396_vm0, %v877_v3 }
 0x168   : > { %v798_v55 = vpop.f32.mrf.mxu0  ;;  %v6645_v9 = vpop.f32.mrf.mxu2  ;;  %769 = vst.msk [vmem:[#allocation2 + $0x28] sm:$0xff] %vm396_vm0, %v765_v0 }
 0x169   : > { %v806_v22 = vadd.f32 %v798_v55, %v6603_v27  ;;  %v1029_v0 = vadd.f32 %v6645_v9, %v6588_v13 }
 0x16a   : > { %5444 = vmatmul.msk.f32.gmra.mxu3 %vm510_vm2, %v6354_v28  ;;  %v982_v21 = vpop.f32.mrf.mxu1 }
 0x16b   : > { %v842_v11 = vadd.f32 %v834_v35, %v806_v22  ;;  %5449 = vmatmul.msk.f32.gmra.mxu0 %vm510_vm2, %v6359_v30 }
 0x16d   : > { %v878_v26 = vadd.f32 %v870_v37, %v842_v11  ;;  %v758_v14 = vpop.f32.mrf.mxu3 }
 0x16e   : > { %v766_v16 = vadd.f32 %v758_v14, %v730_v12 }
 0x16f   : > { %882 = vst.msk [vmem:[#allocation2 + $0x50] sm:$0xff] %vm396_vm0, %v878_v26 }
 0x170   : > { %v801_v58 = vpop.f32.mrf.mxu0  ;;  %v6657_v17 = vpop.f32.mrf.mxu2  ;;  %770 = vst.msk [vmem:[#allocation2 + $0x30] sm:$0xff] %vm396_vm0, %v766_v16 }
 0x171   : > { %v807_v28 = vadd.f32 %v801_v58, %v6560_v60  ;;  %v1030_v56 = vadd.f32 %v6657_v17, %v6603_v27 }
 0x172   : > { %5445 = vmatmul.msk.f32.gmra.mxu3 %vm510_vm2, %v6371_v32  ;;  %v985_v31 = vpop.f32.mrf.mxu1 }
 0x173   : > { %v843_v5 = vadd.f32 %v837_v48, %v807_v28  ;;  %5450 = vmatmul.msk.f32.gmra.mxu0 %vm510_vm2, %v6378_v34 }
 0x175   : > { %v879_v30 = vadd.f32 %v873_v43, %v843_v5  ;;  %v761_v19 = vpop.f32.mrf.mxu3 }
 0x176   : > { %v767_v6 = vadd.f32 %v761_v19, %v731_v61 }
 0x177   : > { %883 = vst.msk [vmem:[#allocation2 + $0x58] sm:$0xff] %vm396_vm0, %v879_v30 }
 0x178   : > { %v940_v62 = vpop.f32.mrf.mxu0  ;;  %v1025_v23 = vpop.f32.mrf.mxu2  ;;  %771 = vst.msk [vmem:[#allocation2 + $0x38] sm:$0xff] %vm396_vm0, %v767_v6 }
 0x179   : > { %v1031_v9 = vadd.f32 %v1025_v23, %v6560_v60 }
 0x17a   : > { %v1128_v39 = vpop.f32.mrf.mxu1 }
 0x17d   : > { %v904_v24 = vpop.f32.mrf.mxu3 }
 0x17e   : > { %v916_v25 = vadd.f32 %v904_v24, %v6576_v8 }
 0x180   : > { %v943_v29 = vpop.f32.mrf.mxu0  ;;  %v6671_v32 = vpop.f32.mrf.mxu2  ;;  %v952_v34 = vadd.f32 %v940_v62, %v916_v25 }
 0x182   : > { %v988_v33 = vadd.f32 %v976_v59, %v952_v34  ;;  %v1131_v48 = vpop.f32.mrf.mxu1 }
 0x184   : > { %992 = vst.msk [vmem:[#allocation2 + $0x60] sm:$0xff] %vm396_vm0, %v988_v33 }
 0x185   : > { %v907_v7 = vpop.f32.mrf.mxu3 }
 0x186   : > { %v917_v35 = vadd.f32 %v907_v7, %v6588_v13  ;;  %v1141_v7 = vadd.f32 %v1131_v48, %v6588_v13  ;;  %v2832_v48 = vld [vmem:[%s7751_s7 + $0x18] sm:$0xff] }
 0x187   : > { %2850 = vperm.xlu0 %5787, %v2832_v48  }
 0x188   : > { %v946_v36 = vpop.f32.mrf.mxu0  ;;  %v6675_v37 = vpop.f32.mrf.mxu2  ;;  %v953_v38 = vadd.f32 %v943_v29, %v917_v35 }
 0x18a   : > { %v989_v40 = vadd.f32 %v979_v57, %v953_v38  ;;  %v1134_v1 = vpop.f32.mrf.mxu1 }
 0x18c   : > { %993 = vst.msk [vmem:[#allocation2 + $0x68] sm:$0xff] %vm396_vm0, %v989_v40 }
 0x18d   : > { %v910_v41 = vpop.f32.mrf.mxu3 }
 0x18e   : > { %v918_v42 = vadd.f32 %v910_v41, %v6603_v27 }
 0x190   : > { %v949_v43 = vpop.f32.mrf.mxu0  ;;  %v6679_v45 = vpop.f32.mrf.mxu2  ;;  %v954_v46 = vadd.f32 %v946_v36, %v918_v42 }
 0x192   : > { %v990_v47 = vadd.f32 %v982_v21, %v954_v46  ;;  %v1137_v26 = vpop.f32.mrf.mxu1  ;;  %v1140_v21 = vadd.f32 %v1128_v39, %v6576_v8  ;;  %v1142_v46 = vadd.f32 %v1134_v1, %v6603_v27 }
 0x193   : > { %v1143_v1 = vadd.f32 %v1137_v26, %v6560_v60 }
 0x194   : > { %994 = vst.msk [vmem:[#allocation2 + $0x70] sm:$0xff] %vm396_vm0, %v990_v47  ;;  %v1176_v29 = vadd.f32 %v6671_v32, %v1140_v21  ;;  %v1177_v32 = vadd.f32 %v6675_v37, %v1141_v7  ;;  %v1515_v7 = vld [vmem:[#allocation2 + $0x8] sm:$0xff] }
 0x195   : > { %v913_v49 = vpop.f32.mrf.mxu3 }
 0x196   : > { %v919_v44 = vadd.f32 %v913_v49, %v6560_v60 }
 0x198   : > { %v1088_v50 = vpop.f32.mrf.mxu0  ;;  %v6683_v51 = vpop.f32.mrf.mxu2  ;;  %v955_v52 = vadd.f32 %v949_v43, %v919_v44  ;;  %v1178_v44 = vadd.f32 %v6679_v45, %v1142_v46 }
 0x199   : > { %v1179_v45 = vadd.f32 %v6683_v51, %v1143_v1  ;;  %v1514_v1 = vld [vmem:[#allocation2] sm:$0xff] }
 0x19a   : > { %v991_v53 = vadd.f32 %v985_v31, %v955_v52  ;;  %v1276_v28 = vpop.f32.mrf.mxu1 }
 0x19c   : > { %995 = vst.msk [vmem:[#allocation2 + $0x78] sm:$0xff] %vm396_vm0, %v991_v53 }
 0x19d   : > { %v1052_v20 = vpop.f32.mrf.mxu3 }
 0x19e   : > { %v1064_v59 = vadd.f32 %v1052_v20, %v1028_v15 }
 0x1a0   : > { %v1091_v3 = vpop.f32.mrf.mxu0  ;;  %v1312_v54 = vpop.f32.mrf.mxu2  ;;  %v1100_v63 = vadd.f32 %v1088_v50, %v1064_v59 }
 0x1a2   : > { %1104 = vst.msk [vmem:[#allocation2 + $0x80] sm:$0xff] %vm396_vm0, %v1100_v63  ;;  %v1279_v24 = vpop.f32.mrf.mxu1 }
 0x1a5   : > { %v1055_v55 = vpop.f32.mrf.mxu3 }
 0x1a6   : > { %v1065_v10 = vadd.f32 %v1055_v55, %v1029_v0  ;;  %v2829_v55 = vld [vmem:[%s7751_s7] sm:$0xff] }
 0x1a7   : > { %2835 = vperm.xlu1 %5788, %v2829_v55  }
 0x1a8   : > { %v1094_v22 = vpop.f32.mrf.mxu0  ;;  %v1315_v11 = vpop.f32.mrf.mxu2  ;;  %v1101_v57 = vadd.f32 %v1091_v3, %v1065_v10 }
 0x1aa   : > { %1105 = vst.msk [vmem:[#allocation2 + $0x88] sm:$0xff] %vm396_vm0, %v1101_v57  ;;  %v1282_v39 = vpop.f32.mrf.mxu1 }
 0x1ad   : > { %v1058_v12 = vpop.f32.mrf.mxu3 }
 0x1ae   : > { %v1066_v14 = vadd.f32 %v1058_v12, %v1030_v56 }
 0x1b0   : > { %v1097_v16 = vpop.f32.mrf.mxu0  ;;  %v1318_v58 = vpop.f32.mrf.mxu2  ;;  %v1102_v18 = vadd.f32 %v1094_v22, %v1066_v14 }
 0x1b2   : > { %1106 = vst.msk [vmem:[#allocation2 + $0x90] sm:$0xff] %vm396_vm0, %v1102_v18  ;;  %v1285_v53 = vpop.f32.mrf.mxu1 }
 0x1b5   : > { %v1061_v5 = vpop.f32.mrf.mxu3 }
 0x1b6   : > { %v1067_v30 = vadd.f32 %v1061_v5, %v1031_v9 }
 0x1b8   : > { %v1240_v61 = vpop.f32.mrf.mxu0  ;;  %v1321_v19 = vpop.f32.mrf.mxu2  ;;  %v1103_v6 = vadd.f32 %v1097_v16, %v1067_v30  ;;  %v6765_v30 = vld [vmem:[%s7747_s3 + $0x18] sm:$0xff] }
 0x1b9   : > { %v1252_v62 = vadd.f32 %v1240_v61, %v6576_v8 }
 0x1ba   : > { %1107 = vst.msk [vmem:[#allocation2 + $0x98] sm:$0xff] %vm396_vm0, %v1103_v6  ;;  %v1424_v12 = vpop.f32.mrf.mxu1 }
 0x1bb   : > { %v1288_v17 = vadd.f32 %v1276_v28, %v1252_v62 }
 0x1bd   : > { %v1324_v25 = vadd.f32 %v1312_v54, %v1288_v17  ;;  %v1200_v31 = vpop.f32.mrf.mxu3 }
 0x1be   : > { %v1212_v23 = vadd.f32 %v1200_v31, %v1176_v29 }
 0x1bf   : > { %1328 = vst.msk [vmem:[#allocation2 + $0xc0] sm:$0xff] %vm396_vm0, %v1324_v25 }
 0x1c0   : > { %v1243_v34 = vpop.f32.mrf.mxu0  ;;  %v6701_v33 = vpop.f32.mrf.mxu2  ;;  %1216 = vst.msk [vmem:[#allocation2 + $0xa0] sm:$0xff] %vm396_vm0, %v1212_v23 }
 0x1c1   : > { %v1253_v35 = vadd.f32 %v1243_v34, %v6588_v13  ;;  %1471 = vst.msk [vmem:[#allocation5] sm:$0xff] %vm396_vm0, %v6701_v33 }
 0x1c3   : > { %v1289_v36 = vadd.f32 %v1279_v24, %v1253_v35 }
 0x1c5   : > { %v1325_v38 = vadd.f32 %v1315_v11, %v1289_v36  ;;  %v1203_v40 = vpop.f32.mrf.mxu3  ;;  %v6738_v11 = vld [vmem:[%s7747_s3] sm:$0xff] }
 0x1c6   : > { %v1213_v41 = vadd.f32 %v1203_v40, %v1177_v32 }
 0x1c7   : > { %1329 = vst.msk [vmem:[#allocation2 + $0xc8] sm:$0xff] %vm396_vm0, %v1325_v38  ;;  %v1516_v38 = vld [vmem:[#allocation2 + $0x10] sm:$0xff] }
 0x1c8   : > { %v1246_v42 = vpop.f32.mrf.mxu0  ;;  %v6710_v43 = vpop.f32.mrf.mxu2  ;;  %1217 = vst.msk [vmem:[#allocation2 + $0xa8] sm:$0xff] %vm396_vm0, %v1213_v41  ;;  %v1518_v51 = vld [vmem:[#allocation5] sm:$0xff] }
 0x1c9   : > { %v1254_v47 = vadd.f32 %v1246_v42, %v6603_v27  ;;  %1492 = vst.msk [vmem:[#allocation5 + $0x8] sm:$0xff] %vm396_vm0, %v6710_v43 }
 0x1cb   : > { %v1290_v37 = vadd.f32 %v1282_v39, %v1254_v47 }
 0x1cd   : > { %v1326_v49 = vadd.f32 %v1318_v58, %v1290_v37  ;;  %v1206_v50 = vpop.f32.mrf.mxu3  ;;  %v6748_v58 = vld [vmem:[%s7747_s3 + $0x8] sm:$0xff] }
 0x1ce   : > { %v1214_v52 = vadd.f32 %v1206_v50, %v1178_v44 }
 0x1cf   : > { %1330 = vst.msk [vmem:[#allocation2 + $0xd0] sm:$0xff] %vm396_vm0, %v1326_v49 }
 0x1d0   : > { %v1249_v15 = vpop.f32.mrf.mxu0  ;;  %v6722_v20 = vpop.f32.mrf.mxu2  ;;  %1218 = vst.msk [vmem:[#allocation2 + $0xb0] sm:$0xff] %vm396_vm0, %v1214_v52  ;;  %v1519_v22 = vld [vmem:[#allocation5 + $0x8] sm:$0xff] }
 0x1d1   : > { %v1255_v59 = vadd.f32 %v1249_v15, %v6560_v60  ;;  %1513 = vst.msk [vmem:[#allocation5 + $0x10] sm:$0xff] %vm396_vm0, %v6722_v20 }
 0x1d3   : > { %v1291_v3 = vadd.f32 %v1285_v53, %v1255_v59 }
 0x1d5   : > { %v1327_v54 = vadd.f32 %v1321_v19, %v1291_v3  ;;  %v1209_v63 = vpop.f32.mrf.mxu3 }
 0x1d6   : > { %v1215_v0 = vadd.f32 %v1209_v63, %v1179_v45 }
 0x1d7   : > { %1331 = vst.msk [vmem:[#allocation2 + $0xd8] sm:$0xff] %vm396_vm0, %v1327_v54 }
 0x1d8   : > { %1219 = vst.msk [vmem:[#allocation2 + $0xb8] sm:$0xff] %vm396_vm0, %v1215_v0  ;;  %v1520_v10 = vld [vmem:[#allocation5 + $0x10] sm:$0xff]  ;;  %v1388_v57 = vpop.f32.mrf.mxu0 }
 0x1d9   : > { %1547 = vmatpush.msrb.mxu2 %v1520_v10 }
 0x1db   : > { %1548 = vmatpush.msrb.mxu2 %v1519_v22 }
 0x1dd   : > { %1549 = vmatpush.msrb.mxu2 %v1518_v51  ;;  %v1352_v26 = vpop.f32.mrf.mxu3 }
 0x1de   : > { %5456 = vmatmul.msk.f32.vlgmr.msrb.gmra.mxu2 %vm1521_vm3, %v6738_v11  ;;  %v1364_v56 = vadd.f32 %v1352_v26, %v6576_v8 }
 0x1df   : > { %2009 = vmatpush.msra.mxu2 %v6253_v2  ;;  %v1427_v2 = vpop.f32.mrf.mxu1 }
 0x1e0   : > { %v1400_v14 = vadd.f32 %v1388_v57, %v1364_v56  ;;  %v1391_v28 = vpop.f32.mrf.mxu0 }
 0x1e1   : > { %2010 = vmatpush.msra.mxu2 %v6266_v4  ;;  %v6757_v4 = vld [vmem:[%s7747_s3 + $0x10] sm:$0xff] }
 0x1e2   : > { %v1436_v16 = vadd.f32 %v1424_v12, %v1400_v14 }
 0x1e4   : > { %1440 = vst.msk [vmem:[#allocation2 + $0xe0] sm:$0xff] %vm396_vm0, %v1436_v16 }
 0x1e5   : > { %v1355_v18 = vpop.f32.mrf.mxu3 }
 0x1e6   : > { %5457 = vmatmul.msk.f32.gmra.mxu2 %vm1521_vm3, %v6748_v58  ;;  %v1365_v8 = vadd.f32 %v1355_v18, %v6588_v13 }
 0x1e7   : > { %v1430_v6 = vpop.f32.mrf.mxu1 }
 0x1e8   : > { %v1401_v9 = vadd.f32 %v1391_v28, %v1365_v8  ;;  %v1394_v19 = vpop.f32.mrf.mxu0 }
 0x1ea   : > { %v1437_v5 = vadd.f32 %v1427_v2, %v1401_v9 }
 0x1ec   : > { %1441 = vst.msk [vmem:[#allocation2 + $0xe8] sm:$0xff] %vm396_vm0, %v1437_v5 }
 0x1ed   : > { %v1358_v13 = vpop.f32.mrf.mxu3 }
 0x1ee   : > { %5458 = vmatmul.msk.f32.gmra.mxu2 %vm1521_vm3, %v6757_v4  ;;  %v1366_v61 = vadd.f32 %v1358_v13, %v6603_v27 }
 0x1ef   : > { %v1433_v31 = vpop.f32.mrf.mxu1 }
 0x1f0   : > { %v1402_v21 = vadd.f32 %v1394_v19, %v1366_v61  ;;  %v1397_v25 = vpop.f32.mrf.mxu0 }
 0x1f2   : > { %v1438_v62 = vadd.f32 %v1430_v6, %v1402_v21 }
 0x1f4   : > { %1442 = vst.msk [vmem:[#allocation2 + $0xf0] sm:$0xff] %vm396_vm0, %v1438_v62 }
 0x1f5   : > { %v1361_v17 = vpop.f32.mrf.mxu3 }
 0x1f6   : > { %5459 = vmatmul.msk.f32.gmra.mxu2 %vm1521_vm3, %v6765_v30  ;;  %v1367_v24 = vadd.f32 %v1361_v17, %v6560_v60  ;;  %v1517_v60 = vld [vmem:[#allocation2 + $0x18] sm:$0xff] }
 0x1f8   : > { %v1403_v29 = vadd.f32 %v1397_v25, %v1367_v24 }
 0x1fa   : > { %v1439_v23 = vadd.f32 %v1433_v31, %v1403_v29 }
 0x1fc   : > { %1443 = vst.msk [vmem:[#allocation2 + $0xf8] sm:$0xff] %vm396_vm0, %v1439_v23 }
 0x261   : > { %v1551_v34 = vpop.f32.mrf.mxu2 }
 0x262   : > { %v1563_v3 = vadd.f32 %v1551_v34, %v1514_v1  ;;  %v6783_v34 = vld [vmem:[%s7745_s1 + $0x28] sm:$0xff] }
 0x269   : > { %v1554_v35 = vpop.f32.mrf.mxu2 }
 0x26a   : > { %v1564_v36 = vadd.f32 %v1554_v35, %v1515_v7  ;;  %v6789_v7 = vld [vmem:[%s7745_s1 + $0x20] sm:$0xff] }
 0x26c   : > { %v5460_v27 = vmul.f32 -1.442695, %v1564_v36 }
 0x26e   : > { %5791 = vpow2.f32 %v5460_v27 }
 0x271   : > { %v1557_v32 = vpop.f32.mrf.mxu2 }
 0x272   : > { %v1565_v39 = vadd.f32 %v1557_v32, %v1516_v38 }
 0x274   : > { %v5792_v40 = vpop.eup %5791  ;;  %v5461_v41 = vmul.f32 -1.442695, %v1565_v39 }
 0x275   : > { %v1576_v42 = vadd.f32 1.0, %v5792_v40  ;;  %v6800_v40 = vld [vmem:[%s7745_s1 + $0x8] sm:$0xff] }
 0x276   : > { %5793 = vpow2.f32 %v5461_v41  ;;  %v6806_v41 = vld [vmem:[%s7745_s1] sm:$0xff] }
 0x277   : > { %5795 = vrcp.f32 %v1576_v42  ;;  %v1590_v0 = vand.u32 2147483648, %v1576_v42  ;;  %vm1584_vm5 = vweird.f32 %v1576_v42  ;;  %v1588_v55 = vand.u32 2147483647, %v1576_v42 }
 0x279   : > { %v1560_v46 = vpop.f32.mrf.mxu2  ;;  %v1591_v56 = vor.u32 1.1754944e-38, %v1590_v0  ;;  %vm1589_vm8 = vcmp.eq.f32.partialorder %v1588_v55, 8.507059e+37 }
 0x27a   : > { %v1566_v47 = vadd.f32 %v1560_v46, %v1517_v60  ;;  %v1698_v60 = vld [vmem:[#allocation2 + $0x28] sm:$0xff] }
 0x27c   : > { %v5794_v48 = vpop.eup %5793  ;;  %v5462_v37 = vmul.f32 -1.442695, %v1566_v47 }
 0x27d   : > { %v5796_v49 = vpop.eup %5795  ;;  %v1577_v44 = vadd.f32 1.0, %v5794_v48 }
 0x27e   : > { %v1580_v50 = vmul.f32 %v5796_v49, %v1576_v42  ;;  %5797 = vpow2.f32 %v5462_v37  ;;  %vm1585_vm4 = vweird.f32 %v5796_v49  ;;  %v1699_v37 = vld [vmem:[#allocation2 + $0x30] sm:$0xff] }
 0x27f   : > { %5799 = vrcp.f32 %v1577_v44  ;;  %vm1586_vm6 = vmor %vm1584_vm5, %vm1585_vm4  ;;  %v1605_v22 = vand.u32 2147483648, %v1577_v44  ;;  %v1603_v57 = vand.u32 2147483647, %v1577_v44  ;;  %vm1599_vm9 = vweird.f32 %v1577_v44 }
 0x280   : > { %v1581_v52 = vsub.f32 1.0, %v1580_v50 }
 0x281   : > { %v1606_v18 = vor.u32 1.1754944e-38, %v1605_v22  ;;  %vm1604_vm11 = vcmp.eq.f32.partialorder %v1603_v57, 8.507059e+37 }
 0x282   : > { %v1582_v53 = vmul.f32 %v5796_v49, %v1581_v52 }
 0x284   : > { %v5798_v15 = vpop.eup %5797  ;;  %v1583_v45 = vadd.f32 %v5796_v49, %v1582_v53 }
 0x285   : > { %v5800_v59 = vpop.eup %5799  ;;  %v1578_v54 = vadd.f32 1.0, %v5798_v15  ;;  %v1700_v15 = vld [vmem:[#allocation2 + $0x38] sm:$0xff] }
 0x286   : > { %v1595_v63 = vmul.f32 %v5800_v59, %v1577_v44  ;;  %v1587_v51 = vsel %vm1586_vm6, %v5796_v49, %v1583_v45  ;;  %vm1600_vm7 = vweird.f32 %v5800_v59 }
 0x287   : > { %5801 = vrcp.f32 %v1578_v54  ;;  %v1592_v16 = vsel %vm1589_vm8, %v1591_v56, %v1587_v51  ;;  %vm1601_vm10 = vmor %vm1599_vm9, %vm1600_vm7  ;;  %v1620_v62 = vand.u32 2147483648, %v1578_v54  ;;  %vm1614_vm13 = vweird.f32 %v1578_v54  ;;  %v1697_v51 = vld [vmem:[#allocation2 + $0x20] sm:$0xff] }
 0x288   : > { %v1596_v10 = vsub.f32 1.0, %v1595_v63  ;;  %5803 = vtanh.f32 %v1563_v3  ;;  %v1618_v17 = vand.u32 2147483647, %v1578_v54 }
 0x289   : > { %v1621_v25 = vor.u32 1.1754944e-38, %v1620_v62 }
 0x28a   : > { %v1597_v26 = vmul.f32 %v5800_v59, %v1596_v10  ;;  %vm1619_vm15 = vcmp.eq.f32.partialorder %v1618_v17, 8.507059e+37 }
 0x28c   : > { %v1598_v12 = vadd.f32 %v5800_v59, %v1597_v26 }
 0x28d   : > { %v5802_v14 = vpop.eup %5801 }
 0x28e   : > { %v1602_v8 = vsel %vm1601_vm10, %v5800_v59, %v1598_v12  ;;  %v1610_v28 = vmul.f32 %v5802_v14, %v1578_v54  ;;  %v5804_v9 = vpop.eup %5803  ;;  %vm1615_vm12 = vweird.f32 %v5802_v14 }
 0x28f   : > { %v1607_v2 = vsel %vm1604_vm11, %v1606_v18, %v1602_v8  ;;  %v1626_v5 = vmul.f32 %v5804_v9, %v1592_v16  ;;  %vm1616_vm14 = vmor %vm1614_vm13, %vm1615_vm12 }
 0x290   : > { %v1624_v13 = vmul.f32 0.0, %v1607_v2  ;;  %v1611_v61 = vsub.f32 1.0, %v1610_v28 }
 0x292   : > { %v6773_v19 = vadd.f32 %v1626_v5, %v1624_v13  ;;  %v1612_v21 = vmul.f32 %v5802_v14, %v1611_v61 }
 0x294   : > { %5805 = vtanh.f32 %v6773_v19  ;;  %v1613_v6 = vadd.f32 %v5802_v14, %v1612_v21 }
 0x296   : > { %v1617_v24 = vsel %vm1616_vm14, %v5802_v14, %v1613_v6 }
 0x297   : > { %v1622_v31 = vsel %vm1619_vm15, %v1621_v25, %v1617_v24 }
 0x29a   : > { %v5806_v29 = vpop.eup %5805 }
 0x29b   : > { %v1629_v23 = vmul.f32 %v5806_v29, %v1622_v31 }
 0x29d   : > { %1630 = vst.msk [vmem:[#allocation3] sm:$0xff] %vm396_vm0, %v1629_v23  ;;  %5463 = vmatmul.msk.f32.vlgmr.msrb.gmra.mxu3 %vm396_vm0, %v1629_v23  ;;  %5464 = vmatmul.msk.f32.vlgmr.msrb.gmra.mxu0 %vm396_vm0, %v1629_v23 }
 0x29e   : > { %5465 = vmatmul.msk.f32.vlgmr.msra.gmra.mxu1 %vm396_vm0, %v1629_v23  ;;  %1860 = vmatpush.msrb.mxu0 %v6783_v34 }
 0x2a0   : > { %1861 = vmatpush.msrb.mxu0 %v6789_v7 }
 0x31a   : > { %v1672_v35 = vpop.f32.mrf.mxu0 }
 0x31b   : > { %1675 = vst.msk [vmem:[#allocation5 + $0x8] sm:$0xff] %vm396_vm0, %v1672_v35  ;;  %v1693_v36 = vpop.f32.mrf.mxu1 }
 0x31c   : > { %1696 = vst.msk [vmem:[#allocation5 + $0x10] sm:$0xff] %vm396_vm0, %v1693_v36 }
 0x320   : > { %v1651_v27 = vpop.f32.mrf.mxu3 }
 0x321   : > { %1654 = vst.msk [vmem:[#allocation5] sm:$0xff] %vm396_vm0, %v1651_v27 }
 0x322   : > { %v1702_v32 = vld [vmem:[#allocation5 + $0x8] sm:$0xff] }
 0x323   : > { %v1703_v38 = vld [vmem:[#allocation5 + $0x10] sm:$0xff] }
 0x324   : > { %1717 = vmatpush.msra.mxu3 %v1703_v38 }
 0x326   : > { %1718 = vmatpush.msra.mxu3 %v1702_v32 }
 0x328   : > { %v1701_v39 = vld [vmem:[#allocation5] sm:$0xff] }
 0x329   : > { %1719 = vmatpush.msra.mxu3 %v1701_v39 }
 0x32a   : > { %5466 = vmatmul.msk.f32.vlgmr.msra.gmra.mxu3 %vm1521_vm3, %v6738_v11 }
 0x32b   : > { %2158 = vmatpush.msrb.mxu3 %v6800_v40 }
 0x32d   : > { %2159 = vmatpush.msrb.mxu3 %v6806_v41 }
 0x32f   : > { %2200 = vmatpush.msra.mxu3 %v6783_v34 }
 0x331   : > { %2201 = vmatpush.msra.mxu3 %v6789_v7 }
 0x332   : > { %5467 = vmatmul.msk.f32.gmra.mxu3 %vm1521_vm3, %v6748_v58 }
 0x33a   : > { %5468 = vmatmul.msk.f32.gmra.mxu3 %vm1521_vm3, %v6757_v4 }
 0x342   : > { %5469 = vmatmul.msk.f32.gmra.mxu3 %vm1521_vm3, %v6765_v30 }
 0x3ad   : > { %v1721_v42 = vpop.f32.mrf.mxu3 }
 0x3ae   : > { %v1733_v57 = vadd.f32 %v1721_v42, %v1697_v51 }
 0x3b5   : > { %v1724_v46 = vpop.f32.mrf.mxu3 }
 0x3b6   : > { %v1734_v47 = vadd.f32 %v1724_v46, %v1698_v60 }
 0x3b8   : > { %v5470_v48 = vmul.f32 -1.442695, %v1734_v47 }
 0x3ba   : > { %5807 = vpow2.f32 %v5470_v48 }
 0x3bd   : > { %v1727_v49 = vpop.f32.mrf.mxu3 }
 0x3be   : > { %v1735_v44 = vadd.f32 %v1727_v49, %v1699_v37 }
 0x3c0   : > { %v5808_v50 = vpop.eup %5807  ;;  %v5471_v52 = vmul.f32 -1.442695, %v1735_v44 }
 0x3c1   : > { %v1746_v53 = vadd.f32 1.0, %v5808_v50 }
 0x3c2   : > { %5809 = vpow2.f32 %v5471_v52 }
 0x3c3   : > { %5811 = vrcp.f32 %v1746_v53  ;;  %v1760_v16 = vand.u32 2147483648, %v1746_v53  ;;  %vm1754_vm2 = vweird.f32 %v1746_v53  ;;  %v1758_v18 = vand.u32 2147483647, %v1746_v53 }
 0x3c5   : > { %v1730_v1 = vpop.f32.mrf.mxu3  ;;  %v1761_v13 = vor.u32 1.1754944e-38, %v1760_v16  ;;  %vm1759_vm6 = vcmp.eq.f32.partialorder %v1758_v18, 8.507059e+37 }
 0x3c6   : > { %v1736_v59 = vadd.f32 %v1730_v1, %v1700_v15  ;;  %v1868_v15 = vld [vmem:[#allocation2 + $0x48] sm:$0xff] }
 0x3c8   : > { %v5810_v3 = vpop.eup %5809  ;;  %v5472_v54 = vmul.f32 -1.442695, %v1736_v59 }
 0x3c9   : > { %v5812_v45 = vpop.eup %5811  ;;  %v1747_v63 = vadd.f32 1.0, %v5810_v3 }
 0x3ca   : > { %v1750_v0 = vmul.f32 %v5812_v45, %v1746_v53  ;;  %5813 = vpow2.f32 %v5472_v54  ;;  %vm1755_vm1 = vweird.f32 %v5812_v45  ;;  %v1869_v54 = vld [vmem:[#allocation2 + $0x50] sm:$0xff] }
 0x3cb   : > { %5815 = vrcp.f32 %v1747_v63  ;;  %vm1756_vm4 = vmor %vm1754_vm2, %vm1755_vm1  ;;  %v1775_v28 = vand.u32 2147483648, %v1747_v63  ;;  %v1773_v5 = vand.u32 2147483647, %v1747_v63  ;;  %vm1769_vm7 = vweird.f32 %v1747_v63 }
 0x3cc   : > { %v1751_v55 = vsub.f32 1.0, %v1750_v0 }
 0x3cd   : > { %v1776_v62 = vor.u32 1.1754944e-38, %v1775_v28  ;;  %vm1774_vm9 = vcmp.eq.f32.partialorder %v1773_v5, 8.507059e+37 }
 0x3ce   : > { %v1752_v10 = vmul.f32 %v5812_v45, %v1751_v55 }
 0x3d0   : > { %v5814_v22 = vpop.eup %5813  ;;  %v1753_v12 = vadd.f32 %v5812_v45, %v1752_v10 }
 0x3d1   : > { %v5816_v26 = vpop.eup %5815  ;;  %v1748_v56 = vadd.f32 1.0, %v5814_v22  ;;  %v1870_v22 = vld [vmem:[#allocation2 + $0x58] sm:$0xff] }
 0x3d2   : > { %v1765_v14 = vmul.f32 %v5816_v26, %v1747_v63  ;;  %v1757_v9 = vsel %vm1756_vm4, %v5812_v45, %v1753_v12  ;;  %vm1770_vm5 = vweird.f32 %v5816_v26 }
 0x3d3   : > { %5817 = vrcp.f32 %v1748_v56  ;;  %v1762_v6 = vsel %vm1759_vm6, %v1761_v13, %v1757_v9  ;;  %vm1771_vm8 = vmor %vm1769_vm7, %vm1770_vm5  ;;  %v1790_v32 = vand.u32 2147483648, %v1748_v56  ;;  %vm1784_vm11 = vweird.f32 %v1748_v56  ;;  %v1867_v9 = vld [vmem:[#allocation2 + $0x40] sm:$0xff] }
 0x3d4   : > { %v1766_v8 = vsub.f32 1.0, %v1765_v14  ;;  %5819 = vtanh.f32 %v1733_v57  ;;  %v1788_v39 = vand.u32 2147483647, %v1748_v56 }
 0x3d5   : > { %v1791_v60 = vor.u32 1.1754944e-38, %v1790_v32 }
 0x3d6   : > { %v1767_v2 = vmul.f32 %v5816_v26, %v1766_v8  ;;  %vm1789_vm13 = vcmp.eq.f32.partialorder %v1788_v39, 8.507059e+37 }
 0x3d8   : > { %v1768_v61 = vadd.f32 %v5816_v26, %v1767_v2 }
 0x3d9   : > { %v5818_v21 = vpop.eup %5817 }
 0x3da   : > { %v1772_v17 = vsel %vm1771_vm8, %v5816_v26, %v1768_v61  ;;  %v1780_v24 = vmul.f32 %v5818_v21, %v1748_v56  ;;  %v5820_v25 = vpop.eup %5819  ;;  %vm1785_vm10 = vweird.f32 %v5818_v21 }
 0x3db   : > { %v1777_v29 = vsel %vm1774_vm9, %v1776_v62, %v1772_v17  ;;  %v1796_v31 = vmul.f32 %v5820_v25, %v1762_v6  ;;  %vm1786_vm12 = vmor %vm1784_vm11, %vm1785_vm10 }
 0x3dc   : > { %v1794_v23 = vmul.f32 %v1777_v29, %v6773_v19  ;;  %v1781_v35 = vsub.f32 1.0, %v1780_v24 }
 0x3de   : > { %v6818_v36 = vadd.f32 %v1796_v31, %v1794_v23  ;;  %v1782_v27 = vmul.f32 %v5818_v21, %v1781_v35 }
 0x3e0   : > { %v1783_v38 = vadd.f32 %v5818_v21, %v1782_v27  ;;  %5821 = vtanh.f32 %v6818_v36 }
 0x3e2   : > { %v1787_v42 = vsel %vm1786_vm12, %v5818_v21, %v1783_v38 }
 0x3e3   : > { %v1792_v47 = vsel %vm1789_vm13, %v1791_v60, %v1787_v42 }
 0x3e6   : > { %v5822_v46 = vpop.eup %5821 }
 0x3e7   : > { %v1799_v48 = vmul.f32 %v5822_v46, %v1792_v47 }
 0x3e9   : > { %1800 = vst.msk [vmem:[#allocation3 + $0x8] sm:$0xff] %vm396_vm0, %v1799_v48  ;;  %5473 = vmatmul.msk.f32.vlgmr.msra.gmra.mxu0 %vm396_vm0, %v1799_v48  ;;  %5474 = vmatmul.msk.f32.vlgmr.msrb.gmra.mxu1 %vm396_vm0, %v1799_v48 }
 0x3ea   : > { %1988 = vmatpush.msra.mxu0 %v6800_v40 }
 0x3ec   : > { %1989 = vmatpush.msra.mxu0 %v6806_v41 }
 0x3f1   : > { %5475 = vmatmul.msk.f32.vlgmr.msrb.gmra.mxu0 %vm396_vm0, %v1799_v48 }
 0x3f2   : > { %2030 = vmatpush.msrb.mxu0 %v6783_v34 }
 0x3f4   : > { %2031 = vmatpush.msrb.mxu0 %v6789_v7 }
 0x466   : > { %v1821_v19 = vpop.f32.mrf.mxu0  ;;  %v1842_v37 = vpop.f32.mrf.mxu1 }
 0x467   : > { %1824 = vst.msk [vmem:[#allocation5] sm:$0xff] %vm396_vm0, %v1821_v19 }
 0x468   : > { %1845 = vst.msk [vmem:[#allocation5 + $0x8] sm:$0xff] %vm396_vm0, %v1842_v37 }
 0x46e   : > { %v1863_v49 = vpop.f32.mrf.mxu0  ;;  %v1871_v52 = vld [vmem:[#allocation5] sm:$0xff] }
 0x46f   : > { %1866 = vst.msk [vmem:[#allocation5 + $0x10] sm:$0xff] %vm396_vm0, %v1863_v49  ;;  %v1872_v50 = vld [vmem:[#allocation5 + $0x8] sm:$0xff] }
 0x476   : > { %v1873_v44 = vld [vmem:[#allocation5 + $0x10] sm:$0xff] }
 0x477   : > { %1887 = vmatpush.msra.mxu1 %v1873_v44 }
 0x479   : > { %1888 = vmatpush.msra.mxu1 %v1872_v50 }
 0x47b   : > { %1889 = vmatpush.msra.mxu1 %v1871_v52 }
 0x47c   : > { %5476 = vmatmul.msk.f32.vlgmr.msra.gmra.mxu1 %vm1521_vm3, %v6738_v11 }
 0x47d   : > { %2328 = vmatpush.msrb.mxu1 %v6800_v40 }
 0x47f   : > { %2329 = vmatpush.msrb.mxu1 %v6806_v41 }
 0x481   : > { %2370 = vmatpush.msra.mxu1 %v6783_v34 }
 0x483   : > { %2371 = vmatpush.msra.mxu1 %v6789_v7 }
 0x484   : > { %5477 = vmatmul.msk.f32.gmra.mxu1 %vm1521_vm3, %v6748_v58 }
 0x48c   : > { %5478 = vmatmul.msk.f32.gmra.mxu1 %vm1521_vm3, %v6757_v4 }
 0x494   : > { %5479 = vmatmul.msk.f32.gmra.mxu1 %vm1521_vm3, %v6765_v30 }
 0x4f9   : > { %v1891_v53 = vpop.f32.mrf.mxu1 }
 0x4fa   : > { %v1903_v5 = vadd.f32 %v1891_v53, %v1867_v9 }
 0x501   : > { %v1894_v1 = vpop.f32.mrf.mxu1 }
 0x502   : > { %v1904_v59 = vadd.f32 %v1894_v1, %v1868_v15 }
 0x504   : > { %v5480_v3 = vmul.f32 -1.442695, %v1904_v59 }
 0x506   : > { %5823 = vpow2.f32 %v5480_v3 }
 0x509   : > { %v1897_v45 = vpop.f32.mrf.mxu1 }
 0x50a   : > { %v1905_v63 = vadd.f32 %v1897_v45, %v1869_v54  ;;  %v6860_v54 = vld [vmem:[%s7745_s1 + $0x10] sm:$0xff] }
 0x50c   : > { %v5824_v0 = vpop.eup %5823  ;;  %v5481_v55 = vmul.f32 -1.442695, %v1905_v63 }
 0x50d   : > { %v1916_v10 = vadd.f32 1.0, %v5824_v0 }
 0x50e   : > { %5825 = vpow2.f32 %v5481_v55 }
 0x50f   : > { %5827 = vrcp.f32 %v1916_v10  ;;  %v1930_v6 = vand.u32 2147483648, %v1916_v10  ;;  %vm1924_vm15 = vweird.f32 %v1916_v10  ;;  %v1928_v62 = vand.u32 2147483647, %v1916_v10 }
 0x511   : > { %v1900_v51 = vpop.f32.mrf.mxu1  ;;  %v1931_v23 = vor.u32 1.1754944e-38, %v1930_v6  ;;  %vm1929_vm4 = vcmp.eq.f32.partialorder %v1928_v62, 8.507059e+37 }
 0x512   : > { %v1906_v26 = vadd.f32 %v1900_v51, %v1870_v22 }
 0x514   : > { %v5826_v57 = vpop.eup %5825  ;;  %v5482_v56 = vmul.f32 -1.442695, %v1906_v26  ;;  %v2038_v26 = vld [vmem:[#allocation2 + $0x68] sm:$0xff] }
 0x515   : > { %v5828_v12 = vpop.eup %5827  ;;  %v1917_v14 = vadd.f32 1.0, %v5826_v57 }
 0x516   : > { %v1920_v16 = vmul.f32 %v5828_v12, %v1916_v10  ;;  %5829 = vpow2.f32 %v5482_v56  ;;  %vm1925_vm14 = vweird.f32 %v5828_v12 }
 0x517   : > { %5831 = vrcp.f32 %v1917_v14  ;;  %vm1926_vm1 = vmor %vm1924_vm15, %vm1925_vm14  ;;  %v1945_v24 = vand.u32 2147483648, %v1917_v14  ;;  %v1943_v31 = vand.u32 2147483647, %v1917_v14  ;;  %vm1939_vm5 = vweird.f32 %v1917_v14 }
 0x518   : > { %v1921_v18 = vsub.f32 1.0, %v1920_v16 }
 0x519   : > { %v1946_v32 = vor.u32 1.1754944e-38, %v1945_v24  ;;  %vm1944_vm7 = vcmp.eq.f32.partialorder %v1943_v31, 8.507059e+37  ;;  %v2037_v31 = vld [vmem:[#allocation2 + $0x60] sm:$0xff] }
 0x51a   : > { %v1922_v8 = vmul.f32 %v5828_v12, %v1921_v18 }
 0x51c   : > { %v5830_v28 = vpop.eup %5829  ;;  %v1923_v61 = vadd.f32 %v5828_v12, %v1922_v8 }
 0x51d   : > { %v5832_v2 = vpop.eup %5831  ;;  %v1918_v13 = vadd.f32 1.0, %v5830_v28 }
 0x51e   : > { %v1935_v21 = vmul.f32 %v5832_v2, %v1917_v14  ;;  %v1927_v25 = vsel %vm1926_vm1, %v5828_v12, %v1923_v61  ;;  %vm1940_vm2 = vweird.f32 %v5832_v2  ;;  %v2039_v14 = vld [vmem:[#allocation2 + $0x70] sm:$0xff] }
 0x51f   : > { %5833 = vrcp.f32 %v1918_v13  ;;  %v1932_v38 = vsel %vm1929_vm4, %v1931_v23, %v1927_v25  ;;  %vm1941_vm6 = vmor %vm1939_vm5, %vm1940_vm2  ;;  %v1960_v50 = vand.u32 2147483648, %v1918_v13  ;;  %vm1954_vm9 = vweird.f32 %v1918_v13 }
 0x520   : > { %v1936_v17 = vsub.f32 1.0, %v1935_v21  ;;  %5835 = vtanh.f32 %v1903_v5  ;;  %v1958_v52 = vand.u32 2147483647, %v1918_v13 }
 0x521   : > { %v1961_v15 = vor.u32 1.1754944e-38, %v1960_v50 }
 0x522   : > { %v1937_v29 = vmul.f32 %v5832_v2, %v1936_v17  ;;  %vm1959_vm11 = vcmp.eq.f32.partialorder %v1958_v52, 8.507059e+37 }
 0x524   : > { %v1938_v35 = vadd.f32 %v5832_v2, %v1937_v29 }
 0x525   : > { %v5834_v27 = vpop.eup %5833 }
 0x526   : > { %v1942_v39 = vsel %vm1941_vm6, %v5832_v2, %v1938_v35  ;;  %v1950_v42 = vmul.f32 %v5834_v27, %v1918_v13  ;;  %v5836_v60 = vpop.eup %5835  ;;  %vm1955_vm8 = vweird.f32 %v5834_v27  ;;  %v2040_v2 = vld [vmem:[#allocation2 + $0x78] sm:$0xff] }
 0x527   : > { %v1947_v46 = vsel %vm1944_vm7, %v1946_v32, %v1942_v39  ;;  %v1966_v47 = vmul.f32 %v5836_v60, %v1932_v38  ;;  %vm1956_vm10 = vmor %vm1954_vm9, %vm1955_vm8 }
 0x528   : > { %v1964_v48 = vmul.f32 %v1947_v46, %v6818_v36  ;;  %v1951_v19 = vsub.f32 1.0, %v1950_v42  ;;  %v6854_v36 = vld [vmem:[%s7745_s1 + $0x18] sm:$0xff] }
 0x52a   : > { %v6845_v37 = vadd.f32 %v1966_v47, %v1964_v48  ;;  %v1952_v49 = vmul.f32 %v5834_v27, %v1951_v19 }
 0x52c   : > { %v1953_v44 = vadd.f32 %v5834_v27, %v1952_v49  ;;  %5837 = vtanh.f32 %v6845_v37 }
 0x52e   : > { %v1957_v53 = vsel %vm1956_vm10, %v5834_v27, %v1953_v44 }
 0x52f   : > { %v1962_v59 = vsel %vm1959_vm11, %v1961_v15, %v1957_v53 }
 0x532   : > { %v5838_v1 = vpop.eup %5837 }
 0x533   : > { %v1969_v3 = vmul.f32 %v5838_v1, %v1962_v59 }
 0x535   : > { %1970 = vst.msk [vmem:[#allocation3 + $0x10] sm:$0xff] %vm396_vm0, %v1969_v3  ;;  %5483 = vmatmul.msk.f32.vlgmr.msra.gmra.mxu0 %vm396_vm0, %v1969_v3  ;;  %5484 = vmatmul.msk.f32.vlgmr.msra.gmra.mxu2 %vm396_vm0, %v1969_v3 }
 0x536   : > { %2179 = vmatpush.msra.mxu0 %v6854_v36 }
 0x538   : > { %2180 = vmatpush.msra.mxu0 %v6860_v54 }
 0x53d   : > { %5485 = vmatmul.msk.f32.vlgmr.msrb.gmra.mxu0 %vm396_vm0, %v1969_v3 }
 0x5b2   : > { %v1991_v45 = vpop.f32.mrf.mxu0 }
 0x5b3   : > { %1994 = vst.msk [vmem:[#allocation5] sm:$0xff] %vm396_vm0, %v1991_v45 }
 0x5b8   : > { %v2012_v63 = vpop.f32.mrf.mxu2 }
 0x5b9   : > { %2015 = vst.msk [vmem:[#allocation5 + $0x8] sm:$0xff] %vm396_vm0, %v2012_v63 }
 0x5ba   : > { %v2033_v0 = vpop.f32.mrf.mxu0  ;;  %v2041_v22 = vld [vmem:[#allocation5] sm:$0xff] }
 0x5bb   : > { %2036 = vst.msk [vmem:[#allocation5 + $0x10] sm:$0xff] %vm396_vm0, %v2033_v0 }
 0x5c0   : > { %v2042_v10 = vld [vmem:[#allocation5 + $0x8] sm:$0xff] }
 0x5c2   : > { %v2043_v55 = vld [vmem:[#allocation5 + $0x10] sm:$0xff] }
 0x5c3   : > { %2057 = vmatpush.msrb.mxu2 %v2043_v55 }
 0x5c5   : > { %2058 = vmatpush.msrb.mxu2 %v2042_v10 }
 0x5c7   : > { %2059 = vmatpush.msrb.mxu2 %v2041_v22 }
 0x5c8   : > { %5486 = vmatmul.msk.f32.vlgmr.msrb.gmra.mxu2 %vm1521_vm3, %v6738_v11 }
 0x5c9   : > { %2519 = vmatpush.msra.mxu2 %v6854_v36 }
 0x5cb   : > { %2520 = vmatpush.msra.mxu2 %v6860_v54 }
 0x5d0   : > { %5487 = vmatmul.msk.f32.gmra.mxu2 %vm1521_vm3, %v6748_v58 }
 0x5d8   : > { %5488 = vmatmul.msk.f32.gmra.mxu2 %vm1521_vm3, %v6757_v4 }
 0x5e0   : > { %5489 = vmatmul.msk.f32.gmra.mxu2 %vm1521_vm3, %v6765_v30 }
 0x64b   : > { %v2061_v51 = vpop.f32.mrf.mxu2 }
 0x64c   : > { %v2073_v35 = vadd.f32 %v2061_v51, %v2037_v31 }
 0x653   : > { %v2064_v57 = vpop.f32.mrf.mxu2 }
 0x654   : > { %v2074_v56 = vadd.f32 %v2064_v57, %v2038_v26 }
 0x656   : > { %v5490_v12 = vmul.f32 -1.442695, %v2074_v56 }
 0x658   : > { %5839 = vpow2.f32 %v5490_v12 }
 0x65b   : > { %v2067_v16 = vpop.f32.mrf.mxu2 }
 0x65c   : > { %v2075_v18 = vadd.f32 %v2067_v16, %v2039_v14 }
 0x65e   : > { %v5840_v8 = vpop.eup %5839  ;;  %v5491_v28 = vmul.f32 -1.442695, %v2075_v18 }
 0x65f   : > { %v2086_v9 = vadd.f32 1.0, %v5840_v8 }
 0x660   : > { %5841 = vpow2.f32 %v5491_v28 }
 0x661   : > { %5843 = vrcp.f32 %v2086_v9  ;;  %v2100_v39 = vand.u32 2147483648, %v2086_v9  ;;  %vm2094_vm13 = vweird.f32 %v2086_v9  ;;  %v2098_v42 = vand.u32 2147483647, %v2086_v9 }
 0x663   : > { %v2070_v5 = vpop.f32.mrf.mxu2  ;;  %v2101_v49 = vor.u32 1.1754944e-38, %v2100_v39  ;;  %vm2099_vm1 = vcmp.eq.f32.partialorder %v2098_v42, 8.507059e+37 }
 0x664   : > { %v2076_v13 = vadd.f32 %v2070_v5, %v2040_v2 }
 0x666   : > { %v5842_v61 = vpop.eup %5841  ;;  %v5492_v21 = vmul.f32 -1.442695, %v2076_v13  ;;  %v2208_v13 = vld [vmem:[#allocation2 + $0x88] sm:$0xff] }
 0x667   : > { %v5844_v6 = vpop.eup %5843  ;;  %v2087_v62 = vadd.f32 1.0, %v5842_v61 }
 0x668   : > { %v2090_v17 = vmul.f32 %v5844_v6, %v2086_v9  ;;  %5845 = vpow2.f32 %v5492_v21  ;;  %vm2095_vm12 = vweird.f32 %v5844_v6 }
 0x669   : > { %5847 = vrcp.f32 %v2087_v62  ;;  %vm2096_vm14 = vmor %vm2094_vm13, %vm2095_vm12  ;;  %v2115_v46 = vand.u32 2147483648, %v2087_v62  ;;  %v2113_v19 = vand.u32 2147483647, %v2087_v62  ;;  %vm2109_vm2 = vweird.f32 %v2087_v62 }
 0x66a   : > { %v2091_v24 = vsub.f32 1.0, %v2090_v17 }
 0x66b   : > { %v2116_v53 = vor.u32 1.1754944e-38, %v2115_v46  ;;  %vm2114_vm5 = vcmp.eq.f32.partialorder %v2113_v19, 8.507059e+37 }
 0x66c   : > { %v2092_v25 = vmul.f32 %v5844_v6, %v2091_v24 }
 0x66e   : > { %v5846_v29 = vpop.eup %5845  ;;  %v2093_v38 = vadd.f32 %v5844_v6, %v2092_v25 }
 0x66f   : > { %v5848_v23 = vpop.eup %5847  ;;  %v2088_v27 = vadd.f32 1.0, %v5846_v29 }
 0x670   : > { %v2105_v32 = vmul.f32 %v5848_v23, %v2087_v62  ;;  %v2097_v47 = vsel %vm2096_vm14, %v5844_v6, %v2093_v38  ;;  %vm2110_vm15 = vweird.f32 %v5848_v23  ;;  %v2209_v6 = vld [vmem:[#allocation2 + $0x90] sm:$0xff] }
 0x671   : > { %5849 = vrcp.f32 %v2088_v27  ;;  %v2102_v52 = vsel %vm2099_vm1, %v2101_v49, %v2097_v47  ;;  %vm2111_vm4 = vmor %vm2109_vm2, %vm2110_vm15  ;;  %v2130_v51 = vand.u32 2147483648, %v2088_v27  ;;  %vm2124_vm7 = vweird.f32 %v2088_v27 }
 0x672   : > { %v2106_v60 = vsub.f32 1.0, %v2105_v32  ;;  %5851 = vtanh.f32 %v2073_v35  ;;  %v2128_v26 = vand.u32 2147483647, %v2088_v27 }
 0x673   : > { %v2131_v56 = vor.u32 1.1754944e-38, %v2130_v51 }
 0x674   : > { %v2107_v48 = vmul.f32 %v5848_v23, %v2106_v60  ;;  %vm2129_vm9 = vcmp.eq.f32.partialorder %v2128_v26, 8.507059e+37  ;;  %v2207_v60 = vld [vmem:[#allocation2 + $0x80] sm:$0xff] }
 0x676   : > { %v2108_v44 = vadd.f32 %v5848_v23, %v2107_v48 }
 0x677   : > { %v5850_v50 = vpop.eup %5849 }
 0x678   : > { %v2112_v15 = vsel %vm2111_vm4, %v5848_v23, %v2108_v44  ;;  %v2120_v1 = vmul.f32 %v5850_v50, %v2088_v27  ;;  %v5852_v59 = vpop.eup %5851  ;;  %vm2125_vm6 = vweird.f32 %v5850_v50 }
 0x679   : > { %v2117_v3 = vsel %vm2114_vm5, %v2116_v53, %v2112_v15  ;;  %v2136_v45 = vmul.f32 %v5852_v59, %v2102_v52  ;;  %vm2126_vm8 = vmor %vm2124_vm7, %vm2125_vm6 }
 0x67a   : > { %v2134_v63 = vmul.f32 %v2117_v3, %v6845_v37  ;;  %v2121_v0 = vsub.f32 1.0, %v2120_v1 }
 0x67c   : > { %v6878_v55 = vadd.f32 %v2136_v45, %v2134_v63  ;;  %v2122_v10 = vmul.f32 %v5850_v50, %v2121_v0 }
 0x67e   : > { %v2123_v22 = vadd.f32 %v5850_v50, %v2122_v10  ;;  %5853 = vtanh.f32 %v6878_v55 }
 0x680   : > { %v2127_v57 = vsel %vm2126_vm8, %v5850_v50, %v2123_v22 }
 0x681   : > { %v2132_v14 = vsel %vm2129_vm9, %v2131_v56, %v2127_v57 }
 0x684   : > { %v5854_v12 = vpop.eup %5853 }
 0x685   : > { %v2139_v16 = vmul.f32 %v5854_v12, %v2132_v14 }
 0x687   : > { %2140 = vst.msk [vmem:[#allocation3 + $0x18] sm:$0xff] %vm396_vm0, %v2139_v16  ;;  %5493 = vmatmul.msk.f32.vlgmr.msrb.gmra.mxu3 %vm396_vm0, %v2139_v16  ;;  %5494 = vmatmul.msk.f32.vlgmr.msra.gmra.mxu0 %vm396_vm0, %v2139_v16 }
 0x688   : > { %2349 = vmatpush.msrb.mxu3 %v6854_v36 }
 0x68a   : > { %2350 = vmatpush.msrb.mxu3 %v6860_v54 }
 0x68f   : > { %5495 = vmatmul.msk.f32.vlgmr.msra.gmra.mxu3 %vm396_vm0, %v2139_v16 }
 0x704   : > { %v2182_v37 = vpop.f32.mrf.mxu0 }
 0x705   : > { %2185 = vst.msk [vmem:[#allocation5 + $0x8] sm:$0xff] %vm396_vm0, %v2182_v37 }
 0x70a   : > { %v2161_v18 = vpop.f32.mrf.mxu3 }
 0x70b   : > { %2164 = vst.msk [vmem:[#allocation5] sm:$0xff] %vm396_vm0, %v2161_v18 }
 0x70c   : > { %v2212_v9 = vld [vmem:[#allocation5 + $0x8] sm:$0xff] }
 0x712   : > { %v2203_v8 = vpop.f32.mrf.mxu3  ;;  %v2211_v2 = vld [vmem:[#allocation5] sm:$0xff] }
 0x713   : > { %2206 = vst.msk [vmem:[#allocation5 + $0x10] sm:$0xff] %vm396_vm0, %v2203_v8 }
 0x71a   : > { %v2213_v28 = vld [vmem:[#allocation5 + $0x10] sm:$0xff] }
 0x71b   : > { %2227 = vmatpush.msrb.mxu0 %v2213_v28 }
 0x71d   : > { %2228 = vmatpush.msrb.mxu0 %v2212_v9 }
 0x71f   : > { %2229 = vmatpush.msrb.mxu0 %v2211_v2 }
 0x720   : > { %5496 = vmatmul.msk.f32.vlgmr.msrb.gmra.mxu0 %vm1521_vm3, %v6738_v11 }
 0x721   : > { %2668 = vmatpush.msra.mxu0 %v6800_v40 }
 0x723   : > { %2669 = vmatpush.msra.mxu0 %v6806_v41 }
 0x725   : > { %2710 = vmatpush.msrb.mxu0 %v6783_v34 }
 0x727   : > { %2711 = vmatpush.msrb.mxu0 %v6789_v7 }
 0x728   : > { %5497 = vmatmul.msk.f32.gmra.mxu0 %vm1521_vm3, %v6748_v58  ;;  %v2210_v58 = vld [vmem:[#allocation2 + $0x98] sm:$0xff] }
 0x730   : > { %5498 = vmatmul.msk.f32.gmra.mxu0 %vm1521_vm3, %v6757_v4 }
 0x738   : > { %5499 = vmatmul.msk.f32.gmra.mxu0 %vm1521_vm3, %v6765_v30 }
 0x79d   : > { %v2231_v5 = vpop.f32.mrf.mxu0 }
 0x79e   : > { %v2243_v47 = vadd.f32 %v2231_v5, %v2207_v60 }
 0x7a5   : > { %v2234_v11 = vpop.f32.mrf.mxu0 }
 0x7a6   : > { %v2244_v61 = vadd.f32 %v2234_v11, %v2208_v13 }
 0x7a8   : > { %v5500_v21 = vmul.f32 -1.442695, %v2244_v61 }
 0x7aa   : > { %5855 = vpow2.f32 %v5500_v21 }
 0x7ad   : > { %v2237_v62 = vpop.f32.mrf.mxu0 }
 0x7ae   : > { %v2245_v17 = vadd.f32 %v2237_v62, %v2209_v6 }
 0x7b0   : > { %v5856_v24 = vpop.eup %5855  ;;  %v5501_v25 = vmul.f32 -1.442695, %v2245_v17 }
 0x7b1   : > { %v2256_v29 = vadd.f32 1.0, %v5856_v24  ;;  %v6936_v24 = vld [vmem:[%s7747_s3 + $0x10] sm:$0xff] }
 0x7b2   : > { %5857 = vpow2.f32 %v5501_v25  ;;  %v6951_v25 = vld [vmem:[#allocation3 + $0x8] sm:$0xff] }
 0x7b3   : > { %5859 = vrcp.f32 %v2256_v29  ;;  %v2270_v44 = vand.u32 2147483648, %v2256_v29  ;;  %vm2264_vm11 = vweird.f32 %v2256_v29  ;;  %v2268_v50 = vand.u32 2147483647, %v2256_v29 }
 0x7b5   : > { %v2240_v31 = vpop.f32.mrf.mxu0  ;;  %v2271_v3 = vor.u32 1.1754944e-38, %v2270_v44  ;;  %vm2269_vm14 = vcmp.eq.f32.partialorder %v2268_v50, 8.507059e+37 }
 0x7b6   : > { %v2246_v4 = vadd.f32 %v2240_v31, %v2210_v58  ;;  %v6959_v58 = vld [vmem:[#allocation3 + $0x18] sm:$0xff] }
 0x7b8   : > { %v5858_v23 = vpop.eup %5857  ;;  %v5502_v35 = vmul.f32 -1.442695, %v2246_v4 }
 0x7b9   : > { %v5860_v30 = vpop.eup %5859  ;;  %v2257_v27 = vadd.f32 1.0, %v5858_v23  ;;  %v2378_v23 = vld [vmem:[#allocation2 + $0xa8] sm:$0xff] }
 0x7ba   : > { %v2260_v38 = vmul.f32 %v5860_v30, %v2256_v29  ;;  %5861 = vpow2.f32 %v5502_v35  ;;  %vm2265_vm10 = vweird.f32 %v5860_v30  ;;  %v6955_v29 = vld [vmem:[#allocation3 + $0x10] sm:$0xff] }
 0x7bb   : > { %5863 = vrcp.f32 %v2257_v27  ;;  %vm2266_vm12 = vmor %vm2264_vm11, %vm2265_vm10  ;;  %v2285_v53 = vand.u32 2147483648, %v2257_v27  ;;  %v2283_v59 = vand.u32 2147483647, %v2257_v27  ;;  %vm2279_vm15 = vweird.f32 %v2257_v27 }
 0x7bc   : > { %v2261_v32 = vsub.f32 1.0, %v2260_v38  ;;  %v2379_v38 = vld [vmem:[#allocation2 + $0xb0] sm:$0xff] }
 0x7bd   : > { %v2286_v10 = vor.u32 1.1754944e-38, %v2285_v53  ;;  %vm2284_vm2 = vcmp.eq.f32.partialorder %v2283_v59, 8.507059e+37 }
 0x7be   : > { %v2262_v39 = vmul.f32 %v5860_v30, %v2261_v32 }
 0x7c0   : > { %v5862_v42 = vpop.eup %5861  ;;  %v2263_v19 = vadd.f32 %v5860_v30, %v2262_v39 }
 0x7c1   : > { %v5864_v46 = vpop.eup %5863  ;;  %v2258_v48 = vadd.f32 1.0, %v5862_v42 }
 0x7c2   : > { %v2275_v49 = vmul.f32 %v5864_v46, %v2257_v27  ;;  %v2267_v15 = vsel %vm2266_vm12, %v5860_v30, %v2263_v19  ;;  %vm2280_vm13 = vweird.f32 %v5864_v46 }
 0x7c3   : > { %5865 = vrcp.f32 %v2258_v48  ;;  %v2272_v0 = vsel %vm2269_vm14, %v2271_v3, %v2267_v15  ;;  %vm2281_vm1 = vmor %vm2279_vm15, %vm2280_vm13  ;;  %v2300_v8 = vand.u32 2147483648, %v2258_v48  ;;  %vm2294_vm5 = vweird.f32 %v2258_v48  ;;  %v2377_v3 = vld [vmem:[#allocation2 + $0xa0] sm:$0xff] }
 0x7c4   : > { %v2276_v52 = vsub.f32 1.0, %v2275_v49  ;;  %5867 = vtanh.f32 %v2243_v47  ;;  %v2298_v28 = vand.u32 2147483647, %v2258_v48  ;;  %v2380_v47 = vld [vmem:[#allocation2 + $0xb8] sm:$0xff] }
 0x7c5   : > { %v2301_v2 = vor.u32 1.1754944e-38, %v2300_v8 }
 0x7c6   : > { %v2277_v1 = vmul.f32 %v5864_v46, %v2276_v52  ;;  %vm2299_vm7 = vcmp.eq.f32.partialorder %v2298_v28, 8.507059e+37 }
 0x7c8   : > { %v2278_v45 = vadd.f32 %v5864_v46, %v2277_v1 }
 0x7c9   : > { %v5866_v63 = vpop.eup %5865 }
 0x7ca   : > { %v2282_v22 = vsel %vm2281_vm1, %v5864_v46, %v2278_v45  ;;  %v2290_v51 = vmul.f32 %v5866_v63, %v2258_v48  ;;  %v5868_v26 = vpop.eup %5867  ;;  %vm2295_vm4 = vweird.f32 %v5866_v63 }
 0x7cb   : > { %v2287_v57 = vsel %vm2284_vm2, %v2286_v10, %v2282_v22  ;;  %v2306_v56 = vmul.f32 %v5868_v26, %v2272_v0  ;;  %vm2296_vm6 = vmor %vm2294_vm5, %vm2295_vm4 }
 0x7cc   : > { %v2304_v12 = vmul.f32 %v2287_v57, %v6878_v55  ;;  %v2291_v14 = vsub.f32 1.0, %v2290_v51 }
 0x7ce   : > { %v6903_v16 = vadd.f32 %v2306_v56, %v2304_v12  ;;  %v2292_v37 = vmul.f32 %v5866_v63, %v2291_v14 }
 0x7d0   : > { %v2293_v18 = vadd.f32 %v5866_v63, %v2292_v37  ;;  %5869 = vtanh.f32 %v6903_v16 }
 0x7d2   : > { %v2297_v9 = vsel %vm2296_vm6, %v5866_v63, %v2293_v18 }
 0x7d3   : > { %v2302_v13 = vsel %vm2299_vm7, %v2301_v2, %v2297_v9 }
 0x7d6   : > { %v5870_v5 = vpop.eup %5869 }
 0x7d7   : > { %v2309_v11 = vmul.f32 %v5870_v5, %v2302_v13 }
 0x7d9   : > { %2310 = vst.msk [vmem:[#allocation3 + $0x20] sm:$0xff] %vm396_vm0, %v2309_v11  ;;  %5503 = vmatmul.msk.f32.vlgmr.msrb.gmra.mxu1 %vm396_vm0, %v2309_v11  ;;  %5504 = vmatmul.msk.f32.vlgmr.msrb.gmra.mxu3 %vm396_vm0, %v2309_v11 }
 0x7da   : > { %2498 = vmatpush.msrb.mxu1 %v6800_v40 }
 0x7dc   : > { %2499 = vmatpush.msrb.mxu1 %v6806_v41 }
 0x7e0   : > { %v6963_v31 = vld [vmem:[#allocation3 + $0x20] sm:$0xff] }
 0x7e1   : > { %5505 = vmatmul.msk.f32.vlgmr.msra.gmra.mxu1 %vm396_vm0, %v2309_v11 }
 0x7e2   : > { %2540 = vmatpush.msra.mxu1 %v6783_v34  ;;  %v6920_v34 = vld [vmem:[%s7747_s3] sm:$0xff] }
 0x7e4   : > { %2541 = vmatpush.msra.mxu1 %v6789_v7  ;;  %v6929_v7 = vld [vmem:[%s7747_s3 + $0x8] sm:$0xff] }
 0x856   : > { %v2331_v55 = vpop.f32.mrf.mxu1 }
 0x857   : > { %2334 = vst.msk [vmem:[#allocation5] sm:$0xff] %vm396_vm0, %v2331_v55 }
 0x85c   : > { %v2352_v61 = vpop.f32.mrf.mxu3 }
 0x85d   : > { %2355 = vst.msk [vmem:[#allocation5 + $0x8] sm:$0xff] %vm396_vm0, %v2352_v61 }
 0x85e   : > { %v2373_v21 = vpop.f32.mrf.mxu1  ;;  %v2381_v17 = vld [vmem:[#allocation5] sm:$0xff] }
 0x85f   : > { %2376 = vst.msk [vmem:[#allocation5 + $0x10] sm:$0xff] %vm396_vm0, %v2373_v21 }
 0x864   : > { %v2382_v62 = vld [vmem:[#allocation5 + $0x8] sm:$0xff] }
 0x866   : > { %v2383_v6 = vld [vmem:[#allocation5 + $0x10] sm:$0xff] }
 0x867   : > { %2397 = vmatpush.msra.mxu3 %v2383_v6 }
 0x869   : > { %2398 = vmatpush.msra.mxu3 %v2382_v62 }
 0x86b   : > { %2399 = vmatpush.msra.mxu3 %v2381_v17 }
 0x86c   : > { %5506 = vmatmul.msk.f32.vlgmr.msra.gmra.mxu3 %vm1521_vm3, %v6920_v34 }
 0x86d   : > { %2891 = vmatpush.msrb.mxu3 %v6800_v40  ;;  %v6943_v40 = vld [vmem:[%s7747_s3 + $0x18] sm:$0xff] }
 0x86f   : > { %2892 = vmatpush.msrb.mxu3 %v6806_v41  ;;  %v6947_v41 = vld [vmem:[#allocation3] sm:$0xff] }
 0x874   : > { %5507 = vmatmul.msk.f32.gmra.mxu3 %vm1521_vm3, %v6929_v7 }
 0x87c   : > { %5508 = vmatmul.msk.f32.gmra.mxu3 %vm1521_vm3, %v6936_v24 }
 0x884   : > { %5509 = vmatmul.msk.f32.gmra.mxu3 %vm1521_vm3, %v6943_v40 }
 0x88c   : > { %5533 = vmatmul.msk.f32.vlgmr.msrb.gmra.mxu3 %vm396_vm0, %v6947_v41 }
 0x894   : > { %5534 = vmatmul.msk.f32.gmra.mxu3 %vm396_vm0, %v6951_v25 }
 0x89c   : > { %5535 = vmatmul.msk.f32.gmra.mxu3 %vm396_vm0, %v6955_v29 }
 0x8a4   : > { %5536 = vmatmul.msk.f32.gmra.mxu3 %vm396_vm0, %v6959_v58 }
 0x8ac   : > { %5537 = vmatmul.msk.f32.gmra.mxu3 %vm396_vm0, %v6963_v31 }
 0x8ef   : > { %v2401_v4 = vpop.f32.mrf.mxu3 }
 0x8f0   : > { %v2413_v63 = vadd.f32 %v2401_v4, %v2377_v3  ;;  %v2549_v3 = vld [vmem:[#allocation2 + $0xd0] sm:$0xff] }
 0x8f7   : > { %v2404_v35 = vpop.f32.mrf.mxu3 }
 0x8f8   : > { %v2414_v30 = vadd.f32 %v2404_v35, %v2378_v23 }
 0x8fa   : > { %v5510_v27 = vmul.f32 -1.442695, %v2414_v30 }
 0x8fc   : > { %5871 = vpow2.f32 %v5510_v27 }
 0x8ff   : > { %v2407_v32 = vpop.f32.mrf.mxu3 }
 0x900   : > { %v2415_v39 = vadd.f32 %v2407_v32, %v2379_v38 }
 0x902   : > { %v5872_v42 = vpop.eup %5871  ;;  %v5511_v60 = vmul.f32 -1.442695, %v2415_v39 }
 0x903   : > { %v2426_v46 = vadd.f32 1.0, %v5872_v42 }
 0x904   : > { %5873 = vpow2.f32 %v5511_v60 }
 0x905   : > { %5875 = vrcp.f32 %v2426_v46  ;;  %v2440_v51 = vand.u32 2147483648, %v2426_v46  ;;  %vm2434_vm9 = vweird.f32 %v2426_v46  ;;  %v2438_v26 = vand.u32 2147483647, %v2426_v46 }
 0x907   : > { %v2410_v48 = vpop.f32.mrf.mxu3  ;;  %v2441_v18 = vor.u32 1.1754944e-38, %v2440_v51  ;;  %vm2439_vm12 = vcmp.eq.f32.partialorder %v2438_v26, 8.507059e+37  ;;  %v2550_v26 = vld [vmem:[#allocation2 + $0xd8] sm:$0xff] }
 0x908   : > { %v2416_v19 = vadd.f32 %v2410_v48, %v2380_v47 }
 0x90a   : > { %v5874_v49 = vpop.eup %5873  ;;  %v5512_v44 = vmul.f32 -1.442695, %v2416_v19 }
 0x90b   : > { %v5876_v50 = vpop.eup %5875  ;;  %v2427_v52 = vadd.f32 1.0, %v5874_v49  ;;  %v6989_v49 = vld [vmem:[%s7745_s1 + $0x28] sm:$0xff] }
 0x90c   : > { %v2430_v53 = vmul.f32 %v5876_v50, %v2426_v46  ;;  %5877 = vpow2.f32 %v5512_v44  ;;  %vm2435_vm8 = vweird.f32 %v5876_v50  ;;  %v6995_v44 = vld [vmem:[%s7745_s1 + $0x20] sm:$0xff] }
 0x90d   : > { %5879 = vrcp.f32 %v2427_v52  ;;  %vm2436_vm10 = vmor %vm2434_vm9, %vm2435_vm8  ;;  %v2455_v56 = vand.u32 2147483648, %v2427_v52  ;;  %v2453_v37 = vand.u32 2147483647, %v2427_v52  ;;  %vm2449_vm13 = vweird.f32 %v2427_v52 }
 0x90e   : > { %v2431_v15 = vsub.f32 1.0, %v2430_v53 }
 0x90f   : > { %v2456_v2 = vor.u32 1.1754944e-38, %v2455_v56  ;;  %vm2454_vm15 = vcmp.eq.f32.partialorder %v2453_v37, 8.507059e+37 }
 0x910   : > { %v2432_v1 = vmul.f32 %v5876_v50, %v2431_v15 }
 0x912   : > { %v5878_v59 = vpop.eup %5877  ;;  %v2433_v10 = vadd.f32 %v5876_v50, %v2432_v1 }
 0x913   : > { %v5880_v45 = vpop.eup %5879  ;;  %v2428_v0 = vadd.f32 1.0, %v5878_v59  ;;  %v7016_v59 = vpop.f32.mrf.mxu3 }
 0x914   : > { %v2445_v22 = vmul.f32 %v5880_v45, %v2427_v52  ;;  %v2437_v12 = vsel %vm2436_vm10, %v5876_v50, %v2433_v10  ;;  %vm2450_vm11 = vweird.f32 %v5880_v45  ;;  %v2548_v52 = vld [vmem:[#allocation2 + $0xc8] sm:$0xff] }
 0x915   : > { %5881 = vrcp.f32 %v2428_v0  ;;  %v2442_v9 = vsel %vm2439_vm12, %v2441_v18, %v2437_v12  ;;  %vm2451_vm14 = vmor %vm2449_vm13, %vm2450_vm11  ;;  %v2470_v23 = vand.u32 2147483648, %v2428_v0  ;;  %vm2464_vm2 = vweird.f32 %v2428_v0 }
 0x916   : > { %v2446_v57 = vsub.f32 1.0, %v2445_v22  ;;  %5883 = vtanh.f32 %v2413_v63  ;;  %v2468_v35 = vand.u32 2147483647, %v2428_v0 }
 0x917   : > { %v2471_v27 = vor.u32 1.1754944e-38, %v2470_v23 }
 0x918   : > { %v2447_v14 = vmul.f32 %v5880_v45, %v2446_v57  ;;  %vm2469_vm5 = vcmp.eq.f32.partialorder %v2468_v35, 8.507059e+37 }
 0x91a   : > { %v2448_v8 = vadd.f32 %v5880_v45, %v2447_v14 }
 0x91b   : > { %v5882_v28 = vpop.eup %5881  ;;  %v7018_v51 = vpop.f32.mrf.mxu3 }
 0x91c   : > { %v2452_v5 = vsel %vm2451_vm14, %v5880_v45, %v2448_v8  ;;  %v2460_v13 = vmul.f32 %v5882_v28, %v2428_v0  ;;  %v5884_v11 = vpop.eup %5883  ;;  %vm2465_vm1 = vweird.f32 %v5882_v28 }
 0x91d   : > { %v2457_v55 = vsel %vm2454_vm15, %v2456_v2, %v2452_v5  ;;  %v2476_v61 = vmul.f32 %v5884_v11, %v2442_v9  ;;  %vm2466_vm4 = vmor %vm2464_vm2, %vm2465_vm1  ;;  %v2547_v11 = vld [vmem:[#allocation2 + $0xc0] sm:$0xff] }
 0x91e   : > { %v2474_v21 = vmul.f32 %v2457_v55, %v6903_v16  ;;  %v2461_v6 = vsub.f32 1.0, %v2460_v13 }
 0x920   : > { %v6968_v62 = vadd.f32 %v2476_v61, %v2474_v21  ;;  %v2462_v17 = vmul.f32 %v5882_v28, %v2461_v6 }
 0x922   : > { %v2463_v4 = vadd.f32 %v5882_v28, %v2462_v17  ;;  %5885 = vtanh.f32 %v6968_v62 }
 0x923   : > { %v2900_v2 = vpop.f32.mrf.mxu3 }
 0x924   : > { %v2467_v30 = vsel %vm2466_vm4, %v5882_v28, %v2463_v4  ;;  %vm3014_vm4 = vcmask 64512  }
 0x925   : > { %v2472_v32 = vsel %vm2469_vm5, %v2471_v27, %v2467_v30 }
 0x928   : > { %v5886_v38 = vpop.eup %5885 }
 0x929   : > { %v2479_v39 = vmul.f32 %v5886_v38, %v2472_v32 }
 0x92b   : > { %2480 = vst.msk [vmem:[#allocation3 + $0x28] sm:$0xff] %vm396_vm0, %v2479_v39  ;;  %5513 = vmatmul.msk.f32.vlgmr.msrb.gmra.mxu1 %vm396_vm0, %v2479_v39  ;;  %5514 = vmatmul.msk.f32.vlgmr.msra.gmra.mxu2 %vm396_vm0, %v2479_v39 }
 0x92c   : > { %2689 = vmatpush.msrb.mxu1 %v6854_v36 }
 0x92e   : > { %2690 = vmatpush.msrb.mxu1 %v6860_v54 }
 0x932   : > { %v6976_v16 = vld [vmem:[#allocation3 + $0x28] sm:$0xff] }
 0x933   : > { %5515 = vmatmul.msk.f32.vlgmr.msra.gmra.mxu1 %vm396_vm0, %v2479_v39  ;;  %5538 = vmatmul.msk.f32.gmra.mxu3 %vm396_vm0, %v6976_v16 }
 0x9a8   : > { %v2501_v42 = vpop.f32.mrf.mxu1 }
 0x9a9   : > { %2504 = vst.msk [vmem:[#allocation5] sm:$0xff] %vm396_vm0, %v2501_v42 }
 0x9ae   : > { %v2522_v60 = vpop.f32.mrf.mxu2 }
 0x9af   : > { %2525 = vst.msk [vmem:[#allocation5 + $0x8] sm:$0xff] %vm396_vm0, %v2522_v60 }
 0x9b0   : > { %v2543_v46 = vpop.f32.mrf.mxu1  ;;  %v2551_v19 = vld [vmem:[#allocation5] sm:$0xff] }
 0x9b1   : > { %2546 = vst.msk [vmem:[#allocation5 + $0x10] sm:$0xff] %vm396_vm0, %v2543_v46 }
 0x9b6   : > { %v2552_v48 = vld [vmem:[#allocation5 + $0x8] sm:$0xff] }
 0x9b8   : > { %v2553_v47 = vld [vmem:[#allocation5 + $0x10] sm:$0xff] }
 0x9b9   : > { %2567 = vmatpush.msrb.mxu2 %v2553_v47 }
 0x9bb   : > { %2568 = vmatpush.msrb.mxu2 %v2552_v48 }
 0x9bd   : > { %2569 = vmatpush.msrb.mxu2 %v2551_v19 }
 0x9be   : > { %5516 = vmatmul.msk.f32.vlgmr.msrb.gmra.mxu2 %vm1521_vm3, %v6920_v34 }
 0x9bf   : > { %2973 = vmatpush.msra.mxu2 %v6989_v49 }
 0x9c1   : > { %2974 = vmatpush.msra.mxu2 %v6995_v44 }
 0x9c6   : > { %5517 = vmatmul.msk.f32.gmra.mxu2 %vm1521_vm3, %v6929_v7 }
 0x9ce   : > { %5518 = vmatmul.msk.f32.gmra.mxu2 %vm1521_vm3, %v6936_v24 }
 0x9d6   : > { %5519 = vmatmul.msk.f32.gmra.mxu2 %vm1521_vm3, %v6943_v40 }
 0x9de   : > { %5549 = vmatmul.msk.f32.vlgmr.msra.gmra.mxu2 %vm396_vm0, %v6947_v41 }
 0x9e6   : > { %5550 = vmatmul.msk.f32.gmra.mxu2 %vm396_vm0, %v6951_v25 }
 0x9ee   : > { %5551 = vmatmul.msk.f32.gmra.mxu2 %vm396_vm0, %v6955_v29 }
 0x9f6   : > { %5552 = vmatmul.msk.f32.gmra.mxu2 %vm396_vm0, %v6959_v58 }
 0x9fe   : > { %5553 = vmatmul.msk.f32.gmra.mxu2 %vm396_vm0, %v6963_v31 }
 0xa06   : > { %5554 = vmatmul.msk.f32.gmra.mxu2 %vm396_vm0, %v6976_v16 }
 0xa41   : > { %v2571_v50 = vpop.f32.mrf.mxu2 }
 0xa42   : > { %v2583_v61 = vadd.f32 %v2571_v50, %v2547_v11  ;;  %v7148_v11 = vld [vmem:[%s7749_s5 + $0x58] sm:$0xff] }
 0xa49   : > { %v2574_v53 = vpop.f32.mrf.mxu2 }
 0xa4a   : > { %v2584_v15 = vadd.f32 %v2574_v53, %v2548_v52 }
 0xa4c   : > { %v5520_v1 = vmul.f32 -1.442695, %v2584_v15 }
 0xa4e   : > { %5887 = vpow2.f32 %v5520_v1 }
 0xa51   : > { %v2577_v45 = vpop.f32.mrf.mxu2 }
 0xa52   : > { %v2585_v63 = vadd.f32 %v2577_v45, %v2549_v3 }
 0xa54   : > { %v5888_v0 = vpop.eup %5887  ;;  %v5521_v10 = vmul.f32 -1.442695, %v2585_v63 }
 0xa55   : > { %v2596_v22 = vadd.f32 1.0, %v5888_v0 }
 0xa56   : > { %5889 = vpow2.f32 %v5521_v10 }
 0xa57   : > { %5891 = vrcp.f32 %v2596_v22  ;;  %v2610_v4 = vand.u32 2147483648, %v2596_v22  ;;  %vm2604_vm7 = vweird.f32 %v2596_v22  ;;  %v2608_v23 = vand.u32 2147483647, %v2596_v22 }
 0xa59   : > { %v2580_v57 = vpop.f32.mrf.mxu2  ;;  %v2611_v39 = vor.u32 1.1754944e-38, %v2610_v4  ;;  %vm2609_vm10 = vcmp.eq.f32.partialorder %v2608_v23, 8.507059e+37 }
 0xa5a   : > { %v2586_v56 = vadd.f32 %v2580_v57, %v2550_v26 }
 0xa5c   : > { %v5890_v12 = vpop.eup %5889  ;;  %v5522_v14 = vmul.f32 -1.442695, %v2586_v56 }
 0xa5d   : > { %v5892_v37 = vpop.eup %5891  ;;  %v2597_v18 = vadd.f32 1.0, %v5890_v12 }
 0xa5e   : > { %v2600_v8 = vmul.f32 %v5892_v37, %v2596_v22  ;;  %5893 = vpow2.f32 %v5522_v14  ;;  %vm2605_vm6 = vweird.f32 %v5892_v37  ;;  %v7102_v14 = vld [vmem:[%s7749_s5 + $0x28] sm:$0xff] }
 0xa5f   : > { %5895 = vrcp.f32 %v2597_v18  ;;  %vm2606_vm8 = vmor %vm2604_vm7, %vm2605_vm6  ;;  %v2625_v30 = vand.u32 2147483648, %v2597_v18  ;;  %v2623_v32 = vand.u32 2147483647, %v2597_v18  ;;  %vm2619_vm11 = vweird.f32 %v2597_v18 }
 0xa60   : > { %v2601_v28 = vsub.f32 1.0, %v2600_v8 }
 0xa61   : > { %v2976_v9 = vpop.f32.mrf.mxu2  ;;  %v2626_v47 = vor.u32 1.1754944e-38, %v2625_v30  ;;  %vm2624_vm13 = vcmp.eq.f32.partialorder %v2623_v32, 8.507059e+37 }
 0xa62   : > { %v2602_v5 = vmul.f32 %v5892_v37, %v2601_v28  ;;  %3132 = vmatpush.msra.mxu3 %v2976_v9  ;;  %v7125_v28 = vld [vmem:[%s7749_s5 + $0x40] sm:$0xff] }
 0xa64   : > { %3272 = vmatpush.msrb.mxu3 %v2900_v2  ;;  %v5894_v13 = vpop.eup %5893  ;;  %v2603_v6 = vadd.f32 %v5892_v37, %v2602_v5  ;;  %v7132_v2 = vld [vmem:[%s7749_s5 + $0x48] sm:$0xff] }
 0xa65   : > { %v5896_v55 = vpop.eup %5895  ;;  %v2598_v21 = vadd.f32 1.0, %v5894_v13  ;;  %v7141_v13 = vld [vmem:[%s7749_s5 + $0x50] sm:$0xff] }
 0xa66   : > { %v2615_v17 = vmul.f32 %v5896_v55, %v2597_v18  ;;  %v2607_v27 = vsel %vm2606_vm8, %v5892_v37, %v2603_v6  ;;  %vm2620_vm9 = vweird.f32 %v5896_v55  ;;  %v7109_v37 = vld [vmem:[%s7749_s5 + $0x30] sm:$0xff]  ;;  %v7116_v18 = vld [vmem:[%s7749_s5 + $0x38] sm:$0xff]  ;;  %v2718_v6 = vld [vmem:[#allocation2 + $0xe8] sm:$0xff] }
 0xa67   : > { %5897 = vrcp.f32 %v2598_v21  ;;  %v2612_v46 = vsel %vm2609_vm10, %v2611_v39, %v2607_v27  ;;  %vm2621_vm12 = vmor %vm2619_vm11, %vm2620_vm9  ;;  %v2640_v0 = vand.u32 2147483648, %v2598_v21  ;;  %vm2634_vm15 = vweird.f32 %v2598_v21 }
 0xa68   : > { %v2616_v35 = vsub.f32 1.0, %v2615_v17  ;;  %5899 = vtanh.f32 %v2583_v61  ;;  %v2638_v10 = vand.u32 2147483647, %v2598_v21 }
 0xa69   : > { %v2641_v26 = vor.u32 1.1754944e-38, %v2640_v0 }
 0xa6a   : > { %v2617_v38 = vmul.f32 %v5896_v55, %v2616_v35  ;;  %vm2639_vm2 = vcmp.eq.f32.partialorder %v2638_v10, 8.507059e+37  ;;  %v2719_v35 = vld [vmem:[#allocation2 + $0xf0] sm:$0xff] }
 0xa6c   : > { %v2618_v42 = vadd.f32 %v5896_v55, %v2617_v38 }
 0xa6d   : > { %v5898_v60 = vpop.eup %5897 }
 0xa6e   : > { %v2622_v48 = vsel %vm2621_vm12, %v5896_v55, %v2618_v42  ;;  %v2630_v19 = vmul.f32 %v5898_v60, %v2598_v21  ;;  %v5900_v50 = vpop.eup %5899  ;;  %vm2635_vm14 = vweird.f32 %v5898_v60  ;;  %v2720_v42 = vld [vmem:[#allocation2 + $0xf8] sm:$0xff] }
 0xa6f   : > { %v2627_v52 = vsel %vm2624_vm13, %v2626_v47, %v2622_v48  ;;  %v2646_v53 = vmul.f32 %v5900_v50, %v2612_v46  ;;  %vm2636_vm1 = vmor %vm2634_vm15, %vm2635_vm14 }
 0xa70   : > { %v2644_v15 = vmul.f32 %v2627_v52, %v6968_v62  ;;  %v2631_v1 = vsub.f32 1.0, %v2630_v19 }
 0xa72   : > { %v7021_v3 = vadd.f32 %v2646_v53, %v2644_v15  ;;  %v2632_v45 = vmul.f32 %v5898_v60, %v2631_v1 }
 0xa74   : > { %v2633_v63 = vadd.f32 %v5898_v60, %v2632_v45  ;;  %5901 = vtanh.f32 %v7021_v3  ;;  %v2717_v45 = vld [vmem:[#allocation2 + $0xe0] sm:$0xff] }
 0xa76   : > { %v2637_v22 = vsel %vm2636_vm1, %v5898_v60, %v2633_v63 }
 0xa77   : > { %v2642_v56 = vsel %vm2639_vm2, %v2641_v26, %v2637_v22 }
 0xa7a   : > { %v5902_v57 = vpop.eup %5901 }
 0xa7b   : > { %v2649_v12 = vmul.f32 %v5902_v57, %v2642_v56 }
 0xa7d   : > { %2650 = vst.msk [vmem:[#allocation3 + $0x30] sm:$0xff] %vm396_vm0, %v2649_v12  ;;  %5523 = vmatmul.msk.f32.vlgmr.msra.gmra.mxu0 %vm396_vm0, %v2649_v12  ;;  %5524 = vmatmul.msk.f32.vlgmr.msrb.gmra.mxu1 %vm396_vm0, %v2649_v12 }
 0xa7e   : > { %2932 = vmatpush.msra.mxu0 %v6854_v36 }
 0xa80   : > { %2933 = vmatpush.msra.mxu0 %v6860_v54 }
 0xa84   : > { %v2827_v62 = vld [vmem:[#allocation3 + $0x30] sm:$0xff] }
 0xa85   : > { %5525 = vmatmul.msk.f32.vlgmr.msrb.gmra.mxu0 %vm396_vm0, %v2649_v12  ;;  %5539 = vmatmul.msk.f32.gmra.mxu3 %vm396_vm0, %v2827_v62 }
 0xa86   : > { %5555 = vmatmul.msk.f32.gmra.mxu2 %vm396_vm0, %v2827_v62  ;;  %3169 = vmatpush.msrb.mxu0 %v7018_v51 }
 0xa8d   : > { %5541 = vmatmul.msk.f32.vlgmr.msra.gmra.mxu0 %vm396_vm0, %v6947_v41 }
 0xa95   : > { %5542 = vmatmul.msk.f32.gmra.mxu0 %vm396_vm0, %v6951_v25 }
 0xa9d   : > { %5543 = vmatmul.msk.f32.gmra.mxu0 %vm396_vm0, %v6955_v29 }
 0xaa5   : > { %5544 = vmatmul.msk.f32.gmra.mxu0 %vm396_vm0, %v6959_v58  ;;  %v2979_v58 = vpop.f32.mrf.mxu2 }
 0xaad   : > { %5545 = vmatmul.msk.f32.gmra.mxu0 %vm396_vm0, %v6963_v31 }
 0xab5   : > { %5546 = vmatmul.msk.f32.gmra.mxu0 %vm396_vm0, %v6976_v16 }
 0xabd   : > { %5547 = vmatmul.msk.f32.gmra.mxu0 %vm396_vm0, %v2827_v62 }
 0xafa   : > { %v2671_v36 = vpop.f32.mrf.mxu0  ;;  %v2692_v54 = vpop.f32.mrf.mxu1 }
 0xafb   : > { %2674 = vst.msk [vmem:[#allocation5] sm:$0xff] %vm396_vm0, %v2671_v36 }
 0xafc   : > { %2695 = vst.msk [vmem:[#allocation5 + $0x8] sm:$0xff] %vm396_vm0, %v2692_v54 }
 0xb02   : > { %v2713_v41 = vpop.f32.mrf.mxu0  ;;  %v2721_v25 = vld [vmem:[#allocation5] sm:$0xff] }
 0xb03   : > { %2716 = vst.msk [vmem:[#allocation5 + $0x10] sm:$0xff] %vm396_vm0, %v2713_v41  ;;  %v2722_v29 = vld [vmem:[#allocation5 + $0x8] sm:$0xff] }
 0xb04   : > { %3880 = vst.msk [vmem:[#allocation5 + $0x8] sm:$0xff] %vm396_vm0, %v6710_v43  ;;  %v2982_v43 = vpop.f32.mrf.mxu2 }
 0xb05   : > { %3879 = vst.msk [vmem:[#allocation5] sm:$0xff] %vm396_vm0, %v6701_v33 }
 0xb0a   : > { %v2935_v31 = vpop.f32.mrf.mxu0  ;;  %v2723_v16 = vld [vmem:[#allocation5 + $0x10] sm:$0xff] }
 0xb0b   : > { %2737 = vmatpush.msra.mxu1 %v2723_v16  ;;  %3881 = vst.msk [vmem:[#allocation5 + $0x10] sm:$0xff] %vm396_vm0, %v6722_v20  ;;  %v7067_v20 = vld [vmem:[%s7749_s5] sm:$0xff] }
 0xb0c   : > { %v7136_v5 = vpop.f32.mrf.mxu2 }
 0xb0d   : > { %2738 = vmatpush.msra.mxu1 %v2722_v29 }
 0xb0f   : > { %2739 = vmatpush.msra.mxu1 %v2721_v25 }
 0xb10   : > { %5526 = vmatmul.msk.f32.vlgmr.msra.gmra.mxu1 %vm1521_vm3, %v6920_v34  ;;  %v7074_v34 = vld [vmem:[%s7749_s5 + $0x8] sm:$0xff] }
 0xb11   : > { %3042 = vmatpush.msrb.mxu1 %v7016_v59  ;;  %v2903_v59 = vpop.f32.mrf.mxu3 }
 0xb12   : > { %v2938_v51 = vpop.f32.mrf.mxu0 }
 0xb13   : > { %3087 = vmatpush.msra.mxu1 %v2935_v31  ;;  %3202 = vmatpush.msrb.mxu2 %v2938_v51 }
 0xb14   : > { %v7150_v55 = vpop.f32.mrf.mxu2 }
 0xb15   : > { %3338 = vmatpush.msra.mxu2 %v2982_v43 }
 0xb18   : > { %5527 = vmatmul.msk.f32.gmra.mxu1 %vm1521_vm3, %v6929_v7  ;;  %v7081_v7 = vld [vmem:[%s7749_s5 + $0x10] sm:$0xff] }
 0xb1a   : > { %v2941_v33 = vpop.f32.mrf.mxu0 }
 0xb1b   : > { %3305 = vmatpush.msra.mxu0 %v2941_v33 }
 0xb1c   : > { %v2991_v21 = vpop.f32.mrf.mxu2 }
 0xb20   : > { %5528 = vmatmul.msk.f32.gmra.mxu1 %vm1521_vm3, %v6936_v24  ;;  %v7088_v24 = vld [vmem:[%s7749_s5 + $0x18] sm:$0xff] }
 0xb22   : > { %v7118_v8 = vpop.f32.mrf.mxu0 }
 0xb28   : > { %5529 = vmatmul.msk.f32.gmra.mxu1 %vm1521_vm3, %v6943_v40  ;;  %v7095_v40 = vld [vmem:[%s7749_s5 + $0x20] sm:$0xff] }
 0xb2a   : > { %v2947_v9 = vpop.f32.mrf.mxu0 }
 0xb30   : > { %5565 = vmatmul.msk.f32.vlgmr.msrb.gmra.mxu1 %vm3014_vm4, %v7067_v20 }
 0xb31   : > { %3235 = vmatpush.msrb.mxu1 %v2979_v58 }
 0xb38   : > { %5566 = vmatmul.msk.f32.gmra.mxu1 %vm3014_vm4, %v7074_v34 }
 0xb40   : > { %5567 = vmatmul.msk.f32.gmra.mxu1 %vm3014_vm4, %v7081_v7 }
 0xb48   : > { %5568 = vmatmul.msk.f32.gmra.mxu1 %vm3014_vm4, %v7088_v24 }
 0xb50   : > { %5569 = vmatmul.msk.f32.vlgmr.msra.gmra.mxu1 %vm3014_vm4, %v7095_v40 }
 0xb51   : > { %3375 = vmatpush.msra.mxu1 %v2903_v59 }
 0xb58   : > { %5570 = vmatmul.msk.f32.gmra.mxu1 %vm3014_vm4, %v7102_v14 }
 0xb60   : > { %5571 = vmatmul.msk.f32.gmra.mxu1 %vm3014_vm4, %v7109_v37 }
 0xb68   : > { %5572 = vmatmul.msk.f32.gmra.mxu1 %vm3014_vm4, %v7116_v18 }
 0xb70   : > { %5585 = vmatmul.msk.f32.vlgmr.msrb.gmra.mxu1 %vm3014_vm4, %v7125_v28 }
 0xb71   : > { %3511 = vmatpush.msrb.mxu1 %v2947_v9 }
 0xb78   : > { %5586 = vmatmul.msk.f32.gmra.mxu1 %vm3014_vm4, %v7132_v2 }
 0xb80   : > { %5587 = vmatmul.msk.f32.gmra.mxu1 %vm3014_vm4, %v7141_v13 }
 0xb88   : > { %5588 = vmatmul.msk.f32.gmra.mxu1 %vm3014_vm4, %v7148_v11 }
 0xb8d   : > { %v2741_v61 = vpop.f32.mrf.mxu1 }
 0xb8e   : > { %v2753_v0 = vadd.f32 %v2741_v61, %v2717_v45 }
 0xb90   : > { %5601 = vmatmul.msk.f32.vlgmr.msra.gmra.mxu1 %vm3014_vm4, %v7067_v20 }
 0xb91   : > { %3647 = vmatpush.msra.mxu1 %v2991_v21 }
 0xb95   : > { %v2744_v17 = vpop.f32.mrf.mxu1 }
 0xb96   : > { %v2754_v4 = vadd.f32 %v2744_v17, %v2718_v6 }
 0xb98   : > { %v5530_v23 = vmul.f32 -1.442695, %v2754_v4  ;;  %5602 = vmatmul.msk.f32.gmra.mxu1 %vm3014_vm4, %v7074_v34 }
 0xb9a   : > { %5903 = vpow2.f32 %v5530_v23 }
 0xb9d   : > { %v2747_v30 = vpop.f32.mrf.mxu1 }
 0xb9e   : > { %v2755_v27 = vadd.f32 %v2747_v30, %v2719_v35 }
 0xba0   : > { %v5904_v38 = vpop.eup %5903  ;;  %v5531_v32 = vmul.f32 -1.442695, %v2755_v27  ;;  %5603 = vmatmul.msk.f32.gmra.mxu1 %vm3014_vm4, %v7081_v7 }
 0xba1   : > { %v2766_v39 = vadd.f32 1.0, %v5904_v38 }
 0xba2   : > { %5905 = vpow2.f32 %v5531_v32 }
 0xba3   : > { %5907 = vrcp.f32 %v2766_v39  ;;  %v2780_v57 = vand.u32 2147483648, %v2766_v39  ;;  %vm2774_vm6 = vweird.f32 %v2766_v39  ;;  %v2778_v56 = vand.u32 2147483647, %v2766_v39 }
 0xba5   : > { %v2750_v60 = vpop.f32.mrf.mxu1  ;;  %v2781_v25 = vor.u32 1.1754944e-38, %v2780_v57  ;;  %vm2779_vm9 = vcmp.eq.f32.partialorder %v2778_v56, 8.507059e+37 }
 0xba6   : > { %v2756_v46 = vadd.f32 %v2750_v60, %v2720_v42  ;;  %v2906_v42 = vpop.f32.mrf.mxu3 }
 0xba8   : > { %v5906_v47 = vpop.eup %5905  ;;  %v5532_v48 = vmul.f32 -1.442695, %v2756_v46  ;;  %5604 = vmatmul.msk.f32.gmra.mxu1 %vm3014_vm4, %v7088_v24 }
 0xba9   : > { %v5908_v19 = vpop.eup %5907  ;;  %v2767_v50 = vadd.f32 1.0, %v5906_v47  ;;  %v2950_v47 = vpop.f32.mrf.mxu0 }
 0xbaa   : > { %v2770_v52 = vmul.f32 %v5908_v19, %v2766_v39  ;;  %5909 = vpow2.f32 %v5532_v48  ;;  %vm2775_vm5 = vweird.f32 %v5908_v19 }
 0xbab   : > { %5911 = vrcp.f32 %v2767_v50  ;;  %vm2776_vm7 = vmor %vm2774_vm6, %vm2775_vm5  ;;  %v2795_v62 = vand.u32 2147483648, %v2767_v50  ;;  %v2793_v41 = vand.u32 2147483647, %v2767_v50  ;;  %vm2789_vm10 = vweird.f32 %v2767_v50 }
 0xbac   : > { %v2771_v53 = vsub.f32 1.0, %v2770_v52  ;;  %v2994_v52 = vpop.f32.mrf.mxu2 }
 0xbad   : > { %v2796_v16 = vor.u32 1.1754944e-38, %v2795_v62  ;;  %vm2794_vm12 = vcmp.eq.f32.partialorder %v2793_v41, 8.507059e+37  ;;  %v7215_v60 = vpop.f32.mrf.mxu1  ;;  %v7307_v41 = vld [vmem:[%s7745_s1 + $0x8] sm:$0xff] }
 0xbae   : > { %v2772_v15 = vmul.f32 %v5908_v19, %v2771_v53  ;;  %v2909_v46 = vpop.f32.mrf.mxu3 }
 0xbb0   : > { %v5910_v1 = vpop.eup %5909  ;;  %5617 = vmatmul.msk.f32.vlgmr.msrb.gmra.mxu1 %vm3014_vm4, %v7095_v40  ;;  %v2773_v22 = vadd.f32 %v5908_v19, %v2772_v15 }
 0xbb1   : > { %v5912_v63 = vpop.eup %5911  ;;  %v2768_v10 = vadd.f32 1.0, %v5910_v1  ;;  %v2953_v53 = vpop.f32.mrf.mxu0 }
 0xbb2   : > { %v2785_v26 = vmul.f32 %v5912_v63, %v2767_v50  ;;  %v2777_v36 = vsel %vm2776_vm7, %v5908_v19, %v2773_v22  ;;  %vm2790_vm8 = vweird.f32 %v5912_v63  ;;  %v3886_v22 = vld [vmem:[#allocation5] sm:$0xff] }
 0xbb3   : > { %5913 = vrcp.f32 %v2768_v10  ;;  %v2782_v31 = vsel %vm2779_vm9, %v2781_v25, %v2777_v36  ;;  %vm2791_vm11 = vmor %vm2789_vm10, %vm2790_vm8  ;;  %v2810_v23 = vand.u32 2147483648, %v2768_v10  ;;  %vm2804_vm14 = vweird.f32 %v2768_v10  ;;  %v7310_v25 = vpop.permute.xlu1 %2835 }
 0xbb4   : > { %v2786_v12 = vsub.f32 1.0, %v2785_v26  ;;  %5915 = vtanh.f32 %v2753_v0  ;;  %v2808_v35 = vand.u32 2147483647, %v2768_v10  ;;  %v3888_v0 = vld [vmem:[#allocation5 + $0x10] sm:$0xff] }
 0xbb5   : > { %v2811_v27 = vor.u32 1.1754944e-38, %v2810_v23  ;;  %v7224_v48 = vpop.f32.mrf.mxu1 }
 0xbb6   : > { %v2787_v54 = vmul.f32 %v5912_v63, %v2786_v12  ;;  %vm2809_vm1 = vcmp.eq.f32.partialorder %v2808_v35, 8.507059e+37  ;;  %v2912_v50 = vpop.f32.mrf.mxu3 }
 0xbb8   : > { %v2788_v29 = vadd.f32 %v5912_v63, %v2787_v54  ;;  %5618 = vmatmul.msk.f32.gmra.mxu1 %vm3014_vm4, %v7102_v14 }
 0xbb9   : > { %v5914_v58 = vpop.eup %5913 }
 0xbba   : > { %v2792_v51 = vsel %vm2791_vm11, %v5912_v63, %v2788_v29  ;;  %v2800_v43 = vmul.f32 %v5914_v58, %v2768_v10  ;;  %v5916_v33 = vpop.eup %5915  ;;  %vm2805_vm13 = vweird.f32 %v5914_v58  ;;  %v3887_v10 = vld [vmem:[#allocation5 + $0x8] sm:$0xff]  ;;  %v3056_v29 = vadd.f32 %v7215_v60, %v7310_v25 }
 0xbbb   : > { %v2797_v59 = vsel %vm2794_vm12, %v2796_v16, %v2792_v51  ;;  %v2816_v9 = vmul.f32 %v5916_v33, %v2782_v31  ;;  %vm2806_vm15 = vmor %vm2804_vm14, %vm2805_vm13  ;;  %v7325_v31 = vld [vmem:[%s7745_s1 + $0x18] sm:$0xff]  ;;  %v7339_v33 = vld [vmem:[%s7745_s1 + $0x10] sm:$0xff] }
 0xbbc   : > { %v2814_v61 = vmul.f32 %v2797_v59, %v7021_v3  ;;  %v2801_v21 = vsub.f32 1.0, %v2800_v43 }
 0xbbd   : > { %v7232_v19 = vpop.f32.mrf.mxu1 }
 0xbbe   : > { %v2817_v6 = vadd.f32 %v2816_v9, %v2814_v61  ;;  %v2802_v17 = vmul.f32 %v5914_v58, %v2801_v21 }
 0xbc0   : > { %5917 = vtanh.f32 %v2817_v6  ;;  %v2803_v4 = vadd.f32 %v5914_v58, %v2802_v17  ;;  %5619 = vmatmul.msk.f32.gmra.mxu1 %vm3014_vm4, %v7109_v37 }
 0xbc2   : > { %v2807_v30 = vsel %vm2806_vm15, %v5914_v58, %v2803_v4 }
 0xbc3   : > { %v2812_v32 = vsel %vm2809_vm1, %v2811_v27, %v2807_v30 }
 0xbc6   : > { %v5918_v38 = vpop.eup %5917 }
 0xbc7   : > { %v2819_v39 = vmul.f32 %v5918_v38, %v2812_v32 }
 0xbc8   : > { %5620 = vmatmul.msk.f32.gmra.mxu1 %vm3014_vm4, %v7116_v18 }
 0xbc9   : > { %2820 = vst.msk [vmem:[#allocation3 + $0x38] sm:$0xff] %vm396_vm0, %v2819_v39 }
 0xbd0   : > { %v2828_v3 = vld [vmem:[#allocation3 + $0x38] sm:$0xff]  ;;  %5633 = vmatmul.msk.f32.vlgmr.msra.gmra.mxu1 %vm3014_vm4, %v7125_v28 }
 0xbd1   : > { %5540 = vmatmul.msk.f32.gmra.mxu3 %vm396_vm0, %v2828_v3  ;;  %5548 = vmatmul.msk.f32.gmra.mxu0 %vm396_vm0, %v2828_v3 }
 0xbd2   : > { %5556 = vmatmul.msk.f32.gmra.mxu2 %vm396_vm0, %v2828_v3 }
 0xbd8   : > { %5634 = vmatmul.msk.f32.gmra.mxu1 %vm3014_vm4, %v7132_v2 }
 0xbd9   : > { %5573 = vmatmul.msk.f32.vlgmr.msra.gmra.mxu3 %vm3014_vm4, %v7125_v28  ;;  %5577 = vmatmul.msk.f32.vlgmr.msrb.gmra.mxu0 %vm3014_vm4, %v7067_v20 }
 0xbda   : > { %5581 = vmatmul.msk.f32.vlgmr.msrb.gmra.mxu2 %vm3014_vm4, %v7095_v40  ;;  %3408 = vmatpush.msra.mxu3 %v7118_v8  ;;  %v2830_v8 = vld [vmem:[%s7751_s7 + $0x8] sm:$0xff] }
 0xbdb   : > { %3441 = vmatpush.msrb.mxu0 %v7136_v5  ;;  %3478 = vmatpush.msrb.mxu2 %v2906_v42  ;;  %v2831_v5 = vld [vmem:[%s7751_s7 + $0x10] sm:$0xff] }
 0xbdc   : > { %2840 = vperm.xlu2 %5789, %v2830_v8  }
 0xbe0   : > { %5635 = vmatmul.msk.f32.gmra.mxu1 %vm3014_vm4, %v7141_v13 }
 0xbe1   : > { %5574 = vmatmul.msk.f32.gmra.mxu3 %vm3014_vm4, %v7132_v2  ;;  %5578 = vmatmul.msk.f32.gmra.mxu0 %vm3014_vm4, %v7074_v34 }
 0xbe2   : > { %5582 = vmatmul.msk.f32.gmra.mxu2 %vm3014_vm4, %v7102_v14 }
 0xbe4   : > { %2845 = vperm.xlu2 %5789, %v2831_v5  }
 0xbe8   : > { %5636 = vmatmul.msk.f32.gmra.mxu1 %vm3014_vm4, %v7148_v11 }
 0xbe9   : > { %5575 = vmatmul.msk.f32.gmra.mxu3 %vm3014_vm4, %v7141_v13  ;;  %5579 = vmatmul.msk.f32.gmra.mxu0 %vm3014_vm4, %v7081_v7 }
 0xbea   : > { %5583 = vmatmul.msk.f32.gmra.mxu2 %vm3014_vm4, %v7109_v37 }
 0xbf1   : > { %5576 = vmatmul.msk.f32.gmra.mxu3 %vm3014_vm4, %v7148_v11  ;;  %5580 = vmatmul.msk.f32.gmra.mxu0 %vm3014_vm4, %v7088_v24 }
 0xbf2   : > { %5584 = vmatmul.msk.f32.gmra.mxu2 %vm3014_vm4, %v7116_v18 }
 0xbf9   : > { %5589 = vmatmul.msk.f32.vlgmr.msrb.gmra.mxu3 %vm3014_vm4, %v7067_v20  ;;  %5593 = vmatmul.msk.f32.vlgmr.msra.gmra.mxu0 %vm3014_vm4, %v7095_v40 }
 0xbfa   : > { %5597 = vmatmul.msk.f32.vlgmr.msra.gmra.mxu2 %vm3014_vm4, %v7125_v28  ;;  %3544 = vmatpush.msrb.mxu3 %v7150_v55  ;;  %v7240_v55 = vpop.f32.mrf.mxu1 }
 0xbfb   : > { %3581 = vmatpush.msra.mxu0 %v2909_v46  ;;  %3614 = vmatpush.msra.mxu2 %v2950_v47 }
 0xc01   : > { %5590 = vmatmul.msk.f32.gmra.mxu3 %vm3014_vm4, %v7074_v34  ;;  %5594 = vmatmul.msk.f32.gmra.mxu0 %vm3014_vm4, %v7102_v14 }
 0xc02   : > { %5598 = vmatmul.msk.f32.gmra.mxu2 %vm3014_vm4, %v7132_v2  ;;  %v3089_v15 = vpop.f32.mrf.mxu1 }
 0xc03   : > { %v3101_v16 = vadd.f32 %v3089_v15, %v3056_v29 }
 0xc09   : > { %5591 = vmatmul.msk.f32.gmra.mxu3 %vm3014_vm4, %v7081_v7  ;;  %5595 = vmatmul.msk.f32.gmra.mxu0 %vm3014_vm4, %v7109_v37 }
 0xc0a   : > { %5599 = vmatmul.msk.f32.gmra.mxu2 %vm3014_vm4, %v7141_v13  ;;  %v7260_v1 = vpop.f32.mrf.mxu1 }
 0xc11   : > { %5592 = vmatmul.msk.f32.gmra.mxu3 %vm3014_vm4, %v7088_v24  ;;  %5596 = vmatmul.msk.f32.gmra.mxu0 %vm3014_vm4, %v7116_v18 }
 0xc12   : > { %5600 = vmatmul.msk.f32.gmra.mxu2 %vm3014_vm4, %v7148_v11  ;;  %v7268_v45 = vpop.f32.mrf.mxu1 }
 0xc19   : > { %5605 = vmatmul.msk.f32.vlgmr.msra.gmra.mxu3 %vm3014_vm4, %v7095_v40  ;;  %5609 = vmatmul.msk.f32.vlgmr.msrb.gmra.mxu0 %vm3014_vm4, %v7125_v28 }
 0xc1a   : > { %5613 = vmatmul.msk.f32.vlgmr.msrb.gmra.mxu2 %vm3014_vm4, %v7067_v20  ;;  %3684 = vmatpush.msra.mxu3 %v2912_v50  ;;  %v7276_v63 = vpop.f32.mrf.mxu1 }
 0xc1b   : > { %3717 = vmatpush.msrb.mxu0 %v2953_v53  ;;  %3750 = vmatpush.msrb.mxu2 %v2994_v52 }
 0xc21   : > { %5606 = vmatmul.msk.f32.gmra.mxu3 %vm3014_vm4, %v7102_v14  ;;  %5610 = vmatmul.msk.f32.gmra.mxu0 %vm3014_vm4, %v7132_v2 }
 0xc22   : > { %5614 = vmatmul.msk.f32.gmra.mxu2 %vm3014_vm4, %v7074_v34  ;;  %v3237_v26 = vpop.f32.mrf.mxu1 }
 0xc29   : > { %5607 = vmatmul.msk.f32.gmra.mxu3 %vm3014_vm4, %v7109_v37  ;;  %5611 = vmatmul.msk.f32.gmra.mxu0 %vm3014_vm4, %v7141_v13 }
 0xc2a   : > { %5615 = vmatmul.msk.f32.gmra.mxu2 %vm3014_vm4, %v7081_v7  ;;  %v3240_v57 = vpop.f32.mrf.mxu1 }
 0xc31   : > { %5608 = vmatmul.msk.f32.gmra.mxu3 %vm3014_vm4, %v7116_v18  ;;  %5612 = vmatmul.msk.f32.gmra.mxu0 %vm3014_vm4, %v7148_v11 }
 0xc32   : > { %5616 = vmatmul.msk.f32.gmra.mxu2 %vm3014_vm4, %v7088_v24  ;;  %v3243_v54 = vpop.f32.mrf.mxu1 }
 0xc36   : > { %v7320_v58 = vpop.permute.xlu2 %2840 }
 0xc37   : > { %v3057_v61 = vadd.f32 %v7224_v48, %v7320_v58  ;;  %v7380_v48 = vpop.permute.xlu0 %2850 }
 0xc38   : > { %v3059_v50 = vadd.f32 %v7240_v55, %v7380_v48 }
 0xc39   : > { %5621 = vmatmul.msk.f32.vlgmr.msrb.gmra.mxu3 %vm3014_vm4, %v7125_v28  ;;  %5625 = vmatmul.msk.f32.vlgmr.msra.gmra.mxu0 %vm3014_vm4, %v7067_v20 }
 0xc3a   : > { %5629 = vmatmul.msk.f32.vlgmr.msra.gmra.mxu2 %vm3014_vm4, %v7095_v40  ;;  %v3246_v4 = vpop.f32.mrf.mxu1  ;;  %v3104_v52 = vadd.f32 %v7276_v63, %v3059_v50 }
 0xc3b   : > { %3914 = vmatpush.msra.mxu2 %v3888_v0 }
 0xc3d   : > { %3915 = vmatpush.msra.mxu2 %v3887_v10 }
 0xc3e   : > { %v7359_v35 = vpop.permute.xlu2 %2845 }
 0xc3f   : > { %3916 = vmatpush.msra.mxu2 %v3886_v22 }
 0xc41   : > { %5622 = vmatmul.msk.f32.gmra.mxu3 %vm3014_vm4, %v7132_v2  ;;  %5626 = vmatmul.msk.f32.gmra.mxu0 %vm3014_vm4, %v7074_v34 }
 0xc42   : > { %5630 = vmatmul.msk.f32.gmra.mxu2 %vm3014_vm4, %v7102_v14  ;;  %v7375_v8 = vpop.f32.mrf.mxu1 }
 0xc49   : > { %5623 = vmatmul.msk.f32.gmra.mxu3 %vm3014_vm4, %v7141_v13  ;;  %5627 = vmatmul.msk.f32.gmra.mxu0 %vm3014_vm4, %v7081_v7 }
 0xc4a   : > { %5631 = vmatmul.msk.f32.gmra.mxu2 %vm3014_vm4, %v7109_v37 }
 0xc4e   : > { %v2956_v56 = vpop.f32.mrf.mxu0 }
 0xc4f   : > { %3820 = vmatpush.msrb.mxu3 %v2956_v56 }
 0xc51   : > { %5624 = vmatmul.msk.f32.gmra.mxu3 %vm3014_vm4, %v7148_v11  ;;  %5628 = vmatmul.msk.f32.gmra.mxu0 %vm3014_vm4, %v7088_v24 }
 0xc52   : > { %5632 = vmatmul.msk.f32.gmra.mxu2 %vm3014_vm4, %v7116_v18 }
 0xc54   : > { %v2915_v12 = vpop.f32.mrf.mxu3 }
 0xc55   : > { %v2997_v62 = vpop.f32.mrf.mxu2  ;;  %3787 = vmatpush.msrb.mxu1 %v2915_v12 }
 0xc56   : > { %3853 = vmatpush.msra.mxu0 %v2997_v62  ;;  %v3171_v36 = vpop.f32.mrf.mxu0  ;;  %5649 = vmatmul.msk.f32.vlgmr.msrb.gmra.mxu1 %vm3014_vm4, %v7067_v20  ;;  %v7418_v62 = vld [vmem:[%s7750_s6 + $0x8] sm:$0xff] }
 0xc57   : > { %4015 = vmatpush.msra.mxu1 %v7307_v41  ;;  %v3183_v51 = vadd.f32 %v3171_v36, %v7310_v25 }
 0xc59   : > { %5637 = vmatmul.msk.f32.vlgmr.msra.gmra.mxu3 %vm3014_vm4, %v7067_v20  ;;  %5641 = vmatmul.msk.f32.vlgmr.msrb.gmra.mxu0 %vm3014_vm4, %v7095_v40  ;;  %v7332_v20 = vld [vmem:[%s7745_s1] sm:$0xff] }
 0xc5a   : > { %5645 = vmatmul.msk.f32.vlgmr.msrb.gmra.mxu2 %vm3014_vm4, %v7125_v28  ;;  %4036 = vmatpush.msra.mxu3 %v7325_v31 }
 0xc5b   : > { %4057 = vmatpush.msrb.mxu0 %v6989_v49  ;;  %4016 = vmatpush.msra.mxu1 %v7332_v20 }
 0xc5c   : > { %v3134_v43 = vpop.f32.mrf.mxu3  ;;  %4037 = vmatpush.msra.mxu3 %v7339_v33  ;;  %4227 = vmatpush.msrb.mxu2 %v6989_v49  ;;  %v3102_v49 = vadd.f32 %v7260_v1, %v3057_v61  ;;  %v7393_v1 = vpop.f32.mrf.mxu1 }
 0xc5d   : > { %v3146_v59 = vadd.f32 %v3134_v43, %v3101_v16  ;;  %v3204_v9 = vpop.f32.mrf.mxu2  ;;  %4058 = vmatpush.msrb.mxu0 %v6995_v44 }
 0xc5e   : > { %v3216_v21 = vadd.f32 %v3204_v9, %v3183_v51  ;;  %v3174_v6 = vpop.f32.mrf.mxu0  ;;  %5650 = vmatmul.msk.f32.gmra.mxu1 %vm3014_vm4, %v7074_v34  ;;  %4228 = vmatpush.msrb.mxu2 %v6995_v44 }
 0xc5f   : > { %3150 = vst.msk [vmem:[#allocation2] sm:$0xff] %vm396_vm0, %v3146_v59  ;;  %v3184_v23 = vadd.f32 %v3174_v6, %v7320_v58  ;;  %v7431_v59 = vld [vmem:[%s7750_s6 + $0x10] sm:$0xff] }
 0xc60   : > { %v3249_v17 = vadd.f32 %v3237_v26, %v3216_v21  ;;  %v5790_v26 = vld [vmem:[#allocation6] ss:$0 sm:$0xff] }
 0xc61   : > { %5638 = vmatmul.msk.f32.gmra.mxu3 %vm3014_vm4, %v7074_v34  ;;  %5642 = vmatmul.msk.f32.gmra.mxu0 %vm3014_vm4, %v7102_v14  ;;  %v3058_v34 = vadd.f32 %v7232_v19, %v7359_v35 }
 0xc62   : > { %3253 = vst.msk [vmem:[#allocation2 + $0x20] sm:$0xff] %vm396_vm0, %v3249_v17  ;;  %5646 = vmatmul.msk.f32.gmra.mxu2 %vm3014_vm4, %v7132_v2  ;;  %5201 = vperm.xlu2 %5789, %v5790_v26  }
 0xc63   : > { %v3103_v3 = vadd.f32 %v7268_v45, %v3058_v34 }
 0xc64   : > { %v3137_v44 = vpop.f32.mrf.mxu3  ;;  %v3383_v56 = vpop.f32.mrf.mxu1 }
 0xc65   : > { %v3207_v30 = vpop.f32.mrf.mxu2  ;;  %v3147_v27 = vadd.f32 %v3137_v44, %v3102_v49 }
 0xc66   : > { %v3177_v38 = vpop.f32.mrf.mxu0  ;;  %5651 = vmatmul.msk.f32.gmra.mxu1 %vm3014_vm4, %v7081_v7  ;;  %v3217_v32 = vadd.f32 %v3207_v30, %v3184_v23 }
 0xc67   : > { %3151 = vst.msk [vmem:[#allocation2 + $0x8] sm:$0xff] %vm396_vm0, %v3147_v27  ;;  %v3185_v42 = vadd.f32 %v3177_v38, %v7359_v35  ;;  %v3389_v38 = vadd.f32 %v7375_v8, %v7310_v25  ;;  %v3391_v8 = vadd.f32 %v3383_v56, %v7359_v35 }
 0xc68   : > { %v3250_v39 = vadd.f32 %v3240_v57, %v3217_v32 }
 0xc69   : > { %5639 = vmatmul.msk.f32.gmra.mxu3 %vm3014_vm4, %v7081_v7  ;;  %5643 = vmatmul.msk.f32.gmra.mxu0 %vm3014_vm4, %v7109_v37 }
 0xc6a   : > { %3254 = vst.msk [vmem:[#allocation2 + $0x28] sm:$0xff] %vm396_vm0, %v3250_v39  ;;  %5647 = vmatmul.msk.f32.gmra.mxu2 %vm3014_vm4, %v7141_v13 }
 0xc6c   : > { %v3140_v5 = vpop.f32.mrf.mxu3 }
 0xc6d   : > { %v3210_v60 = vpop.f32.mrf.mxu2  ;;  %v3148_v46 = vadd.f32 %v3140_v5, %v3103_v3  ;;  %v3390_v5 = vadd.f32 %v7393_v1, %v7320_v58 }
 0xc6e   : > { %v3180_v47 = vpop.f32.mrf.mxu0  ;;  %5652 = vmatmul.msk.f32.gmra.mxu1 %vm3014_vm4, %v7088_v24  ;;  %v3218_v7 = vadd.f32 %v3210_v60, %v3185_v42 }
 0xc6f   : > { %3152 = vst.msk [vmem:[#allocation2 + $0x10] sm:$0xff] %vm396_vm0, %v3148_v46  ;;  %v3186_v53 = vadd.f32 %v3180_v47, %v7380_v48 }
 0xc70   : > { %v3251_v19 = vadd.f32 %v3243_v54, %v3218_v7 }
 0xc71   : > { %5640 = vmatmul.msk.f32.gmra.mxu3 %vm3014_vm4, %v7088_v24  ;;  %5644 = vmatmul.msk.f32.gmra.mxu0 %vm3014_vm4, %v7116_v18  ;;  %v7399_v24 = vld [vmem:[%s7750_s6] sm:$0xff] }
 0xc72   : > { %3255 = vst.msk [vmem:[#allocation2 + $0x30] sm:$0xff] %vm396_vm0, %v3251_v19  ;;  %5648 = vmatmul.msk.f32.gmra.mxu2 %vm3014_vm4, %v7148_v11 }
 0xc74   : > { %v3143_v15 = vpop.f32.mrf.mxu3 }
 0xc75   : > { %v3149_v45 = vadd.f32 %v3143_v15, %v3104_v52  ;;  %v3213_v55 = vpop.f32.mrf.mxu2 }
 0xc76   : > { %v3219_v0 = vadd.f32 %v3213_v55, %v3186_v53  ;;  %v3307_v10 = vpop.f32.mrf.mxu0 }
 0xc77   : > { %3153 = vst.msk [vmem:[#allocation2 + $0x18] sm:$0xff] %vm396_vm0, %v3149_v45 }
 0xc78   : > { %v3252_v22 = vadd.f32 %v3246_v4, %v3219_v0  ;;  %v7444_v4 = vld [vmem:[%s7750_s6 + $0x18] sm:$0xff] }
 0xc79   : > { %5653 = vmatmul.msk.f32.vlgmr.msrb.gmra.mxu3 %vm3014_vm4, %v7095_v40  ;;  %5657 = vmatmul.msk.f32.vlgmr.msra.gmra.mxu0 %vm3014_vm4, %v7125_v28 }
 0xc7a   : > { %3256 = vst.msk [vmem:[#allocation2 + $0x38] sm:$0xff] %vm396_vm0, %v3252_v22  ;;  %5661 = vmatmul.msk.f32.vlgmr.msra.gmra.mxu2 %vm1521_vm3, %v7399_v24  ;;  %4185 = vmatpush.msrb.mxu3 %v7307_v41 }
 0xc7b   : > { %4206 = vmatpush.msra.mxu0 %v7325_v31  ;;  %4376 = vmatpush.msra.mxu2 %v7325_v31 }
 0xc7c   : > { %v3274_v63 = vpop.f32.mrf.mxu3  ;;  %4186 = vmatpush.msrb.mxu3 %v7332_v20 }
 0xc7d   : > { %v3286_v40 = vadd.f32 %v3274_v63, %v7310_v25  ;;  %v3340_v57 = vpop.f32.mrf.mxu2  ;;  %4207 = vmatpush.msra.mxu0 %v7339_v33  ;;  %4377 = vmatpush.msra.mxu2 %v7339_v33 }
 0xc7e   : > { %v3310_v28 = vpop.f32.mrf.mxu0 }
 0xc7f   : > { %v3319_v12 = vadd.f32 %v3307_v10, %v3286_v40 }
 0xc81   : > { %v3352_v36 = vadd.f32 %v3340_v57, %v3319_v12  ;;  %5654 = vmatmul.msk.f32.gmra.mxu3 %vm3014_vm4, %v7102_v14  ;;  %5658 = vmatmul.msk.f32.gmra.mxu0 %vm3014_vm4, %v7132_v2  ;;  %v3386_v14 = vpop.f32.mrf.mxu1 }
 0xc82   : > { %5662 = vmatmul.msk.f32.gmra.mxu2 %vm1521_vm3, %v7418_v62  ;;  %v3392_v1 = vadd.f32 %v3386_v14, %v7380_v48 }
 0xc83   : > { %3356 = vst.msk [vmem:[#allocation2 + $0x40] sm:$0xff] %vm396_vm0, %v3352_v36 }
 0xc84   : > { %v3277_v54 = vpop.f32.mrf.mxu3 }
 0xc85   : > { %v3287_v29 = vadd.f32 %v3277_v54, %v7320_v58  ;;  %v3343_v16 = vpop.f32.mrf.mxu2 }
 0xc86   : > { %v3313_v51 = vpop.f32.mrf.mxu0 }
 0xc87   : > { %v3320_v43 = vadd.f32 %v3310_v28, %v3287_v29 }
 0xc89   : > { %v3353_v9 = vadd.f32 %v3343_v16, %v3320_v43  ;;  %5655 = vmatmul.msk.f32.gmra.mxu3 %vm3014_vm4, %v7109_v37  ;;  %5659 = vmatmul.msk.f32.gmra.mxu0 %vm3014_vm4, %v7141_v13  ;;  %v3513_v13 = vpop.f32.mrf.mxu1 }
 0xc8a   : > { %5663 = vmatmul.msk.f32.gmra.mxu2 %vm1521_vm3, %v7431_v59 }
 0xc8b   : > { %3357 = vst.msk [vmem:[#allocation2 + $0x48] sm:$0xff] %vm396_vm0, %v3353_v9 }
 0xc8c   : > { %v3280_v2 = vpop.f32.mrf.mxu3 }
 0xc8d   : > { %v3288_v61 = vadd.f32 %v3280_v2, %v7359_v35  ;;  %v3346_v21 = vpop.f32.mrf.mxu2 }
 0xc8e   : > { %v3316_v6 = vpop.f32.mrf.mxu0 }
 0xc8f   : > { %v3321_v17 = vadd.f32 %v3313_v51, %v3288_v61 }
 0xc91   : > { %v3354_v37 = vadd.f32 %v3346_v21, %v3321_v17  ;;  %5656 = vmatmul.msk.f32.gmra.mxu3 %vm3014_vm4, %v7116_v18  ;;  %5660 = vmatmul.msk.f32.gmra.mxu0 %vm3014_vm4, %v7148_v11  ;;  %v3516_v18 = vpop.f32.mrf.mxu1 }
 0xc92   : > { %5664 = vmatmul.msk.f32.gmra.mxu2 %vm1521_vm3, %v7444_v4 }
 0xc93   : > { %3358 = vst.msk [vmem:[#allocation2 + $0x50] sm:$0xff] %vm396_vm0, %v3354_v37 }
 0xc94   : > { %v3283_v49 = vpop.f32.mrf.mxu3 }
 0xc95   : > { %v3289_v23 = vadd.f32 %v3283_v49, %v7380_v48  ;;  %v3349_v44 = vpop.f32.mrf.mxu2 }
 0xc96   : > { %v3443_v30 = vpop.f32.mrf.mxu0 }
 0xc97   : > { %v3322_v27 = vadd.f32 %v3316_v6, %v3289_v23 }
 0xc99   : > { %v3355_v34 = vadd.f32 %v3349_v44, %v3322_v27  ;;  %v3519_v46 = vpop.f32.mrf.mxu1 }
 0xc9b   : > { %3359 = vst.msk [vmem:[#allocation2 + $0x58] sm:$0xff] %vm396_vm0, %v3355_v34 }
 0xc9c   : > { %v3410_v32 = vpop.f32.mrf.mxu3 }
 0xc9d   : > { %v3422_v11 = vadd.f32 %v3410_v32, %v3389_v38  ;;  %v3480_v39 = vpop.f32.mrf.mxu2 }
 0xc9e   : > { %v3446_v3 = vpop.f32.mrf.mxu0  ;;  %v3492_v40 = vadd.f32 %v3480_v39, %v7310_v25 }
 0xc9f   : > { %v3455_v42 = vadd.f32 %v3443_v30, %v3422_v11 }
 0xca0   : > { %v3525_v56 = vadd.f32 %v3513_v13, %v3492_v40 }
 0xca1   : > { %3459 = vst.msk [vmem:[#allocation2 + $0x60] sm:$0xff] %vm396_vm0, %v3455_v42  ;;  %v3522_v55 = vpop.f32.mrf.mxu1 }
 0xca4   : > { %v3413_v60 = vpop.f32.mrf.mxu3 }
 0xca5   : > { %v3423_v47 = vadd.f32 %v3413_v60, %v3390_v5  ;;  %v3483_v7 = vpop.f32.mrf.mxu2 }
 0xca6   : > { %v3449_v19 = vpop.f32.mrf.mxu0  ;;  %v3493_v43 = vadd.f32 %v3483_v7, %v7320_v58 }
 0xca7   : > { %v3456_v50 = vadd.f32 %v3446_v3, %v3423_v47 }
 0xca8   : > { %v3526_v61 = vadd.f32 %v3516_v18, %v3493_v43 }
 0xca9   : > { %3460 = vst.msk [vmem:[#allocation2 + $0x68] sm:$0xff] %vm396_vm0, %v3456_v50  ;;  %v3649_v28 = vpop.f32.mrf.mxu1 }
 0xcac   : > { %v3416_v52 = vpop.f32.mrf.mxu3 }
 0xcad   : > { %v3424_v53 = vadd.f32 %v3416_v52, %v3391_v8  ;;  %v3486_v15 = vpop.f32.mrf.mxu2 }
 0xcae   : > { %v3452_v45 = vpop.f32.mrf.mxu0  ;;  %v3494_v49 = vadd.f32 %v3486_v15, %v7359_v35 }
 0xcaf   : > { %v3457_v0 = vadd.f32 %v3449_v19, %v3424_v53 }
 0xcb0   : > { %v3527_v30 = vadd.f32 %v3519_v46, %v3494_v49 }
 0xcb1   : > { %3461 = vst.msk [vmem:[#allocation2 + $0x70] sm:$0xff] %vm396_vm0, %v3457_v0  ;;  %v3652_v2 = vpop.f32.mrf.mxu1 }
 0xcb4   : > { %v3419_v10 = vpop.f32.mrf.mxu3 }
 0xcb5   : > { %v3425_v22 = vadd.f32 %v3419_v10, %v3392_v1  ;;  %v3489_v63 = vpop.f32.mrf.mxu2 }
 0xcb6   : > { %v3583_v26 = vpop.f32.mrf.mxu0  ;;  %v3495_v39 = vadd.f32 %v3489_v63, %v7380_v48 }
 0xcb7   : > { %v3458_v57 = vadd.f32 %v3452_v45, %v3425_v22  ;;  %v3595_v12 = vadd.f32 %v3583_v26, %v7310_v25 }
 0xcb8   : > { %v3528_v42 = vadd.f32 %v3522_v55, %v3495_v39 }
 0xcb9   : > { %3462 = vst.msk [vmem:[#allocation2 + $0x78] sm:$0xff] %vm396_vm0, %v3458_v57  ;;  %v3655_v34 = vpop.f32.mrf.mxu1 }
 0xcbc   : > { %v3546_v36 = vpop.f32.mrf.mxu3 }
 0xcbd   : > { %v3558_v54 = vadd.f32 %v3546_v36, %v3525_v56  ;;  %v3616_v29 = vpop.f32.mrf.mxu2 }
 0xcbe   : > { %v3628_v16 = vadd.f32 %v3616_v29, %v3595_v12  ;;  %v3586_v51 = vpop.f32.mrf.mxu0 }
 0xcbf   : > { %3562 = vst.msk [vmem:[#allocation2 + $0x80] sm:$0xff] %vm396_vm0, %v3558_v54  ;;  %v3596_v9 = vadd.f32 %v3586_v51, %v7320_v58 }
 0xcc0   : > { %v3661_v14 = vadd.f32 %v3649_v28, %v3628_v16 }
 0xcc1   : > { %v3658_v50 = vpop.f32.mrf.mxu1 }
 0xcc2   : > { %3665 = vst.msk [vmem:[#allocation2 + $0xa0] sm:$0xff] %vm396_vm0, %v3661_v14 }
 0xcc4   : > { %v3549_v21 = vpop.f32.mrf.mxu3 }
 0xcc5   : > { %v3559_v6 = vadd.f32 %v3549_v21, %v3526_v61  ;;  %v3619_v17 = vpop.f32.mrf.mxu2 }
 0xcc6   : > { %v3629_v37 = vadd.f32 %v3619_v17, %v3596_v9  ;;  %v3589_v13 = vpop.f32.mrf.mxu0 }
 0xcc7   : > { %3563 = vst.msk [vmem:[#allocation2 + $0x88] sm:$0xff] %vm396_vm0, %v3559_v6  ;;  %v3597_v44 = vadd.f32 %v3589_v13, %v7359_v35 }
 0xcc8   : > { %v3662_v23 = vadd.f32 %v3652_v2, %v3629_v37 }
 0xcca   : > { %3666 = vst.msk [vmem:[#allocation2 + $0xa8] sm:$0xff] %vm396_vm0, %v3662_v23 }
 0xccc   : > { %v3552_v27 = vpop.f32.mrf.mxu3 }
 0xccd   : > { %v3560_v38 = vadd.f32 %v3552_v27, %v3527_v30  ;;  %v3622_v32 = vpop.f32.mrf.mxu2  ;;  %v3883_v27 = vld [vmem:[#allocation2 + $0x8] sm:$0xff] }
 0xcce   : > { %v3630_v18 = vadd.f32 %v3622_v32, %v3597_v44  ;;  %v3592_v11 = vpop.f32.mrf.mxu0 }
 0xccf   : > { %3564 = vst.msk [vmem:[#allocation2 + $0x90] sm:$0xff] %vm396_vm0, %v3560_v38  ;;  %v3598_v5 = vadd.f32 %v3592_v11, %v7380_v48 }
 0xcd0   : > { %v3663_v3 = vadd.f32 %v3655_v34, %v3630_v18 }
 0xcd2   : > { %3667 = vst.msk [vmem:[#allocation2 + $0xb0] sm:$0xff] %vm396_vm0, %v3663_v3 }
 0xcd3   : > { %v3789_v29 = vpop.f32.mrf.mxu1 }
 0xcd4   : > { %v3555_v60 = vpop.f32.mrf.mxu3  ;;  %v3801_v61 = vadd.f32 %v3789_v29, %v7310_v25 }
 0xcd5   : > { %v3561_v47 = vadd.f32 %v3555_v60, %v3528_v42  ;;  %v3625_v7 = vpop.f32.mrf.mxu2 }
 0xcd6   : > { %v3631_v46 = vadd.f32 %v3625_v7, %v3598_v5  ;;  %v3719_v19 = vpop.f32.mrf.mxu0  ;;  %v3884_v5 = vld [vmem:[#allocation2 + $0x10] sm:$0xff] }
 0xcd7   : > { %3565 = vst.msk [vmem:[#allocation2 + $0x98] sm:$0xff] %vm396_vm0, %v3561_v47 }
 0xcd8   : > { %v3664_v8 = vadd.f32 %v3658_v50, %v3631_v46 }
 0xcda   : > { %3668 = vst.msk [vmem:[#allocation2 + $0xb8] sm:$0xff] %vm396_vm0, %v3664_v8 }
 0xcdb   : > { %v3792_v21 = vpop.f32.mrf.mxu1 }
 0xcdc   : > { %v3686_v52 = vpop.f32.mrf.mxu3  ;;  %v3802_v23 = vadd.f32 %v3792_v21, %v7320_v58 }
 0xcdd   : > { %v3698_v53 = vadd.f32 %v3686_v52, %v7310_v25  ;;  %v3752_v15 = vpop.f32.mrf.mxu2 }
 0xcde   : > { %v3722_v45 = vpop.f32.mrf.mxu0 }
 0xcdf   : > { %v3731_v0 = vadd.f32 %v3719_v19, %v3698_v53 }
 0xce1   : > { %v3764_v55 = vadd.f32 %v3752_v15, %v3731_v0 }
 0xce3   : > { %3768 = vst.msk [vmem:[#allocation2 + $0xc0] sm:$0xff] %vm396_vm0, %v3764_v55  ;;  %v3795_v38 = vpop.f32.mrf.mxu1 }
 0xce4   : > { %v3689_v1 = vpop.f32.mrf.mxu3  ;;  %v3803_v39 = vadd.f32 %v3795_v38, %v7359_v35 }
 0xce5   : > { %v3699_v10 = vadd.f32 %v3689_v1, %v7320_v58  ;;  %v3755_v22 = vpop.f32.mrf.mxu2 }
 0xce6   : > { %v3725_v63 = vpop.f32.mrf.mxu0 }
 0xce7   : > { %v3732_v26 = vadd.f32 %v3722_v45, %v3699_v10 }
 0xce9   : > { %v3765_v40 = vadd.f32 %v3755_v22, %v3732_v26 }
 0xceb   : > { %3769 = vst.msk [vmem:[#allocation2 + $0xc8] sm:$0xff] %vm396_vm0, %v3765_v40  ;;  %v3798_v46 = vpop.f32.mrf.mxu1 }
 0xcec   : > { %v3692_v57 = vpop.f32.mrf.mxu3  ;;  %v3804_v8 = vadd.f32 %v3798_v46, %v7380_v48 }
 0xced   : > { %v3700_v28 = vadd.f32 %v3692_v57, %v7359_v35  ;;  %v3758_v56 = vpop.f32.mrf.mxu2  ;;  %v3885_v35 = vld [vmem:[#allocation2 + $0x18] sm:$0xff] }
 0xcee   : > { %v3728_v12 = vpop.f32.mrf.mxu0 }
 0xcef   : > { %v3733_v36 = vadd.f32 %v3725_v63, %v3700_v28  ;;  %v3882_v28 = vld [vmem:[#allocation2] sm:$0xff] }
 0xcf1   : > { %v3766_v54 = vadd.f32 %v3758_v56, %v3733_v36 }
 0xcf3   : > { %3770 = vst.msk [vmem:[#allocation2 + $0xd0] sm:$0xff] %vm396_vm0, %v3766_v54 }
 0xcf4   : > { %v3695_v16 = vpop.f32.mrf.mxu3 }
 0xcf5   : > { %v3701_v51 = vadd.f32 %v3695_v16, %v7380_v48  ;;  %v3761_v43 = vpop.f32.mrf.mxu2 }
 0xcf6   : > { %v3855_v14 = vpop.f32.mrf.mxu0 }
 0xcf7   : > { %v3734_v9 = vadd.f32 %v3728_v12, %v3701_v51 }
 0xcf9   : > { %v3767_v2 = vadd.f32 %v3761_v43, %v3734_v9 }
 0xcfb   : > { %3771 = vst.msk [vmem:[#allocation2 + $0xd8] sm:$0xff] %vm396_vm0, %v3767_v2 }
 0xcfc   : > { %v3822_v6 = vpop.f32.mrf.mxu3 }
 0xcfd   : > { %v3834_v17 = vadd.f32 %v3822_v6, %v3801_v61  ;;  %v3918_v37 = vpop.f32.mrf.mxu2 }
 0xcfe   : > { %v3858_v49 = vpop.f32.mrf.mxu0  ;;  %v3930_v12 = vadd.f32 %v3918_v37, %v3882_v28 }
 0xcff   : > { %v3867_v13 = vadd.f32 %v3855_v14, %v3834_v17 }
 0xd01   : > { %3871 = vst.msk [vmem:[#allocation2 + $0xe0] sm:$0xff] %vm396_vm0, %v3867_v13 }
 0xd04   : > { %v3825_v44 = vpop.f32.mrf.mxu3 }
 0xd05   : > { %v3835_v30 = vadd.f32 %v3825_v44, %v3802_v23  ;;  %v3921_v34 = vpop.f32.mrf.mxu2 }
 0xd06   : > { %v3931_v32 = vadd.f32 %v3921_v34, %v3883_v27  ;;  %v3861_v11 = vpop.f32.mrf.mxu0 }
 0xd07   : > { %v3868_v18 = vadd.f32 %v3858_v49, %v3835_v30 }
 0xd08   : > { %v5665_v25 = vmul.f32 -1.442695, %v3931_v32 }
 0xd09   : > { %3872 = vst.msk [vmem:[#allocation2 + $0xe8] sm:$0xff] %vm396_vm0, %v3868_v18 }
 0xd0a   : > { %5919 = vpow2.f32 %v5665_v25 }
 0xd0c   : > { %v3828_v3 = vpop.f32.mrf.mxu3 }
 0xd0d   : > { %v3836_v42 = vadd.f32 %v3828_v3, %v3803_v39  ;;  %v3924_v60 = vpop.f32.mrf.mxu2 }
 0xd0e   : > { %v3932_v47 = vadd.f32 %v3924_v60, %v3884_v5  ;;  %v3864_v53 = vpop.f32.mrf.mxu0 }
 0xd0f   : > { %v3869_v58 = vadd.f32 %v3861_v11, %v3836_v42 }
 0xd10   : > { %v5920_v7 = vpop.eup %5919  ;;  %v5666_v19 = vmul.f32 -1.442695, %v3932_v47 }
 0xd11   : > { %v3943_v50 = vadd.f32 1.0, %v5920_v7  ;;  %3873 = vst.msk [vmem:[#allocation2 + $0xf0] sm:$0xff] %vm396_vm0, %v3869_v58 }
 0xd12   : > { %5921 = vpow2.f32 %v5666_v19 }
 0xd13   : > { %5923 = vrcp.f32 %v3943_v50  ;;  %v3957_v16 = vand.u32 2147483648, %v3943_v50  ;;  %vm3951_vm4 = vweird.f32 %v3943_v50  ;;  %v3955_v51 = vand.u32 2147483647, %v3943_v50 }
 0xd14   : > { %v3831_v52 = vpop.f32.mrf.mxu3 }
 0xd15   : > { %v3837_v15 = vadd.f32 %v3831_v52, %v3804_v8  ;;  %v3927_v45 = vpop.f32.mrf.mxu2  ;;  %v3958_v21 = vor.u32 1.1754944e-38, %v3957_v16  ;;  %vm3956_vm7 = vcmp.eq.f32.partialorder %v3955_v51, 8.507059e+37 }
 0xd16   : > { %v3933_v0 = vadd.f32 %v3927_v45, %v3885_v35 }
 0xd17   : > { %v3870_v55 = vadd.f32 %v3864_v53, %v3837_v15  ;;  %v4065_v53 = vld [vmem:[#allocation2 + $0x28] sm:$0xff] }
 0xd18   : > { %v5922_v1 = vpop.eup %5921  ;;  %v5667_v10 = vmul.f32 -1.442695, %v3933_v0  ;;  %v4066_v0 = vld [vmem:[#allocation2 + $0x30] sm:$0xff] }
 0xd19   : > { %v5924_v22 = vpop.eup %5923  ;;  %v3944_v63 = vadd.f32 1.0, %v5922_v1  ;;  %3874 = vst.msk [vmem:[#allocation2 + $0xf8] sm:$0xff] %vm396_vm0, %v3870_v55 }
 0xd1a   : > { %v3947_v26 = vmul.f32 %v5924_v22, %v3943_v50  ;;  %5925 = vpow2.f32 %v5667_v10  ;;  %vm3952_vm2 = vweird.f32 %v5924_v22 }
 0xd1b   : > { %5927 = vrcp.f32 %v3944_v63  ;;  %vm3953_vm5 = vmor %vm3951_vm4, %vm3952_vm2  ;;  %v3972_v14 = vand.u32 2147483648, %v3944_v63  ;;  %v3970_v61 = vand.u32 2147483647, %v3944_v63  ;;  %vm3966_vm8 = vweird.f32 %v3944_v63 }
 0xd1c   : > { %v3948_v40 = vsub.f32 1.0, %v3947_v26 }
 0xd1d   : > { %v3973_v13 = vor.u32 1.1754944e-38, %v3972_v14  ;;  %vm3971_vm10 = vcmp.eq.f32.partialorder %v3970_v61, 8.507059e+37 }
 0xd1e   : > { %v3949_v57 = vmul.f32 %v5924_v22, %v3948_v40 }
 0xd20   : > { %v5926_v48 = vpop.eup %5925  ;;  %v3950_v54 = vadd.f32 %v5924_v22, %v3949_v57 }
 0xd21   : > { %v5928_v56 = vpop.eup %5927  ;;  %v3945_v36 = vadd.f32 1.0, %v5926_v48 }
 0xd22   : > { %v3962_v29 = vmul.f32 %v5928_v56, %v3944_v63  ;;  %v3954_v9 = vsel %vm3953_vm5, %v5924_v22, %v3950_v54  ;;  %vm3967_vm6 = vweird.f32 %v5928_v56  ;;  %v4067_v22 = vld [vmem:[#allocation2 + $0x38] sm:$0xff] }
 0xd23   : > { %5929 = vrcp.f32 %v3945_v36  ;;  %v3959_v37 = vsel %vm3956_vm7, %v3958_v21, %v3954_v9  ;;  %vm3968_vm9 = vmor %vm3966_vm8, %vm3967_vm6  ;;  %v3987_v11 = vand.u32 2147483648, %v3945_v36  ;;  %vm3981_vm12 = vweird.f32 %v3945_v36 }
 0xd24   : > { %v3963_v43 = vsub.f32 1.0, %v3962_v29  ;;  %5931 = vtanh.f32 %v3930_v12  ;;  %v3985_v39 = vand.u32 2147483647, %v3945_v36  ;;  %v4064_v29 = vld [vmem:[#allocation2 + $0x20] sm:$0xff] }
 0xd25   : > { %v3988_v42 = vor.u32 1.1754944e-38, %v3987_v11 }
 0xd26   : > { %v3964_v2 = vmul.f32 %v5928_v56, %v3963_v43  ;;  %vm3986_vm14 = vcmp.eq.f32.partialorder %v3985_v39, 8.507059e+37 }
 0xd28   : > { %v3965_v6 = vadd.f32 %v5928_v56, %v3964_v2 }
 0xd29   : > { %v5930_v17 = vpop.eup %5929 }
 0xd2a   : > { %v3969_v49 = vsel %vm3968_vm9, %v5928_v56, %v3965_v6  ;;  %v3977_v23 = vmul.f32 %v5930_v17, %v3945_v36  ;;  %v5932_v44 = vpop.eup %5931  ;;  %vm3982_vm11 = vweird.f32 %v5930_v17 }
 0xd2b   : > { %v3974_v30 = vsel %vm3971_vm10, %v3973_v13, %v3969_v49  ;;  %v3993_v27 = vmul.f32 %v5932_v44, %v3959_v37  ;;  %vm3983_vm13 = vmor %vm3981_vm12, %vm3982_vm11 }
 0xd2c   : > { %v3991_v34 = vmul.f32 0.0, %v3974_v30  ;;  %v3978_v38 = vsub.f32 1.0, %v3977_v23 }
 0xd2e   : > { %v7497_v32 = vadd.f32 %v3993_v27, %v3991_v34  ;;  %v3979_v18 = vmul.f32 %v5930_v17, %v3978_v38 }
 0xd30   : > { %5933 = vtanh.f32 %v7497_v32  ;;  %v3980_v25 = vadd.f32 %v5930_v17, %v3979_v18 }
 0xd32   : > { %v3984_v3 = vsel %vm3983_vm13, %v5930_v17, %v3980_v25 }
 0xd33   : > { %v3989_v60 = vsel %vm3986_vm14, %v3988_v42, %v3984_v3 }
 0xd36   : > { %v5934_v5 = vpop.eup %5933 }
 0xd37   : > { %v3996_v47 = vmul.f32 %v5934_v5, %v3989_v60 }
 0xd39   : > { %3997 = vst.msk [vmem:[#allocation4] sm:$0xff] %vm396_vm0, %v3996_v47  ;;  %5668 = vmatmul.msk.f32.vlgmr.msra.gmra.mxu1 %vm396_vm0, %v3996_v47  ;;  %5669 = vmatmul.msk.f32.vlgmr.msra.gmra.mxu3 %vm396_vm0, %v3996_v47 }
 0xd3a   : > { %5670 = vmatmul.msk.f32.vlgmr.msrb.gmra.mxu0 %vm396_vm0, %v3996_v47 }
 0xd3b   : > { %4355 = vmatpush.msrb.mxu0 %v7307_v41 }
 0xd3d   : > { %4356 = vmatpush.msrb.mxu0 %v7332_v20 }
 0xdb6   : > { %v4018_v58 = vpop.f32.mrf.mxu1 }
 0xdb7   : > { %4021 = vst.msk [vmem:[#allocation5] sm:$0xff] %vm396_vm0, %v4018_v58  ;;  %v4060_v7 = vpop.f32.mrf.mxu0 }
 0xdb8   : > { %4063 = vst.msk [vmem:[#allocation5 + $0x10] sm:$0xff] %vm396_vm0, %v4060_v7 }
 0xdbc   : > { %v4039_v46 = vpop.f32.mrf.mxu3 }
 0xdbd   : > { %4042 = vst.msk [vmem:[#allocation5 + $0x8] sm:$0xff] %vm396_vm0, %v4039_v46 }
 0xdbe   : > { %v4068_v8 = vld [vmem:[#allocation5] sm:$0xff] }
 0xdbf   : > { %v4070_v19 = vld [vmem:[#allocation5 + $0x10] sm:$0xff] }
 0xdc0   : > { %4084 = vmatpush.msrb.mxu1 %v4070_v19 }
 0xdc4   : > { %v4069_v50 = vld [vmem:[#allocation5 + $0x8] sm:$0xff] }
 0xdc5   : > { %4085 = vmatpush.msrb.mxu1 %v4069_v50 }
 0xdc7   : > { %4086 = vmatpush.msrb.mxu1 %v4068_v8 }
 0xdc8   : > { %5671 = vmatmul.msk.f32.vlgmr.msrb.gmra.mxu1 %vm1521_vm3, %v7399_v24 }
 0xdc9   : > { %4546 = vmatpush.msra.mxu1 %v7325_v31 }
 0xdcb   : > { %4547 = vmatpush.msra.mxu1 %v7339_v33 }
 0xdd0   : > { %5672 = vmatmul.msk.f32.gmra.mxu1 %vm1521_vm3, %v7418_v62 }
 0xdd8   : > { %5673 = vmatmul.msk.f32.gmra.mxu1 %vm1521_vm3, %v7431_v59 }
 0xde0   : > { %5674 = vmatmul.msk.f32.gmra.mxu1 %vm1521_vm3, %v7444_v4 }
 0xe45   : > { %v4088_v52 = vpop.f32.mrf.mxu1 }
 0xe46   : > { %v4100_v51 = vadd.f32 %v4088_v52, %v4064_v29  ;;  %v7536_v52 = vld [vmem:[%s7745_s1 + $0x20] sm:$0xff] }
 0xe4d   : > { %v4091_v15 = vpop.f32.mrf.mxu1 }
 0xe4e   : > { %v4101_v35 = vadd.f32 %v4091_v15, %v4065_v53 }
 0xe50   : > { %v5675_v45 = vmul.f32 -1.442695, %v4101_v35 }
 0xe52   : > { %5935 = vpow2.f32 %v5675_v45 }
 0xe55   : > { %v4094_v55 = vpop.f32.mrf.mxu1 }
 0xe56   : > { %v4102_v31 = vadd.f32 %v4094_v55, %v4066_v0 }
 0xe58   : > { %v5936_v1 = vpop.eup %5935  ;;  %v5676_v33 = vmul.f32 -1.442695, %v4102_v31 }
 0xe59   : > { %v4113_v10 = vadd.f32 1.0, %v5936_v1  ;;  %v4235_v1 = vld [vmem:[#allocation2 + $0x48] sm:$0xff] }
 0xe5a   : > { %5937 = vpow2.f32 %v5676_v33 }
 0xe5b   : > { %5939 = vrcp.f32 %v4113_v10  ;;  %v4127_v2 = vand.u32 2147483648, %v4113_v10  ;;  %vm4121_vm1 = vweird.f32 %v4113_v10  ;;  %v4125_v61 = vand.u32 2147483647, %v4113_v10 }
 0xe5d   : > { %v4097_v63 = vpop.f32.mrf.mxu1  ;;  %v4128_v49 = vor.u32 1.1754944e-38, %v4127_v2  ;;  %vm4126_vm5 = vcmp.eq.f32.partialorder %v4125_v61, 8.507059e+37 }
 0xe5e   : > { %v4103_v26 = vadd.f32 %v4097_v63, %v4067_v22 }
 0xe60   : > { %v5938_v40 = vpop.eup %5937  ;;  %v5677_v57 = vmul.f32 -1.442695, %v4103_v26 }
 0xe61   : > { %v5940_v48 = vpop.eup %5939  ;;  %v4114_v28 = vadd.f32 1.0, %v5938_v40 }
 0xe62   : > { %v4117_v56 = vmul.f32 %v5940_v48, %v4113_v10  ;;  %5941 = vpow2.f32 %v5677_v57  ;;  %vm4122_vm15 = vweird.f32 %v5940_v48 }
 0xe63   : > { %5943 = vrcp.f32 %v4114_v28  ;;  %vm4123_vm2 = vmor %vm4121_vm1, %vm4122_vm15  ;;  %v4142_v6 = vand.u32 2147483648, %v4114_v28  ;;  %v4140_v13 = vand.u32 2147483647, %v4114_v28  ;;  %vm4136_vm6 = vweird.f32 %v4114_v28 }
 0xe64   : > { %v4118_v12 = vsub.f32 1.0, %v4117_v56 }
 0xe65   : > { %v4143_v27 = vor.u32 1.1754944e-38, %v4142_v6  ;;  %vm4141_vm8 = vcmp.eq.f32.partialorder %v4140_v13, 8.507059e+37 }
 0xe66   : > { %v4119_v36 = vmul.f32 %v5940_v48, %v4118_v12 }
 0xe68   : > { %v5942_v54 = vpop.eup %5941  ;;  %v4120_v14 = vadd.f32 %v5940_v48, %v4119_v36 }
 0xe69   : > { %v5944_v16 = vpop.eup %5943  ;;  %v4115_v43 = vadd.f32 1.0, %v5942_v54 }
 0xe6a   : > { %v4132_v9 = vmul.f32 %v5944_v16, %v4114_v28  ;;  %v4124_v17 = vsel %vm4123_vm2, %v5940_v48, %v4120_v14  ;;  %vm4137_vm4 = vweird.f32 %v5944_v16  ;;  %v4237_v48 = vld [vmem:[#allocation2 + $0x58] sm:$0xff] }
 0xe6b   : > { %5945 = vrcp.f32 %v4115_v43  ;;  %v4129_v30 = vsel %vm4126_vm5, %v4128_v49, %v4124_v17  ;;  %vm4138_vm7 = vmor %vm4136_vm6, %vm4137_vm4  ;;  %v4157_v47 = vand.u32 2147483648, %v4115_v43  ;;  %vm4151_vm10 = vweird.f32 %v4115_v43 }
 0xe6c   : > { %v4133_v21 = vsub.f32 1.0, %v4132_v9  ;;  %5947 = vtanh.f32 %v4100_v51  ;;  %v4155_v58 = vand.u32 2147483647, %v4115_v43  ;;  %v4234_v9 = vld [vmem:[#allocation2 + $0x40] sm:$0xff] }
 0xe6d   : > { %v4158_v46 = vor.u32 1.1754944e-38, %v4157_v47 }
 0xe6e   : > { %v4134_v37 = vmul.f32 %v5944_v16, %v4133_v21  ;;  %vm4156_vm12 = vcmp.eq.f32.partialorder %v4155_v58, 8.507059e+37 }
 0xe70   : > { %v4135_v23 = vadd.f32 %v5944_v16, %v4134_v37 }
 0xe71   : > { %v5946_v44 = vpop.eup %5945 }
 0xe72   : > { %v4139_v34 = vsel %vm4138_vm7, %v5944_v16, %v4135_v23  ;;  %v4147_v38 = vmul.f32 %v5946_v44, %v4115_v43  ;;  %v5948_v18 = vpop.eup %5947  ;;  %vm4152_vm9 = vweird.f32 %v5946_v44 }
 0xe73   : > { %v4144_v25 = vsel %vm4141_vm8, %v4143_v27, %v4139_v34  ;;  %v4163_v11 = vmul.f32 %v5948_v18, %v4129_v30  ;;  %vm4153_vm11 = vmor %vm4151_vm10, %vm4152_vm9 }
 0xe74   : > { %v4161_v39 = vmul.f32 %v4144_v25, %v7497_v32  ;;  %v4148_v3 = vsub.f32 1.0, %v4147_v38  ;;  %v7530_v32 = vld [vmem:[%s7745_s1 + $0x28] sm:$0xff] }
 0xe76   : > { %v7520_v42 = vadd.f32 %v4163_v11, %v4161_v39  ;;  %v4149_v5 = vmul.f32 %v5946_v44, %v4148_v3 }
 0xe78   : > { %5949 = vtanh.f32 %v7520_v42  ;;  %v4150_v60 = vadd.f32 %v5946_v44, %v4149_v5 }
 0xe7a   : > { %v4154_v7 = vsel %vm4153_vm11, %v5946_v44, %v4150_v60 }
 0xe7b   : > { %v4159_v50 = vsel %vm4156_vm12, %v4158_v46, %v4154_v7 }
 0xe7e   : > { %v5950_v19 = vpop.eup %5949 }
 0xe7f   : > { %v4166_v8 = vmul.f32 %v5950_v19, %v4159_v50 }
 0xe81   : > { %4167 = vst.msk [vmem:[#allocation4 + $0x8] sm:$0xff] %vm396_vm0, %v4166_v8  ;;  %5678 = vmatmul.msk.f32.vlgmr.msrb.gmra.mxu3 %vm396_vm0, %v4166_v8  ;;  %5679 = vmatmul.msk.f32.vlgmr.msra.gmra.mxu0 %vm396_vm0, %v4166_v8 }
 0xe82   : > { %5680 = vmatmul.msk.f32.vlgmr.msrb.gmra.mxu2 %vm396_vm0, %v4166_v8  ;;  %4397 = vmatpush.msra.mxu0 %v7530_v32 }
 0xe84   : > { %4398 = vmatpush.msra.mxu0 %v7536_v52 }
 0xefe   : > { %v4209_v53 = vpop.f32.mrf.mxu0 }
 0xeff   : > { %4212 = vst.msk [vmem:[#allocation5 + $0x8] sm:$0xff] %vm396_vm0, %v4209_v53 }
 0xf04   : > { %v4188_v15 = vpop.f32.mrf.mxu3 }
 0xf05   : > { %4191 = vst.msk [vmem:[#allocation5] sm:$0xff] %vm396_vm0, %v4188_v15  ;;  %v4230_v35 = vpop.f32.mrf.mxu2 }
 0xf06   : > { %4233 = vst.msk [vmem:[#allocation5 + $0x10] sm:$0xff] %vm396_vm0, %v4230_v35  ;;  %v4239_v0 = vld [vmem:[#allocation5 + $0x8] sm:$0xff] }
 0xf0c   : > { %v4238_v55 = vld [vmem:[#allocation5] sm:$0xff] }
 0xf0d   : > { %v4240_v45 = vld [vmem:[#allocation5 + $0x10] sm:$0xff] }
 0xf0e   : > { %4254 = vmatpush.msra.mxu3 %v4240_v45 }
 0xf10   : > { %4255 = vmatpush.msra.mxu3 %v4239_v0 }
 0xf12   : > { %4256 = vmatpush.msra.mxu3 %v4238_v55 }
 0xf13   : > { %5681 = vmatmul.msk.f32.vlgmr.msra.gmra.mxu3 %vm1521_vm3, %v7399_v24 }
 0xf14   : > { %4695 = vmatpush.msrb.mxu3 %v7307_v41 }
 0xf16   : > { %4696 = vmatpush.msrb.mxu3 %v7332_v20  ;;  %v4236_v20 = vld [vmem:[#allocation2 + $0x50] sm:$0xff] }
 0xf18   : > { %4737 = vmatpush.msra.mxu3 %v7530_v32 }
 0xf1a   : > { %4738 = vmatpush.msra.mxu3 %v7536_v52 }
 0xf1b   : > { %5682 = vmatmul.msk.f32.gmra.mxu3 %vm1521_vm3, %v7418_v62 }
 0xf23   : > { %5683 = vmatmul.msk.f32.gmra.mxu3 %vm1521_vm3, %v7431_v59 }
 0xf2b   : > { %5684 = vmatmul.msk.f32.gmra.mxu3 %vm1521_vm3, %v7444_v4 }
 0xf96   : > { %v4258_v31 = vpop.f32.mrf.mxu3 }
 0xf97   : > { %v4270_v61 = vadd.f32 %v4258_v31, %v4234_v9  ;;  %v7570_v31 = vld [vmem:[%s7745_s1] sm:$0xff] }
 0xf9e   : > { %v4261_v33 = vpop.f32.mrf.mxu3 }
 0xf9f   : > { %v4271_v10 = vadd.f32 %v4261_v33, %v4235_v1 }
 0xfa1   : > { %v5685_v41 = vmul.f32 -1.442695, %v4271_v10 }
 0xfa3   : > { %5951 = vpow2.f32 %v5685_v41 }
 0xfa6   : > { %v4264_v22 = vpop.f32.mrf.mxu3 }
 0xfa7   : > { %v4272_v63 = vadd.f32 %v4264_v22, %v4236_v20 }
 0xfa9   : > { %v5952_v26 = vpop.eup %5951  ;;  %v5686_v40 = vmul.f32 -1.442695, %v4272_v63 }
 0xfaa   : > { %v4283_v57 = vadd.f32 1.0, %v5952_v26  ;;  %v4405_v26 = vld [vmem:[#allocation2 + $0x68] sm:$0xff] }
 0xfab   : > { %5953 = vpow2.f32 %v5686_v40 }
 0xfac   : > { %5955 = vrcp.f32 %v4283_v57  ;;  %v4297_v37 = vand.u32 2147483648, %v4283_v57  ;;  %vm4291_vm14 = vweird.f32 %v4283_v57  ;;  %v4295_v13 = vand.u32 2147483647, %v4283_v57 }
 0xfae   : > { %v4267_v28 = vpop.f32.mrf.mxu3  ;;  %v4298_v34 = vor.u32 1.1754944e-38, %v4297_v37  ;;  %vm4296_vm2 = vcmp.eq.f32.partialorder %v4295_v13, 8.507059e+37 }
 0xfaf   : > { %v4273_v56 = vadd.f32 %v4267_v28, %v4237_v48  ;;  %v4406_v48 = vld [vmem:[#allocation2 + $0x70] sm:$0xff] }
 0xfb1   : > { %v5954_v12 = vpop.eup %5953  ;;  %v5687_v36 = vmul.f32 -1.442695, %v4273_v56 }
 0xfb2   : > { %v5956_v54 = vpop.eup %5955  ;;  %v4284_v29 = vadd.f32 1.0, %v5954_v12 }
 0xfb3   : > { %v4287_v16 = vmul.f32 %v5956_v54, %v4283_v57  ;;  %5957 = vpow2.f32 %v5687_v36  ;;  %vm4292_vm13 = vweird.f32 %v5956_v54 }
 0xfb4   : > { %5959 = vrcp.f32 %v4284_v29  ;;  %vm4293_vm15 = vmor %vm4291_vm14, %vm4292_vm13  ;;  %v4312_v23 = vand.u32 2147483648, %v4284_v29  ;;  %v4310_v27 = vand.u32 2147483647, %v4284_v29  ;;  %vm4306_vm4 = vweird.f32 %v4284_v29 }
 0xfb5   : > { %v4288_v51 = vsub.f32 1.0, %v4287_v16 }
 0xfb6   : > { %v4313_v11 = vor.u32 1.1754944e-38, %v4312_v23  ;;  %vm4311_vm6 = vcmp.eq.f32.partialorder %v4310_v27, 8.507059e+37 }
 0xfb7   : > { %v4289_v43 = vmul.f32 %v5956_v54, %v4288_v51 }
 0xfb9   : > { %v5958_v14 = vpop.eup %5957  ;;  %v4290_v6 = vadd.f32 %v5956_v54, %v4289_v43 }
 0xfba   : > { %v5960_v2 = vpop.eup %5959  ;;  %v4285_v21 = vadd.f32 1.0, %v5958_v14 }
 0xfbb   : > { %v4302_v17 = vmul.f32 %v5960_v2, %v4284_v29  ;;  %v4294_v44 = vsel %vm4293_vm15, %v5956_v54, %v4290_v6  ;;  %vm4307_vm1 = vweird.f32 %v5960_v2 }
 0xfbc   : > { %5961 = vrcp.f32 %v4285_v21  ;;  %v4299_v25 = vsel %vm4296_vm2, %v4298_v34, %v4294_v44  ;;  %vm4308_vm5 = vmor %vm4306_vm4, %vm4307_vm1  ;;  %v4327_v8 = vand.u32 2147483648, %v4285_v21  ;;  %vm4321_vm8 = vweird.f32 %v4285_v21 }
 0xfbd   : > { %v4303_v49 = vsub.f32 1.0, %v4302_v17  ;;  %5963 = vtanh.f32 %v4270_v61  ;;  %v4325_v53 = vand.u32 2147483647, %v4285_v21 }
 0xfbe   : > { %v4328_v35 = vor.u32 1.1754944e-38, %v4327_v8 }
 0xfbf   : > { %v4304_v30 = vmul.f32 %v5960_v2, %v4303_v49  ;;  %vm4326_vm10 = vcmp.eq.f32.partialorder %v4325_v53, 8.507059e+37 }
 0xfc1   : > { %v4305_v38 = vadd.f32 %v5960_v2, %v4304_v30 }
 0xfc2   : > { %v5962_v18 = vpop.eup %5961 }
 0xfc3   : > { %v4309_v39 = vsel %vm4308_vm5, %v5960_v2, %v4305_v38  ;;  %v4317_v3 = vmul.f32 %v5962_v18, %v4285_v21  ;;  %v5964_v5 = vpop.eup %5963  ;;  %vm4322_vm7 = vweird.f32 %v5962_v18  ;;  %v4404_v21 = vld [vmem:[#allocation2 + $0x60] sm:$0xff] }
 0xfc4   : > { %v4314_v60 = vsel %vm4311_vm6, %v4313_v11, %v4309_v39  ;;  %v4333_v47 = vmul.f32 %v5964_v5, %v4299_v25  ;;  %vm4323_vm9 = vmor %vm4321_vm8, %vm4322_vm7 }
 0xfc5   : > { %v4331_v58 = vmul.f32 %v4314_v60, %v7520_v42  ;;  %v4318_v7 = vsub.f32 1.0, %v4317_v3  ;;  %v7564_v42 = vld [vmem:[%s7745_s1 + $0x8] sm:$0xff] }
 0xfc7   : > { %v7555_v46 = vadd.f32 %v4333_v47, %v4331_v58  ;;  %v4319_v19 = vmul.f32 %v5962_v18, %v4318_v7 }
 0xfc9   : > { %5965 = vtanh.f32 %v7555_v46  ;;  %v4320_v50 = vadd.f32 %v5962_v18, %v4319_v19 }
 0xfcb   : > { %v4324_v15 = vsel %vm4323_vm9, %v5962_v18, %v4320_v50 }
 0xfcc   : > { %v4329_v0 = vsel %vm4326_vm10, %v4328_v35, %v4324_v15 }
 0xfcf   : > { %v5966_v45 = vpop.eup %5965 }
 0xfd0   : > { %v4336_v55 = vmul.f32 %v5966_v45, %v4329_v0 }
 0xfd2   : > { %4337 = vst.msk [vmem:[#allocation4 + $0x10] sm:$0xff] %vm396_vm0, %v4336_v55  ;;  %5688 = vmatmul.msk.f32.vlgmr.msrb.gmra.mxu0 %vm396_vm0, %v4336_v55  ;;  %5689 = vmatmul.msk.f32.vlgmr.msra.gmra.mxu2 %vm396_vm0, %v4336_v55 }
 0xfd3   : > { %4525 = vmatpush.msrb.mxu0 %v7564_v42 }
 0xfd5   : > { %4526 = vmatpush.msrb.mxu0 %v7570_v31 }
 0xfda   : > { %5690 = vmatmul.msk.f32.vlgmr.msra.gmra.mxu0 %vm396_vm0, %v4336_v55 }
 0xfdb   : > { %4567 = vmatpush.msra.mxu0 %v7530_v32 }
 0xfdd   : > { %4568 = vmatpush.msra.mxu0 %v7536_v52 }
0x104f   : > { %v4358_v1 = vpop.f32.mrf.mxu0 }
0x1050   : > { %4361 = vst.msk [vmem:[#allocation5] sm:$0xff] %vm396_vm0, %v4358_v1 }
0x1055   : > { %v4379_v33 = vpop.f32.mrf.mxu2 }
0x1056   : > { %4382 = vst.msk [vmem:[#allocation5 + $0x8] sm:$0xff] %vm396_vm0, %v4379_v33 }
0x1057   : > { %v4400_v10 = vpop.f32.mrf.mxu0  ;;  %v4408_v22 = vld [vmem:[#allocation5] sm:$0xff] }
0x1058   : > { %4403 = vst.msk [vmem:[#allocation5 + $0x10] sm:$0xff] %vm396_vm0, %v4400_v10 }
0x105d   : > { %v4409_v20 = vld [vmem:[#allocation5 + $0x8] sm:$0xff] }
0x105f   : > { %v4410_v41 = vld [vmem:[#allocation5 + $0x10] sm:$0xff] }
0x1060   : > { %4424 = vmatpush.msrb.mxu2 %v4410_v41 }
0x1062   : > { %4425 = vmatpush.msrb.mxu2 %v4409_v20  ;;  %v7607_v20 = vld [vmem:[%s7745_s1 + $0x10] sm:$0xff] }
0x1064   : > { %4426 = vmatpush.msrb.mxu2 %v4408_v22 }
0x1065   : > { %5691 = vmatmul.msk.f32.vlgmr.msrb.gmra.mxu2 %vm1521_vm3, %v7399_v24 }
0x1066   : > { %4865 = vmatpush.msra.mxu2 %v7564_v42 }
0x1068   : > { %4866 = vmatpush.msra.mxu2 %v7570_v31 }
0x106a   : > { %4907 = vmatpush.msrb.mxu2 %v7530_v32 }
0x106c   : > { %4908 = vmatpush.msrb.mxu2 %v7536_v52 }
0x106d   : > { %5692 = vmatmul.msk.f32.gmra.mxu2 %vm1521_vm3, %v7418_v62  ;;  %v4407_v62 = vld [vmem:[#allocation2 + $0x78] sm:$0xff] }
0x1075   : > { %5693 = vmatmul.msk.f32.gmra.mxu2 %vm1521_vm3, %v7431_v59 }
0x107d   : > { %5694 = vmatmul.msk.f32.gmra.mxu2 %vm1521_vm3, %v7444_v4 }
0x10e8   : > { %v4428_v63 = vpop.f32.mrf.mxu2 }
0x10e9   : > { %v4440_v17 = vadd.f32 %v4428_v63, %v4404_v21 }
0x10f0   : > { %v4431_v24 = vpop.f32.mrf.mxu2 }
0x10f1   : > { %v4441_v40 = vadd.f32 %v4431_v24, %v4405_v26 }
0x10f3   : > { %v5695_v57 = vmul.f32 -1.442695, %v4441_v40 }
0x10f5   : > { %5967 = vpow2.f32 %v5695_v57 }
0x10f8   : > { %v4434_v28 = vpop.f32.mrf.mxu2 }
0x10f9   : > { %v4442_v56 = vadd.f32 %v4434_v28, %v4406_v48  ;;  %v7617_v48 = vld [vmem:[%s7750_s6] sm:$0xff]  ;;  %v7628_v28 = vld [vmem:[%s7750_s6 + $0x8] sm:$0xff] }
0x10fb   : > { %v5968_v12 = vpop.eup %5967  ;;  %v5696_v36 = vmul.f32 -1.442695, %v4442_v56  ;;  %v7635_v56 = vld [vmem:[%s7750_s6 + $0x10] sm:$0xff] }
0x10fc   : > { %v4453_v54 = vadd.f32 1.0, %v5968_v12 }
0x10fd   : > { %5969 = vpow2.f32 %v5696_v36 }
0x10fe   : > { %5971 = vrcp.f32 %v4453_v54  ;;  %v4467_v23 = vand.u32 2147483648, %v4453_v54  ;;  %vm4461_vm12 = vweird.f32 %v4453_v54  ;;  %v4465_v44 = vand.u32 2147483647, %v4453_v54 }
0x1100   : > { %v4437_v29 = vpop.f32.mrf.mxu2  ;;  %v4468_v25 = vor.u32 1.1754944e-38, %v4467_v23  ;;  %vm4466_vm15 = vcmp.eq.f32.partialorder %v4465_v44, 8.507059e+37 }
0x1101   : > { %v4443_v59 = vadd.f32 %v4437_v29, %v4407_v62 }
0x1103   : > { %v5970_v16 = vpop.eup %5969  ;;  %v5697_v51 = vmul.f32 -1.442695, %v4443_v59 }
0x1104   : > { %v5972_v4 = vpop.eup %5971  ;;  %v4454_v43 = vadd.f32 1.0, %v5970_v16 }
0x1105   : > { %v4457_v14 = vmul.f32 %v5972_v4, %v4453_v54  ;;  %5973 = vpow2.f32 %v5697_v51  ;;  %vm4462_vm11 = vweird.f32 %v5972_v4  ;;  %v4576_v54 = vld [vmem:[#allocation2 + $0x90] sm:$0xff] }
0x1106   : > { %5975 = vrcp.f32 %v4454_v43  ;;  %vm4463_vm13 = vmor %vm4461_vm12, %vm4462_vm11  ;;  %v4482_v27 = vand.u32 2147483648, %v4454_v43  ;;  %v4480_v18 = vand.u32 2147483647, %v4454_v43  ;;  %vm4476_vm1 = vweird.f32 %v4454_v43 }
0x1107   : > { %v4458_v9 = vsub.f32 1.0, %v4457_v14 }
0x1108   : > { %v4483_v5 = vor.u32 1.1754944e-38, %v4482_v27  ;;  %vm4481_vm4 = vcmp.eq.f32.partialorder %v4480_v18, 8.507059e+37 }
0x1109   : > { %v4459_v2 = vmul.f32 %v5972_v4, %v4458_v9 }
0x110b   : > { %v5974_v61 = vpop.eup %5973  ;;  %v4460_v13 = vadd.f32 %v5972_v4, %v4459_v2 }
0x110c   : > { %v5976_v6 = vpop.eup %5975  ;;  %v4455_v37 = vadd.f32 1.0, %v5974_v61 }
0x110d   : > { %v4472_v49 = vmul.f32 %v5976_v6, %v4454_v43  ;;  %v4464_v34 = vsel %vm4463_vm13, %v5972_v4, %v4460_v13  ;;  %vm4477_vm14 = vweird.f32 %v5976_v6  ;;  %v4577_v4 = vld [vmem:[#allocation2 + $0x98] sm:$0xff] }
0x110e   : > { %5977 = vrcp.f32 %v4455_v37  ;;  %v4469_v3 = vsel %vm4466_vm15, %v4468_v25, %v4464_v34  ;;  %vm4478_vm2 = vmor %vm4476_vm1, %vm4477_vm14  ;;  %v4497_v45 = vand.u32 2147483648, %v4455_v37  ;;  %vm4491_vm6 = vweird.f32 %v4455_v37 }
0x110f   : > { %v4473_v30 = vsub.f32 1.0, %v4472_v49  ;;  %5979 = vtanh.f32 %v4440_v17  ;;  %v4495_v0 = vand.u32 2147483647, %v4455_v37  ;;  %v4574_v49 = vld [vmem:[#allocation2 + $0x80] sm:$0xff] }
0x1110   : > { %v4498_v1 = vor.u32 1.1754944e-38, %v4497_v45 }
0x1111   : > { %v4474_v38 = vmul.f32 %v5976_v6, %v4473_v30  ;;  %vm4496_vm8 = vcmp.eq.f32.partialorder %v4495_v0, 8.507059e+37 }
0x1113   : > { %v4475_v11 = vadd.f32 %v5976_v6, %v4474_v38 }
0x1114   : > { %v5978_v39 = vpop.eup %5977 }
0x1115   : > { %v4479_v60 = vsel %vm4478_vm2, %v5976_v6, %v4475_v11  ;;  %v4487_v47 = vmul.f32 %v5978_v39, %v4455_v37  ;;  %v5980_v58 = vpop.eup %5979  ;;  %vm4492_vm5 = vweird.f32 %v5978_v39 }
0x1116   : > { %v4484_v7 = vsel %vm4481_vm4, %v4483_v5, %v4479_v60  ;;  %v4503_v19 = vmul.f32 %v5980_v58, %v4469_v3  ;;  %vm4493_vm7 = vmor %vm4491_vm6, %vm4492_vm5 }
0x1117   : > { %v4501_v50 = vmul.f32 %v4484_v7, %v7555_v46  ;;  %v4488_v8 = vsub.f32 1.0, %v4487_v47  ;;  %v7601_v46 = vld [vmem:[%s7745_s1 + $0x18] sm:$0xff] }
0x1119   : > { %v7592_v53 = vadd.f32 %v4503_v19, %v4501_v50  ;;  %v4489_v15 = vmul.f32 %v5978_v39, %v4488_v8 }
0x111b   : > { %5981 = vtanh.f32 %v7592_v53  ;;  %v4490_v35 = vadd.f32 %v5978_v39, %v4489_v15 }
0x111d   : > { %v4494_v55 = vsel %vm4493_vm7, %v5978_v39, %v4490_v35 }
0x111e   : > { %v4499_v10 = vsel %vm4496_vm8, %v4498_v1, %v4494_v55 }
0x1121   : > { %v5982_v33 = vpop.eup %5981 }
0x1122   : > { %v4506_v41 = vmul.f32 %v5982_v33, %v4499_v10 }
0x1124   : > { %4507 = vst.msk [vmem:[#allocation4 + $0x18] sm:$0xff] %vm396_vm0, %v4506_v41  ;;  %5698 = vmatmul.msk.f32.vlgmr.msrb.gmra.mxu0 %vm396_vm0, %v4506_v41  ;;  %5699 = vmatmul.msk.f32.vlgmr.msra.gmra.mxu1 %vm396_vm0, %v4506_v41 }
0x1125   : > { %4716 = vmatpush.msrb.mxu0 %v7601_v46 }
0x1127   : > { %4717 = vmatpush.msrb.mxu0 %v7607_v20 }
0x112c   : > { %5700 = vmatmul.msk.f32.vlgmr.msra.gmra.mxu0 %vm396_vm0, %v4506_v41 }
0x11a1   : > { %v4528_v22 = vpop.f32.mrf.mxu0  ;;  %v4549_v63 = vpop.f32.mrf.mxu1 }
0x11a2   : > { %4531 = vst.msk [vmem:[#allocation5] sm:$0xff] %vm396_vm0, %v4528_v22 }
0x11a3   : > { %4552 = vst.msk [vmem:[#allocation5 + $0x8] sm:$0xff] %vm396_vm0, %v4549_v63 }
0x11a9   : > { %v4570_v26 = vpop.f32.mrf.mxu0  ;;  %v4578_v57 = vld [vmem:[#allocation5] sm:$0xff] }
0x11aa   : > { %4573 = vst.msk [vmem:[#allocation5 + $0x10] sm:$0xff] %vm396_vm0, %v4570_v26  ;;  %v4579_v40 = vld [vmem:[#allocation5 + $0x8] sm:$0xff] }
0x11b1   : > { %v4580_v24 = vld [vmem:[#allocation5 + $0x10] sm:$0xff] }
0x11b2   : > { %4594 = vmatpush.msrb.mxu1 %v4580_v24 }
0x11b4   : > { %4595 = vmatpush.msrb.mxu1 %v4579_v40 }
0x11b6   : > { %4596 = vmatpush.msrb.mxu1 %v4578_v57 }
0x11b7   : > { %5701 = vmatmul.msk.f32.vlgmr.msrb.gmra.mxu1 %vm1521_vm3, %v7617_v48 }
0x11b8   : > { %5035 = vmatpush.msra.mxu1 %v7564_v42  ;;  %v4575_v42 = vld [vmem:[#allocation2 + $0x88] sm:$0xff] }
0x11ba   : > { %5036 = vmatpush.msra.mxu1 %v7570_v31 }
0x11bc   : > { %5077 = vmatpush.msrb.mxu1 %v7530_v32  ;;  %v7642_v32 = vld [vmem:[%s7750_s6 + $0x18] sm:$0xff] }
0x11be   : > { %5078 = vmatpush.msrb.mxu1 %v7536_v52 }
0x11bf   : > { %5702 = vmatmul.msk.f32.gmra.mxu1 %vm1521_vm3, %v7628_v28 }
0x11c7   : > { %5703 = vmatmul.msk.f32.gmra.mxu1 %vm1521_vm3, %v7635_v56 }
0x11cf   : > { %5704 = vmatmul.msk.f32.gmra.mxu1 %vm1521_vm3, %v7642_v32 }
0x1234   : > { %v4598_v52 = vpop.f32.mrf.mxu1 }
0x1235   : > { %v4610_v44 = vadd.f32 %v4598_v52, %v4574_v49 }
0x123c   : > { %v4601_v31 = vpop.f32.mrf.mxu1 }
0x123d   : > { %v4611_v12 = vadd.f32 %v4601_v31, %v4575_v42 }
0x123f   : > { %v5705_v36 = vmul.f32 -1.442695, %v4611_v12 }
0x1241   : > { %5983 = vpow2.f32 %v5705_v36 }
0x1244   : > { %v4604_v62 = vpop.f32.mrf.mxu1 }
0x1245   : > { %v4612_v29 = vadd.f32 %v4604_v62, %v4576_v54  ;;  %v4745_v62 = vld [vmem:[#allocation2 + $0xa8] sm:$0xff] }
0x1247   : > { %v5984_v59 = vpop.eup %5983  ;;  %v5706_v16 = vmul.f32 -1.442695, %v4612_v29 }
0x1248   : > { %v4623_v51 = vadd.f32 1.0, %v5984_v59 }
0x1249   : > { %5985 = vpow2.f32 %v5706_v16 }
0x124a   : > { %5987 = vrcp.f32 %v4623_v51  ;;  %v4637_v38 = vand.u32 2147483648, %v4623_v51  ;;  %vm4631_vm10 = vweird.f32 %v4623_v51  ;;  %v4635_v18 = vand.u32 2147483647, %v4623_v51 }
0x124c   : > { %v4607_v43 = vpop.f32.mrf.mxu1  ;;  %v4638_v60 = vor.u32 1.1754944e-38, %v4637_v38  ;;  %vm4636_vm13 = vcmp.eq.f32.partialorder %v4635_v18, 8.507059e+37 }
0x124d   : > { %v4613_v14 = vadd.f32 %v4607_v43, %v4577_v4 }
0x124f   : > { %v5986_v9 = vpop.eup %5985  ;;  %v5707_v2 = vmul.f32 -1.442695, %v4613_v14 }
0x1250   : > { %v5988_v61 = vpop.eup %5987  ;;  %v4624_v21 = vadd.f32 1.0, %v5986_v9 }
0x1251   : > { %v4627_v6 = vmul.f32 %v5988_v61, %v4623_v51  ;;  %5989 = vpow2.f32 %v5707_v2  ;;  %vm4632_vm9 = vweird.f32 %v5988_v61  ;;  %v4746_v51 = vld [vmem:[#allocation2 + $0xb0] sm:$0xff] }
0x1252   : > { %5991 = vrcp.f32 %v4624_v21  ;;  %vm4633_vm11 = vmor %vm4631_vm10, %vm4632_vm9  ;;  %v4652_v11 = vand.u32 2147483648, %v4624_v21  ;;  %v4650_v5 = vand.u32 2147483647, %v4624_v21  ;;  %vm4646_vm14 = vweird.f32 %v4624_v21 }
0x1253   : > { %v4628_v17 = vsub.f32 1.0, %v4627_v6 }
0x1254   : > { %v4653_v19 = vor.u32 1.1754944e-38, %v4652_v11  ;;  %vm4651_vm1 = vcmp.eq.f32.partialorder %v4650_v5, 8.507059e+37 }
0x1255   : > { %v4629_v37 = vmul.f32 %v5988_v61, %v4628_v17 }
0x1257   : > { %v5990_v13 = vpop.eup %5989  ;;  %v4630_v27 = vadd.f32 %v5988_v61, %v4629_v37 }
0x1258   : > { %v5992_v23 = vpop.eup %5991  ;;  %v4625_v30 = vadd.f32 1.0, %v5990_v13 }
0x1259   : > { %v4642_v34 = vmul.f32 %v5992_v23, %v4624_v21  ;;  %v4634_v39 = vsel %vm4633_vm11, %v5988_v61, %v4630_v27  ;;  %vm4647_vm12 = vweird.f32 %v5992_v23  ;;  %v4747_v61 = vld [vmem:[#allocation2 + $0xb8] sm:$0xff] }
0x125a   : > { %5993 = vrcp.f32 %v4625_v30  ;;  %v4639_v7 = vsel %vm4636_vm13, %v4638_v60, %v4634_v39  ;;  %vm4648_vm15 = vmor %vm4646_vm14, %vm4647_vm12  ;;  %v4667_v41 = vand.u32 2147483648, %v4625_v30  ;;  %vm4661_vm4 = vweird.f32 %v4625_v30 }
0x125b   : > { %v4643_v25 = vsub.f32 1.0, %v4642_v34  ;;  %5995 = vtanh.f32 %v4610_v44  ;;  %v4665_v22 = vand.u32 2147483647, %v4625_v30  ;;  %v4744_v34 = vld [vmem:[#allocation2 + $0xa0] sm:$0xff] }
0x125c   : > { %v4668_v26 = vor.u32 1.1754944e-38, %v4667_v41 }
0x125d   : > { %v4644_v3 = vmul.f32 %v5992_v23, %v4643_v25  ;;  %vm4666_vm6 = vcmp.eq.f32.partialorder %v4665_v22, 8.507059e+37 }
0x125f   : > { %v4645_v47 = vadd.f32 %v5992_v23, %v4644_v3 }
0x1260   : > { %v5994_v58 = vpop.eup %5993 }
0x1261   : > { %v4649_v50 = vsel %vm4648_vm15, %v5992_v23, %v4645_v47  ;;  %v4657_v8 = vmul.f32 %v5994_v58, %v4625_v30  ;;  %v5996_v15 = vpop.eup %5995  ;;  %vm4662_vm2 = vweird.f32 %v5994_v58 }
0x1262   : > { %v4654_v35 = vsel %vm4651_vm1, %v4653_v19, %v4649_v50  ;;  %v4673_v45 = vmul.f32 %v5996_v15, %v4639_v7  ;;  %vm4663_vm5 = vmor %vm4661_vm4, %vm4662_vm2 }
0x1263   : > { %v4671_v0 = vmul.f32 %v4654_v35, %v7592_v53  ;;  %v4658_v55 = vsub.f32 1.0, %v4657_v8 }
0x1265   : > { %v7647_v1 = vadd.f32 %v4673_v45, %v4671_v0  ;;  %v4659_v33 = vmul.f32 %v5994_v58, %v4658_v55 }
0x1267   : > { %5997 = vtanh.f32 %v7647_v1  ;;  %v4660_v10 = vadd.f32 %v5994_v58, %v4659_v33 }
0x1269   : > { %v4664_v63 = vsel %vm4663_vm5, %v5994_v58, %v4660_v10 }
0x126a   : > { %v4669_v40 = vsel %vm4666_vm6, %v4668_v26, %v4664_v63 }
0x126d   : > { %v5998_v24 = vpop.eup %5997 }
0x126e   : > { %v4676_v57 = vmul.f32 %v5998_v24, %v4669_v40 }
0x1270   : > { %4677 = vst.msk [vmem:[#allocation4 + $0x20] sm:$0xff] %vm396_vm0, %v4676_v57  ;;  %5708 = vmatmul.msk.f32.vlgmr.msrb.gmra.mxu3 %vm396_vm0, %v4676_v57  ;;  %5709 = vmatmul.msk.f32.vlgmr.msrb.gmra.mxu0 %vm396_vm0, %v4676_v57 }
0x1271   : > { %4886 = vmatpush.msrb.mxu3 %v7601_v46 }
0x1273   : > { %4887 = vmatpush.msrb.mxu3 %v7607_v20 }
0x1278   : > { %5710 = vmatmul.msk.f32.vlgmr.msra.gmra.mxu3 %vm396_vm0, %v4676_v57 }
0x12ed   : > { %v4719_v53 = vpop.f32.mrf.mxu0 }
0x12ee   : > { %4722 = vst.msk [vmem:[#allocation5 + $0x8] sm:$0xff] %vm396_vm0, %v4719_v53 }
0x12f3   : > { %v4698_v52 = vpop.f32.mrf.mxu3 }
0x12f4   : > { %4701 = vst.msk [vmem:[#allocation5] sm:$0xff] %vm396_vm0, %v4698_v52 }
0x12f5   : > { %v4749_v12 = vld [vmem:[#allocation5 + $0x8] sm:$0xff] }
0x12fb   : > { %v4740_v42 = vpop.f32.mrf.mxu3  ;;  %v4748_v36 = vld [vmem:[#allocation5] sm:$0xff] }
0x12fc   : > { %4743 = vst.msk [vmem:[#allocation5 + $0x10] sm:$0xff] %vm396_vm0, %v4740_v42 }
0x1303   : > { %v4750_v31 = vld [vmem:[#allocation5 + $0x10] sm:$0xff] }
0x1304   : > { %4764 = vmatpush.msra.mxu0 %v4750_v31 }
0x1306   : > { %4765 = vmatpush.msra.mxu0 %v4749_v12 }
0x1308   : > { %4766 = vmatpush.msra.mxu0 %v4748_v36 }
0x1309   : > { %5711 = vmatmul.msk.f32.vlgmr.msra.gmra.mxu0 %vm1521_vm3, %v7617_v48 }
0x1311   : > { %5712 = vmatmul.msk.f32.gmra.mxu0 %vm1521_vm3, %v7628_v28 }
0x1319   : > { %5713 = vmatmul.msk.f32.gmra.mxu0 %vm1521_vm3, %v7635_v56 }
0x1321   : > { %5714 = vmatmul.msk.f32.gmra.mxu0 %vm1521_vm3, %v7642_v32 }
0x1386   : > { %v4768_v54 = vpop.f32.mrf.mxu0 }
0x1387   : > { %v4780_v18 = vadd.f32 %v4768_v54, %v4744_v34 }
0x138e   : > { %v4771_v29 = vpop.f32.mrf.mxu0 }
0x138f   : > { %v4781_v59 = vadd.f32 %v4771_v29, %v4745_v62 }
0x1391   : > { %v5715_v16 = vmul.f32 -1.442695, %v4781_v59 }
0x1393   : > { %5999 = vpow2.f32 %v5715_v16 }
0x1396   : > { %v4774_v4 = vpop.f32.mrf.mxu0 }
0x1397   : > { %v4782_v43 = vadd.f32 %v4774_v4, %v4746_v51 }
0x1399   : > { %v6000_v14 = vpop.eup %5999  ;;  %v5716_v9 = vmul.f32 -1.442695, %v4782_v43 }
0x139a   : > { %v4793_v2 = vadd.f32 1.0, %v6000_v14  ;;  %v4916_v14 = vld [vmem:[#allocation2 + $0xd0] sm:$0xff] }
0x139b   : > { %6001 = vpow2.f32 %v5716_v9 }
0x139c   : > { %6003 = vrcp.f32 %v4793_v2  ;;  %v4807_v3 = vand.u32 2147483648, %v4793_v2  ;;  %vm4801_vm8 = vweird.f32 %v4793_v2  ;;  %v4805_v5 = vand.u32 2147483647, %v4793_v2 }
0x139e   : > { %v4777_v21 = vpop.f32.mrf.mxu0  ;;  %v4808_v50 = vor.u32 1.1754944e-38, %v4807_v3  ;;  %vm4806_vm11 = vcmp.eq.f32.partialorder %v4805_v5, 8.507059e+37 }
0x139f   : > { %v4783_v6 = vadd.f32 %v4777_v21, %v4747_v61 }
0x13a1   : > { %v6002_v17 = vpop.eup %6001  ;;  %v5717_v37 = vmul.f32 -1.442695, %v4783_v6 }
0x13a2   : > { %v6004_v13 = vpop.eup %6003  ;;  %v4794_v49 = vadd.f32 1.0, %v6002_v17  ;;  %v4917_v17 = vld [vmem:[#allocation2 + $0xd8] sm:$0xff] }
0x13a3   : > { %v4797_v23 = vmul.f32 %v6004_v13, %v4793_v2  ;;  %6005 = vpow2.f32 %v5717_v37  ;;  %vm4802_vm7 = vweird.f32 %v6004_v13 }
0x13a4   : > { %6007 = vrcp.f32 %v4794_v49  ;;  %vm4803_vm9 = vmor %vm4801_vm8, %vm4802_vm7  ;;  %v4822_v47 = vand.u32 2147483648, %v4794_v49  ;;  %v4820_v19 = vand.u32 2147483647, %v4794_v49  ;;  %vm4816_vm12 = vweird.f32 %v4794_v49 }
0x13a5   : > { %v4798_v44 = vsub.f32 1.0, %v4797_v23 }
0x13a6   : > { %v4823_v45 = vor.u32 1.1754944e-38, %v4822_v47  ;;  %vm4821_vm14 = vcmp.eq.f32.partialorder %v4820_v19, 8.507059e+37 }
0x13a7   : > { %v4799_v30 = vmul.f32 %v6004_v13, %v4798_v44 }
0x13a9   : > { %v6006_v27 = vpop.eup %6005  ;;  %v4800_v11 = vadd.f32 %v6004_v13, %v4799_v30 }
0x13aa   : > { %v6008_v38 = vpop.eup %6007  ;;  %v4795_v25 = vadd.f32 1.0, %v6006_v27 }
0x13ab   : > { %v4812_v39 = vmul.f32 %v6008_v38, %v4794_v49  ;;  %v4804_v58 = vsel %vm4803_vm9, %v6004_v13, %v4800_v11  ;;  %vm4817_vm10 = vweird.f32 %v6008_v38 }
0x13ac   : > { %6009 = vrcp.f32 %v4795_v25  ;;  %v4809_v35 = vsel %vm4806_vm11, %v4808_v50, %v4804_v58  ;;  %vm4818_vm13 = vmor %vm4816_vm12, %vm4817_vm10  ;;  %v4837_v57 = vand.u32 2147483648, %v4795_v25  ;;  %vm4831_vm1 = vweird.f32 %v4795_v25 }
0x13ad   : > { %v4813_v60 = vsub.f32 1.0, %v4812_v39  ;;  %6011 = vtanh.f32 %v4780_v18  ;;  %v4835_v53 = vand.u32 2147483647, %v4795_v25 }
0x13ae   : > { %v4838_v42 = vor.u32 1.1754944e-38, %v4837_v57 }
0x13af   : > { %v4814_v7 = vmul.f32 %v6008_v38, %v4813_v60  ;;  %vm4836_vm4 = vcmp.eq.f32.partialorder %v4835_v53, 8.507059e+37 }
0x13b1   : > { %v4815_v8 = vadd.f32 %v6008_v38, %v4814_v7 }
0x13b2   : > { %v6010_v15 = vpop.eup %6009 }
0x13b3   : > { %v4819_v0 = vsel %vm4818_vm13, %v6008_v38, %v4815_v8  ;;  %v4827_v55 = vmul.f32 %v6010_v15, %v4795_v25  ;;  %v6012_v33 = vpop.eup %6011  ;;  %vm4832_vm15 = vweird.f32 %v6010_v15  ;;  %v4914_v25 = vld [vmem:[#allocation2 + $0xc0] sm:$0xff] }
0x13b4   : > { %v4824_v10 = vsel %vm4821_vm14, %v4823_v45, %v4819_v0  ;;  %v4843_v41 = vmul.f32 %v6012_v33, %v4809_v35  ;;  %vm4833_vm2 = vmor %vm4831_vm1, %vm4832_vm15 }
0x13b5   : > { %v4841_v22 = vmul.f32 %v4824_v10, %v7647_v1  ;;  %v4828_v63 = vsub.f32 1.0, %v4827_v55 }
0x13b7   : > { %v7668_v26 = vadd.f32 %v4843_v41, %v4841_v22  ;;  %v4829_v24 = vmul.f32 %v6010_v15, %v4828_v63 }
0x13b9   : > { %6013 = vtanh.f32 %v7668_v26  ;;  %v4830_v40 = vadd.f32 %v6010_v15, %v4829_v24 }
0x13bb   : > { %v4834_v52 = vsel %vm4833_vm2, %v6010_v15, %v4830_v40 }
0x13bc   : > { %v4839_v12 = vsel %vm4836_vm4, %v4838_v42, %v4834_v52 }
0x13bf   : > { %v6014_v31 = vpop.eup %6013 }
0x13c0   : > { %v4846_v36 = vmul.f32 %v6014_v31, %v4839_v12 }
0x13c2   : > { %4847 = vst.msk [vmem:[#allocation4 + $0x28] sm:$0xff] %vm396_vm0, %v4846_v36  ;;  %5718 = vmatmul.msk.f32.vlgmr.msra.gmra.mxu2 %vm396_vm0, %v4846_v36  ;;  %5719 = vmatmul.msk.f32.vlgmr.msrb.gmra.mxu3 %vm396_vm0, %v4846_v36 }
0x13c3   : > { %5056 = vmatpush.msra.mxu2 %v7601_v46 }
0x13c5   : > { %5057 = vmatpush.msra.mxu2 %v7607_v20  ;;  %v4915_v20 = vld [vmem:[#allocation2 + $0xc8] sm:$0xff] }
0x13ca   : > { %5720 = vmatmul.msk.f32.vlgmr.msrb.gmra.mxu2 %vm396_vm0, %v4846_v36 }
0x1445   : > { %v4868_v1 = vpop.f32.mrf.mxu2  ;;  %v4889_v54 = vpop.f32.mrf.mxu3 }
0x1446   : > { %4871 = vst.msk [vmem:[#allocation5] sm:$0xff] %vm396_vm0, %v4868_v1 }
0x1447   : > { %4892 = vst.msk [vmem:[#allocation5 + $0x8] sm:$0xff] %vm396_vm0, %v4889_v54 }
0x144d   : > { %v4910_v62 = vpop.f32.mrf.mxu2  ;;  %v4918_v16 = vld [vmem:[#allocation5] sm:$0xff] }
0x144e   : > { %4913 = vst.msk [vmem:[#allocation5 + $0x10] sm:$0xff] %vm396_vm0, %v4910_v62  ;;  %v4919_v59 = vld [vmem:[#allocation5 + $0x8] sm:$0xff] }
0x1455   : > { %v4920_v29 = vld [vmem:[#allocation5 + $0x10] sm:$0xff] }
0x1456   : > { %4934 = vmatpush.msra.mxu3 %v4920_v29 }
0x1458   : > { %4935 = vmatpush.msra.mxu3 %v4919_v59 }
0x145a   : > { %4936 = vmatpush.msra.mxu3 %v4918_v16 }
0x145b   : > { %5721 = vmatmul.msk.f32.vlgmr.msra.gmra.mxu3 %vm1521_vm3, %v7617_v48 }
0x1463   : > { %5722 = vmatmul.msk.f32.gmra.mxu3 %vm1521_vm3, %v7628_v28 }
0x146b   : > { %5723 = vmatmul.msk.f32.gmra.mxu3 %vm1521_vm3, %v7635_v56 }
0x1473   : > { %5724 = vmatmul.msk.f32.gmra.mxu3 %vm1521_vm3, %v7642_v32 }
0x14de   : > { %v4938_v46 = vpop.f32.mrf.mxu3 }
0x14df   : > { %v4950_v39 = vadd.f32 %v4938_v46, %v4914_v25 }
0x14e6   : > { %v4941_v51 = vpop.f32.mrf.mxu3 }
0x14e7   : > { %v4951_v4 = vadd.f32 %v4941_v51, %v4915_v20 }
0x14e9   : > { %v5725_v43 = vmul.f32 -1.442695, %v4951_v4 }
0x14eb   : > { %6015 = vpow2.f32 %v5725_v43  ;;  %v5085_v43 = vld [vmem:[#allocation2 + $0xe8] sm:$0xff] }
0x14ee   : > { %v4944_v9 = vpop.f32.mrf.mxu3 }
0x14ef   : > { %v4952_v2 = vadd.f32 %v4944_v9, %v4916_v14 }
0x14f1   : > { %v6016_v61 = vpop.eup %6015  ;;  %v5726_v21 = vmul.f32 -1.442695, %v4952_v2 }
0x14f2   : > { %v4963_v6 = vadd.f32 1.0, %v6016_v61  ;;  %v5086_v61 = vld [vmem:[#allocation2 + $0xf0] sm:$0xff] }
0x14f3   : > { %6017 = vpow2.f32 %v5726_v21 }
0x14f4   : > { %6019 = vrcp.f32 %v4963_v6  ;;  %v4977_v47 = vand.u32 2147483648, %v4963_v6  ;;  %vm4971_vm6 = vweird.f32 %v4963_v6  ;;  %v4975_v58 = vand.u32 2147483647, %v4963_v6 }
0x14f6   : > { %v4947_v37 = vpop.f32.mrf.mxu3  ;;  %v4978_v35 = vor.u32 1.1754944e-38, %v4977_v47  ;;  %vm4976_vm9 = vcmp.eq.f32.partialorder %v4975_v58, 8.507059e+37 }
0x14f7   : > { %v4953_v13 = vadd.f32 %v4947_v37, %v4917_v17 }
0x14f9   : > { %v6018_v49 = vpop.eup %6017  ;;  %v5727_v23 = vmul.f32 -1.442695, %v4953_v13 }
0x14fa   : > { %v6020_v44 = vpop.eup %6019  ;;  %v4964_v30 = vadd.f32 1.0, %v6018_v49 }
0x14fb   : > { %v4967_v27 = vmul.f32 %v6020_v44, %v4963_v6  ;;  %6021 = vpow2.f32 %v5727_v23  ;;  %vm4972_vm5 = vweird.f32 %v6020_v44 }
0x14fc   : > { %6023 = vrcp.f32 %v4964_v30  ;;  %vm4973_vm7 = vmor %vm4971_vm6, %vm4972_vm5  ;;  %v4992_v19 = vand.u32 2147483648, %v4964_v30  ;;  %v4990_v15 = vand.u32 2147483647, %v4964_v30  ;;  %vm4986_vm10 = vweird.f32 %v4964_v30 }
0x14fd   : > { %v4968_v34 = vsub.f32 1.0, %v4967_v27 }
0x14fe   : > { %v4993_v33 = vor.u32 1.1754944e-38, %v4992_v19  ;;  %vm4991_vm12 = vcmp.eq.f32.partialorder %v4990_v15, 8.507059e+37 }
0x14ff   : > { %v4969_v38 = vmul.f32 %v6020_v44, %v4968_v34 }
0x1501   : > { %v6022_v18 = vpop.eup %6021  ;;  %v4970_v5 = vadd.f32 %v6020_v44, %v4969_v38 }
0x1502   : > { %v6024_v11 = vpop.eup %6023  ;;  %v4965_v3 = vadd.f32 1.0, %v6022_v18  ;;  %v5084_v18 = vld [vmem:[#allocation2 + $0xe0] sm:$0xff] }
0x1503   : > { %v4982_v60 = vmul.f32 %v6024_v11, %v4964_v30  ;;  %v4974_v50 = vsel %vm4973_vm7, %v6020_v44, %v4970_v5  ;;  %vm4987_vm8 = vweird.f32 %v6024_v11 }
0x1504   : > { %6025 = vrcp.f32 %v4965_v3  ;;  %v4979_v55 = vsel %vm4976_vm9, %v4978_v35, %v4974_v50  ;;  %vm4988_vm11 = vmor %vm4986_vm10, %vm4987_vm8  ;;  %v5007_v31 = vand.u32 2147483648, %v4965_v3  ;;  %vm5001_vm14 = vweird.f32 %v4965_v3 }
0x1505   : > { %v4983_v7 = vsub.f32 1.0, %v4982_v60  ;;  %6027 = vtanh.f32 %v4950_v39  ;;  %v5005_v12 = vand.u32 2147483647, %v4965_v3 }
0x1506   : > { %v5008_v1 = vor.u32 1.1754944e-38, %v5007_v31 }
0x1507   : > { %v4984_v8 = vmul.f32 %v6024_v11, %v4983_v7  ;;  %vm5006_vm1 = vcmp.eq.f32.partialorder %v5005_v12, 8.507059e+37 }
0x1509   : > { %v4985_v45 = vadd.f32 %v6024_v11, %v4984_v8 }
0x150a   : > { %v6026_v0 = vpop.eup %6025 }
0x150b   : > { %v4989_v10 = vsel %vm4988_vm11, %v6024_v11, %v4985_v45  ;;  %v4997_v41 = vmul.f32 %v6026_v0, %v4965_v3  ;;  %v6028_v22 = vpop.eup %6027  ;;  %vm5002_vm13 = vweird.f32 %v6026_v0 }
0x150c   : > { %v4994_v63 = vsel %vm4991_vm12, %v4993_v33, %v4989_v10  ;;  %v5013_v24 = vmul.f32 %v6028_v22, %v4979_v55  ;;  %vm5003_vm15 = vmor %vm5001_vm14, %vm5002_vm13  ;;  %vm5228_vm14 = vcmask 125952  }
0x150d   : > { %v5011_v40 = vmul.f32 %v4994_v63, %v7668_v26  ;;  %v4998_v57 = vsub.f32 1.0, %v4997_v41 }
0x150f   : > { %v7689_v53 = vadd.f32 %v5013_v24, %v5011_v40  ;;  %v4999_v52 = vmul.f32 %v6026_v0, %v4998_v57 }
0x1511   : > { %6029 = vtanh.f32 %v7689_v53  ;;  %v5000_v42 = vadd.f32 %v6026_v0, %v4999_v52 }
0x1513   : > { %v5004_v36 = vsel %vm5003_vm15, %v6026_v0, %v5000_v42 }
0x1514   : > { %v5009_v62 = vsel %vm5006_vm1, %v5008_v1, %v5004_v36 }
0x1517   : > { %v6030_v54 = vpop.eup %6029 }
0x1518   : > { %v5016_v29 = vmul.f32 %v6030_v54, %v5009_v62 }
0x151a   : > { %5017 = vst.msk [vmem:[#allocation4 + $0x30] sm:$0xff] %vm396_vm0, %v5016_v29  ;;  %5728 = vmatmul.msk.f32.vlgmr.msra.gmra.mxu1 %vm396_vm0, %v5016_v29  ;;  %5729 = vmatmul.msk.f32.vlgmr.msra.gmra.mxu2 %vm396_vm0, %v5016_v29 }
0x1522   : > { %5730 = vmatmul.msk.f32.vlgmr.msrb.gmra.mxu1 %vm396_vm0, %v5016_v29 }
0x1597   : > { %v5038_v26 = vpop.f32.mrf.mxu1 }
0x1598   : > { %5041 = vst.msk [vmem:[#allocation5] sm:$0xff] %vm396_vm0, %v5038_v26 }
0x159d   : > { %v5059_v59 = vpop.f32.mrf.mxu2 }
0x159e   : > { %5062 = vst.msk [vmem:[#allocation5 + $0x8] sm:$0xff] %vm396_vm0, %v5059_v59  ;;  %v5194_v59 = vld [vmem:[#allocation4 + $0x28] sm:$0xff] }
0x159f   : > { %v5080_v16 = vpop.f32.mrf.mxu1  ;;  %v5088_v51 = vld [vmem:[#allocation5] sm:$0xff] }
0x15a0   : > { %5083 = vst.msk [vmem:[#allocation5 + $0x10] sm:$0xff] %vm396_vm0, %v5080_v16  ;;  %v5193_v16 = vld [vmem:[#allocation4 + $0x20] sm:$0xff] }
0x15a5   : > { %v5089_v20 = vld [vmem:[#allocation5 + $0x8] sm:$0xff] }
0x15a7   : > { %v5090_v46 = vld [vmem:[#allocation5 + $0x10] sm:$0xff] }
0x15a8   : > { %5104 = vmatpush.msrb.mxu2 %v5090_v46  ;;  %v5192_v46 = vld [vmem:[#allocation4 + $0x18] sm:$0xff] }
0x15aa   : > { %5105 = vmatpush.msrb.mxu2 %v5089_v20  ;;  %v5191_v20 = vld [vmem:[#allocation4 + $0x10] sm:$0xff] }
0x15ac   : > { %5106 = vmatpush.msrb.mxu2 %v5088_v51  ;;  %v5190_v51 = vld [vmem:[#allocation4 + $0x8] sm:$0xff] }
0x15ad   : > { %5731 = vmatmul.msk.f32.vlgmr.msrb.gmra.mxu2 %vm1521_vm3, %v7617_v48 }
0x15b5   : > { %5732 = vmatmul.msk.f32.gmra.mxu2 %vm1521_vm3, %v7628_v28  ;;  %v5087_v28 = vld [vmem:[#allocation2 + $0xf8] sm:$0xff] }
0x15bd   : > { %5733 = vmatmul.msk.f32.gmra.mxu2 %vm1521_vm3, %v7635_v56 }
0x15c5   : > { %5734 = vmatmul.msk.f32.gmra.mxu2 %vm1521_vm3, %v7642_v32 }
0x1630   : > { %v5108_v4 = vpop.f32.mrf.mxu2 }
0x1631   : > { %v5120_v11 = vadd.f32 %v5108_v4, %v5084_v18  ;;  %v5188_v4 = vld [vmem:[%s7752_s8] sm:$0xf] }
0x1638   : > { %v5111_v14 = vpop.f32.mrf.mxu2 }
0x1639   : > { %v5121_v9 = vadd.f32 %v5111_v14, %v5085_v43  ;;  %v5189_v43 = vld [vmem:[#allocation4] sm:$0xff]  ;;  %v5202_v14 = vpop.permute.xlu2 %5201 }
0x163b   : > { %v5735_v2 = vmul.f32 -1.442695, %v5121_v9 }
0x163d   : > { %6031 = vpow2.f32 %v5735_v2 }
0x1640   : > { %v5114_v21 = vpop.f32.mrf.mxu2 }
0x1641   : > { %v5122_v6 = vadd.f32 %v5114_v21, %v5086_v61 }
0x1643   : > { %v6032_v17 = vpop.eup %6031  ;;  %v5736_v48 = vmul.f32 -1.442695, %v5122_v6 }
0x1644   : > { %v5133_v37 = vadd.f32 1.0, %v6032_v17 }
0x1645   : > { %6033 = vpow2.f32 %v5736_v48 }
0x1646   : > { %6035 = vrcp.f32 %v5133_v37  ;;  %v5147_v60 = vand.u32 2147483648, %v5133_v37  ;;  %vm5141_vm2 = vweird.f32 %v5133_v37  ;;  %v5145_v47 = vand.u32 2147483647, %v5133_v37 }
0x1648   : > { %v5117_v13 = vpop.f32.mrf.mxu2  ;;  %v5148_v15 = vor.u32 1.1754944e-38, %v5147_v60  ;;  %vm5146_vm6 = vcmp.eq.f32.partialorder %v5145_v47, 8.507059e+37 }
0x1649   : > { %v5123_v56 = vadd.f32 %v5117_v13, %v5087_v28 }
0x164b   : > { %v6034_v49 = vpop.eup %6033  ;;  %v5737_v23 = vmul.f32 -1.442695, %v5123_v56 }
0x164c   : > { %v6036_v32 = vpop.eup %6035  ;;  %v5134_v44 = vadd.f32 1.0, %v6034_v49 }
0x164d   : > { %v5137_v30 = vmul.f32 %v6036_v32, %v5133_v37  ;;  %6037 = vpow2.f32 %v5737_v23  ;;  %vm5142_vm3 = vweird.f32 %v6036_v32 }
0x164e   : > { %6039 = vrcp.f32 %v5134_v44  ;;  %vm5143_vm4 = vmor %vm5141_vm2, %vm5142_vm3  ;;  %v5162_v7 = vand.u32 2147483648, %v5134_v44  ;;  %v5160_v8 = vand.u32 2147483647, %v5134_v44  ;;  %vm5156_vm7 = vweird.f32 %v5134_v44 }
0x164f   : > { %v5138_v27 = vsub.f32 1.0, %v5137_v30 }
0x1650   : > { %v5163_v55 = vor.u32 1.1754944e-38, %v5162_v7  ;;  %vm5161_vm9 = vcmp.eq.f32.partialorder %v5160_v8, 8.507059e+37 }
0x1651   : > { %v5139_v34 = vmul.f32 %v6036_v32, %v5138_v27 }
0x1653   : > { %v6038_v38 = vpop.eup %6037  ;;  %v5140_v3 = vadd.f32 %v6036_v32, %v5139_v34 }
0x1654   : > { %v6040_v25 = vpop.eup %6039  ;;  %v5135_v39 = vadd.f32 1.0, %v6038_v38 }
0x1655   : > { %v5152_v5 = vmul.f32 %v6040_v25, %v5134_v44  ;;  %v5144_v19 = vsel %vm5143_vm4, %v6036_v32, %v5140_v3  ;;  %vm5157_vm5 = vweird.f32 %v6040_v25 }
0x1656   : > { %6041 = vrcp.f32 %v5135_v39  ;;  %v5149_v0 = vsel %vm5146_vm6, %v5148_v15, %v5144_v19  ;;  %vm5158_vm8 = vmor %vm5156_vm7, %vm5157_vm5  ;;  %v5177_v31 = vand.u32 2147483648, %v5135_v39  ;;  %vm5171_vm11 = vweird.f32 %v5135_v39 }
0x1657   : > { %v5153_v58 = vsub.f32 1.0, %v5152_v5  ;;  %6043 = vtanh.f32 %v5120_v11  ;;  %v5175_v12 = vand.u32 2147483647, %v5135_v39 }
0x1658   : > { %v5178_v1 = vor.u32 1.1754944e-38, %v5177_v31 }
0x1659   : > { %v5154_v50 = vmul.f32 %v6040_v25, %v5153_v58  ;;  %vm5176_vm13 = vcmp.eq.f32.partialorder %v5175_v12, 8.507059e+37 }
0x165b   : > { %v5155_v35 = vadd.f32 %v6040_v25, %v5154_v50 }
0x165c   : > { %v6042_v45 = vpop.eup %6041 }
0x165d   : > { %v5159_v33 = vsel %vm5158_vm8, %v6040_v25, %v5155_v35  ;;  %v5167_v10 = vmul.f32 %v6042_v45, %v5135_v39  ;;  %v6044_v41 = vpop.eup %6043  ;;  %vm5172_vm10 = vweird.f32 %v6042_v45 }
0x165e   : > { %v5164_v22 = vsel %vm5161_vm9, %v5163_v55, %v5159_v33  ;;  %v5183_v63 = vmul.f32 %v6044_v41, %v5149_v0  ;;  %vm5173_vm12 = vmor %vm5171_vm11, %vm5172_vm10 }
0x165f   : > { %v5181_v24 = vmul.f32 %v5164_v22, %v7689_v53  ;;  %v5168_v40 = vsub.f32 1.0, %v5167_v10  ;;  %v5195_v53 = vld [vmem:[#allocation4 + $0x30] sm:$0xff] }
0x1661   : > { %v5184_v57 = vadd.f32 %v5183_v63, %v5181_v24  ;;  %v5169_v52 = vmul.f32 %v6042_v45, %v5168_v40 }
0x1663   : > { %6045 = vtanh.f32 %v5184_v57  ;;  %v5170_v42 = vadd.f32 %v6042_v45, %v5169_v52 }
0x1665   : > { %v5174_v36 = vsel %vm5173_vm12, %v6042_v45, %v5170_v42 }
0x1666   : > { %v5179_v62 = vsel %vm5176_vm13, %v5178_v1, %v5174_v36 }
0x1669   : > { %v6046_v54 = vpop.eup %6045 }
0x166a   : > { %v5186_v29 = vmul.f32 %v6046_v54, %v5179_v62 }
0x166c   : > { %5187 = vst.msk [vmem:[#allocation4 + $0x38] sm:$0xff] %vm396_vm0, %v5186_v29  ;;  %vm5204_vm0 = vcmask 523264  }
0x1673   : > { %v5196_v26 = vld [vmem:[#allocation4 + $0x38] sm:$0xff] }
0x1674   : > { %5216 = vmatpush.msrb.mxu0 %v5196_v26 }
0x1676   : > { %5217 = vmatpush.msrb.mxu0 %v5195_v53 }
0x1678   : > { %5218 = vmatpush.msrb.mxu0 %v5194_v59 }
0x167a   : > { %5219 = vmatpush.msrb.mxu0 %v5193_v16 }
0x167c   : > { %5220 = vmatpush.msrb.mxu0 %v5192_v46 }
0x167e   : > { %5221 = vmatpush.msrb.mxu0 %v5191_v20 }
0x1680   : > { %5222 = vmatpush.msrb.mxu0 %v5190_v51 }
0x1682   : > { %5223 = vmatpush.msrb.mxu0 %v5189_v43 }
0x1683   : > { %5738 = vmatmul.msk.f32.vlgmr.msrb.gmra.mxu0 %vm5204_vm0, %v5188_v4 }
0x1700   : > { %v5225_v9 = vpop.f32.mrf.mxu0 }
0x1701   : > { %v5226_v2 = vadd.f32 %v5225_v9, %v5202_v14 }
0x1703   : > { %5229 = vst.msk [vmem:[%s354_s27] sm:$0xf] %vm5228_vm14, %v5226_v2 }
0x1704   : > { %6100 = shalt.err (!%p6097_p3)
}
0x1705   : > { %5746 = dma.vmem_to_hbm [thread:$0]  (%p6235_p5), %s5244_s28, 64, %s5246_s29, %s5231_s30  }
0x1706 PF: > { %p5752_p4 = scmp.ge.s32.totalorder %s6135_s18, 2  ;;  %s5257_s13 = sand.u32 1, %s6123_s15  }
0x1707   : > { %s5258_s26 = scalar_lea.sflag [#allocation8], %s5257_s13 }
0x1708   : > { %p5749_p7 = pnand %p5752_p4, %p6239_p6 }
0x170a   : > { %p5750_p8 = pneg %p5749_p7 }
0x170c   : > { %6118 = dma.done.wait (%p5750_p8), %s5258_s26, 64  }
0x170d   : > { %6120 = vsyncadd (%p5750_p8), %s5258_s26, 4294967232  ;;  %p22_p9 = scmp.ge.s32.totalorder %s6222_s20, 4   ;;  %s7757_s15 = smov %s6127_s16 }
0x170e   : > { %s7758_s16 = smov %s6131_s17  ;;  %s7759_s17 = smov %s6233_s23 }
0x170f   : > { %s7760_s18 = smov %s6222_s20  ;;  %24 = sbr.rel (!%p22_p9) target bundleno = 6 (0x6), region = 101 }
0x1714   :  { %5264 = vsyncpa [#allocation8], 1 }
0x1715   :  { %5266 = vsyncpa [#allocation8 + $0x1], 1 }

</bundles_post_ra>
